<compile_context>
chip_gen: v5e
topology: v5e:2x2
jax: 0.10.0
libtpu: 0.0.40
codegen_flags: <defaults>
</compile_context>

<pallas_src>
import numpy as np
import jax
import jax.numpy as jnp
from jax.experimental import pallas as pl
from jax.experimental.pallas import tpu as pltpu

CHANNELS = 4
IMG_SIZE = 16
LATENT_DIM = 32
FEAT = 256 * (IMG_SIZE // 16) ** 2
assert IMG_SIZE == 16, "this fused kernel assumes the encoder reaches 1x1 spatial"

ENC_CH = [CHANNELS, 32, 64, 128, 256]
DEC_CH = [256, 128, 64, 32, CHANNELS]

BF = jnp.bfloat16
F32 = jnp.float32


# ---------------------------------------------------------------------------
# 0/1 gather / scatter matrices (built once with numpy at init time)
# ---------------------------------------------------------------------------
def _conv_gather(h, w):
    """G[t, oy*Wo+ox, iy*W+ix] = 1 for a 3x3 stride-2 pad-1 conv (per sample)."""
    ho, wo = h // 2, w // 2
    oy, ox = np.meshgrid(np.arange(ho), np.arange(wo), indexing="ij")
    g = np.zeros((3, 3, ho * wo, h * w), np.float32)
    for ky in range(3):
        for kx in range(3):
            iy = 2 * oy + ky - 1
            ix = 2 * ox + kx - 1
            ok = (iy >= 0) & (iy < h) & (ix >= 0) & (ix < w)
            g[ky, kx, (oy * wo + ox)[ok], (iy * w + ix)[ok]] = 1.0
    return g.reshape(9, ho * wo, h * w)


def _convT_scatter(h, w):
    """G[t, oy*Wo+ox, iy*W+ix] = 1 for 3x3 stride-2 pad-1 outpad-1 ConvTranspose."""
    ho, wo = 2 * h, 2 * w
    iy, ix = np.meshgrid(np.arange(h), np.arange(w), indexing="ij")
    g = np.zeros((3, 3, ho * wo, h * w), np.float32)
    for ky in range(3):
        for kx in range(3):
            oy = 2 * iy - 1 + ky
            ox = 2 * ix - 1 + kx
            ok = (oy >= 0) & (oy < ho) & (ox >= 0) & (ox < wo)
            g[ky, kx, (oy * wo + ox)[ok], (iy * w + ix)[ok]] = 1.0
    return g.reshape(9, ho * wo, h * w)


# ---------------------------------------------------------------------------
# The single fused Pallas kernel (one grid step == one sample)
# ---------------------------------------------------------------------------
def _vae_kernel(*refs):
    x_ref, eps_ref = refs[0], refs[1]
    g1_ref, w1t_ref, b1_ref = refs[2:5]                   # encoder L1 (channel-major)
    enc = [refs[5 + 3 * i: 8 + 3 * i] for i in range(3)]  # encoder L2..L4 (G, Wcat, b)
    wmu_ref, bmu_ref, wlv_ref, blv_ref, wdi_ref, bdi_ref = refs[14:20]
    dec = [refs[20 + 3 * i: 23 + 3 * i] for i in range(3)]  # decoder L1..L3
    g4_ref, w4t_ref, b4_ref = refs[29:32]                 # decoder L4 (channel-major)
    recon_ref, mu_ref, lv_ref = refs[32:35]

    # ---- encoder layer 1, channel-major: x (C, HW) -> (32, 64) -> T -> (64, 32)
    m1 = (IMG_SIZE // 2) ** 2                              # 64 output positions
    x_cm = x_ref[0].astype(BF)                             # (4, 256)
    q = jnp.dot(x_cm, g1_ref[...], preferred_element_type=F32)   # (4, 9*64) gather
    qb = q.astype(BF)
    h_cm = jnp.zeros((ENC_CH[1], m1), F32)
    for t in range(9):                                     # tiny per-tap channel mixes
        h_cm = h_cm + jnp.dot(w1t_ref[t], qb[:, t * m1:(t + 1) * m1],
                              preferred_element_type=F32)
    h_cm = jnp.maximum(h_cm + b1_ref[...], 0.0)            # bias/ReLU in f32
    h = jnp.transpose(h_cm)                                # -> (64, 32) spatial-major

    # ---- encoder layers 2..4: gather-first, single W_cat (9*Cin, Cout) matmul
    for g_ref, wcat_ref, b_ref in enc:
        hb = h.astype(BF)
        p = jnp.concatenate(
            [jnp.dot(g_ref[t], hb, preferred_element_type=F32) for t in range(9)],
            axis=1)                                        # (HWout, 9*Cin)
        h = jnp.dot(p.astype(BF), wcat_ref[...], preferred_element_type=F32)
        h = jnp.maximum(h + b_ref[...], 0.0)
    # h is now (1, 256) == PyTorch NCHW flatten (encoder spatial is 1x1)

    # ---- latent heads + reparameterize + decoder_input (fused, f32 VPU/EUP) ----
    hb = h.astype(BF)
    mu = jnp.dot(hb, wmu_ref[...], preferred_element_type=F32) + bmu_ref[...]
    lv = jnp.dot(hb, wlv_ref[...], preferred_element_type=F32) + blv_ref[...]
    mu_ref[0] = mu
    lv_ref[0] = lv
    z = mu + eps_ref[0] * jnp.exp(0.5 * lv)
    d = jnp.dot(z.astype(BF), wdi_ref[...], preferred_element_type=F32) + bdi_ref[...]

    # ---- decoder layers 1..3: single W_cat (Cin, 9*Cout) mix + 9 lane-slice scatters
    for g_ref, wcat_ref, b_ref in dec:
        m_in = g_ref.shape[2]
        cout = wcat_ref.shape[1] // 9
        zmix = jnp.dot(d.astype(BF), wcat_ref[...], preferred_element_type=F32)
        zb = zmix.astype(BF) if m_in > 1 else None
        acc = jnp.zeros((g_ref.shape[1], cout), F32)
        for t in range(9):
            if m_in == 1:                                  # 1x1 input: scatter == broadcast
                acc = acc + g_ref[t].astype(F32) * zmix[:, t * cout:(t + 1) * cout]
            else:
                acc = acc + jnp.dot(g_ref[t], zb[:, t * cout:(t + 1) * cout],
                                    preferred_element_type=F32)
        d = jnp.maximum(acc + b_ref[...], 0.0)
    # d is now (64, 32) spatial-major

    # ---- decoder layer 4, channel-major: lane-dense (4, 256) NCHW output ----
    d_cm = jnp.transpose(d).astype(BF)                     # (32, 64)
    hw_in4 = d.shape[0]                                    # 64
    zcat = jnp.concatenate(
        [jnp.dot(w4t_ref[t], d_cm, preferred_element_type=F32) for t in range(9)],
        axis=1)                                            # (4, 9*64)
    y = jnp.dot(zcat.astype(BF), g4_ref[...], preferred_element_type=F32)  # (4, 256)
    recon_ref[0] = jnp.tanh(y + b4_ref[...])
    del hw_in4


# ---------------------------------------------------------------------------
# Parameter init (deterministic, synthetic)
# ---------------------------------------------------------------------------
def init_params(key):
    keys = iter(jax.random.split(key, 32))

    def conv_p(cin, cout):
        w = jax.random.normal(next(keys), (cout, cin, 3, 3), jnp.float32) * 0.05
        b = jax.random.normal(next(keys), (cout,), jnp.float32) * 0.05
        return w, b

    def convT_p(cin, cout):
        w = jax.random.normal(next(keys), (cin, cout, 3, 3), jnp.float32) * 0.05
        b = jax.random.normal(next(keys), (cout,), jnp.float32) * 0.05
        return w, b

    def lin_p(fin, fout):
        w = jax.random.normal(next(keys), (fin, fout), jnp.float32) * 0.05
        b = jax.random.normal(next(keys), (fout,), jnp.float32) * 0.05
        return w, b

    return {
        "enc": [conv_p(ENC_CH[i], ENC_CH[i + 1]) for i in range(4)],
        "fc_mu": lin_p(FEAT, LATENT_DIM),
        "fc_var": lin_p(FEAT, LATENT_DIM),
        "dec_in": lin_p(LATENT_DIM, FEAT),
        "dec": [convT_p(DEC_CH[i], DEC_CH[i + 1]) for i in range(4)],
    }


# ---------------------------------------------------------------------------
# One-time preprocessing: bf16 tap-fused weights + bf16 0/1 gather/scatter mats
# ---------------------------------------------------------------------------
def prepare_kernel_params(params):
    flat = []

    # encoder layer 1 : channel-major ("transposed") form
    w1, b1 = params["enc"][0]                                  # (32, 4, 3, 3)
    g1 = _conv_gather(IMG_SIZE, IMG_SIZE)                      # (9, 64, 256)
    hw_in, hw_out = IMG_SIZE * IMG_SIZE, (IMG_SIZE // 2) ** 2
    g1_allT = np.transpose(g1, (2, 0, 1)).reshape(hw_in, 9 * hw_out)   # [n, t*64+m]
    flat += [jnp.asarray(g1_allT, BF),
             jnp.transpose(w1, (2, 3, 0, 1)).reshape(9, ENC_CH[1], CHANNELS).astype(BF),
             b1.reshape(ENC_CH[1], 1).astype(F32)]

    # encoder layers 2..4 : gather-first, taps concatenated along K (9*Cin, Cout)
    h = IMG_SIZE // 2
    for (w, b) in params["enc"][1:]:
        cout, cin = w.shape[0], w.shape[1]
        flat += [jnp.asarray(_conv_gather(h, h), BF),
                 jnp.transpose(w, (2, 3, 1, 0)).reshape(9 * cin, cout).astype(BF),
                 b.reshape(1, cout).astype(F32)]
        h //= 2

    # fc heads (weights bf16, biases f32)
    for name in ("fc_mu", "fc_var", "dec_in"):
        w, b = params[name]
        flat += [w.astype(BF), b.reshape(1, -1).astype(F32)]

    # decoder layers 1..3 : channel-mix first, taps concatenated along N (Cin, 9*Cout)
    h = IMG_SIZE // 16
    for (w, b) in params["dec"][:3]:
        cin, cout = w.shape[0], w.shape[1]
        flat += [jnp.asarray(_convT_scatter(h, h), BF),
                 jnp.transpose(w, (0, 2, 3, 1)).reshape(cin, 9 * cout).astype(BF),
                 b.reshape(1, cout).astype(F32)]
        h *= 2

    # decoder layer 4 : channel-major output path
    w4, b4 = params["dec"][3]                                  # (32, 4, 3, 3)
    g4 = _convT_scatter(h, h)                                  # h == 8 -> (9, 256, 64)
    g4_stackT = np.transpose(g4, (0, 2, 1)).reshape(9 * h * h, 4 * h * h)  # [(t,n), m]
    flat += [jnp.asarray(g4_stackT, BF),
             jnp.transpose(w4, (2, 3, 1, 0)).reshape(9, CHANNELS, DEC_CH[3]).astype(BF),
             b4.reshape(CHANNELS, 1).astype(F32)]
    return flat


# ---------------------------------------------------------------------------
# Forward wrapper: NCHW in / NCHW out, one pallas_call for the whole network
# ---------------------------------------------------------------------------
def vae_forward(kernel_params, x_nchw, eps):
    B = x_nchw.shape[0]
    hw = IMG_SIZE * IMG_SIZE
    x_cm = x_nchw.reshape(B, CHANNELS, hw)          # channel-major rows, no transpose
    eps3 = eps.reshape(B, 1, LATENT_DIM)

    per_sample = lambda i: (i, 0, 0)
    in_specs = [pl.BlockSpec((1, CHANNELS, hw), per_sample),
                pl.BlockSpec((1, 1, LATENT_DIM), per_sample)]
    for p in kernel_params:                          # constants: fetched once, VMEM resident
        in_specs.append(pl.BlockSpec(p.shape, lambda i, n=p.ndim: (0,) * n))
    out_specs = (pl.BlockSpec((1, CHANNELS, hw), per_sample),
                 pl.BlockSpec((1, 1, LATENT_DIM), per_sample),
                 pl.BlockSpec((1, 1, LATENT_DIM), per_sample))
    out_shape = (jax.ShapeDtypeStruct((B, CHANNELS, hw), jnp.float32),
                 jax.ShapeDtypeStruct((B, 1, LATENT_DIM), jnp.float32),
                 jax.ShapeDtypeStruct((B, 1, LATENT_DIM), jnp.float32))

    recon_cm, mu, lv = pl.pallas_call(
        _vae_kernel,
        grid=(B,),
        in_specs=in_specs,
        out_specs=out_specs,
        out_shape=out_shape,
        compiler_params=pltpu.CompilerParams(
            dimension_semantics=("parallel",),
            vmem_limit_bytes=32 * 1024 * 1024),
    )(x_cm, eps3, *kernel_params)

    recon = recon_cm.reshape(B, CHANNELS, IMG_SIZE, IMG_SIZE)   # already NCHW order
    return recon, mu.reshape(B, LATENT_DIM), lv.reshape(B, LATENT_DIM)


if __name__ == "__main__":
    key = jax.random.PRNGKey(0)
    k_par, k_x, k_eps = jax.random.split(key, 3)

    params = init_params(k_par)
    kparams = prepare_kernel_params(params)          # one-time preprocessing

    x = jax.random.normal(k_x, (2, CHANNELS, IMG_SIZE, IMG_SIZE), jnp.float32)
    eps = jax.random.normal(k_eps, (2, LATENT_DIM), jnp.float32)

    recon, mu, log_var = jax.jit(vae_forward)(kparams, x, eps)
    jax.block_until_ready((recon, mu, log_var))

    assert recon.shape == (2, CHANNELS, IMG_SIZE, IMG_SIZE), recon.shape
    assert mu.shape == (2, LATENT_DIM) and log_var.shape == (2, LATENT_DIM)
    assert bool(jnp.all(jnp.isfinite(recon)))
    assert bool(jnp.all(jnp.isfinite(mu))) and bool(jnp.all(jnp.isfinite(log_var)))
    print("KERNEL_OK")
</pallas_src>

<mosaic_0001>
module attributes {stable_mosaic.version = 11 : i64} {
  func.func @_vae_kernel(%arg0: i32, %arg1: memref<1x4x256xf32, #tpu.memory_space<vmem>>, %arg2: memref<1x1x32xf32, #tpu.memory_space<vmem>>, %arg3: memref<256x576xbf16, #tpu.memory_space<vmem>>, %arg4: memref<9x32x4xbf16, #tpu.memory_space<vmem>>, %arg5: memref<32x1xf32, #tpu.memory_space<vmem>>, %arg6: memref<9x16x64xbf16, #tpu.memory_space<vmem>>, %arg7: memref<288x64xbf16, #tpu.memory_space<vmem>>, %arg8: memref<1x64xf32, #tpu.memory_space<vmem>>, %arg9: memref<9x4x16xbf16, #tpu.memory_space<vmem>>, %arg10: memref<576x128xbf16, #tpu.memory_space<vmem>>, %arg11: memref<1x128xf32, #tpu.memory_space<vmem>>, %arg12: memref<9x1x4xbf16, #tpu.memory_space<vmem>>, %arg13: memref<1152x256xbf16, #tpu.memory_space<vmem>>, %arg14: memref<1x256xf32, #tpu.memory_space<vmem>>, %arg15: memref<256x32xbf16, #tpu.memory_space<vmem>>, %arg16: memref<1x32xf32, #tpu.memory_space<vmem>>, %arg17: memref<256x32xbf16, #tpu.memory_space<vmem>>, %arg18: memref<1x32xf32, #tpu.memory_space<vmem>>, %arg19: memref<32x256xbf16, #tpu.memory_space<vmem>>, %arg20: memref<1x256xf32, #tpu.memory_space<vmem>>, %arg21: memref<9x4x1xbf16, #tpu.memory_space<vmem>>, %arg22: memref<256x1152xbf16, #tpu.memory_space<vmem>>, %arg23: memref<1x128xf32, #tpu.memory_space<vmem>>, %arg24: memref<9x16x4xbf16, #tpu.memory_space<vmem>>, %arg25: memref<128x576xbf16, #tpu.memory_space<vmem>>, %arg26: memref<1x64xf32, #tpu.memory_space<vmem>>, %arg27: memref<9x64x16xbf16, #tpu.memory_space<vmem>>, %arg28: memref<64x288xbf16, #tpu.memory_space<vmem>>, %arg29: memref<1x32xf32, #tpu.memory_space<vmem>>, %arg30: memref<576x256xbf16, #tpu.memory_space<vmem>>, %arg31: memref<9x4x32xbf16, #tpu.memory_space<vmem>>, %arg32: memref<4x1xf32, #tpu.memory_space<vmem>>, %arg33: memref<1x4x256xf32, #tpu.memory_space<vmem>>, %arg34: memref<1x1x32xf32, #tpu.memory_space<vmem>>, %arg35: memref<1x1x32xf32, #tpu.memory_space<vmem>>) attributes {dimension_semantics = [#tpu.dimension_semantics<parallel>], iteration_bounds = array<i64: 2>, scalar_prefetch = 0 : i64, scratch_operands = 0 : i64, tpu.core_type = #tpu.core_type<tc>, window_params = [{transform_indices = @transform_0, window_bounds = array<i64: 1, 4, 256>}, {transform_indices = @transform_1, window_bounds = array<i64: 1, 1, 32>}, {pipeline_mode = #tpu.pipeline_mode<synchronous>, transform_indices = @transform_2, window_bounds = array<i64: 256, 576>}, {pipeline_mode = #tpu.pipeline_mode<synchronous>, transform_indices = @transform_3, window_bounds = array<i64: 9, 32, 4>}, {pipeline_mode = #tpu.pipeline_mode<synchronous>, transform_indices = @transform_4, window_bounds = array<i64: 32, 1>}, {pipeline_mode = #tpu.pipeline_mode<synchronous>, transform_indices = @transform_5, window_bounds = array<i64: 9, 16, 64>}, {pipeline_mode = #tpu.pipeline_mode<synchronous>, transform_indices = @transform_6, window_bounds = array<i64: 288, 64>}, {pipeline_mode = #tpu.pipeline_mode<synchronous>, transform_indices = @transform_7, window_bounds = array<i64: 1, 64>}, {pipeline_mode = #tpu.pipeline_mode<synchronous>, transform_indices = @transform_8, window_bounds = array<i64: 9, 4, 16>}, {pipeline_mode = #tpu.pipeline_mode<synchronous>, transform_indices = @transform_9, window_bounds = array<i64: 576, 128>}, {pipeline_mode = #tpu.pipeline_mode<synchronous>, transform_indices = @transform_10, window_bounds = array<i64: 1, 128>}, {pipeline_mode = #tpu.pipeline_mode<synchronous>, transform_indices = @transform_11, window_bounds = array<i64: 9, 1, 4>}, {pipeline_mode = #tpu.pipeline_mode<synchronous>, transform_indices = @transform_12, window_bounds = array<i64: 1152, 256>}, {pipeline_mode = #tpu.pipeline_mode<synchronous>, transform_indices = @transform_13, window_bounds = array<i64: 1, 256>}, {pipeline_mode = #tpu.pipeline_mode<synchronous>, transform_indices = @transform_14, window_bounds = array<i64: 256, 32>}, {pipeline_mode = #tpu.pipeline_mode<synchronous>, transform_indices = @transform_15, window_bounds = array<i64: 1, 32>}, {pipeline_mode = #tpu.pipeline_mode<synchronous>, transform_indices = @transform_16, window_bounds = array<i64: 256, 32>}, {pipeline_mode = #tpu.pipeline_mode<synchronous>, transform_indices = @transform_17, window_bounds = array<i64: 1, 32>}, {pipeline_mode = #tpu.pipeline_mode<synchronous>, transform_indices = @transform_18, window_bounds = array<i64: 32, 256>}, {pipeline_mode = #tpu.pipeline_mode<synchronous>, transform_indices = @transform_19, window_bounds = array<i64: 1, 256>}, {pipeline_mode = #tpu.pipeline_mode<synchronous>, transform_indices = @transform_20, window_bounds = array<i64: 9, 4, 1>}, {pipeline_mode = #tpu.pipeline_mode<synchronous>, transform_indices = @transform_21, window_bounds = array<i64: 256, 1152>}, {pipeline_mode = #tpu.pipeline_mode<synchronous>, transform_indices = @transform_22, window_bounds = array<i64: 1, 128>}, {pipeline_mode = #tpu.pipeline_mode<synchronous>, transform_indices = @transform_23, window_bounds = array<i64: 9, 16, 4>}, {pipeline_mode = #tpu.pipeline_mode<synchronous>, transform_indices = @transform_24, window_bounds = array<i64: 128, 576>}, {pipeline_mode = #tpu.pipeline_mode<synchronous>, transform_indices = @transform_25, window_bounds = array<i64: 1, 64>}, {pipeline_mode = #tpu.pipeline_mode<synchronous>, transform_indices = @transform_26, window_bounds = array<i64: 9, 64, 16>}, {pipeline_mode = #tpu.pipeline_mode<synchronous>, transform_indices = @transform_27, window_bounds = array<i64: 64, 288>}, {pipeline_mode = #tpu.pipeline_mode<synchronous>, transform_indices = @transform_28, window_bounds = array<i64: 1, 32>}, {pipeline_mode = #tpu.pipeline_mode<synchronous>, transform_indices = @transform_29, window_bounds = array<i64: 576, 256>}, {pipeline_mode = #tpu.pipeline_mode<synchronous>, transform_indices = @transform_30, window_bounds = array<i64: 9, 4, 32>}, {pipeline_mode = #tpu.pipeline_mode<synchronous>, transform_indices = @transform_31, window_bounds = array<i64: 4, 1>}, {transform_indices = @transform_32, window_bounds = array<i64: 1, 4, 256>}, {transform_indices = @transform_33, window_bounds = array<i64: 1, 1, 32>}, {transform_indices = @transform_34, window_bounds = array<i64: 1, 1, 32>}]} {
    %c0 = arith.constant 0 : index
    %c0_0 = arith.constant 0 : index
    %c0_1 = arith.constant 0 : index
    %0 = vector.load %arg1[%c0, %c0_0, %c0_1] : memref<1x4x256xf32, #tpu.memory_space<vmem>>, vector<1x4x256xf32>
    %1 = vector.shape_cast %0 : vector<1x4x256xf32> to vector<4x256xf32>
    %2 = arith.truncf %1 : vector<4x256xf32> to vector<4x256xbf16>
    %c0_2 = arith.constant 0 : index
    %c0_3 = arith.constant 0 : index
    %3 = vector.load %arg3[%c0_2, %c0_3] : memref<256x576xbf16, #tpu.memory_space<vmem>>, vector<256x576xbf16>
    %cst = arith.constant dense<0.000000e+00> : vector<4x576xf32>
    %4 = tpu.matmul %2, %3, %cst {dimension_numbers = #tpu.dot_dimension_numbers<[1], [0], [0], [1], [0, 0, 1, 1], [], []>} : vector<4x256xbf16>, vector<256x576xbf16>, vector<4x576xf32> -> vector<4x576xf32>
    %5 = arith.truncf %4 : vector<4x576xf32> to vector<4x576xbf16>
    %cst_4 = arith.constant 0.000000e+00 : f32
    %6 = vector.broadcast %cst_4 : f32 to vector<32x64xf32>
    %c0_5 = arith.constant 0 : index
    %c0_6 = arith.constant 0 : index
    %c0_7 = arith.constant 0 : index
    %7 = vector.load %arg4[%c0_5, %c0_6, %c0_7] : memref<9x32x4xbf16, #tpu.memory_space<vmem>>, vector<1x32x4xbf16>
    %8 = vector.shape_cast %7 : vector<1x32x4xbf16> to vector<32x4xbf16>
    %9 = vector.extract_strided_slice %5 {offsets = [0, 0], sizes = [4, 64], strides = [1, 1]} : vector<4x576xbf16> to vector<4x64xbf16>
    %cst_8 = arith.constant dense<0.000000e+00> : vector<32x64xf32>
    %10 = tpu.matmul %8, %9, %cst_8 {dimension_numbers = #tpu.dot_dimension_numbers<[1], [0], [0], [1], [0, 0, 1, 1], [], []>} : vector<32x4xbf16>, vector<4x64xbf16>, vector<32x64xf32> -> vector<32x64xf32>
    %11 = arith.addf %6, %10 : vector<32x64xf32>
    %c1 = arith.constant 1 : index
    %c0_9 = arith.constant 0 : index
    %c0_10 = arith.constant 0 : index
    %12 = vector.load %arg4[%c1, %c0_9, %c0_10] : memref<9x32x4xbf16, #tpu.memory_space<vmem>>, vector<1x32x4xbf16>
    %13 = vector.shape_cast %12 : vector<1x32x4xbf16> to vector<32x4xbf16>
    %14 = vector.extract_strided_slice %5 {offsets = [0, 64], sizes = [4, 64], strides = [1, 1]} : vector<4x576xbf16> to vector<4x64xbf16>
    %cst_11 = arith.constant dense<0.000000e+00> : vector<32x64xf32>
    %15 = tpu.matmul %13, %14, %cst_11 {dimension_numbers = #tpu.dot_dimension_numbers<[1], [0], [0], [1], [0, 0, 1, 1], [], []>} : vector<32x4xbf16>, vector<4x64xbf16>, vector<32x64xf32> -> vector<32x64xf32>
    %16 = arith.addf %11, %15 : vector<32x64xf32>
    %c2 = arith.constant 2 : index
    %c0_12 = arith.constant 0 : index
    %c0_13 = arith.constant 0 : index
    %17 = vector.load %arg4[%c2, %c0_12, %c0_13] : memref<9x32x4xbf16, #tpu.memory_space<vmem>>, vector<1x32x4xbf16>
    %18 = vector.shape_cast %17 : vector<1x32x4xbf16> to vector<32x4xbf16>
    %19 = vector.extract_strided_slice %5 {offsets = [0, 128], sizes = [4, 64], strides = [1, 1]} : vector<4x576xbf16> to vector<4x64xbf16>
    %cst_14 = arith.constant dense<0.000000e+00> : vector<32x64xf32>
    %20 = tpu.matmul %18, %19, %cst_14 {dimension_numbers = #tpu.dot_dimension_numbers<[1], [0], [0], [1], [0, 0, 1, 1], [], []>} : vector<32x4xbf16>, vector<4x64xbf16>, vector<32x64xf32> -> vector<32x64xf32>
    %21 = arith.addf %16, %20 : vector<32x64xf32>
    %c3 = arith.constant 3 : index
    %c0_15 = arith.constant 0 : index
    %c0_16 = arith.constant 0 : index
    %22 = vector.load %arg4[%c3, %c0_15, %c0_16] : memref<9x32x4xbf16, #tpu.memory_space<vmem>>, vector<1x32x4xbf16>
    %23 = vector.shape_cast %22 : vector<1x32x4xbf16> to vector<32x4xbf16>
    %24 = vector.extract_strided_slice %5 {offsets = [0, 192], sizes = [4, 64], strides = [1, 1]} : vector<4x576xbf16> to vector<4x64xbf16>
    %cst_17 = arith.constant dense<0.000000e+00> : vector<32x64xf32>
    %25 = tpu.matmul %23, %24, %cst_17 {dimension_numbers = #tpu.dot_dimension_numbers<[1], [0], [0], [1], [0, 0, 1, 1], [], []>} : vector<32x4xbf16>, vector<4x64xbf16>, vector<32x64xf32> -> vector<32x64xf32>
    %26 = arith.addf %21, %25 : vector<32x64xf32>
    %c4 = arith.constant 4 : index
    %c0_18 = arith.constant 0 : index
    %c0_19 = arith.constant 0 : index
    %27 = vector.load %arg4[%c4, %c0_18, %c0_19] : memref<9x32x4xbf16, #tpu.memory_space<vmem>>, vector<1x32x4xbf16>
    %28 = vector.shape_cast %27 : vector<1x32x4xbf16> to vector<32x4xbf16>
    %29 = vector.extract_strided_slice %5 {offsets = [0, 256], sizes = [4, 64], strides = [1, 1]} : vector<4x576xbf16> to vector<4x64xbf16>
    %cst_20 = arith.constant dense<0.000000e+00> : vector<32x64xf32>
    %30 = tpu.matmul %28, %29, %cst_20 {dimension_numbers = #tpu.dot_dimension_numbers<[1], [0], [0], [1], [0, 0, 1, 1], [], []>} : vector<32x4xbf16>, vector<4x64xbf16>, vector<32x64xf32> -> vector<32x64xf32>
    %31 = arith.addf %26, %30 : vector<32x64xf32>
    %c5 = arith.constant 5 : index
    %c0_21 = arith.constant 0 : index
    %c0_22 = arith.constant 0 : index
    %32 = vector.load %arg4[%c5, %c0_21, %c0_22] : memref<9x32x4xbf16, #tpu.memory_space<vmem>>, vector<1x32x4xbf16>
    %33 = vector.shape_cast %32 : vector<1x32x4xbf16> to vector<32x4xbf16>
    %34 = vector.extract_strided_slice %5 {offsets = [0, 320], sizes = [4, 64], strides = [1, 1]} : vector<4x576xbf16> to vector<4x64xbf16>
    %cst_23 = arith.constant dense<0.000000e+00> : vector<32x64xf32>
    %35 = tpu.matmul %33, %34, %cst_23 {dimension_numbers = #tpu.dot_dimension_numbers<[1], [0], [0], [1], [0, 0, 1, 1], [], []>} : vector<32x4xbf16>, vector<4x64xbf16>, vector<32x64xf32> -> vector<32x64xf32>
    %36 = arith.addf %31, %35 : vector<32x64xf32>
    %c6 = arith.constant 6 : index
    %c0_24 = arith.constant 0 : index
    %c0_25 = arith.constant 0 : index
    %37 = vector.load %arg4[%c6, %c0_24, %c0_25] : memref<9x32x4xbf16, #tpu.memory_space<vmem>>, vector<1x32x4xbf16>
    %38 = vector.shape_cast %37 : vector<1x32x4xbf16> to vector<32x4xbf16>
    %39 = vector.extract_strided_slice %5 {offsets = [0, 384], sizes = [4, 64], strides = [1, 1]} : vector<4x576xbf16> to vector<4x64xbf16>
    %cst_26 = arith.constant dense<0.000000e+00> : vector<32x64xf32>
    %40 = tpu.matmul %38, %39, %cst_26 {dimension_numbers = #tpu.dot_dimension_numbers<[1], [0], [0], [1], [0, 0, 1, 1], [], []>} : vector<32x4xbf16>, vector<4x64xbf16>, vector<32x64xf32> -> vector<32x64xf32>
    %41 = arith.addf %36, %40 : vector<32x64xf32>
    %c7 = arith.constant 7 : index
    %c0_27 = arith.constant 0 : index
    %c0_28 = arith.constant 0 : index
    %42 = vector.load %arg4[%c7, %c0_27, %c0_28] : memref<9x32x4xbf16, #tpu.memory_space<vmem>>, vector<1x32x4xbf16>
    %43 = vector.shape_cast %42 : vector<1x32x4xbf16> to vector<32x4xbf16>
    %44 = vector.extract_strided_slice %5 {offsets = [0, 448], sizes = [4, 64], strides = [1, 1]} : vector<4x576xbf16> to vector<4x64xbf16>
    %cst_29 = arith.constant dense<0.000000e+00> : vector<32x64xf32>
    %45 = tpu.matmul %43, %44, %cst_29 {dimension_numbers = #tpu.dot_dimension_numbers<[1], [0], [0], [1], [0, 0, 1, 1], [], []>} : vector<32x4xbf16>, vector<4x64xbf16>, vector<32x64xf32> -> vector<32x64xf32>
    %46 = arith.addf %41, %45 : vector<32x64xf32>
    %c8 = arith.constant 8 : index
    %c0_30 = arith.constant 0 : index
    %c0_31 = arith.constant 0 : index
    %47 = vector.load %arg4[%c8, %c0_30, %c0_31] : memref<9x32x4xbf16, #tpu.memory_space<vmem>>, vector<1x32x4xbf16>
    %48 = vector.shape_cast %47 : vector<1x32x4xbf16> to vector<32x4xbf16>
    %49 = vector.extract_strided_slice %5 {offsets = [0, 512], sizes = [4, 64], strides = [1, 1]} : vector<4x576xbf16> to vector<4x64xbf16>
    %cst_32 = arith.constant dense<0.000000e+00> : vector<32x64xf32>
    %50 = tpu.matmul %48, %49, %cst_32 {dimension_numbers = #tpu.dot_dimension_numbers<[1], [0], [0], [1], [0, 0, 1, 1], [], []>} : vector<32x4xbf16>, vector<4x64xbf16>, vector<32x64xf32> -> vector<32x64xf32>
    %51 = arith.addf %46, %50 : vector<32x64xf32>
    %c0_33 = arith.constant 0 : index
    %c0_34 = arith.constant 0 : index
    %52 = vector.load %arg5[%c0_33, %c0_34] : memref<32x1xf32, #tpu.memory_space<vmem>>, vector<32x1xf32>
    %53 = vector.broadcast %52 : vector<32x1xf32> to vector<32x64xf32>
    %54 = arith.addf %51, %53 : vector<32x64xf32>
    %cst_35 = arith.constant 0.000000e+00 : f32
    %55 = vector.broadcast %cst_35 : f32 to vector<32x64xf32>
    %56 = arith.maximumf %54, %55 : vector<32x64xf32>
    %57 = tpu.transpose %56, [1, 0] : vector<32x64xf32> -> vector<64x32xf32>
    %58 = arith.truncf %57 : vector<64x32xf32> to vector<64x32xbf16>
    %c0_36 = arith.constant 0 : index
    %c0_37 = arith.constant 0 : index
    %c0_38 = arith.constant 0 : index
    %59 = vector.load %arg6[%c0_36, %c0_37, %c0_38] : memref<9x16x64xbf16, #tpu.memory_space<vmem>>, vector<1x16x64xbf16>
    %60 = vector.shape_cast %59 : vector<1x16x64xbf16> to vector<16x64xbf16>
    %cst_39 = arith.constant dense<0.000000e+00> : vector<16x32xf32>
    %61 = tpu.matmul %60, %58, %cst_39 {dimension_numbers = #tpu.dot_dimension_numbers<[1], [0], [0], [1], [0, 0, 1, 1], [], []>} : vector<16x64xbf16>, vector<64x32xbf16>, vector<16x32xf32> -> vector<16x32xf32>
    %c1_40 = arith.constant 1 : index
    %c0_41 = arith.constant 0 : index
    %c0_42 = arith.constant 0 : index
    %62 = vector.load %arg6[%c1_40, %c0_41, %c0_42] : memref<9x16x64xbf16, #tpu.memory_space<vmem>>, vector<1x16x64xbf16>
    %63 = vector.shape_cast %62 : vector<1x16x64xbf16> to vector<16x64xbf16>
    %cst_43 = arith.constant dense<0.000000e+00> : vector<16x32xf32>
    %64 = tpu.matmul %63, %58, %cst_43 {dimension_numbers = #tpu.dot_dimension_numbers<[1], [0], [0], [1], [0, 0, 1, 1], [], []>} : vector<16x64xbf16>, vector<64x32xbf16>, vector<16x32xf32> -> vector<16x32xf32>
    %c2_44 = arith.constant 2 : index
    %c0_45 = arith.constant 0 : index
    %c0_46 = arith.constant 0 : index
    %65 = vector.load %arg6[%c2_44, %c0_45, %c0_46] : memref<9x16x64xbf16, #tpu.memory_space<vmem>>, vector<1x16x64xbf16>
    %66 = vector.shape_cast %65 : vector<1x16x64xbf16> to vector<16x64xbf16>
    %cst_47 = arith.constant dense<0.000000e+00> : vector<16x32xf32>
    %67 = tpu.matmul %66, %58, %cst_47 {dimension_numbers = #tpu.dot_dimension_numbers<[1], [0], [0], [1], [0, 0, 1, 1], [], []>} : vector<16x64xbf16>, vector<64x32xbf16>, vector<16x32xf32> -> vector<16x32xf32>
    %c3_48 = arith.constant 3 : index
    %c0_49 = arith.constant 0 : index
    %c0_50 = arith.constant 0 : index
    %68 = vector.load %arg6[%c3_48, %c0_49, %c0_50] : memref<9x16x64xbf16, #tpu.memory_space<vmem>>, vector<1x16x64xbf16>
    %69 = vector.shape_cast %68 : vector<1x16x64xbf16> to vector<16x64xbf16>
    %cst_51 = arith.constant dense<0.000000e+00> : vector<16x32xf32>
    %70 = tpu.matmul %69, %58, %cst_51 {dimension_numbers = #tpu.dot_dimension_numbers<[1], [0], [0], [1], [0, 0, 1, 1], [], []>} : vector<16x64xbf16>, vector<64x32xbf16>, vector<16x32xf32> -> vector<16x32xf32>
    %c4_52 = arith.constant 4 : index
    %c0_53 = arith.constant 0 : index
    %c0_54 = arith.constant 0 : index
    %71 = vector.load %arg6[%c4_52, %c0_53, %c0_54] : memref<9x16x64xbf16, #tpu.memory_space<vmem>>, vector<1x16x64xbf16>
    %72 = vector.shape_cast %71 : vector<1x16x64xbf16> to vector<16x64xbf16>
    %cst_55 = arith.constant dense<0.000000e+00> : vector<16x32xf32>
    %73 = tpu.matmul %72, %58, %cst_55 {dimension_numbers = #tpu.dot_dimension_numbers<[1], [0], [0], [1], [0, 0, 1, 1], [], []>} : vector<16x64xbf16>, vector<64x32xbf16>, vector<16x32xf32> -> vector<16x32xf32>
    %c5_56 = arith.constant 5 : index
    %c0_57 = arith.constant 0 : index
    %c0_58 = arith.constant 0 : index
    %74 = vector.load %arg6[%c5_56, %c0_57, %c0_58] : memref<9x16x64xbf16, #tpu.memory_space<vmem>>, vector<1x16x64xbf16>
    %75 = vector.shape_cast %74 : vector<1x16x64xbf16> to vector<16x64xbf16>
    %cst_59 = arith.constant dense<0.000000e+00> : vector<16x32xf32>
    %76 = tpu.matmul %75, %58, %cst_59 {dimension_numbers = #tpu.dot_dimension_numbers<[1], [0], [0], [1], [0, 0, 1, 1], [], []>} : vector<16x64xbf16>, vector<64x32xbf16>, vector<16x32xf32> -> vector<16x32xf32>
    %c6_60 = arith.constant 6 : index
    %c0_61 = arith.constant 0 : index
    %c0_62 = arith.constant 0 : index
    %77 = vector.load %arg6[%c6_60, %c0_61, %c0_62] : memref<9x16x64xbf16, #tpu.memory_space<vmem>>, vector<1x16x64xbf16>
    %78 = vector.shape_cast %77 : vector<1x16x64xbf16> to vector<16x64xbf16>
    %cst_63 = arith.constant dense<0.000000e+00> : vector<16x32xf32>
    %79 = tpu.matmul %78, %58, %cst_63 {dimension_numbers = #tpu.dot_dimension_numbers<[1], [0], [0], [1], [0, 0, 1, 1], [], []>} : vector<16x64xbf16>, vector<64x32xbf16>, vector<16x32xf32> -> vector<16x32xf32>
    %c7_64 = arith.constant 7 : index
    %c0_65 = arith.constant 0 : index
    %c0_66 = arith.constant 0 : index
    %80 = vector.load %arg6[%c7_64, %c0_65, %c0_66] : memref<9x16x64xbf16, #tpu.memory_space<vmem>>, vector<1x16x64xbf16>
    %81 = vector.shape_cast %80 : vector<1x16x64xbf16> to vector<16x64xbf16>
    %cst_67 = arith.constant dense<0.000000e+00> : vector<16x32xf32>
    %82 = tpu.matmul %81, %58, %cst_67 {dimension_numbers = #tpu.dot_dimension_numbers<[1], [0], [0], [1], [0, 0, 1, 1], [], []>} : vector<16x64xbf16>, vector<64x32xbf16>, vector<16x32xf32> -> vector<16x32xf32>
    %c8_68 = arith.constant 8 : index
    %c0_69 = arith.constant 0 : index
    %c0_70 = arith.constant 0 : index
    %83 = vector.load %arg6[%c8_68, %c0_69, %c0_70] : memref<9x16x64xbf16, #tpu.memory_space<vmem>>, vector<1x16x64xbf16>
    %84 = vector.shape_cast %83 : vector<1x16x64xbf16> to vector<16x64xbf16>
    %cst_71 = arith.constant dense<0.000000e+00> : vector<16x32xf32>
    %85 = tpu.matmul %84, %58, %cst_71 {dimension_numbers = #tpu.dot_dimension_numbers<[1], [0], [0], [1], [0, 0, 1, 1], [], []>} : vector<16x64xbf16>, vector<64x32xbf16>, vector<16x32xf32> -> vector<16x32xf32>
    %86 = tpu.concatenate %61, %64, %67, %70, %73, %76, %79, %82, %85 in 1 : vector<16x32xf32>, vector<16x32xf32>, vector<16x32xf32>, vector<16x32xf32>, vector<16x32xf32>, vector<16x32xf32>, vector<16x32xf32>, vector<16x32xf32>, vector<16x32xf32> -> vector<16x288xf32>
    %87 = arith.truncf %86 : vector<16x288xf32> to vector<16x288xbf16>
    %c0_72 = arith.constant 0 : index
    %c0_73 = arith.constant 0 : index
    %88 = vector.load %arg7[%c0_72, %c0_73] : memref<288x64xbf16, #tpu.memory_space<vmem>>, vector<288x64xbf16>
    %cst_74 = arith.constant dense<0.000000e+00> : vector<16x64xf32>
    %89 = tpu.matmul %87, %88, %cst_74 {dimension_numbers = #tpu.dot_dimension_numbers<[1], [0], [0], [1], [0, 0, 1, 1], [], []>} : vector<16x288xbf16>, vector<288x64xbf16>, vector<16x64xf32> -> vector<16x64xf32>
    %c0_75 = arith.constant 0 : index
    %c0_76 = arith.constant 0 : index
    %90 = vector.load %arg8[%c0_75, %c0_76] : memref<1x64xf32, #tpu.memory_space<vmem>>, vector<1x64xf32>
    %91 = vector.broadcast %90 : vector<1x64xf32> to vector<16x64xf32>
    %92 = arith.addf %89, %91 : vector<16x64xf32>
    %cst_77 = arith.constant 0.000000e+00 : f32
    %93 = vector.broadcast %cst_77 : f32 to vector<16x64xf32>
    %94 = arith.maximumf %92, %93 : vector<16x64xf32>
    %95 = arith.truncf %94 : vector<16x64xf32> to vector<16x64xbf16>
    %c0_78 = arith.constant 0 : index
    %c0_79 = arith.constant 0 : index
    %c0_80 = arith.constant 0 : index
    %96 = vector.load %arg9[%c0_78, %c0_79, %c0_80] : memref<9x4x16xbf16, #tpu.memory_space<vmem>>, vector<1x4x16xbf16>
    %97 = vector.shape_cast %96 : vector<1x4x16xbf16> to vector<4x16xbf16>
    %cst_81 = arith.constant dense<0.000000e+00> : vector<4x64xf32>
    %98 = tpu.matmul %97, %95, %cst_81 {dimension_numbers = #tpu.dot_dimension_numbers<[1], [0], [0], [1], [0, 0, 1, 1], [], []>} : vector<4x16xbf16>, vector<16x64xbf16>, vector<4x64xf32> -> vector<4x64xf32>
    %c1_82 = arith.constant 1 : index
    %c0_83 = arith.constant 0 : index
    %c0_84 = arith.constant 0 : index
    %99 = vector.load %arg9[%c1_82, %c0_83, %c0_84] : memref<9x4x16xbf16, #tpu.memory_space<vmem>>, vector<1x4x16xbf16>
    %100 = vector.shape_cast %99 : vector<1x4x16xbf16> to vector<4x16xbf16>
    %cst_85 = arith.constant dense<0.000000e+00> : vector<4x64xf32>
    %101 = tpu.matmul %100, %95, %cst_85 {dimension_numbers = #tpu.dot_dimension_numbers<[1], [0], [0], [1], [0, 0, 1, 1], [], []>} : vector<4x16xbf16>, vector<16x64xbf16>, vector<4x64xf32> -> vector<4x64xf32>
    %c2_86 = arith.constant 2 : index
    %c0_87 = arith.constant 0 : index
    %c0_88 = arith.constant 0 : index
    %102 = vector.load %arg9[%c2_86, %c0_87, %c0_88] : memref<9x4x16xbf16, #tpu.memory_space<vmem>>, vector<1x4x16xbf16>
    %103 = vector.shape_cast %102 : vector<1x4x16xbf16> to vector<4x16xbf16>
    %cst_89 = arith.constant dense<0.000000e+00> : vector<4x64xf32>
    %104 = tpu.matmul %103, %95, %cst_89 {dimension_numbers = #tpu.dot_dimension_numbers<[1], [0], [0], [1], [0, 0, 1, 1], [], []>} : vector<4x16xbf16>, vector<16x64xbf16>, vector<4x64xf32> -> vector<4x64xf32>
    %c3_90 = arith.constant 3 : index
    %c0_91 = arith.constant 0 : index
    %c0_92 = arith.constant 0 : index
    %105 = vector.load %arg9[%c3_90, %c0_91, %c0_92] : memref<9x4x16xbf16, #tpu.memory_space<vmem>>, vector<1x4x16xbf16>
    %106 = vector.shape_cast %105 : vector<1x4x16xbf16> to vector<4x16xbf16>
    %cst_93 = arith.constant dense<0.000000e+00> : vector<4x64xf32>
    %107 = tpu.matmul %106, %95, %cst_93 {dimension_numbers = #tpu.dot_dimension_numbers<[1], [0], [0], [1], [0, 0, 1, 1], [], []>} : vector<4x16xbf16>, vector<16x64xbf16>, vector<4x64xf32> -> vector<4x64xf32>
    %c4_94 = arith.constant 4 : index
    %c0_95 = arith.constant 0 : index
    %c0_96 = arith.constant 0 : index
    %108 = vector.load %arg9[%c4_94, %c0_95, %c0_96] : memref<9x4x16xbf16, #tpu.memory_space<vmem>>, vector<1x4x16xbf16>
    %109 = vector.shape_cast %108 : vector<1x4x16xbf16> to vector<4x16xbf16>
    %cst_97 = arith.constant dense<0.000000e+00> : vector<4x64xf32>
    %110 = tpu.matmul %109, %95, %cst_97 {dimension_numbers = #tpu.dot_dimension_numbers<[1], [0], [0], [1], [0, 0, 1, 1], [], []>} : vector<4x16xbf16>, vector<16x64xbf16>, vector<4x64xf32> -> vector<4x64xf32>
    %c5_98 = arith.constant 5 : index
    %c0_99 = arith.constant 0 : index
    %c0_100 = arith.constant 0 : index
    %111 = vector.load %arg9[%c5_98, %c0_99, %c0_100] : memref<9x4x16xbf16, #tpu.memory_space<vmem>>, vector<1x4x16xbf16>
    %112 = vector.shape_cast %111 : vector<1x4x16xbf16> to vector<4x16xbf16>
    %cst_101 = arith.constant dense<0.000000e+00> : vector<4x64xf32>
    %113 = tpu.matmul %112, %95, %cst_101 {dimension_numbers = #tpu.dot_dimension_numbers<[1], [0], [0], [1], [0, 0, 1, 1], [], []>} : vector<4x16xbf16>, vector<16x64xbf16>, vector<4x64xf32> -> vector<4x64xf32>
    %c6_102 = arith.constant 6 : index
    %c0_103 = arith.constant 0 : index
    %c0_104 = arith.constant 0 : index
    %114 = vector.load %arg9[%c6_102, %c0_103, %c0_104] : memref<9x4x16xbf16, #tpu.memory_space<vmem>>, vector<1x4x16xbf16>
    %115 = vector.shape_cast %114 : vector<1x4x16xbf16> to vector<4x16xbf16>
    %cst_105 = arith.constant dense<0.000000e+00> : vector<4x64xf32>
    %116 = tpu.matmul %115, %95, %cst_105 {dimension_numbers = #tpu.dot_dimension_numbers<[1], [0], [0], [1], [0, 0, 1, 1], [], []>} : vector<4x16xbf16>, vector<16x64xbf16>, vector<4x64xf32> -> vector<4x64xf32>
    %c7_106 = arith.constant 7 : index
    %c0_107 = arith.constant 0 : index
    %c0_108 = arith.constant 0 : index
    %117 = vector.load %arg9[%c7_106, %c0_107, %c0_108] : memref<9x4x16xbf16, #tpu.memory_space<vmem>>, vector<1x4x16xbf16>
    %118 = vector.shape_cast %117 : vector<1x4x16xbf16> to vector<4x16xbf16>
    %cst_109 = arith.constant dense<0.000000e+00> : vector<4x64xf32>
    %119 = tpu.matmul %118, %95, %cst_109 {dimension_numbers = #tpu.dot_dimension_numbers<[1], [0], [0], [1], [0, 0, 1, 1], [], []>} : vector<4x16xbf16>, vector<16x64xbf16>, vector<4x64xf32> -> vector<4x64xf32>
    %c8_110 = arith.constant 8 : index
    %c0_111 = arith.constant 0 : index
    %c0_112 = arith.constant 0 : index
    %120 = vector.load %arg9[%c8_110, %c0_111, %c0_112] : memref<9x4x16xbf16, #tpu.memory_space<vmem>>, vector<1x4x16xbf16>
    %121 = vector.shape_cast %120 : vector<1x4x16xbf16> to vector<4x16xbf16>
    %cst_113 = arith.constant dense<0.000000e+00> : vector<4x64xf32>
    %122 = tpu.matmul %121, %95, %cst_113 {dimension_numbers = #tpu.dot_dimension_numbers<[1], [0], [0], [1], [0, 0, 1, 1], [], []>} : vector<4x16xbf16>, vector<16x64xbf16>, vector<4x64xf32> -> vector<4x64xf32>
    %123 = tpu.concatenate %98, %101, %104, %107, %110, %113, %116, %119, %122 in 1 : vector<4x64xf32>, vector<4x64xf32>, vector<4x64xf32>, vector<4x64xf32>, vector<4x64xf32>, vector<4x64xf32>, vector<4x64xf32>, vector<4x64xf32>, vector<4x64xf32> -> vector<4x576xf32>
    %124 = arith.truncf %123 : vector<4x576xf32> to vector<4x576xbf16>
    %c0_114 = arith.constant 0 : index
    %c0_115 = arith.constant 0 : index
    %125 = vector.load %arg10[%c0_114, %c0_115] : memref<576x128xbf16, #tpu.memory_space<vmem>>, vector<576x128xbf16>
    %cst_116 = arith.constant dense<0.000000e+00> : vector<4x128xf32>
    %126 = tpu.matmul %124, %125, %cst_116 {dimension_numbers = #tpu.dot_dimension_numbers<[1], [0], [0], [1], [0, 0, 1, 1], [], []>} : vector<4x576xbf16>, vector<576x128xbf16>, vector<4x128xf32> -> vector<4x128xf32>
    %c0_117 = arith.constant 0 : index
    %c0_118 = arith.constant 0 : index
    %127 = vector.load %arg11[%c0_117, %c0_118] : memref<1x128xf32, #tpu.memory_space<vmem>>, vector<1x128xf32>
    %128 = vector.broadcast %127 : vector<1x128xf32> to vector<4x128xf32>
    %129 = arith.addf %126, %128 : vector<4x128xf32>
    %cst_119 = arith.constant 0.000000e+00 : f32
    %130 = vector.broadcast %cst_119 : f32 to vector<4x128xf32>
    %131 = arith.maximumf %129, %130 : vector<4x128xf32>
    %132 = arith.truncf %131 : vector<4x128xf32> to vector<4x128xbf16>
    %c0_120 = arith.constant 0 : index
    %c0_121 = arith.constant 0 : index
    %c0_122 = arith.constant 0 : index
    %133 = vector.load %arg12[%c0_120, %c0_121, %c0_122] : memref<9x1x4xbf16, #tpu.memory_space<vmem>>, vector<1x1x4xbf16>
    %134 = vector.shape_cast %133 : vector<1x1x4xbf16> to vector<1x4xbf16>
    %cst_123 = arith.constant dense<0.000000e+00> : vector<1x128xf32>
    %135 = tpu.matmul %134, %132, %cst_123 {dimension_numbers = #tpu.dot_dimension_numbers<[1], [0], [0], [1], [0, 0, 1, 1], [], []>} : vector<1x4xbf16>, vector<4x128xbf16>, vector<1x128xf32> -> vector<1x128xf32>
    %c1_124 = arith.constant 1 : index
    %c0_125 = arith.constant 0 : index
    %c0_126 = arith.constant 0 : index
    %136 = vector.load %arg12[%c1_124, %c0_125, %c0_126] : memref<9x1x4xbf16, #tpu.memory_space<vmem>>, vector<1x1x4xbf16>
    %137 = vector.shape_cast %136 : vector<1x1x4xbf16> to vector<1x4xbf16>
    %cst_127 = arith.constant dense<0.000000e+00> : vector<1x128xf32>
    %138 = tpu.matmul %137, %132, %cst_127 {dimension_numbers = #tpu.dot_dimension_numbers<[1], [0], [0], [1], [0, 0, 1, 1], [], []>} : vector<1x4xbf16>, vector<4x128xbf16>, vector<1x128xf32> -> vector<1x128xf32>
    %c2_128 = arith.constant 2 : index
    %c0_129 = arith.constant 0 : index
    %c0_130 = arith.constant 0 : index
    %139 = vector.load %arg12[%c2_128, %c0_129, %c0_130] : memref<9x1x4xbf16, #tpu.memory_space<vmem>>, vector<1x1x4xbf16>
    %140 = vector.shape_cast %139 : vector<1x1x4xbf16> to vector<1x4xbf16>
    %cst_131 = arith.constant dense<0.000000e+00> : vector<1x128xf32>
    %141 = tpu.matmul %140, %132, %cst_131 {dimension_numbers = #tpu.dot_dimension_numbers<[1], [0], [0], [1], [0, 0, 1, 1], [], []>} : vector<1x4xbf16>, vector<4x128xbf16>, vector<1x128xf32> -> vector<1x128xf32>
    %c3_132 = arith.constant 3 : index
    %c0_133 = arith.constant 0 : index
    %c0_134 = arith.constant 0 : index
    %142 = vector.load %arg12[%c3_132, %c0_133, %c0_134] : memref<9x1x4xbf16, #tpu.memory_space<vmem>>, vector<1x1x4xbf16>
    %143 = vector.shape_cast %142 : vector<1x1x4xbf16> to vector<1x4xbf16>
    %cst_135 = arith.constant dense<0.000000e+00> : vector<1x128xf32>
    %144 = tpu.matmul %143, %132, %cst_135 {dimension_numbers = #tpu.dot_dimension_numbers<[1], [0], [0], [1], [0, 0, 1, 1], [], []>} : vector<1x4xbf16>, vector<4x128xbf16>, vector<1x128xf32> -> vector<1x128xf32>
    %c4_136 = arith.constant 4 : index
    %c0_137 = arith.constant 0 : index
    %c0_138 = arith.constant 0 : index
    %145 = vector.load %arg12[%c4_136, %c0_137, %c0_138] : memref<9x1x4xbf16, #tpu.memory_space<vmem>>, vector<1x1x4xbf16>
    %146 = vector.shape_cast %145 : vector<1x1x4xbf16> to vector<1x4xbf16>
    %cst_139 = arith.constant dense<0.000000e+00> : vector<1x128xf32>
    %147 = tpu.matmul %146, %132, %cst_139 {dimension_numbers = #tpu.dot_dimension_numbers<[1], [0], [0], [1], [0, 0, 1, 1], [], []>} : vector<1x4xbf16>, vector<4x128xbf16>, vector<1x128xf32> -> vector<1x128xf32>
    %c5_140 = arith.constant 5 : index
    %c0_141 = arith.constant 0 : index
    %c0_142 = arith.constant 0 : index
    %148 = vector.load %arg12[%c5_140, %c0_141, %c0_142] : memref<9x1x4xbf16, #tpu.memory_space<vmem>>, vector<1x1x4xbf16>
    %149 = vector.shape_cast %148 : vector<1x1x4xbf16> to vector<1x4xbf16>
    %cst_143 = arith.constant dense<0.000000e+00> : vector<1x128xf32>
    %150 = tpu.matmul %149, %132, %cst_143 {dimension_numbers = #tpu.dot_dimension_numbers<[1], [0], [0], [1], [0, 0, 1, 1], [], []>} : vector<1x4xbf16>, vector<4x128xbf16>, vector<1x128xf32> -> vector<1x128xf32>
    %c6_144 = arith.constant 6 : index
    %c0_145 = arith.constant 0 : index
    %c0_146 = arith.constant 0 : index
    %151 = vector.load %arg12[%c6_144, %c0_145, %c0_146] : memref<9x1x4xbf16, #tpu.memory_space<vmem>>, vector<1x1x4xbf16>
    %152 = vector.shape_cast %151 : vector<1x1x4xbf16> to vector<1x4xbf16>
    %cst_147 = arith.constant dense<0.000000e+00> : vector<1x128xf32>
    %153 = tpu.matmul %152, %132, %cst_147 {dimension_numbers = #tpu.dot_dimension_numbers<[1], [0], [0], [1], [0, 0, 1, 1], [], []>} : vector<1x4xbf16>, vector<4x128xbf16>, vector<1x128xf32> -> vector<1x128xf32>
    %c7_148 = arith.constant 7 : index
    %c0_149 = arith.constant 0 : index
    %c0_150 = arith.constant 0 : index
    %154 = vector.load %arg12[%c7_148, %c0_149, %c0_150] : memref<9x1x4xbf16, #tpu.memory_space<vmem>>, vector<1x1x4xbf16>
    %155 = vector.shape_cast %154 : vector<1x1x4xbf16> to vector<1x4xbf16>
    %cst_151 = arith.constant dense<0.000000e+00> : vector<1x128xf32>
    %156 = tpu.matmul %155, %132, %cst_151 {dimension_numbers = #tpu.dot_dimension_numbers<[1], [0], [0], [1], [0, 0, 1, 1], [], []>} : vector<1x4xbf16>, vector<4x128xbf16>, vector<1x128xf32> -> vector<1x128xf32>
    %c8_152 = arith.constant 8 : index
    %c0_153 = arith.constant 0 : index
    %c0_154 = arith.constant 0 : index
    %157 = vector.load %arg12[%c8_152, %c0_153, %c0_154] : memref<9x1x4xbf16, #tpu.memory_space<vmem>>, vector<1x1x4xbf16>
    %158 = vector.shape_cast %157 : vector<1x1x4xbf16> to vector<1x4xbf16>
    %cst_155 = arith.constant dense<0.000000e+00> : vector<1x128xf32>
    %159 = tpu.matmul %158, %132, %cst_155 {dimension_numbers = #tpu.dot_dimension_numbers<[1], [0], [0], [1], [0, 0, 1, 1], [], []>} : vector<1x4xbf16>, vector<4x128xbf16>, vector<1x128xf32> -> vector<1x128xf32>
    %160 = tpu.concatenate %135, %138, %141, %144, %147, %150, %153, %156, %159 in 1 : vector<1x128xf32>, vector<1x128xf32>, vector<1x128xf32>, vector<1x128xf32>, vector<1x128xf32>, vector<1x128xf32>, vector<1x128xf32>, vector<1x128xf32>, vector<1x128xf32> -> vector<1x1152xf32>
    %161 = arith.truncf %160 : vector<1x1152xf32> to vector<1x1152xbf16>
    %c0_156 = arith.constant 0 : index
    %c0_157 = arith.constant 0 : index
    %162 = vector.load %arg13[%c0_156, %c0_157] : memref<1152x256xbf16, #tpu.memory_space<vmem>>, vector<1152x256xbf16>
    %cst_158 = arith.constant dense<0.000000e+00> : vector<1x256xf32>
    %163 = tpu.matmul %161, %162, %cst_158 {dimension_numbers = #tpu.dot_dimension_numbers<[1], [0], [0], [1], [0, 0, 1, 1], [], []>} : vector<1x1152xbf16>, vector<1152x256xbf16>, vector<1x256xf32> -> vector<1x256xf32>
    %c0_159 = arith.constant 0 : index
    %c0_160 = arith.constant 0 : index
    %164 = vector.load %arg14[%c0_159, %c0_160] : memref<1x256xf32, #tpu.memory_space<vmem>>, vector<1x256xf32>
    %165 = arith.addf %163, %164 : vector<1x256xf32>
    %cst_161 = arith.constant 0.000000e+00 : f32
    %166 = vector.broadcast %cst_161 : f32 to vector<1x256xf32>
    %167 = arith.maximumf %165, %166 : vector<1x256xf32>
    %168 = arith.truncf %167 : vector<1x256xf32> to vector<1x256xbf16>
    %c0_162 = arith.constant 0 : index
    %c0_163 = arith.constant 0 : index
    %169 = vector.load %arg15[%c0_162, %c0_163] : memref<256x32xbf16, #tpu.memory_space<vmem>>, vector<256x32xbf16>
    %cst_164 = arith.constant dense<0.000000e+00> : vector<1x32xf32>
    %170 = tpu.matmul %168, %169, %cst_164 {dimension_numbers = #tpu.dot_dimension_numbers<[1], [0], [0], [1], [0, 0, 1, 1], [], []>} : vector<1x256xbf16>, vector<256x32xbf16>, vector<1x32xf32> -> vector<1x32xf32>
    %c0_165 = arith.constant 0 : index
    %c0_166 = arith.constant 0 : index
    %171 = vector.load %arg16[%c0_165, %c0_166] : memref<1x32xf32, #tpu.memory_space<vmem>>, vector<1x32xf32>
    %172 = arith.addf %170, %171 : vector<1x32xf32>
    %c0_167 = arith.constant 0 : index
    %c0_168 = arith.constant 0 : index
    %173 = vector.load %arg17[%c0_167, %c0_168] : memref<256x32xbf16, #tpu.memory_space<vmem>>, vector<256x32xbf16>
    %cst_169 = arith.constant dense<0.000000e+00> : vector<1x32xf32>
    %174 = tpu.matmul %168, %173, %cst_169 {dimension_numbers = #tpu.dot_dimension_numbers<[1], [0], [0], [1], [0, 0, 1, 1], [], []>} : vector<1x256xbf16>, vector<256x32xbf16>, vector<1x32xf32> -> vector<1x32xf32>
    %c0_170 = arith.constant 0 : index
    %c0_171 = arith.constant 0 : index
    %175 = vector.load %arg18[%c0_170, %c0_171] : memref<1x32xf32, #tpu.memory_space<vmem>>, vector<1x32xf32>
    %176 = arith.addf %174, %175 : vector<1x32xf32>
    %c0_172 = arith.constant 0 : index
    %c0_173 = arith.constant 0 : index
    %c0_174 = arith.constant 0 : index
    %177 = vector.load %arg34[%c0_172, %c0_173, %c0_174] : memref<1x1x32xf32, #tpu.memory_space<vmem>>, vector<1x1x32xf32>
    %178 = vector.shape_cast %177 : vector<1x1x32xf32> to vector<1x32xf32>
    %179 = vector.shape_cast %172 : vector<1x32xf32> to vector<1x1x32xf32>
    tpu.vector_store %arg34[%c0_172, %c0_173, %c0_174], %179 {strides = array<i32>} : memref<1x1x32xf32, #tpu.memory_space<vmem>>, vector<1x1x32xf32>,
    %c0_175 = arith.constant 0 : index
    %c0_176 = arith.constant 0 : index
    %c0_177 = arith.constant 0 : index
    %180 = vector.load %arg35[%c0_175, %c0_176, %c0_177] : memref<1x1x32xf32, #tpu.memory_space<vmem>>, vector<1x1x32xf32>
    %181 = vector.shape_cast %180 : vector<1x1x32xf32> to vector<1x32xf32>
    %182 = vector.shape_cast %176 : vector<1x32xf32> to vector<1x1x32xf32>
    tpu.vector_store %arg35[%c0_175, %c0_176, %c0_177], %182 {strides = array<i32>} : memref<1x1x32xf32, #tpu.memory_space<vmem>>, vector<1x1x32xf32>,
    %c0_178 = arith.constant 0 : index
    %c0_179 = arith.constant 0 : index
    %c0_180 = arith.constant 0 : index
    %183 = vector.load %arg2[%c0_178, %c0_179, %c0_180] : memref<1x1x32xf32, #tpu.memory_space<vmem>>, vector<1x1x32xf32>
    %184 = vector.shape_cast %183 : vector<1x1x32xf32> to vector<1x32xf32>
    %cst_181 = arith.constant 5.000000e-01 : f32
    %185 = vector.broadcast %cst_181 : f32 to vector<1x32xf32>
    %186 = arith.mulf %185, %176 : vector<1x32xf32>
    %187 = math.exp %186 : vector<1x32xf32>
    %188 = arith.mulf %184, %187 : vector<1x32xf32>
    %189 = arith.addf %172, %188 : vector<1x32xf32>
    %190 = arith.truncf %189 : vector<1x32xf32> to vector<1x32xbf16>
    %c0_182 = arith.constant 0 : index
    %c0_183 = arith.constant 0 : index
    %191 = vector.load %arg19[%c0_182, %c0_183] : memref<32x256xbf16, #tpu.memory_space<vmem>>, vector<32x256xbf16>
    %cst_184 = arith.constant dense<0.000000e+00> : vector<1x256xf32>
    %192 = tpu.matmul %190, %191, %cst_184 {dimension_numbers = #tpu.dot_dimension_numbers<[1], [0], [0], [1], [0, 0, 1, 1], [], []>} : vector<1x32xbf16>, vector<32x256xbf16>, vector<1x256xf32> -> vector<1x256xf32>
    %c0_185 = arith.constant 0 : index
    %c0_186 = arith.constant 0 : index
    %193 = vector.load %arg20[%c0_185, %c0_186] : memref<1x256xf32, #tpu.memory_space<vmem>>, vector<1x256xf32>
    %194 = arith.addf %192, %193 : vector<1x256xf32>
    %195 = arith.truncf %194 : vector<1x256xf32> to vector<1x256xbf16>
    %c0_187 = arith.constant 0 : index
    %c0_188 = arith.constant 0 : index
    %196 = vector.load %arg22[%c0_187, %c0_188] : memref<256x1152xbf16, #tpu.memory_space<vmem>>, vector<256x1152xbf16>
    %cst_189 = arith.constant dense<0.000000e+00> : vector<1x1152xf32>
    %197 = tpu.matmul %195, %196, %cst_189 {dimension_numbers = #tpu.dot_dimension_numbers<[1], [0], [0], [1], [0, 0, 1, 1], [], []>} : vector<1x256xbf16>, vector<256x1152xbf16>, vector<1x1152xf32> -> vector<1x1152xf32>
    %cst_190 = arith.constant 0.000000e+00 : f32
    %198 = vector.broadcast %cst_190 : f32 to vector<4x128xf32>
    %c0_191 = arith.constant 0 : index
    %c0_192 = arith.constant 0 : index
    %c0_193 = arith.constant 0 : index
    %199 = vector.load %arg21[%c0_191, %c0_192, %c0_193] : memref<9x4x1xbf16, #tpu.memory_space<vmem>>, vector<1x4x1xbf16>
    %200 = vector.shape_cast %199 : vector<1x4x1xbf16> to vector<4x1xbf16>
    %201 = arith.extf %200 : vector<4x1xbf16> to vector<4x1xf32>
    %202 = vector.extract_strided_slice %197 {offsets = [0, 0], sizes = [1, 128], strides = [1, 1]} : vector<1x1152xf32> to vector<1x128xf32>
    %203 = vector.broadcast %201 : vector<4x1xf32> to vector<4x128xf32>
    %204 = vector.broadcast %202 : vector<1x128xf32> to vector<4x128xf32>
    %205 = arith.mulf %203, %204 : vector<4x128xf32>
    %206 = arith.addf %198, %205 : vector<4x128xf32>
    %c1_194 = arith.constant 1 : index
    %c0_195 = arith.constant 0 : index
    %c0_196 = arith.constant 0 : index
    %207 = vector.load %arg21[%c1_194, %c0_195, %c0_196] : memref<9x4x1xbf16, #tpu.memory_space<vmem>>, vector<1x4x1xbf16>
    %208 = vector.shape_cast %207 : vector<1x4x1xbf16> to vector<4x1xbf16>
    %209 = arith.extf %208 : vector<4x1xbf16> to vector<4x1xf32>
    %210 = vector.extract_strided_slice %197 {offsets = [0, 128], sizes = [1, 128], strides = [1, 1]} : vector<1x1152xf32> to vector<1x128xf32>
    %211 = vector.broadcast %209 : vector<4x1xf32> to vector<4x128xf32>
    %212 = vector.broadcast %210 : vector<1x128xf32> to vector<4x128xf32>
    %213 = arith.mulf %211, %212 : vector<4x128xf32>
    %214 = arith.addf %206, %213 : vector<4x128xf32>
    %c2_197 = arith.constant 2 : index
    %c0_198 = arith.constant 0 : index
    %c0_199 = arith.constant 0 : index
    %215 = vector.load %arg21[%c2_197, %c0_198, %c0_199] : memref<9x4x1xbf16, #tpu.memory_space<vmem>>, vector<1x4x1xbf16>
    %216 = vector.shape_cast %215 : vector<1x4x1xbf16> to vector<4x1xbf16>
    %217 = arith.extf %216 : vector<4x1xbf16> to vector<4x1xf32>
    %218 = vector.extract_strided_slice %197 {offsets = [0, 256], sizes = [1, 128], strides = [1, 1]} : vector<1x1152xf32> to vector<1x128xf32>
    %219 = vector.broadcast %217 : vector<4x1xf32> to vector<4x128xf32>
    %220 = vector.broadcast %218 : vector<1x128xf32> to vector<4x128xf32>
    %221 = arith.mulf %219, %220 : vector<4x128xf32>
    %222 = arith.addf %214, %221 : vector<4x128xf32>
    %c3_200 = arith.constant 3 : index
    %c0_201 = arith.constant 0 : index
    %c0_202 = arith.constant 0 : index
    %223 = vector.load %arg21[%c3_200, %c0_201, %c0_202] : memref<9x4x1xbf16, #tpu.memory_space<vmem>>, vector<1x4x1xbf16>
    %224 = vector.shape_cast %223 : vector<1x4x1xbf16> to vector<4x1xbf16>
    %225 = arith.extf %224 : vector<4x1xbf16> to vector<4x1xf32>
    %226 = vector.extract_strided_slice %197 {offsets = [0, 384], sizes = [1, 128], strides = [1, 1]} : vector<1x1152xf32> to vector<1x128xf32>
    %227 = vector.broadcast %225 : vector<4x1xf32> to vector<4x128xf32>
    %228 = vector.broadcast %226 : vector<1x128xf32> to vector<4x128xf32>
    %229 = arith.mulf %227, %228 : vector<4x128xf32>
    %230 = arith.addf %222, %229 : vector<4x128xf32>
    %c4_203 = arith.constant 4 : index
    %c0_204 = arith.constant 0 : index
    %c0_205 = arith.constant 0 : index
    %231 = vector.load %arg21[%c4_203, %c0_204, %c0_205] : memref<9x4x1xbf16, #tpu.memory_space<vmem>>, vector<1x4x1xbf16>
    %232 = vector.shape_cast %231 : vector<1x4x1xbf16> to vector<4x1xbf16>
    %233 = arith.extf %232 : vector<4x1xbf16> to vector<4x1xf32>
    %234 = vector.extract_strided_slice %197 {offsets = [0, 512], sizes = [1, 128], strides = [1, 1]} : vector<1x1152xf32> to vector<1x128xf32>
    %235 = vector.broadcast %233 : vector<4x1xf32> to vector<4x128xf32>
    %236 = vector.broadcast %234 : vector<1x128xf32> to vector<4x128xf32>
    %237 = arith.mulf %235, %236 : vector<4x128xf32>
    %238 = arith.addf %230, %237 : vector<4x128xf32>
    %c5_206 = arith.constant 5 : index
    %c0_207 = arith.constant 0 : index
    %c0_208 = arith.constant 0 : index
    %239 = vector.load %arg21[%c5_206, %c0_207, %c0_208] : memref<9x4x1xbf16, #tpu.memory_space<vmem>>, vector<1x4x1xbf16>
    %240 = vector.shape_cast %239 : vector<1x4x1xbf16> to vector<4x1xbf16>
    %241 = arith.extf %240 : vector<4x1xbf16> to vector<4x1xf32>
    %242 = vector.extract_strided_slice %197 {offsets = [0, 640], sizes = [1, 128], strides = [1, 1]} : vector<1x1152xf32> to vector<1x128xf32>
    %243 = vector.broadcast %241 : vector<4x1xf32> to vector<4x128xf32>
    %244 = vector.broadcast %242 : vector<1x128xf32> to vector<4x128xf32>
    %245 = arith.mulf %243, %244 : vector<4x128xf32>
    %246 = arith.addf %238, %245 : vector<4x128xf32>
    %c6_209 = arith.constant 6 : index
    %c0_210 = arith.constant 0 : index
    %c0_211 = arith.constant 0 : index
    %247 = vector.load %arg21[%c6_209, %c0_210, %c0_211] : memref<9x4x1xbf16, #tpu.memory_space<vmem>>, vector<1x4x1xbf16>
    %248 = vector.shape_cast %247 : vector<1x4x1xbf16> to vector<4x1xbf16>
    %249 = arith.extf %248 : vector<4x1xbf16> to vector<4x1xf32>
    %250 = vector.extract_strided_slice %197 {offsets = [0, 768], sizes = [1, 128], strides = [1, 1]} : vector<1x1152xf32> to vector<1x128xf32>
    %251 = vector.broadcast %249 : vector<4x1xf32> to vector<4x128xf32>
    %252 = vector.broadcast %250 : vector<1x128xf32> to vector<4x128xf32>
    %253 = arith.mulf %251, %252 : vector<4x128xf32>
    %254 = arith.addf %246, %253 : vector<4x128xf32>
    %c7_212 = arith.constant 7 : index
    %c0_213 = arith.constant 0 : index
    %c0_214 = arith.constant 0 : index
    %255 = vector.load %arg21[%c7_212, %c0_213, %c0_214] : memref<9x4x1xbf16, #tpu.memory_space<vmem>>, vector<1x4x1xbf16>
    %256 = vector.shape_cast %255 : vector<1x4x1xbf16> to vector<4x1xbf16>
    %257 = arith.extf %256 : vector<4x1xbf16> to vector<4x1xf32>
    %258 = vector.extract_strided_slice %197 {offsets = [0, 896], sizes = [1, 128], strides = [1, 1]} : vector<1x1152xf32> to vector<1x128xf32>
    %259 = vector.broadcast %257 : vector<4x1xf32> to vector<4x128xf32>
    %260 = vector.broadcast %258 : vector<1x128xf32> to vector<4x128xf32>
    %261 = arith.mulf %259, %260 : vector<4x128xf32>
    %262 = arith.addf %254, %261 : vector<4x128xf32>
    %c8_215 = arith.constant 8 : index
    %c0_216 = arith.constant 0 : index
    %c0_217 = arith.constant 0 : index
    %263 = vector.load %arg21[%c8_215, %c0_216, %c0_217] : memref<9x4x1xbf16, #tpu.memory_space<vmem>>, vector<1x4x1xbf16>
    %264 = vector.shape_cast %263 : vector<1x4x1xbf16> to vector<4x1xbf16>
    %265 = arith.extf %264 : vector<4x1xbf16> to vector<4x1xf32>
    %266 = vector.extract_strided_slice %197 {offsets = [0, 1024], sizes = [1, 128], strides = [1, 1]} : vector<1x1152xf32> to vector<1x128xf32>
    %267 = vector.broadcast %265 : vector<4x1xf32> to vector<4x128xf32>
    %268 = vector.broadcast %266 : vector<1x128xf32> to vector<4x128xf32>
    %269 = arith.mulf %267, %268 : vector<4x128xf32>
    %270 = arith.addf %262, %269 : vector<4x128xf32>
    %c0_218 = arith.constant 0 : index
    %c0_219 = arith.constant 0 : index
    %271 = vector.load %arg23[%c0_218, %c0_219] : memref<1x128xf32, #tpu.memory_space<vmem>>, vector<1x128xf32>
    %272 = vector.broadcast %271 : vector<1x128xf32> to vector<4x128xf32>
    %273 = arith.addf %270, %272 : vector<4x128xf32>
    %cst_220 = arith.constant 0.000000e+00 : f32
    %274 = vector.broadcast %cst_220 : f32 to vector<4x128xf32>
    %275 = arith.maximumf %273, %274 : vector<4x128xf32>
    %276 = arith.truncf %275 : vector<4x128xf32> to vector<4x128xbf16>
    %c0_221 = arith.constant 0 : index
    %c0_222 = arith.constant 0 : index
    %277 = vector.load %arg25[%c0_221, %c0_222] : memref<128x576xbf16, #tpu.memory_space<vmem>>, vector<128x576xbf16>
    %cst_223 = arith.constant dense<0.000000e+00> : vector<4x576xf32>
    %278 = tpu.matmul %276, %277, %cst_223 {dimension_numbers = #tpu.dot_dimension_numbers<[1], [0], [0], [1], [0, 0, 1, 1], [], []>} : vector<4x128xbf16>, vector<128x576xbf16>, vector<4x576xf32> -> vector<4x576xf32>
    %279 = arith.truncf %278 : vector<4x576xf32> to vector<4x576xbf16>
    %cst_224 = arith.constant 0.000000e+00 : f32
    %280 = vector.broadcast %cst_224 : f32 to vector<16x64xf32>
    %c0_225 = arith.constant 0 : index
    %c0_226 = arith.constant 0 : index
    %c0_227 = arith.constant 0 : index
    %281 = vector.load %arg24[%c0_225, %c0_226, %c0_227] : memref<9x16x4xbf16, #tpu.memory_space<vmem>>, vector<1x16x4xbf16>
    %282 = vector.shape_cast %281 : vector<1x16x4xbf16> to vector<16x4xbf16>
    %283 = vector.extract_strided_slice %279 {offsets = [0, 0], sizes = [4, 64], strides = [1, 1]} : vector<4x576xbf16> to vector<4x64xbf16>
    %cst_228 = arith.constant dense<0.000000e+00> : vector<16x64xf32>
    %284 = tpu.matmul %282, %283, %cst_228 {dimension_numbers = #tpu.dot_dimension_numbers<[1], [0], [0], [1], [0, 0, 1, 1], [], []>} : vector<16x4xbf16>, vector<4x64xbf16>, vector<16x64xf32> -> vector<16x64xf32>
    %285 = arith.addf %280, %284 : vector<16x64xf32>
    %c1_229 = arith.constant 1 : index
    %c0_230 = arith.constant 0 : index
    %c0_231 = arith.constant 0 : index
    %286 = vector.load %arg24[%c1_229, %c0_230, %c0_231] : memref<9x16x4xbf16, #tpu.memory_space<vmem>>, vector<1x16x4xbf16>
    %287 = vector.shape_cast %286 : vector<1x16x4xbf16> to vector<16x4xbf16>
    %288 = vector.extract_strided_slice %279 {offsets = [0, 64], sizes = [4, 64], strides = [1, 1]} : vector<4x576xbf16> to vector<4x64xbf16>
    %cst_232 = arith.constant dense<0.000000e+00> : vector<16x64xf32>
    %289 = tpu.matmul %287, %288, %cst_232 {dimension_numbers = #tpu.dot_dimension_numbers<[1], [0], [0], [1], [0, 0, 1, 1], [], []>} : vector<16x4xbf16>, vector<4x64xbf16>, vector<16x64xf32> -> vector<16x64xf32>
    %290 = arith.addf %285, %289 : vector<16x64xf32>
    %c2_233 = arith.constant 2 : index
    %c0_234 = arith.constant 0 : index
    %c0_235 = arith.constant 0 : index
    %291 = vector.load %arg24[%c2_233, %c0_234, %c0_235] : memref<9x16x4xbf16, #tpu.memory_space<vmem>>, vector<1x16x4xbf16>
    %292 = vector.shape_cast %291 : vector<1x16x4xbf16> to vector<16x4xbf16>
    %293 = vector.extract_strided_slice %279 {offsets = [0, 128], sizes = [4, 64], strides = [1, 1]} : vector<4x576xbf16> to vector<4x64xbf16>
    %cst_236 = arith.constant dense<0.000000e+00> : vector<16x64xf32>
    %294 = tpu.matmul %292, %293, %cst_236 {dimension_numbers = #tpu.dot_dimension_numbers<[1], [0], [0], [1], [0, 0, 1, 1], [], []>} : vector<16x4xbf16>, vector<4x64xbf16>, vector<16x64xf32> -> vector<16x64xf32>
    %295 = arith.addf %290, %294 : vector<16x64xf32>
    %c3_237 = arith.constant 3 : index
    %c0_238 = arith.constant 0 : index
    %c0_239 = arith.constant 0 : index
    %296 = vector.load %arg24[%c3_237, %c0_238, %c0_239] : memref<9x16x4xbf16, #tpu.memory_space<vmem>>, vector<1x16x4xbf16>
    %297 = vector.shape_cast %296 : vector<1x16x4xbf16> to vector<16x4xbf16>
    %298 = vector.extract_strided_slice %279 {offsets = [0, 192], sizes = [4, 64], strides = [1, 1]} : vector<4x576xbf16> to vector<4x64xbf16>
    %cst_240 = arith.constant dense<0.000000e+00> : vector<16x64xf32>
    %299 = tpu.matmul %297, %298, %cst_240 {dimension_numbers = #tpu.dot_dimension_numbers<[1], [0], [0], [1], [0, 0, 1, 1], [], []>} : vector<16x4xbf16>, vector<4x64xbf16>, vector<16x64xf32> -> vector<16x64xf32>
    %300 = arith.addf %295, %299 : vector<16x64xf32>
    %c4_241 = arith.constant 4 : index
    %c0_242 = arith.constant 0 : index
    %c0_243 = arith.constant 0 : index
    %301 = vector.load %arg24[%c4_241, %c0_242, %c0_243] : memref<9x16x4xbf16, #tpu.memory_space<vmem>>, vector<1x16x4xbf16>
    %302 = vector.shape_cast %301 : vector<1x16x4xbf16> to vector<16x4xbf16>
    %303 = vector.extract_strided_slice %279 {offsets = [0, 256], sizes = [4, 64], strides = [1, 1]} : vector<4x576xbf16> to vector<4x64xbf16>
    %cst_244 = arith.constant dense<0.000000e+00> : vector<16x64xf32>
    %304 = tpu.matmul %302, %303, %cst_244 {dimension_numbers = #tpu.dot_dimension_numbers<[1], [0], [0], [1], [0, 0, 1, 1], [], []>} : vector<16x4xbf16>, vector<4x64xbf16>, vector<16x64xf32> -> vector<16x64xf32>
    %305 = arith.addf %300, %304 : vector<16x64xf32>
    %c5_245 = arith.constant 5 : index
    %c0_246 = arith.constant 0 : index
    %c0_247 = arith.constant 0 : index
    %306 = vector.load %arg24[%c5_245, %c0_246, %c0_247] : memref<9x16x4xbf16, #tpu.memory_space<vmem>>, vector<1x16x4xbf16>
    %307 = vector.shape_cast %306 : vector<1x16x4xbf16> to vector<16x4xbf16>
    %308 = vector.extract_strided_slice %279 {offsets = [0, 320], sizes = [4, 64], strides = [1, 1]} : vector<4x576xbf16> to vector<4x64xbf16>
    %cst_248 = arith.constant dense<0.000000e+00> : vector<16x64xf32>
    %309 = tpu.matmul %307, %308, %cst_248 {dimension_numbers = #tpu.dot_dimension_numbers<[1], [0], [0], [1], [0, 0, 1, 1], [], []>} : vector<16x4xbf16>, vector<4x64xbf16>, vector<16x64xf32> -> vector<16x64xf32>
    %310 = arith.addf %305, %309 : vector<16x64xf32>
    %c6_249 = arith.constant 6 : index
    %c0_250 = arith.constant 0 : index
    %c0_251 = arith.constant 0 : index
    %311 = vector.load %arg24[%c6_249, %c0_250, %c0_251] : memref<9x16x4xbf16, #tpu.memory_space<vmem>>, vector<1x16x4xbf16>
    %312 = vector.shape_cast %311 : vector<1x16x4xbf16> to vector<16x4xbf16>
    %313 = vector.extract_strided_slice %279 {offsets = [0, 384], sizes = [4, 64], strides = [1, 1]} : vector<4x576xbf16> to vector<4x64xbf16>
    %cst_252 = arith.constant dense<0.000000e+00> : vector<16x64xf32>
    %314 = tpu.matmul %312, %313, %cst_252 {dimension_numbers = #tpu.dot_dimension_numbers<[1], [0], [0], [1], [0, 0, 1, 1], [], []>} : vector<16x4xbf16>, vector<4x64xbf16>, vector<16x64xf32> -> vector<16x64xf32>
    %315 = arith.addf %310, %314 : vector<16x64xf32>
    %c7_253 = arith.constant 7 : index
    %c0_254 = arith.constant 0 : index
    %c0_255 = arith.constant 0 : index
    %316 = vector.load %arg24[%c7_253, %c0_254, %c0_255] : memref<9x16x4xbf16, #tpu.memory_space<vmem>>, vector<1x16x4xbf16>
    %317 = vector.shape_cast %316 : vector<1x16x4xbf16> to vector<16x4xbf16>
    %318 = vector.extract_strided_slice %279 {offsets = [0, 448], sizes = [4, 64], strides = [1, 1]} : vector<4x576xbf16> to vector<4x64xbf16>
    %cst_256 = arith.constant dense<0.000000e+00> : vector<16x64xf32>
    %319 = tpu.matmul %317, %318, %cst_256 {dimension_numbers = #tpu.dot_dimension_numbers<[1], [0], [0], [1], [0, 0, 1, 1], [], []>} : vector<16x4xbf16>, vector<4x64xbf16>, vector<16x64xf32> -> vector<16x64xf32>
    %320 = arith.addf %315, %319 : vector<16x64xf32>
    %c8_257 = arith.constant 8 : index
    %c0_258 = arith.constant 0 : index
    %c0_259 = arith.constant 0 : index
    %321 = vector.load %arg24[%c8_257, %c0_258, %c0_259] : memref<9x16x4xbf16, #tpu.memory_space<vmem>>, vector<1x16x4xbf16>
    %322 = vector.shape_cast %321 : vector<1x16x4xbf16> to vector<16x4xbf16>
    %323 = vector.extract_strided_slice %279 {offsets = [0, 512], sizes = [4, 64], strides = [1, 1]} : vector<4x576xbf16> to vector<4x64xbf16>
    %cst_260 = arith.constant dense<0.000000e+00> : vector<16x64xf32>
    %324 = tpu.matmul %322, %323, %cst_260 {dimension_numbers = #tpu.dot_dimension_numbers<[1], [0], [0], [1], [0, 0, 1, 1], [], []>} : vector<16x4xbf16>, vector<4x64xbf16>, vector<16x64xf32> -> vector<16x64xf32>
    %325 = arith.addf %320, %324 : vector<16x64xf32>
    %c0_261 = arith.constant 0 : index
    %c0_262 = arith.constant 0 : index
    %326 = vector.load %arg26[%c0_261, %c0_262] : memref<1x64xf32, #tpu.memory_space<vmem>>, vector<1x64xf32>
    %327 = vector.broadcast %326 : vector<1x64xf32> to vector<16x64xf32>
    %328 = arith.addf %325, %327 : vector<16x64xf32>
    %cst_263 = arith.constant 0.000000e+00 : f32
    %329 = vector.broadcast %cst_263 : f32 to vector<16x64xf32>
    %330 = arith.maximumf %328, %329 : vector<16x64xf32>
    %331 = arith.truncf %330 : vector<16x64xf32> to vector<16x64xbf16>
    %c0_264 = arith.constant 0 : index
    %c0_265 = arith.constant 0 : index
    %332 = vector.load %arg28[%c0_264, %c0_265] : memref<64x288xbf16, #tpu.memory_space<vmem>>, vector<64x288xbf16>
    %cst_266 = arith.constant dense<0.000000e+00> : vector<16x288xf32>
    %333 = tpu.matmul %331, %332, %cst_266 {dimension_numbers = #tpu.dot_dimension_numbers<[1], [0], [0], [1], [0, 0, 1, 1], [], []>} : vector<16x64xbf16>, vector<64x288xbf16>, vector<16x288xf32> -> vector<16x288xf32>
    %334 = arith.truncf %333 : vector<16x288xf32> to vector<16x288xbf16>
    %cst_267 = arith.constant 0.000000e+00 : f32
    %335 = vector.broadcast %cst_267 : f32 to vector<64x32xf32>
    %c0_268 = arith.constant 0 : index
    %c0_269 = arith.constant 0 : index
    %c0_270 = arith.constant 0 : index
    %336 = vector.load %arg27[%c0_268, %c0_269, %c0_270] : memref<9x64x16xbf16, #tpu.memory_space<vmem>>, vector<1x64x16xbf16>
    %337 = vector.shape_cast %336 : vector<1x64x16xbf16> to vector<64x16xbf16>
    %338 = vector.extract_strided_slice %334 {offsets = [0, 0], sizes = [16, 32], strides = [1, 1]} : vector<16x288xbf16> to vector<16x32xbf16>
    %cst_271 = arith.constant dense<0.000000e+00> : vector<64x32xf32>
    %339 = tpu.matmul %337, %338, %cst_271 {dimension_numbers = #tpu.dot_dimension_numbers<[1], [0], [0], [1], [0, 0, 1, 1], [], []>} : vector<64x16xbf16>, vector<16x32xbf16>, vector<64x32xf32> -> vector<64x32xf32>
    %340 = arith.addf %335, %339 : vector<64x32xf32>
    %c1_272 = arith.constant 1 : index
    %c0_273 = arith.constant 0 : index
    %c0_274 = arith.constant 0 : index
    %341 = vector.load %arg27[%c1_272, %c0_273, %c0_274] : memref<9x64x16xbf16, #tpu.memory_space<vmem>>, vector<1x64x16xbf16>
    %342 = vector.shape_cast %341 : vector<1x64x16xbf16> to vector<64x16xbf16>
    %343 = vector.extract_strided_slice %334 {offsets = [0, 32], sizes = [16, 32], strides = [1, 1]} : vector<16x288xbf16> to vector<16x32xbf16>
    %cst_275 = arith.constant dense<0.000000e+00> : vector<64x32xf32>
    %344 = tpu.matmul %342, %343, %cst_275 {dimension_numbers = #tpu.dot_dimension_numbers<[1], [0], [0], [1], [0, 0, 1, 1], [], []>} : vector<64x16xbf16>, vector<16x32xbf16>, vector<64x32xf32> -> vector<64x32xf32>
    %345 = arith.addf %340, %344 : vector<64x32xf32>
    %c2_276 = arith.constant 2 : index
    %c0_277 = arith.constant 0 : index
    %c0_278 = arith.constant 0 : index
    %346 = vector.load %arg27[%c2_276, %c0_277, %c0_278] : memref<9x64x16xbf16, #tpu.memory_space<vmem>>, vector<1x64x16xbf16>
    %347 = vector.shape_cast %346 : vector<1x64x16xbf16> to vector<64x16xbf16>
    %348 = vector.extract_strided_slice %334 {offsets = [0, 64], sizes = [16, 32], strides = [1, 1]} : vector<16x288xbf16> to vector<16x32xbf16>
    %cst_279 = arith.constant dense<0.000000e+00> : vector<64x32xf32>
    %349 = tpu.matmul %347, %348, %cst_279 {dimension_numbers = #tpu.dot_dimension_numbers<[1], [0], [0], [1], [0, 0, 1, 1], [], []>} : vector<64x16xbf16>, vector<16x32xbf16>, vector<64x32xf32> -> vector<64x32xf32>
    %350 = arith.addf %345, %349 : vector<64x32xf32>
    %c3_280 = arith.constant 3 : index
    %c0_281 = arith.constant 0 : index
    %c0_282 = arith.constant 0 : index
    %351 = vector.load %arg27[%c3_280, %c0_281, %c0_282] : memref<9x64x16xbf16, #tpu.memory_space<vmem>>, vector<1x64x16xbf16>
    %352 = vector.shape_cast %351 : vector<1x64x16xbf16> to vector<64x16xbf16>
    %353 = vector.extract_strided_slice %334 {offsets = [0, 96], sizes = [16, 32], strides = [1, 1]} : vector<16x288xbf16> to vector<16x32xbf16>
    %cst_283 = arith.constant dense<0.000000e+00> : vector<64x32xf32>
    %354 = tpu.matmul %352, %353, %cst_283 {dimension_numbers = #tpu.dot_dimension_numbers<[1], [0], [0], [1], [0, 0, 1, 1], [], []>} : vector<64x16xbf16>, vector<16x32xbf16>, vector<64x32xf32> -> vector<64x32xf32>
    %355 = arith.addf %350, %354 : vector<64x32xf32>
    %c4_284 = arith.constant 4 : index
    %c0_285 = arith.constant 0 : index
    %c0_286 = arith.constant 0 : index
    %356 = vector.load %arg27[%c4_284, %c0_285, %c0_286] : memref<9x64x16xbf16, #tpu.memory_space<vmem>>, vector<1x64x16xbf16>
    %357 = vector.shape_cast %356 : vector<1x64x16xbf16> to vector<64x16xbf16>
    %358 = vector.extract_strided_slice %334 {offsets = [0, 128], sizes = [16, 32], strides = [1, 1]} : vector<16x288xbf16> to vector<16x32xbf16>
    %cst_287 = arith.constant dense<0.000000e+00> : vector<64x32xf32>
    %359 = tpu.matmul %357, %358, %cst_287 {dimension_numbers = #tpu.dot_dimension_numbers<[1], [0], [0], [1], [0, 0, 1, 1], [], []>} : vector<64x16xbf16>, vector<16x32xbf16>, vector<64x32xf32> -> vector<64x32xf32>
    %360 = arith.addf %355, %359 : vector<64x32xf32>
    %c5_288 = arith.constant 5 : index
    %c0_289 = arith.constant 0 : index
    %c0_290 = arith.constant 0 : index
    %361 = vector.load %arg27[%c5_288, %c0_289, %c0_290] : memref<9x64x16xbf16, #tpu.memory_space<vmem>>, vector<1x64x16xbf16>
    %362 = vector.shape_cast %361 : vector<1x64x16xbf16> to vector<64x16xbf16>
    %363 = vector.extract_strided_slice %334 {offsets = [0, 160], sizes = [16, 32], strides = [1, 1]} : vector<16x288xbf16> to vector<16x32xbf16>
    %cst_291 = arith.constant dense<0.000000e+00> : vector<64x32xf32>
    %364 = tpu.matmul %362, %363, %cst_291 {dimension_numbers = #tpu.dot_dimension_numbers<[1], [0], [0], [1], [0, 0, 1, 1], [], []>} : vector<64x16xbf16>, vector<16x32xbf16>, vector<64x32xf32> -> vector<64x32xf32>
    %365 = arith.addf %360, %364 : vector<64x32xf32>
    %c6_292 = arith.constant 6 : index
    %c0_293 = arith.constant 0 : index
    %c0_294 = arith.constant 0 : index
    %366 = vector.load %arg27[%c6_292, %c0_293, %c0_294] : memref<9x64x16xbf16, #tpu.memory_space<vmem>>, vector<1x64x16xbf16>
    %367 = vector.shape_cast %366 : vector<1x64x16xbf16> to vector<64x16xbf16>
    %368 = vector.extract_strided_slice %334 {offsets = [0, 192], sizes = [16, 32], strides = [1, 1]} : vector<16x288xbf16> to vector<16x32xbf16>
    %cst_295 = arith.constant dense<0.000000e+00> : vector<64x32xf32>
    %369 = tpu.matmul %367, %368, %cst_295 {dimension_numbers = #tpu.dot_dimension_numbers<[1], [0], [0], [1], [0, 0, 1, 1], [], []>} : vector<64x16xbf16>, vector<16x32xbf16>, vector<64x32xf32> -> vector<64x32xf32>
    %370 = arith.addf %365, %369 : vector<64x32xf32>
    %c7_296 = arith.constant 7 : index
    %c0_297 = arith.constant 0 : index
    %c0_298 = arith.constant 0 : index
    %371 = vector.load %arg27[%c7_296, %c0_297, %c0_298] : memref<9x64x16xbf16, #tpu.memory_space<vmem>>, vector<1x64x16xbf16>
    %372 = vector.shape_cast %371 : vector<1x64x16xbf16> to vector<64x16xbf16>
    %373 = vector.extract_strided_slice %334 {offsets = [0, 224], sizes = [16, 32], strides = [1, 1]} : vector<16x288xbf16> to vector<16x32xbf16>
    %cst_299 = arith.constant dense<0.000000e+00> : vector<64x32xf32>
    %374 = tpu.matmul %372, %373, %cst_299 {dimension_numbers = #tpu.dot_dimension_numbers<[1], [0], [0], [1], [0, 0, 1, 1], [], []>} : vector<64x16xbf16>, vector<16x32xbf16>, vector<64x32xf32> -> vector<64x32xf32>
    %375 = arith.addf %370, %374 : vector<64x32xf32>
    %c8_300 = arith.constant 8 : index
    %c0_301 = arith.constant 0 : index
    %c0_302 = arith.constant 0 : index
    %376 = vector.load %arg27[%c8_300, %c0_301, %c0_302] : memref<9x64x16xbf16, #tpu.memory_space<vmem>>, vector<1x64x16xbf16>
    %377 = vector.shape_cast %376 : vector<1x64x16xbf16> to vector<64x16xbf16>
    %378 = vector.extract_strided_slice %334 {offsets = [0, 256], sizes = [16, 32], strides = [1, 1]} : vector<16x288xbf16> to vector<16x32xbf16>
    %cst_303 = arith.constant dense<0.000000e+00> : vector<64x32xf32>
    %379 = tpu.matmul %377, %378, %cst_303 {dimension_numbers = #tpu.dot_dimension_numbers<[1], [0], [0], [1], [0, 0, 1, 1], [], []>} : vector<64x16xbf16>, vector<16x32xbf16>, vector<64x32xf32> -> vector<64x32xf32>
    %380 = arith.addf %375, %379 : vector<64x32xf32>
    %c0_304 = arith.constant 0 : index
    %c0_305 = arith.constant 0 : index
    %381 = vector.load %arg29[%c0_304, %c0_305] : memref<1x32xf32, #tpu.memory_space<vmem>>, vector<1x32xf32>
    %382 = vector.broadcast %381 : vector<1x32xf32> to vector<64x32xf32>
    %383 = arith.addf %380, %382 : vector<64x32xf32>
    %cst_306 = arith.constant 0.000000e+00 : f32
    %384 = vector.broadcast %cst_306 : f32 to vector<64x32xf32>
    %385 = arith.maximumf %383, %384 : vector<64x32xf32>
    %386 = tpu.transpose %385, [1, 0] : vector<64x32xf32> -> vector<32x64xf32>
    %387 = arith.truncf %386 : vector<32x64xf32> to vector<32x64xbf16>
    %c0_307 = arith.constant 0 : index
    %c0_308 = arith.constant 0 : index
    %c0_309 = arith.constant 0 : index
    %388 = vector.load %arg31[%c0_307, %c0_308, %c0_309] : memref<9x4x32xbf16, #tpu.memory_space<vmem>>, vector<1x4x32xbf16>
    %389 = vector.shape_cast %388 : vector<1x4x32xbf16> to vector<4x32xbf16>
    %cst_310 = arith.constant dense<0.000000e+00> : vector<4x64xf32>
    %390 = tpu.matmul %389, %387, %cst_310 {dimension_numbers = #tpu.dot_dimension_numbers<[1], [0], [0], [1], [0, 0, 1, 1], [], []>} : vector<4x32xbf16>, vector<32x64xbf16>, vector<4x64xf32> -> vector<4x64xf32>
    %c1_311 = arith.constant 1 : index
    %c0_312 = arith.constant 0 : index
    %c0_313 = arith.constant 0 : index
    %391 = vector.load %arg31[%c1_311, %c0_312, %c0_313] : memref<9x4x32xbf16, #tpu.memory_space<vmem>>, vector<1x4x32xbf16>
    %392 = vector.shape_cast %391 : vector<1x4x32xbf16> to vector<4x32xbf16>
    %cst_314 = arith.constant dense<0.000000e+00> : vector<4x64xf32>
    %393 = tpu.matmul %392, %387, %cst_314 {dimension_numbers = #tpu.dot_dimension_numbers<[1], [0], [0], [1], [0, 0, 1, 1], [], []>} : vector<4x32xbf16>, vector<32x64xbf16>, vector<4x64xf32> -> vector<4x64xf32>
    %c2_315 = arith.constant 2 : index
    %c0_316 = arith.constant 0 : index
    %c0_317 = arith.constant 0 : index
    %394 = vector.load %arg31[%c2_315, %c0_316, %c0_317] : memref<9x4x32xbf16, #tpu.memory_space<vmem>>, vector<1x4x32xbf16>
    %395 = vector.shape_cast %394 : vector<1x4x32xbf16> to vector<4x32xbf16>
    %cst_318 = arith.constant dense<0.000000e+00> : vector<4x64xf32>
    %396 = tpu.matmul %395, %387, %cst_318 {dimension_numbers = #tpu.dot_dimension_numbers<[1], [0], [0], [1], [0, 0, 1, 1], [], []>} : vector<4x32xbf16>, vector<32x64xbf16>, vector<4x64xf32> -> vector<4x64xf32>
    %c3_319 = arith.constant 3 : index
    %c0_320 = arith.constant 0 : index
    %c0_321 = arith.constant 0 : index
    %397 = vector.load %arg31[%c3_319, %c0_320, %c0_321] : memref<9x4x32xbf16, #tpu.memory_space<vmem>>, vector<1x4x32xbf16>
    %398 = vector.shape_cast %397 : vector<1x4x32xbf16> to vector<4x32xbf16>
    %cst_322 = arith.constant dense<0.000000e+00> : vector<4x64xf32>
    %399 = tpu.matmul %398, %387, %cst_322 {dimension_numbers = #tpu.dot_dimension_numbers<[1], [0], [0], [1], [0, 0, 1, 1], [], []>} : vector<4x32xbf16>, vector<32x64xbf16>, vector<4x64xf32> -> vector<4x64xf32>
    %c4_323 = arith.constant 4 : index
    %c0_324 = arith.constant 0 : index
    %c0_325 = arith.constant 0 : index
    %400 = vector.load %arg31[%c4_323, %c0_324, %c0_325] : memref<9x4x32xbf16, #tpu.memory_space<vmem>>, vector<1x4x32xbf16>
    %401 = vector.shape_cast %400 : vector<1x4x32xbf16> to vector<4x32xbf16>
    %cst_326 = arith.constant dense<0.000000e+00> : vector<4x64xf32>
    %402 = tpu.matmul %401, %387, %cst_326 {dimension_numbers = #tpu.dot_dimension_numbers<[1], [0], [0], [1], [0, 0, 1, 1], [], []>} : vector<4x32xbf16>, vector<32x64xbf16>, vector<4x64xf32> -> vector<4x64xf32>
    %c5_327 = arith.constant 5 : index
    %c0_328 = arith.constant 0 : index
    %c0_329 = arith.constant 0 : index
    %403 = vector.load %arg31[%c5_327, %c0_328, %c0_329] : memref<9x4x32xbf16, #tpu.memory_space<vmem>>, vector<1x4x32xbf16>
    %404 = vector.shape_cast %403 : vector<1x4x32xbf16> to vector<4x32xbf16>
    %cst_330 = arith.constant dense<0.000000e+00> : vector<4x64xf32>
    %405 = tpu.matmul %404, %387, %cst_330 {dimension_numbers = #tpu.dot_dimension_numbers<[1], [0], [0], [1], [0, 0, 1, 1], [], []>} : vector<4x32xbf16>, vector<32x64xbf16>, vector<4x64xf32> -> vector<4x64xf32>
    %c6_331 = arith.constant 6 : index
    %c0_332 = arith.constant 0 : index
    %c0_333 = arith.constant 0 : index
    %406 = vector.load %arg31[%c6_331, %c0_332, %c0_333] : memref<9x4x32xbf16, #tpu.memory_space<vmem>>, vector<1x4x32xbf16>
    %407 = vector.shape_cast %406 : vector<1x4x32xbf16> to vector<4x32xbf16>
    %cst_334 = arith.constant dense<0.000000e+00> : vector<4x64xf32>
    %408 = tpu.matmul %407, %387, %cst_334 {dimension_numbers = #tpu.dot_dimension_numbers<[1], [0], [0], [1], [0, 0, 1, 1], [], []>} : vector<4x32xbf16>, vector<32x64xbf16>, vector<4x64xf32> -> vector<4x64xf32>
    %c7_335 = arith.constant 7 : index
    %c0_336 = arith.constant 0 : index
    %c0_337 = arith.constant 0 : index
    %409 = vector.load %arg31[%c7_335, %c0_336, %c0_337] : memref<9x4x32xbf16, #tpu.memory_space<vmem>>, vector<1x4x32xbf16>
    %410 = vector.shape_cast %409 : vector<1x4x32xbf16> to vector<4x32xbf16>
    %cst_338 = arith.constant dense<0.000000e+00> : vector<4x64xf32>
    %411 = tpu.matmul %410, %387, %cst_338 {dimension_numbers = #tpu.dot_dimension_numbers<[1], [0], [0], [1], [0, 0, 1, 1], [], []>} : vector<4x32xbf16>, vector<32x64xbf16>, vector<4x64xf32> -> vector<4x64xf32>
    %c8_339 = arith.constant 8 : index
    %c0_340 = arith.constant 0 : index
    %c0_341 = arith.constant 0 : index
    %412 = vector.load %arg31[%c8_339, %c0_340, %c0_341] : memref<9x4x32xbf16, #tpu.memory_space<vmem>>, vector<1x4x32xbf16>
    %413 = vector.shape_cast %412 : vector<1x4x32xbf16> to vector<4x32xbf16>
    %cst_342 = arith.constant dense<0.000000e+00> : vector<4x64xf32>
    %414 = tpu.matmul %413, %387, %cst_342 {dimension_numbers = #tpu.dot_dimension_numbers<[1], [0], [0], [1], [0, 0, 1, 1], [], []>} : vector<4x32xbf16>, vector<32x64xbf16>, vector<4x64xf32> -> vector<4x64xf32>
    %415 = tpu.concatenate %390, %393, %396, %399, %402, %405, %408, %411, %414 in 1 : vector<4x64xf32>, vector<4x64xf32>, vector<4x64xf32>, vector<4x64xf32>, vector<4x64xf32>, vector<4x64xf32>, vector<4x64xf32>, vector<4x64xf32>, vector<4x64xf32> -> vector<4x576xf32>
    %416 = arith.truncf %415 : vector<4x576xf32> to vector<4x576xbf16>
    %c0_343 = arith.constant 0 : index
    %c0_344 = arith.constant 0 : index
    %417 = vector.load %arg30[%c0_343, %c0_344] : memref<576x256xbf16, #tpu.memory_space<vmem>>, vector<576x256xbf16>
    %cst_345 = arith.constant dense<0.000000e+00> : vector<4x256xf32>
    %418 = tpu.matmul %416, %417, %cst_345 {dimension_numbers = #tpu.dot_dimension_numbers<[1], [0], [0], [1], [0, 0, 1, 1], [], []>} : vector<4x576xbf16>, vector<576x256xbf16>, vector<4x256xf32> -> vector<4x256xf32>
    %c0_346 = arith.constant 0 : index
    %c0_347 = arith.constant 0 : index
    %419 = vector.load %arg32[%c0_346, %c0_347] : memref<4x1xf32, #tpu.memory_space<vmem>>, vector<4x1xf32>
    %420 = vector.broadcast %419 : vector<4x1xf32> to vector<4x256xf32>
    %421 = arith.addf %418, %420 : vector<4x256xf32>
    %422 = math.tanh %421 : vector<4x256xf32>
    %c0_348 = arith.constant 0 : index
    %c0_349 = arith.constant 0 : index
    %c0_350 = arith.constant 0 : index
    %423 = vector.load %arg33[%c0_348, %c0_349, %c0_350] : memref<1x4x256xf32, #tpu.memory_space<vmem>>, vector<1x4x256xf32>
    %424 = vector.shape_cast %423 : vector<1x4x256xf32> to vector<4x256xf32>
    %425 = vector.shape_cast %422 : vector<4x256xf32> to vector<1x4x256xf32>
    tpu.vector_store %arg33[%c0_348, %c0_349, %c0_350], %425 {strides = array<i32>} : memref<1x4x256xf32, #tpu.memory_space<vmem>>, vector<1x4x256xf32>,
    return
  }
  func.func @transform_0(%arg0: i32) -> (i32, i32, i32) {
    %c0_i32 = arith.constant 0 : i32
    %c0_i32_0 = arith.constant 0 : i32
    %c0_i32_1 = arith.constant 0 : i32
    return %arg0, %c0_i32, %c0_i32_0 : i32, i32, i32
  }
  func.func @transform_1(%arg0: i32) -> (i32, i32, i32) {
    %c0_i32 = arith.constant 0 : i32
    %c0_i32_0 = arith.constant 0 : i32
    %c0_i32_1 = arith.constant 0 : i32
    return %arg0, %c0_i32, %c0_i32_0 : i32, i32, i32
  }
  func.func @transform_2(%arg0: i32) -> (i32, i32) {
    %c0_i32 = arith.constant 0 : i32
    %c0_i32_0 = arith.constant 0 : i32
    %c0_i32_1 = arith.constant 0 : i32
    return %c0_i32, %c0_i32_0 : i32, i32
  }
  func.func @transform_3(%arg0: i32) -> (i32, i32, i32) {
    %c0_i32 = arith.constant 0 : i32
    %c0_i32_0 = arith.constant 0 : i32
    %c0_i32_1 = arith.constant 0 : i32
    %c0_i32_2 = arith.constant 0 : i32
    return %c0_i32, %c0_i32_0, %c0_i32_1 : i32, i32, i32
  }
  func.func @transform_4(%arg0: i32) -> (i32, i32) {
    %c0_i32 = arith.constant 0 : i32
    %c0_i32_0 = arith.constant 0 : i32
    %c0_i32_1 = arith.constant 0 : i32
    return %c0_i32, %c0_i32_0 : i32, i32
  }
  func.func @transform_5(%arg0: i32) -> (i32, i32, i32) {
    %c0_i32 = arith.constant 0 : i32
    %c0_i32_0 = arith.constant 0 : i32
    %c0_i32_1 = arith.constant 0 : i32
    %c0_i32_2 = arith.constant 0 : i32
    return %c0_i32, %c0_i32_0, %c0_i32_1 : i32, i32, i32
  }
  func.func @transform_6(%arg0: i32) -> (i32, i32) {
    %c0_i32 = arith.constant 0 : i32
    %c0_i32_0 = arith.constant 0 : i32
    %c0_i32_1 = arith.constant 0 : i32
    return %c0_i32, %c0_i32_0 : i32, i32
  }
  func.func @transform_7(%arg0: i32) -> (i32, i32) {
    %c0_i32 = arith.constant 0 : i32
    %c0_i32_0 = arith.constant 0 : i32
    %c0_i32_1 = arith.constant 0 : i32
    return %c0_i32, %c0_i32_0 : i32, i32
  }
  func.func @transform_8(%arg0: i32) -> (i32, i32, i32) {
    %c0_i32 = arith.constant 0 : i32
    %c0_i32_0 = arith.constant 0 : i32
    %c0_i32_1 = arith.constant 0 : i32
    %c0_i32_2 = arith.constant 0 : i32
    return %c0_i32, %c0_i32_0, %c0_i32_1 : i32, i32, i32
  }
  func.func @transform_9(%arg0: i32) -> (i32, i32) {
    %c0_i32 = arith.constant 0 : i32
    %c0_i32_0 = arith.constant 0 : i32
    %c0_i32_1 = arith.constant 0 : i32
    return %c0_i32, %c0_i32_0 : i32, i32
  }
  func.func @transform_10(%arg0: i32) -> (i32, i32) {
    %c0_i32 = arith.constant 0 : i32
    %c0_i32_0 = arith.constant 0 : i32
    %c0_i32_1 = arith.constant 0 : i32
    return %c0_i32, %c0_i32_0 : i32, i32
  }
  func.func @transform_11(%arg0: i32) -> (i32, i32, i32) {
    %c0_i32 = arith.constant 0 : i32
    %c0_i32_0 = arith.constant 0 : i32
    %c0_i32_1 = arith.constant 0 : i32
    %c0_i32_2 = arith.constant 0 : i32
    return %c0_i32, %c0_i32_0, %c0_i32_1 : i32, i32, i32
  }
  func.func @transform_12(%arg0: i32) -> (i32, i32) {
    %c0_i32 = arith.constant 0 : i32
    %c0_i32_0 = arith.constant 0 : i32
    %c0_i32_1 = arith.constant 0 : i32
    return %c0_i32, %c0_i32_0 : i32, i32
  }
  func.func @transform_13(%arg0: i32) -> (i32, i32) {
    %c0_i32 = arith.constant 0 : i32
    %c0_i32_0 = arith.constant 0 : i32
    %c0_i32_1 = arith.constant 0 : i32
    return %c0_i32, %c0_i32_0 : i32, i32
  }
  func.func @transform_14(%arg0: i32) -> (i32, i32) {
    %c0_i32 = arith.constant 0 : i32
    %c0_i32_0 = arith.constant 0 : i32
    %c0_i32_1 = arith.constant 0 : i32
    return %c0_i32, %c0_i32_0 : i32, i32
  }
  func.func @transform_15(%arg0: i32) -> (i32, i32) {
    %c0_i32 = arith.constant 0 : i32
    %c0_i32_0 = arith.constant 0 : i32
    %c0_i32_1 = arith.constant 0 : i32
    return %c0_i32, %c0_i32_0 : i32, i32
  }
  func.func @transform_16(%arg0: i32) -> (i32, i32) {
    %c0_i32 = arith.constant 0 : i32
    %c0_i32_0 = arith.constant 0 : i32
    %c0_i32_1 = arith.constant 0 : i32
    return %c0_i32, %c0_i32_0 : i32, i32
  }
  func.func @transform_17(%arg0: i32) -> (i32, i32) {
    %c0_i32 = arith.constant 0 : i32
    %c0_i32_0 = arith.constant 0 : i32
    %c0_i32_1 = arith.constant 0 : i32
    return %c0_i32, %c0_i32_0 : i32, i32
  }
  func.func @transform_18(%arg0: i32) -> (i32, i32) {
    %c0_i32 = arith.constant 0 : i32
    %c0_i32_0 = arith.constant 0 : i32
    %c0_i32_1 = arith.constant 0 : i32
    return %c0_i32, %c0_i32_0 : i32, i32
  }
  func.func @transform_19(%arg0: i32) -> (i32, i32) {
    %c0_i32 = arith.constant 0 : i32
    %c0_i32_0 = arith.constant 0 : i32
    %c0_i32_1 = arith.constant 0 : i32
    return %c0_i32, %c0_i32_0 : i32, i32
  }
  func.func @transform_20(%arg0: i32) -> (i32, i32, i32) {
    %c0_i32 = arith.constant 0 : i32
    %c0_i32_0 = arith.constant 0 : i32
    %c0_i32_1 = arith.constant 0 : i32
    %c0_i32_2 = arith.constant 0 : i32
    return %c0_i32, %c0_i32_0, %c0_i32_1 : i32, i32, i32
  }
  func.func @transform_21(%arg0: i32) -> (i32, i32) {
    %c0_i32 = arith.constant 0 : i32
    %c0_i32_0 = arith.constant 0 : i32
    %c0_i32_1 = arith.constant 0 : i32
    return %c0_i32, %c0_i32_0 : i32, i32
  }
  func.func @transform_22(%arg0: i32) -> (i32, i32) {
    %c0_i32 = arith.constant 0 : i32
    %c0_i32_0 = arith.constant 0 : i32
    %c0_i32_1 = arith.constant 0 : i32
    return %c0_i32, %c0_i32_0 : i32, i32
  }
  func.func @transform_23(%arg0: i32) -> (i32, i32, i32) {
    %c0_i32 = arith.constant 0 : i32
    %c0_i32_0 = arith.constant 0 : i32
    %c0_i32_1 = arith.constant 0 : i32
    %c0_i32_2 = arith.constant 0 : i32
    return %c0_i32, %c0_i32_0, %c0_i32_1 : i32, i32, i32
  }
  func.func @transform_24(%arg0: i32) -> (i32, i32) {
    %c0_i32 = arith.constant 0 : i32
    %c0_i32_0 = arith.constant 0 : i32
    %c0_i32_1 = arith.constant 0 : i32
    return %c0_i32, %c0_i32_0 : i32, i32
  }
  func.func @transform_25(%arg0: i32) -> (i32, i32) {
    %c0_i32 = arith.constant 0 : i32
    %c0_i32_0 = arith.constant 0 : i32
    %c0_i32_1 = arith.constant 0 : i32
    return %c0_i32, %c0_i32_0 : i32, i32
  }
  func.func @transform_26(%arg0: i32) -> (i32, i32, i32) {
    %c0_i32 = arith.constant 0 : i32
    %c0_i32_0 = arith.constant 0 : i32
    %c0_i32_1 = arith.constant 0 : i32
    %c0_i32_2 = arith.constant 0 : i32
    return %c0_i32, %c0_i32_0, %c0_i32_1 : i32, i32, i32
  }
  func.func @transform_27(%arg0: i32) -> (i32, i32) {
    %c0_i32 = arith.constant 0 : i32
    %c0_i32_0 = arith.constant 0 : i32
    %c0_i32_1 = arith.constant 0 : i32
    return %c0_i32, %c0_i32_0 : i32, i32
  }
  func.func @transform_28(%arg0: i32) -> (i32, i32) {
    %c0_i32 = arith.constant 0 : i32
    %c0_i32_0 = arith.constant 0 : i32
    %c0_i32_1 = arith.constant 0 : i32
    return %c0_i32, %c0_i32_0 : i32, i32
  }
  func.func @transform_29(%arg0: i32) -> (i32, i32) {
    %c0_i32 = arith.constant 0 : i32
    %c0_i32_0 = arith.constant 0 : i32
    %c0_i32_1 = arith.constant 0 : i32
    return %c0_i32, %c0_i32_0 : i32, i32
  }
  func.func @transform_30(%arg0: i32) -> (i32, i32, i32) {
    %c0_i32 = arith.constant 0 : i32
    %c0_i32_0 = arith.constant 0 : i32
    %c0_i32_1 = arith.constant 0 : i32
    %c0_i32_2 = arith.constant 0 : i32
    return %c0_i32, %c0_i32_0, %c0_i32_1 : i32, i32, i32
  }
  func.func @transform_31(%arg0: i32) -> (i32, i32) {
    %c0_i32 = arith.constant 0 : i32
    %c0_i32_0 = arith.constant 0 : i32
    %c0_i32_1 = arith.constant 0 : i32
    return %c0_i32, %c0_i32_0 : i32, i32
  }
  func.func @transform_32(%arg0: i32) -> (i32, i32, i32) {
    %c0_i32 = arith.constant 0 : i32
    %c0_i32_0 = arith.constant 0 : i32
    %c0_i32_1 = arith.constant 0 : i32
    return %arg0, %c0_i32, %c0_i32_0 : i32, i32, i32
  }
  func.func @transform_33(%arg0: i32) -> (i32, i32, i32) {
    %c0_i32 = arith.constant 0 : i32
    %c0_i32_0 = arith.constant 0 : i32
    %c0_i32_1 = arith.constant 0 : i32
    return %arg0, %c0_i32, %c0_i32_0 : i32, i32, i32
  }
  func.func @transform_34(%arg0: i32) -> (i32, i32, i32) {
    %c0_i32 = arith.constant 0 : i32
    %c0_i32_0 = arith.constant 0 : i32
    %c0_i32_1 = arith.constant 0 : i32
    return %arg0, %c0_i32, %c0_i32_0 : i32, i32, i32
  }
}

</mosaic_0001>

<bundles_post_ra>
// kernel: vae_forward.1
= control target key start
LH: loop header
LB: loop body
LE: loop exit
PB: predicated region body
PF: predicated region fallthrough
CT: control target
= control target key end

     0   :  { %s12626_s6 = smov 1   ;;  %s12627_s10 = smov 2   ;;  %s14182_s0 = inlined_call_operand.smem [shape: u32[35], index: -1, kind: input, shape index: {}] }
   0x1   :  { %s12679_s5 = sld [smem:[%s14182_s0]]   ;;  %s12628_s14 = smov 3  }
   0x2   :  { %s12684_s9 = sld [smem:[%s14182_s0 + %s12626_s6]]   ;;  %s12629_s18 = smov 4  }
   0x3   :  { %s12689_s13 = sld [smem:[%s14182_s0 + %s12627_s10]]   ;;  %s12630_s22 = smov 5  }
   0x4   :  { %s12694_s17 = sld [smem:[%s14182_s0 + %s12628_s14]]   ;;  %s12631_s26 = smov 6  }
   0x5   :  { %s12699_s21 = sld [smem:[%s14182_s0 + %s12629_s18]]   ;;  %s12632_s30 = smov 7  }
   0x6   :  { %s12704_s25 = sld [smem:[%s14182_s0 + %s12630_s22]]   ;;  %s12633_s4 = smov 8  }
   0x7   :  { %14214 = sst [smem:[#allocation14_spill]] %s12679_s5  ;;  %s12634_s10 = smov 9  }
   0x8   :  { %14215 = sst [smem:[#allocation15_spill]] %s12684_s9  ;;  %s12635_s15 = smov 10  }
   0x9   :  { %s12709_s29 = sld [smem:[%s14182_s0 + %s12631_s26]]   ;;  %s12636_s20 = smov 11  }
   0xa   :  { %s12714_s3 = sld [smem:[%s14182_s0 + %s12632_s30]]   ;;  %s12637_s26 = smov 12  }
   0xb   :  { %s12719_s8 = sld [smem:[%s14182_s0 + %s12633_s4]]   ;;  %s12638_s1 = smov 13  }
   0xc   :  { %s12724_s14 = sld [smem:[%s14182_s0 + %s12634_s10]]   ;;  %s12639_s7 = smov 14  }
   0xd   :  { %s12729_s19 = sld [smem:[%s14182_s0 + %s12635_s15]]   ;;  %s12640_s15 = smov 15  }
   0xe   :  { %s12734_s24 = sld [smem:[%s14182_s0 + %s12636_s20]]   ;;  %s12641_s22 = smov 16  }
   0xf   :  { %s12739_s30 = sld [smem:[%s14182_s0 + %s12637_s26]]   ;;  %s12642_s28 = smov 17  }
  0x10   :  { %14216 = sst [smem:[#allocation16_spill]] %s12714_s3 }
  0x11   :  { %14217 = sst [smem:[#allocation17_spill]] %s12719_s8 }
  0x12   :  { %s12744_s6 = sld [smem:[%s14182_s0 + %s12638_s1]]  }
  0x13   :  { %s12749_s12 = sld [smem:[%s14182_s0 + %s12639_s7]]   ;;  %s12643_s7 = smov 18  }
  0x14   :  { %s12754_s20 = sld [smem:[%s14182_s0 + %s12640_s15]]   ;;  %s12644_s15 = smov 19  }
  0x15   :  { %14218 = sst [smem:[#allocation18_spill]] %s12739_s30 }
  0x16   :  { %s12759_s27 = sld [smem:[%s14182_s0 + %s12641_s22]]   ;;  %s12645_s22 = smov 20  }
  0x17   :  { %s12764_s4 = sld [smem:[%s14182_s0 + %s12642_s28]]   ;;  %s12646_s28 = smov 21  }
  0x18   :  { %14219 = sst [smem:[#allocation19_spill]] %s12744_s6 }
  0x19   :  { %14220 = sst [smem:[#allocation20_spill]] %s12749_s12 }
  0x1a   :  { %14221 = sst [smem:[#allocation21_spill]] %s12754_s20 }
  0x1b   :  { %s12769_s9 = sld [smem:[%s14182_s0 + %s12643_s7]]   ;;  %s12647_s7 = smov 22  }
  0x1c   :  { %14222 = sst [smem:[#allocation22_spill]] %s12759_s27 }
  0x1d   :  { %14223 = sst [smem:[#allocation23_spill]] %s12764_s4 }
  0x1e   :  { %s12774_s20 = sld [smem:[%s14182_s0 + %s12644_s15]]   ;;  %s12648_s15 = smov 23  }
  0x1f   :  { %s12779_s6 = sld [smem:[%s14182_s0 + %s12645_s22]]   ;;  %s12649_s22 = smov 24  }
  0x20   :  { %s12784_s4 = sld [smem:[%s14182_s0 + %s12646_s28]]   ;;  %s12650_s28 = smov 25  }
  0x21   :  { %14224 = sst [smem:[#allocation24_spill]] %s12769_s9 }
  0x22   :  { %s12789_s9 = sld [smem:[%s14182_s0 + %s12647_s7]]   ;;  %s12651_s7 = smov 26  }
  0x23   :  { %s12799_s27 = sld [smem:[%s14182_s0 + %s12649_s22]]   ;;  %s12653_s22 = smov 28  }
  0x24   :  { %14225 = sst [smem:[#allocation25_spill]] %s12774_s20 }
  0x25   :  { %14226 = sst [smem:[#allocation26_spill]] %s12779_s6 }
  0x26   :  { %14227 = sst [smem:[#allocation27_spill]] %s12784_s4 }
  0x27   :  { %s12794_s20 = sld [smem:[%s14182_s0 + %s12648_s15]]   ;;  %s12652_s15 = smov 27  }
  0x28   :  { %14228 = sst [smem:[#allocation28_spill]] %s12789_s9 }
  0x29   :  { %14230 = sst [smem:[#allocation30_spill]] %s12799_s27 }
  0x2a   :  { %s12804_s12 = sld [smem:[%s14182_s0 + %s12650_s28]]   ;;  %s12654_s28 = smov 29  }
  0x2b   :  { %s12809_s9 = sld [smem:[%s14182_s0 + %s12651_s7]]   ;;  %s12655_s7 = smov 30  }
  0x2c   :  { %s12819_s27 = sld [smem:[%s14182_s0 + %s12653_s22]]   ;;  %s12657_s22 = smov 32  }
  0x2d   :  { %14229 = sst [smem:[#allocation29_spill]] %s12794_s20 }
  0x2e   :  { %s12814_s20 = sld [smem:[%s14182_s0 + %s12652_s15]]   ;;  %s12656_s15 = smov 31  }
  0x30   :  { %14231 = sst [smem:[#allocation31_spill]] %s12804_s12 }
  0x31   :  { %14232 = sst [smem:[#allocation32_spill]] %s12809_s9 }
  0x32   :  { %14234 = sst [smem:[#allocation34_spill]] %s12819_s27 }
  0x33   :  { %s12824_s12 = sld [smem:[%s14182_s0 + %s12654_s28]]   ;;  %s12658_s28 = smov 33  }
  0x34   :  { %14233 = sst [smem:[#allocation33_spill]] %s12814_s20 }
  0x35   :  { %s12829_s9 = sld [smem:[%s14182_s0 + %s12655_s7]]   ;;  %s12659_s7 = smov 34  }
  0x36   :  { %s12834_s20 = sld [smem:[%s14182_s0 + %s12656_s15]]  }
  0x37   :  { %s12839_s27 = sld [smem:[%s14182_s0 + %s12657_s22]]  }
  0x38   :  { %s12844_s30 = sld [smem:[%s14182_s0 + %s12658_s28]]  }
  0x3b   :  { %14235 = sst [smem:[#allocation35_spill]] %s12829_s9 }
  0x3c   :  { %s12849_s9 = sld [smem:[%s14182_s0 + %s12659_s7]]  }
  0x3d   :  { %14236 = sst [smem:[#allocation36_spill]] %s12839_s27 }
  0x3e   :  { %14237 = sst [smem:[#allocation37_spill]] %s12844_s30 }
  0x42   :  { %14238 = sst [smem:[#allocation38_spill]] %s12849_s9 }
  0x43   :  { %75 = vsyncpa [#allocation3], 0 }
  0x44   :  { %76 = vsyncpa [#allocation6], 0 }
  0x45   :  { %77 = vsyncpa [#allocation4], 0 }
  0x46   :  { %79 = vsyncpa [#allocation4 + $0x1], 0 }
  0x47   :  { %80 = vsyncpa [#allocation9], 0 }
  0x48   :  { %82 = vsyncpa [#allocation9 + $0x1], 0  ;;  %s12851_s15 = smov 0   ;;  %s12853_s16 = smov 0  }
  0x49   :  { %s12855_s18 = smov 0   ;;  %s12857_s22 = smov 0  }
  0x4a LB: > { %s14239_s8 = sld [smem:[#allocation17_spill]]  ;;  %s12872_s0 = sadd.s32 4294967295, %s12624_s22   ;;  %s12620_s18 = sphi %s12855_s18, %s14288_s18   ;;  %s12616_s16 = sphi %s12853_s16, %s14290_s16   ;;  %s12612_s15 = sphi %s12851_s15, %s14289_s15   ;;  %s12624_s22 = sphi %s12857_s22, %s14286_s22  }
  0x4b   : > { %s14240_s6 = sld [smem:[#allocation26_spill]]  ;;  %s8730_s23 = sadd.s32 4294967294, %s12624_s22  }
  0x4c   : > { %s14241_s4 = sld [smem:[#allocation27_spill]]  ;;  %s12876_s26 = sadd.s32 1, %s12624_s22  }
  0x4d   : > { %14242 = sst [smem:[#allocation39_spill]] %s12612_s15  ;;  %s803_s28 = sadd.s32 1, %s12620_s18 }
  0x4e   : > { %14243 = sst [smem:[#allocation40_spill]] %s12620_s18  ;;  %s800_s1 = ssub.s32 %s12624_s22, %s12876_s26 }
  0x4f   : > { %14244 = sst [smem:[#allocation41_spill]] %s12624_s22  ;;  %p813_p0 = scmp.ne.s32.totalorder %s12620_s18, %s12616_s16 }
  0x50   : > { %14245 = sst [smem:[#allocation42_spill]] %s12876_s26  ;;  %p801_p1 = scmp.eq.s32.totalorder %s800_s1, 0 }
  0x51   : > { %p814_p2 = scmp.eq.s32.totalorder %s12872_s0, 1  ;;  %p819_p3 = scmp.ne.s32.totalorder %s12616_s16, %s12612_s15 }
  0x52   : > { %p820_p4 = scmp.eq.s32.totalorder %s8730_s23, 1  ;;  %p8731_p7 = scmp.ge.s32.totalorder %s12624_s22, 1 }
  0x53   : > { %s12887_s2 = scalar_select %p801_p1, %s12620_s18, %s803_s28  }
  0x54   : > { %p12889_p5 = por %p814_p2, %p813_p0  ;;  %p12893_p6 = por %p820_p4, %p819_p3 }
  0x55   : > { %14246 = sst [smem:[#allocation43_spill]] %s12887_s2  ;;  %p853_p8 = scmp.lt.s32.totalorder %s12624_s22, 3 }
  0x56   : > { %s14247_s7 = scalar_select %p12889_p5, 1, 0 }
  0x57   : > { %s14249_s10 = scalar_select %p12893_p6, 1, 0 }
  0x58   : > { %14248 = sst [smem:[#allocation44_spill]] %s14247_s7  ;;  %p12310_p9 = scmp.eq.s32.totalorder %s12872_s0, 0 }
  0x59   : > { %14250 = sst [smem:[#allocation45_spill]] %s14249_s10  ;;  %p12900_p10 = pnand %p8731_p7, %p853_p8 }
  0x5a   : > { %s921_s1 = sshll.u32 %s14241_s4, 4  ;;  %s12660_s23 = smov [#allocation2]   ;;  %s922_s1 = int_to_ptr.hbm [resolvable:$true] %s921_s1 }
  0x5b   : > { %p12296_p11 = pneg %p12900_p10  ;;  %s923_s28 = sshll.u32 %s12660_s23, 4  ;;  %s924_s28 = int_to_ptr.vmem [resolvable:$true] %s923_s28 }
  0x5c   : > { %s956_s18 = sshll.u32 %s12824_s12, 4  ;;  %s12462_s26 = sshra.s32 %s922_s1, 4  ;;  %s12914_s18 = int_to_ptr.hbm [resolvable:$true] %s956_s18  ;;  %s12463_s26 = int_to_ptr.hbm [resolvable:$true] %s12462_s26 }
  0x5d   : > { %p12909_p12 = pnand %p12310_p9, %p12296_p11  ;;  %s12464_s10 = scalar_lea.hbm %s12463_s26, 1152 }
  0x5e   : > { %p12465_p13 = scmp.ne.s32.totalorder %s12463_s26, %s12464_s10  ;;  %s12469_s23 = scalar_lea.hbm %s14241_s4, 1152 }
  0x5f   : > { %p12466_p0 = pneg %p12909_p12  ;;  %p12470_p3 = scmp.lt.s32.totalorder %s12463_s26, %s14241_s4 }
  0x60   : > { %p12471_p4 = scmp.lt.s32.totalorder %s12469_s23, %s12464_s10 }
  0x61   : > { %p12467_p1 = pnand %p12466_p0, %p12465_p13 }
  0x62   : > { %p12472_p7 = por %p12471_p4, %p12470_p3 }
  0x63   : > { %p12468_p2 = pneg %p12467_p1 }
  0x65   : > { %p12473_p8 = pnand %p12472_p7, %p12468_p2 }
  0x67   : > { %12476 = shalt.err (!%p12473_p8)
}
  0x68   : > { %s12661_s15 = smov 576   ;;  %s12662_s22 = smov 36  }
  0x69   : > { %12299 = dma.hbm_to_vmem [thread:$0]  (!%p12909_p12), %s922_s1, 18432, %s924_s28, [#allocation3], %s12661_s15, %s12661_s15, %s12662_s22  }
  0x6a   : > { %s12663_s27 = smov [#allocation5]   ;;  %s12492_s7 = sshra.s32 %s12914_s18, 4  ;;  %s12493_s7 = int_to_ptr.hbm [resolvable:$true] %s12492_s7 }
  0x6b   : > { %s958_s9 = sshll.u32 %s12663_s27, 4  ;;  %s12494_s30 = scalar_lea.hbm %s12493_s7, 576  ;;  %s959_s9 = int_to_ptr.vmem [resolvable:$true] %s958_s9 }
  0x6c   : > { %p12495_p11 = scmp.ne.s32.totalorder %s12493_s7, %s12494_s30  ;;  %s12499_s26 = scalar_lea.hbm %s12824_s12, 576 }
  0x6d   : > { %p12500_p2 = scmp.lt.s32.totalorder %s12493_s7, %s12824_s12  ;;  %p12501_p3 = scmp.lt.s32.totalorder %s12499_s26, %s12494_s30 }
  0x6e   : > { %p12497_p13 = pnand %p12495_p11, %p12466_p0 }
  0x6f   : > { %p12502_p4 = por %p12501_p3, %p12500_p2 }
  0x70   : > { %p12498_p1 = pneg %p12497_p13 }
  0x72   : > { %p12503_p7 = pnand %p12502_p4, %p12498_p1 }
  0x74   : > { %12506 = shalt.err (!%p12503_p7)
}
  0x75   : > { %s12664_s10 = smov 128   ;;  %s12665_s15 = smov 8  }
  0x76   : > { %12302 = dma.hbm_to_vmem [thread:$0]  (!%p12909_p12), %s12914_s18, 9216, %s959_s9, [#allocation6], %s12664_s10, %s12664_s10, %s12665_s15  }
  0x77   : > { %994 = sbr.rel (%p12900_p10) target bundleno = 4210 (0x1072), region = 148 }
  0x7c   : > { %12595 = dma.done.wait (%p12310_p9), [#allocation3], 18432  }
  0x7d   : > { %12597 = vsyncadd (%p12310_p9), [#allocation3], 4294948864 }
  0x7e   : > { %12599 = dma.done.wait (%p12310_p9), [#allocation6], 9216  }
  0x7f   : > { %12601 = vsyncadd (%p12310_p9), [#allocation6], 4294958080  ;;  %p1097_p10 = scmp.lt.s32.totalorder %s12872_s0, 1  ;;  %v8884_v0 = vld [vmem:[%s12689_s13 + $0x118] sm:$0xf]  ;;  %s14253_s5 = sld [smem:[#allocation14_spill]] }
  0x80   : > { %v11667_v1 = vld [vmem:[%s12689_s13 + $0x128] sm:$0xf0]  ;;  %v9044_v2 = vld [vmem:[%s12689_s13 + $0x258] sm:$0xf]  ;;  %v11665_v5 = vld [vmem:[%s12689_s13 + $0x11c] sm:$0xf] }
  0x81   : > { %v8885_v3 = vor.u32 %v11667_v1, %v8884_v0  ;;  %v11707_v4 = vld [vmem:[%s12689_s13 + $0x268] sm:$0xf0]  ;;  %v8886_v6 = vld [vmem:[%s12689_s13 + $0x12c] sm:$0xf0]  ;;  %v11705_v9 = vld [vmem:[%s12689_s13 + $0x25c] sm:$0xf] }
  0x82   : > { %v9045_v7 = vor.u32 %v11707_v4, %v9044_v2  ;;  %v8889_v8 = vor.u32 %v11665_v5, %v8886_v6  ;;  %v9046_v10 = vld [vmem:[%s12689_s13 + $0x26c] sm:$0xf0]  ;;  %v11662_v13 = vld [vmem:[%s12689_s13 + $0x100] sm:$0xf0]  ;;  %v11660_v18 = vld [vmem:[%s12689_s13 + $0xf4] sm:$0xf] }
  0x83   : > { %v8864_v11 = vld [vmem:[%s12689_s13 + $0xf0] sm:$0xf]  ;;  %1632 = vmatpush.bf16.msra.mxu0 %v8885_v3  ;;  %v9049_v12 = vor.u32 %v11705_v9, %v9046_v10  ;;  %v11702_v15 = vld [vmem:[%s12689_s13 + $0x240] sm:$0xf0]  ;;  %v8866_v19 = vld [vmem:[%s12689_s13 + $0x104] sm:$0xf0] }
  0x84   : > { %v9024_v14 = vld [vmem:[%s12689_s13 + $0x230] sm:$0xf]  ;;  %1645 = vmatpush.bf16.msra.mxu1 %v9045_v7  ;;  %1658 = vmatpush.bf16.msra.mxu2 %v8889_v8  ;;  %v8865_v16 = vor.u32 %v11662_v13, %v8864_v11  ;;  %v11700_v20 = vld [vmem:[%s12689_s13 + $0x234] sm:$0xf]  ;;  %v8869_v21 = vor.u32 %v11660_v18, %v8866_v19  ;;  %v9026_v22 = vld [vmem:[%s12689_s13 + $0x244] sm:$0xf0] }
  0x85   : > { %v9025_v17 = vor.u32 %v11702_v15, %v9024_v14  ;;  %1671 = vmatpush.bf16.msra.mxu3 %v9049_v12  ;;  %v8844_v23 = vld [vmem:[%s12689_s13 + $0xc8] sm:$0xf]  ;;  %v11657_v24 = vld [vmem:[%s12689_s13 + $0xd8] sm:$0xf0]  ;;  %v9029_v25 = vor.u32 %v11700_v20, %v9026_v22  ;;  %v11655_v28 = vld [vmem:[%s12689_s13 + $0xcc] sm:$0xf] }
  0x86   : > { %v9004_v26 = vld [vmem:[%s12689_s13 + $0x208] sm:$0xf]  ;;  %v11697_v27 = vld [vmem:[%s12689_s13 + $0x218] sm:$0xf0]  ;;  %v8845_v29 = vor.u32 %v11657_v24, %v8844_v23  ;;  %v8846_v30 = vld [vmem:[%s12689_s13 + $0xdc] sm:$0xf0] }
  0x87   : > { %1633 = vmatpush.bf16.msra.mxu0 %v8865_v16  ;;  %v11695_v31 = vld [vmem:[%s12689_s13 + $0x20c] sm:$0xf]  ;;  %v9006_v32 = vld [vmem:[%s12689_s13 + $0x21c] sm:$0xf0]  ;;  %v9005_v33 = vor.u32 %v11697_v27, %v9004_v26  ;;  %v8849_v34 = vor.u32 %v11655_v28, %v8846_v30  ;;  %v11652_v36 = vld [vmem:[%s12689_s13 + $0xb0] sm:$0xf0] }
  0x88   : > { %1646 = vmatpush.bf16.msra.mxu1 %v9025_v17  ;;  %1659 = vmatpush.bf16.msra.mxu2 %v8869_v21  ;;  %v8824_v35 = vld [vmem:[%s12689_s13 + $0xa0] sm:$0xf]  ;;  %v9009_v38 = vor.u32 %v11695_v31, %v9006_v32  ;;  %v11692_v39 = vld [vmem:[%s12689_s13 + $0x1f0] sm:$0xf0]  ;;  %v11650_v40 = vld [vmem:[%s12689_s13 + $0xa4] sm:$0xf] }
  0x89   : > { %v8984_v37 = vld [vmem:[%s12689_s13 + $0x1e0] sm:$0xf]  ;;  %1672 = vmatpush.bf16.msra.mxu3 %v9029_v25  ;;  %v8826_v41 = vld [vmem:[%s12689_s13 + $0xb4] sm:$0xf0]  ;;  %v11690_v42 = vld [vmem:[%s12689_s13 + $0x1e4] sm:$0xf]  ;;  %v8825_v44 = vor.u32 %v11652_v36, %v8824_v35 }
  0x8a   : > { %v8986_v43 = vld [vmem:[%s12689_s13 + $0x1f4] sm:$0xf0]  ;;  %s12980_s9 = scalar_select %p1097_p10, %s12872_s0, 1  ;;  %v8985_v45 = vor.u32 %v11692_v39, %v8984_v37  ;;  %v8829_v46 = vor.u32 %v11650_v40, %v8826_v41  ;;  %v11647_v48 = vld [vmem:[%s12689_s13 + $0x88] sm:$0xf0]  ;;  %vm1796_vm0 = vcmask 1041408  }
  0x8b   : > { %1634 = vmatpush.bf16.msra.mxu0 %v8845_v29  ;;  %v8804_v47 = vld [vmem:[%s12689_s13 + $0x78] sm:$0xf]  ;;  %v8989_v50 = vor.u32 %v11690_v42, %v8986_v43  ;;  %v11687_v51 = vld [vmem:[%s12689_s13 + $0x1c8] sm:$0xf0]  ;;  %v11645_v52 = vld [vmem:[%s12689_s13 + $0x7c] sm:$0xf] }
  0x8c   : > { %1647 = vmatpush.bf16.msra.mxu1 %v9005_v33  ;;  %1660 = vmatpush.bf16.msra.mxu2 %v8849_v34  ;;  %v8964_v49 = vld [vmem:[%s12689_s13 + $0x1b8] sm:$0xf]  ;;  %v8806_v53 = vld [vmem:[%s12689_s13 + $0x8c] sm:$0xf0]  ;;  %v11685_v54 = vld [vmem:[%s12689_s13 + $0x1bc] sm:$0xf]  ;;  %v8805_v56 = vor.u32 %v11647_v48, %v8804_v47 }
  0x8d   : > { %1673 = vmatpush.bf16.msra.mxu3 %v9009_v38  ;;  %v8966_v55 = vld [vmem:[%s12689_s13 + $0x1cc] sm:$0xf0]  ;;  %s14202_s30 = sshll.u32 %s12980_s9, 3  ;;  %v8965_v57 = vor.u32 %v11687_v51, %v8964_v49  ;;  %v8809_v58 = vor.u32 %v11645_v52, %v8806_v53  ;;  %v11642_v60 = vld [vmem:[%s12689_s13 + $0x60] sm:$0xf0]  ;;  %s12666_s18 = smov 64  }
  0x8e   : > { %v8784_v59 = vld [vmem:[%s12689_s13 + $0x50] sm:$0xf]  ;;  %v8969_v62 = vor.u32 %v11685_v54, %v8966_v55  ;;  %v11682_v63 = vld [vmem:[%s12689_s13 + $0x1a0] sm:$0xf0]  ;;  %v11640_v0 = vld [vmem:[%s12689_s13 + $0x54] sm:$0xf]  ;;  %s1101_s27 = scalar_lea.vmem %s14253_s5, %s14202_s30 }
  0x8f   : > { %1635 = vmatpush.bf16.msra.mxu0 %v8825_v44  ;;  %v8944_v61 = vld [vmem:[%s12689_s13 + $0x190] sm:$0xf]  ;;  %v8786_v1 = vld [vmem:[%s12689_s13 + $0x64] sm:$0xf0]  ;;  %v11680_v2 = vld [vmem:[%s12689_s13 + $0x194] sm:$0xf]  ;;  %v8785_v4 = vor.u32 %v11642_v60, %v8784_v59 }
  0x90   : > { %1648 = vmatpush.bf16.msra.mxu1 %v8985_v45  ;;  %1661 = vmatpush.bf16.msra.mxu2 %v8829_v46  ;;  %v8946_v3 = vld [vmem:[%s12689_s13 + $0x1a4] sm:$0xf0]  ;;  %v8945_v6 = vor.u32 %v11682_v63, %v8944_v61  ;;  %v8789_v7 = vor.u32 %v11640_v0, %v8786_v1  ;;  %v11637_v8 = vld [vmem:[%s12689_s13 + $0x38] sm:$0xf0]  ;;  %v11635_v12 = vld [vmem:[%s12689_s13 + $0x2c] sm:$0xf] }
  0x91   : > { %1674 = vmatpush.bf16.msra.mxu3 %v8989_v50  ;;  %v8764_v5 = vld [vmem:[%s12689_s13 + $0x28] sm:$0xf]  ;;  %v11677_v10 = vld [vmem:[%s12689_s13 + $0x178] sm:$0xf0]  ;;  %v8949_v11 = vor.u32 %v11680_v2, %v8946_v3  ;;  %v8766_v13 = vld [vmem:[%s12689_s13 + $0x3c] sm:$0xf0] }
  0x92   : > { %v8924_v9 = vld [vmem:[%s12689_s13 + $0x168] sm:$0xf]  ;;  %v1111_v14 = vld [vmem:[%s1101_s27] sm:$0xff]  ;;  %v11675_v15 = vld [vmem:[%s12689_s13 + $0x16c] sm:$0xf]  ;;  %v8765_v17 = vor.u32 %v11637_v8, %v8764_v5  ;;  %v8769_v20 = vor.u32 %v11635_v12, %v8766_v13  ;;  %vm1789_vm1 = vcmask 31744  }
  0x93   : > { %1636 = vmatpush.bf16.msra.mxu0 %v8805_v56  ;;  %v8926_v16 = vld [vmem:[%s12689_s13 + $0x17c] sm:$0xf0]  ;;  %1113 = vst [vmem:[#allocation1] ss:$2 sm:$0xff] %v1111_v14  ;;  %v8925_v19 = vor.u32 %v11677_v10, %v8924_v9  ;;  %v11632_v21 = vld [vmem:[%s12689_s13 + $0x10] sm:$0xf0] }
  0x94   : > { %1649 = vmatpush.bf16.msra.mxu1 %v8965_v57  ;;  %1662 = vmatpush.bf16.msra.mxu2 %v8809_v58  ;;  %v8744_v18 = vld [vmem:[%s12689_s13] sm:$0xf]  ;;  %v11672_v23 = vld [vmem:[%s12689_s13 + $0x150] sm:$0xf0]  ;;  %v8929_v24 = vor.u32 %v11675_v15, %v8926_v16  ;;  %v11630_v25 = vld [vmem:[%s12689_s13 + $0x4] sm:$0xf] }
  0x95   : > { %1675 = vmatpush.bf16.msra.mxu3 %v8969_v62  ;;  %v8904_v22 = vld [vmem:[%s12689_s13 + $0x140] sm:$0xf]  ;;  %v8746_v26 = vld [vmem:[%s12689_s13 + $0x14] sm:$0xf0]  ;;  %v11670_v27 = vld [vmem:[%s12689_s13 + $0x144] sm:$0xf]  ;;  %v8745_v31 = vor.u32 %v11632_v21, %v8744_v18 }
  0x96   : > { %v8906_v28 = vld [vmem:[%s12689_s13 + $0x154] sm:$0xf0]  ;;  %v11666_v29 = vld [vmem:[%s12689_s13 + $0x124] sm:$0xf]  ;;  %v8905_v34 = vor.u32 %v11672_v23, %v8904_v22  ;;  %v8749_v35 = vor.u32 %v11630_v25, %v8746_v26  ;;  %v11661_v36 = vld [vmem:[%s12689_s13 + $0xfc] sm:$0xf] }
  0x97   : > { %1637 = vmatpush.bf16.msra.mxu0 %v8785_v4  ;;  %v8894_v30 = vld [vmem:[%s12689_s13 + $0x134] sm:$0xf0]  ;;  %v11706_v32 = vld [vmem:[%s12689_s13 + $0x264] sm:$0xf]  ;;  %v8892_v37 = vld [vmem:[%s12689_s13 + $0x120] sm:$0xf]  ;;  %v8909_v39 = vor.u32 %v11670_v27, %v8906_v28 }
  0x98   : > { %1650 = vmatpush.bf16.msra.mxu1 %v8945_v6  ;;  %1663 = vmatpush.bf16.msra.mxu2 %v8789_v7  ;;  %v9054_v33 = vld [vmem:[%s12689_s13 + $0x274] sm:$0xf0]  ;;  %v11668_v38 = vld [vmem:[%s12689_s13 + $0x130] sm:$0xf0]  ;;  %v8897_v42 = vor.u32 %v11666_v29, %v8894_v30  ;;  %v8874_v45 = vld [vmem:[%s12689_s13 + $0x10c] sm:$0xf0] }
  0x99   : > { %1676 = vmatpush.bf16.msra.mxu3 %v8949_v11  ;;  %v9057_v44 = vor.u32 %v11706_v32, %v9054_v33  ;;  %v9052_v46 = vld [vmem:[%s12689_s13 + $0x260] sm:$0xf]  ;;  %v11708_v47 = vld [vmem:[%s12689_s13 + $0x270] sm:$0xf0]  ;;  %v11701_v49 = vld [vmem:[%s12689_s13 + $0x23c] sm:$0xf]  ;;  %v8893_v51 = vor.u32 %v11668_v38, %v8892_v37  ;;  %v8877_v52 = vor.u32 %v11661_v36, %v8874_v45 }
  0x9a   : > { %v1114_v40 = vld.sshfl [vmem:[#allocation1] sm:$0xff pattern:$0x75316420]  ;;  %v1115_v41 = vld.sshfl [vmem:[#allocation1 + $0x8] sm:$0xff pattern:$0x75316420]  ;;  %v9053_v53 = vor.u32 %v11708_v47, %v9052_v46 }
  0x9b   : > { %1638 = vmatpush.bf16.msra.mxu0 %v8765_v17  ;;  %v13025_v43 = vpack.c.bf16 %v1114_v40, %v1114_v40  ;;  %v13030_v48 = vpack.c.bf16 %v1115_v41, %v1115_v41  ;;  %v9034_v50 = vld [vmem:[%s12689_s13 + $0x24c] sm:$0xf0]  ;;  %v11656_v54 = vld [vmem:[%s12689_s13 + $0xd4] sm:$0xf]  ;;  %v8872_v55 = vld [vmem:[%s12689_s13 + $0xf8] sm:$0xf] }
  0x9c   : > { %1651 = vmatpush.bf16.msra.mxu1 %v8925_v19  ;;  %1664 = vmatpush.bf16.msra.mxu2 %v8769_v20  ;;  %v11663_v56 = vld [vmem:[%s12689_s13 + $0x108] sm:$0xf0]  ;;  %v9037_v57 = vor.u32 %v11701_v49, %v9034_v50  ;;  %v8854_v58 = vld [vmem:[%s12689_s13 + $0xe4] sm:$0xf0]  ;;  %v9032_v59 = vld [vmem:[%s12689_s13 + $0x238] sm:$0xf] }
  0x9d   : > { %1677 = vmatpush.bf16.msra.mxu3 %v8929_v24  ;;  %v11703_v60 = vld [vmem:[%s12689_s13 + $0x248] sm:$0xf0]  ;;  %v11696_v61 = vld [vmem:[%s12689_s13 + $0x214] sm:$0xf]  ;;  %v9014_v62 = vld [vmem:[%s12689_s13 + $0x224] sm:$0xf0]  ;;  %v8873_v63 = vor.u32 %v11663_v56, %v8872_v55  ;;  %v8857_v0 = vor.u32 %v11656_v54, %v8854_v58 }
  0x9e   : > { %v9033_v1 = vor.u32 %v11703_v60, %v9032_v59  ;;  %v11651_v2 = vld [vmem:[%s12689_s13 + $0xac] sm:$0xf]  ;;  %v8852_v3 = vld [vmem:[%s12689_s13 + $0xd0] sm:$0xf]  ;;  %v11658_v4 = vld [vmem:[%s12689_s13 + $0xe0] sm:$0xf0]  ;;  %v9017_v5 = vor.u32 %v11696_v61, %v9014_v62 }
  0x9f   : > { %1639 = vmatpush.bf16.msra.mxu0 %v8745_v31  ;;  %v8834_v6 = vld [vmem:[%s12689_s13 + $0xbc] sm:$0xf0]  ;;  %v9012_v7 = vld [vmem:[%s12689_s13 + $0x210] sm:$0xf]  ;;  %v11698_v8 = vld [vmem:[%s12689_s13 + $0x220] sm:$0xf0]  ;;  %v8853_v11 = vor.u32 %v11658_v4, %v8852_v3 }
  0xa0   : > { %1652 = vmatpush.bf16.msra.mxu1 %v8905_v34  ;;  %1665 = vmatpush.bf16.msra.mxu2 %v8749_v35  ;;  %v11691_v9 = vld [vmem:[%s12689_s13 + $0x1ec] sm:$0xf]  ;;  %v8994_v10 = vld [vmem:[%s12689_s13 + $0x1fc] sm:$0xf0]  ;;  %v8837_v12 = vor.u32 %v11651_v2, %v8834_v6  ;;  %v9013_v13 = vor.u32 %v11698_v8, %v9012_v7  ;;  %v11646_v14 = vld [vmem:[%s12689_s13 + $0x84] sm:$0xf] }
  0xa1   : > { %1678 = vmatpush.bf16.msra.mxu3 %v8909_v39  ;;  %v8832_v15 = vld [vmem:[%s12689_s13 + $0xa8] sm:$0xf]  ;;  %v11653_v16 = vld [vmem:[%s12689_s13 + $0xb8] sm:$0xf0]  ;;  %v8997_v17 = vor.u32 %v11691_v9, %v8994_v10  ;;  %v8814_v18 = vld [vmem:[%s12689_s13 + $0x94] sm:$0xf0] }
  0xa2   : > { %1640 = vmatmul.bf16.vlgmr.msra.gmra.mxu0 %v13025_v43  ;;  %v8992_v19 = vld [vmem:[%s12689_s13 + $0x1e8] sm:$0xf]  ;;  %v11693_v20 = vld [vmem:[%s12689_s13 + $0x1f8] sm:$0xf0]  ;;  %v11686_v21 = vld [vmem:[%s12689_s13 + $0x1c4] sm:$0xf]  ;;  %v8833_v23 = vor.u32 %v11653_v16, %v8832_v15  ;;  %v8817_v25 = vor.u32 %v11646_v14, %v8814_v18 }
  0xa3   : > { %1653 = vmatmul.bf16.vlgmr.msra.gmra.mxu1 %v13030_v48  ;;  %1666 = vmatmul.bf16.vlgmr.msra.gmra.mxu2 %v13025_v43  ;;  %v8974_v22 = vld [vmem:[%s12689_s13 + $0x1d4] sm:$0xf0]  ;;  %v11641_v24 = vld [vmem:[%s12689_s13 + $0x5c] sm:$0xf]  ;;  %v8993_v26 = vor.u32 %v11693_v20, %v8992_v19  ;;  %v8794_v27 = vld [vmem:[%s12689_s13 + $0x6c] sm:$0xf0] }
  0xa4   : > { %1710 = vmatpush.bf16.msrb.mxu2 %v8897_v42  ;;  %1679 = vmatmul.bf16.vlgmr.msra.gmra.mxu3 %v13030_v48  ;;  %v8812_v28 = vld [vmem:[%s12689_s13 + $0x80] sm:$0xf]  ;;  %v11648_v29 = vld [vmem:[%s12689_s13 + $0x90] sm:$0xf0]  ;;  %v8977_v30 = vor.u32 %v11686_v21, %v8974_v22  ;;  %v11681_v31 = vld [vmem:[%s12689_s13 + $0x19c] sm:$0xf]  ;;  %v8797_v36 = vor.u32 %v11641_v24, %v8794_v27 }
  0xa5   : > { %1723 = vmatpush.bf16.msrb.mxu3 %v9057_v44  ;;  %1684 = vmatpush.bf16.msrb.mxu0 %v8893_v51  ;;  %v8972_v32 = vld [vmem:[%s12689_s13 + $0x1c0] sm:$0xf]  ;;  %v11688_v33 = vld [vmem:[%s12689_s13 + $0x1d0] sm:$0xf0]  ;;  %v8954_v34 = vld [vmem:[%s12689_s13 + $0x1ac] sm:$0xf0]  ;;  %v8813_v35 = vor.u32 %v11648_v29, %v8812_v28 }
  0xa6   : > { %1697 = vmatpush.bf16.msrb.mxu1 %v9053_v53  ;;  %v8973_v37 = vor.u32 %v11688_v33, %v8972_v32  ;;  %v11636_v38 = vld [vmem:[%s12689_s13 + $0x34] sm:$0xf]  ;;  %v8792_v39 = vld [vmem:[%s12689_s13 + $0x58] sm:$0xf]  ;;  %v11643_v40 = vld [vmem:[%s12689_s13 + $0x68] sm:$0xf0]  ;;  %v8957_v41 = vor.u32 %v11681_v31, %v8954_v34 }
  0xa7   : > { %v8774_v42 = vld [vmem:[%s12689_s13 + $0x44] sm:$0xf0]  ;;  %v8952_v44 = vld [vmem:[%s12689_s13 + $0x198] sm:$0xf]  ;;  %v11683_v45 = vld [vmem:[%s12689_s13 + $0x1a8] sm:$0xf0]  ;;  %v8793_v49 = vor.u32 %v11643_v40, %v8792_v39 }
  0xa8   : > { %1711 = vmatpush.bf16.msrb.mxu2 %v8877_v52  ;;  %v11676_v46 = vld [vmem:[%s12689_s13 + $0x174] sm:$0xf]  ;;  %v8934_v47 = vld [vmem:[%s12689_s13 + $0x184] sm:$0xf0]  ;;  %v8777_v50 = vor.u32 %v11636_v38, %v8774_v42  ;;  %v8953_v51 = vor.u32 %v11683_v45, %v8952_v44  ;;  %v11631_v52 = vld [vmem:[%s12689_s13 + $0xc] sm:$0xf] }
  0xa9   : > { %1724 = vmatpush.bf16.msrb.mxu3 %v9037_v57  ;;  %1685 = vmatpush.bf16.msrb.mxu0 %v8873_v63  ;;  %v8772_v53 = vld [vmem:[%s12689_s13 + $0x30] sm:$0xf]  ;;  %v11638_v54 = vld [vmem:[%s12689_s13 + $0x40] sm:$0xf0]  ;;  %v8937_v55 = vor.u32 %v11676_v46, %v8934_v47  ;;  %v8754_v56 = vld [vmem:[%s12689_s13 + $0x1c] sm:$0xf0] }
  0xaa   : > { %1698 = vmatpush.bf16.msrb.mxu1 %v9033_v1  ;;  %v8932_v57 = vld [vmem:[%s12689_s13 + $0x170] sm:$0xf]  ;;  %v11678_v58 = vld [vmem:[%s12689_s13 + $0x180] sm:$0xf0]  ;;  %v11671_v59 = vld [vmem:[%s12689_s13 + $0x14c] sm:$0xf]  ;;  %v8773_v61 = vor.u32 %v11638_v54, %v8772_v53  ;;  %v8757_v62 = vor.u32 %v11631_v52, %v8754_v56 }
  0xab   : > { %v8914_v60 = vld [vmem:[%s12689_s13 + $0x15c] sm:$0xf0]  ;;  %v8933_v63 = vor.u32 %v11678_v58, %v8932_v57  ;;  %v11633_v1 = vld [vmem:[%s12689_s13 + $0x18] sm:$0xf0]  ;;  %v8912_v3 = vld [vmem:[%s12689_s13 + $0x148] sm:$0xf] }
  0xac   : > { %1712 = vmatpush.bf16.msrb.mxu2 %v8857_v0  ;;  %v8752_v0 = vld [vmem:[%s12689_s13 + $0x8] sm:$0xf]  ;;  %v8917_v2 = vor.u32 %v11671_v59, %v8914_v60  ;;  %v11673_v4 = vld [vmem:[%s12689_s13 + $0x158] sm:$0xf0]  ;;  %v8880_v10 = vld [vmem:[%s12689_s13 + $0x100] sm:$0xf] }
  0xad   : > { %1725 = vmatpush.bf16.msrb.mxu3 %v9017_v5  ;;  %1686 = vmatpush.bf16.msrb.mxu0 %v8853_v11  ;;  %v8900_v5 = vld [vmem:[%s12689_s13 + $0x128] sm:$0xf]  ;;  %v11669_v6 = vld [vmem:[%s12689_s13 + $0x138] sm:$0xf0]  ;;  %v8753_v7 = vor.u32 %v11633_v1, %v8752_v0  ;;  %v8913_v8 = vor.u32 %v11673_v4, %v8912_v3  ;;  %v11664_v11 = vld [vmem:[%s12689_s13 + $0x110] sm:$0xf0] }
  0xae   : > { %1699 = vmatpush.bf16.msrb.mxu1 %v9013_v13  ;;  %v8901_v9 = vor.u32 %v11669_v6, %v8900_v5  ;;  %v8860_v13 = vld [vmem:[%s12689_s13 + $0xd8] sm:$0xf]  ;;  %v11659_v14 = vld [vmem:[%s12689_s13 + $0xe8] sm:$0xf0]  ;;  %v8840_v16 = vld [vmem:[%s12689_s13 + $0xb0] sm:$0xf] }
  0xaf   : > { %v8861_v15 = vor.u32 %v11659_v14, %v8860_v13  ;;  %v8820_v19 = vld [vmem:[%s12689_s13 + $0x88] sm:$0xf]  ;;  %v11649_v20 = vld [vmem:[%s12689_s13 + $0x98] sm:$0xf0]  ;;  %v8800_v22 = vld [vmem:[%s12689_s13 + $0x60] sm:$0xf] }
  0xb0   : > { %1713 = vmatpush.bf16.msrb.mxu2 %v8837_v12  ;;  %v8881_v12 = vor.u32 %v11664_v11, %v8880_v10  ;;  %v8821_v21 = vor.u32 %v11649_v20, %v8820_v19  ;;  %v8760_v28 = vld [vmem:[%s12689_s13 + $0x10] sm:$0xf]  ;;  %v11634_v29 = vld [vmem:[%s12689_s13 + $0x20] sm:$0xf0]  ;;  %v9060_v31 = vld [vmem:[%s12689_s13 + $0x268] sm:$0xf] }
  0xb1   : > { %1726 = vmatpush.bf16.msrb.mxu3 %v8997_v17  ;;  %1687 = vmatpush.bf16.msrb.mxu0 %v8833_v23  ;;  %v11654_v17 = vld [vmem:[%s12689_s13 + $0xc0] sm:$0xf0]  ;;  %v11644_v23 = vld [vmem:[%s12689_s13 + $0x70] sm:$0xf0]  ;;  %v11709_v32 = vld [vmem:[%s12689_s13 + $0x278] sm:$0xf0] }
  0xb2   : > { %1700 = vmatpush.bf16.msrb.mxu1 %v8993_v26  ;;  %v8841_v18 = vor.u32 %v11654_v17, %v8840_v16  ;;  %v8801_v24 = vor.u32 %v11644_v23, %v8800_v22  ;;  %v11639_v26 = vld [vmem:[%s12689_s13 + $0x48] sm:$0xf0]  ;;  %v9061_v33 = vor.u32 %v11709_v32, %v9060_v31  ;;  %v9040_v34 = vld [vmem:[%s12689_s13 + $0x240] sm:$0xf]  ;;  %v11694_v42 = vld [vmem:[%s12689_s13 + $0x200] sm:$0xf0] }
  0xb3   : > { %v11699_v38 = vld [vmem:[%s12689_s13 + $0x228] sm:$0xf0]  ;;  %v8960_v52 = vld [vmem:[%s12689_s13 + $0x1a0] sm:$0xf]  ;;  %v11684_v56 = vld [vmem:[%s12689_s13 + $0x1b0] sm:$0xf0] }
  0xb4   : > { %1714 = vmatpush.bf16.msrb.mxu2 %v8817_v25  ;;  %v8780_v25 = vld [vmem:[%s12689_s13 + $0x38] sm:$0xf]  ;;  %v8961_v58 = vor.u32 %v11684_v56, %v8960_v52  ;;  %v11679_v60 = vld [vmem:[%s12689_s13 + $0x188] sm:$0xf0]  ;;  %v8920_v5 = vld [vmem:[%s12689_s13 + $0x150] sm:$0xf] }
  0xb5   : > { %1727 = vmatpush.bf16.msrb.mxu3 %v8977_v30  ;;  %1688 = vmatpush.bf16.msrb.mxu0 %v8813_v35  ;;  %v8781_v27 = vor.u32 %v11639_v26, %v8780_v25  ;;  %v8761_v30 = vor.u32 %v11634_v29, %v8760_v28  ;;  %v11704_v35 = vld [vmem:[%s12689_s13 + $0x250] sm:$0xf0]  ;;  %v8940_v59 = vld [vmem:[%s12689_s13 + $0x178] sm:$0xf]  ;;  %v11674_v6 = vld [vmem:[%s12689_s13 + $0x160] sm:$0xf0] }
  0xb6   : > { %1701 = vmatpush.bf16.msrb.mxu1 %v8973_v37  ;;  %v9020_v37 = vld [vmem:[%s12689_s13 + $0x218] sm:$0xf]  ;;  %v8941_v3 = vor.u32 %v11679_v60, %v8940_v59  ;;  %v11714_v25 = vld [vmem:[%s12694_s17 + $0x20] sm:$0xff]  ;;  %v11711_v26 = vld [vmem:[%s12694_s17 + $0x8] sm:$0xff]  ;;  %vm2274_vm2 = vcmask 523264   ;;  %s12668_s22 = smov 32  }
  0xb7   : > { %v9021_v39 = vor.u32 %v11699_v38, %v9020_v37  ;;  %v11713_v37 = vld [vmem:[%s12694_s17 + $0x18] sm:$0xff]  ;;  %v2199_v56 = vld [vmem:[%s12699_s21] sm:$0xff]  ;;  %s12669_s2 = smov 96   ;;  %vm2540_vm3 = vcmask 261120   ;;  %vm2545_vm4 = vcmask 785408   ;;  %s14254_s3 = sld [smem:[#allocation16_spill]] }
  0xb8   : > { %1715 = vmatpush.bf16.msrb.mxu2 %v8797_v36  ;;  %v9041_v36 = vor.u32 %v11704_v35, %v9040_v34  ;;  %v11716_v35 = vld [vmem:[%s12694_s17 + $0x30] sm:$0xff]  ;;  %v2202_v59 = vld [vmem:[%s12699_s21 + $0x18] sm:$0xff]  ;;  %vm2754_vm5 = vcmask 130048   ;;  %s14255_s7 = sld [smem:[#allocation18_spill]]  ;;  %vm4893_vm6 = vcmask 253952  }
  0xb9   : > { %1728 = vmatpush.bf16.msrb.mxu3 %v8957_v41  ;;  %1689 = vmatpush.bf16.msrb.mxu0 %v8793_v49  ;;  %v9000_v41 = vld [vmem:[%s12689_s13 + $0x1f0] sm:$0xf]  ;;  %v11725_v60 = vld [vmem:[%s12694_s17 + $0x78] sm:$0xff]  ;;  %s14256_s11 = sld [smem:[#allocation20_spill]] }
  0xba   : > { %1702 = vmatpush.bf16.msrb.mxu1 %v8953_v51  ;;  %v11689_v51 = vld [vmem:[%s12689_s13 + $0x1d8] sm:$0xf0]  ;;  %s14257_s1 = sld [smem:[#allocation22_spill]] }
  0xbb   : > { %s14258_s28 = sld [smem:[#allocation19_spill]] }
  0xbc   : > { %1716 = vmatpush.bf16.msrb.mxu2 %v8777_v50  ;;  %v8980_v50 = vld [vmem:[%s12689_s13 + $0x1c8] sm:$0xf]  ;;  %s14259_s23 = sld [smem:[#allocation24_spill]] }
  0xbd   : > { %1729 = vmatpush.bf16.msrb.mxu3 %v8937_v55  ;;  %1690 = vmatpush.bf16.msrb.mxu0 %v8773_v61  ;;  %v8981_v55 = vor.u32 %v11689_v51, %v8980_v50  ;;  %v11718_v50 = vld [vmem:[%s12694_s17 + $0x40] sm:$0xff]  ;;  %s14260_s26 = sld [smem:[#allocation23_spill]] }
  0xbe   : > { %1703 = vmatpush.bf16.msrb.mxu1 %v8933_v63  ;;  %s14261_s10 = sld [smem:[#allocation15_spill]] }
  0xbf   : > { %s14262_s15 = sld [smem:[#allocation21_spill]] }
  0xc0   : > { %1717 = vmatpush.bf16.msrb.mxu2 %v8757_v62 }
  0xc1   : > { %1730 = vmatpush.bf16.msrb.mxu3 %v8917_v2  ;;  %1691 = vmatpush.bf16.msrb.mxu0 %v8753_v7 }
  0xc2   : > { %1704 = vmatpush.bf16.msrb.mxu1 %v8913_v8  ;;  %v8921_v8 = vor.u32 %v11674_v6, %v8920_v5 }
  0xc3   : > { %1718 = vmatmul.bf16.vlgmr.msrb.gmra.mxu2 %v13025_v43 }
  0xc4   : > { %1731 = vmatmul.bf16.vlgmr.msrb.gmra.mxu3 %v13030_v48  ;;  %1692 = vmatmul.bf16.vlgmr.msrb.gmra.mxu0 %v13025_v43  ;;  %s1104_s27 = scalar_lea.vmem %s14261_s10, %s12980_s9 }
  0xc5   : > { %1736 = vmatpush.bf16.msra.mxu0 %v8901_v9  ;;  %1705 = vmatmul.bf16.vlgmr.msrb.gmra.mxu1 %v13030_v48 }
  0xc6   : > { %1749 = vmatpush.bf16.msra.mxu1 %v9061_v33  ;;  %v11722_v33 = vld [vmem:[%s12694_s17 + $0x60] sm:$0xff] }
  0xc9   : > { %1737 = vmatpush.bf16.msra.mxu0 %v8881_v12 }
  0xca   : > { %1750 = vmatpush.bf16.msra.mxu1 %v9041_v36 }
  0xcd   : > { %1738 = vmatpush.bf16.msra.mxu0 %v8861_v15 }
  0xce   : > { %1751 = vmatpush.bf16.msra.mxu1 %v9021_v39 }
  0xd1   : > { %1739 = vmatpush.bf16.msra.mxu0 %v8841_v18 }
  0xd5   : > { %1740 = vmatpush.bf16.msra.mxu0 %v8821_v21 }
  0xd9   : > { %1741 = vmatpush.bf16.msra.mxu0 %v8801_v24  ;;  %v11710_v24 = vld [vmem:[%s12694_s17] sm:$0xff] }
  0xdd   : > { %1742 = vmatpush.bf16.msra.mxu0 %v8781_v27  ;;  %v11715_v27 = vld [vmem:[%s12694_s17 + $0x28] sm:$0xff] }
  0xe1   : > { %1743 = vmatpush.bf16.msra.mxu0 %v8761_v30  ;;  %v11712_v30 = vld [vmem:[%s12694_s17 + $0x10] sm:$0xff] }
  0xe4   : > { %1744 = vmatmul.bf16.vlgmr.msra.gmra.mxu0 %v13025_v43  ;;  %v9001_v43 = vor.u32 %v11694_v42, %v9000_v41  ;;  %v11723_v42 = vld [vmem:[%s12694_s17 + $0x68] sm:$0xff] }
  0xe6   : > { %1752 = vmatpush.bf16.msra.mxu1 %v9001_v43 }
  0xea   : > { %1753 = vmatpush.bf16.msra.mxu1 %v8981_v55  ;;  %v11719_v55 = vld [vmem:[%s12694_s17 + $0x48] sm:$0xff] }
  0xee   : > { %1754 = vmatpush.bf16.msra.mxu1 %v8961_v58  ;;  %v12667_v58 = vmov 0  }
  0xef   : > { %12394 = vset.pattern.permute.xlu0 %v12667_v58  ;;  %12393 = vset.pattern.permute.xlu2 %v12667_v58 }
  0xf0   : > { %2205 = vperm.xlu2 %12393, %v2199_v56   ;;  %12395 = vset.pattern.permute.xlu1 %v12667_v58 }
  0xf2   : > { %1755 = vmatpush.bf16.msra.mxu1 %v8941_v3 }
  0xf6   : > { %1756 = vmatpush.bf16.msra.mxu1 %v8921_v8 }
  0xf9   : > { %1757 = vmatmul.bf16.vlgmr.msra.gmra.mxu1 %v13030_v48 }
 0x11f   : > { %v1641_v40 = vpop.f32.mrf.mxu0 }
 0x120   : > { %v1654_v44 = vpop.f32.mrf.mxu1 }
 0x121   : > { %v1655_v45 = vadd.f32 %v1654_v44, %v1641_v40  ;;  %v11717_v44 = vld [vmem:[%s12694_s17 + $0x38] sm:$0xff] }
 0x126   : > { %v1667_v46 = vpop.f32.mrf.mxu2 }
 0x127   : > { %v1680_v47 = vpop.f32.mrf.mxu3  ;;  %v1643_v49 = vpop.f32.mrf.mxu0 }
 0x128   : > { %v1681_v53 = vadd.f32 %v1680_v47, %v1667_v46  ;;  %v1656_v54 = vpop.f32.mrf.mxu1  ;;  %v11720_v49 = vld [vmem:[%s12694_s17 + $0x50] sm:$0xff] }
 0x129   : > { %v11721_v54 = vld [vmem:[%s12694_s17 + $0x58] sm:$0xff] }
 0x12a   : > { %v1762_v57 = vpack.c.bf16 %v1681_v53, %v1655_v45  ;;  %v11724_v53 = vld [vmem:[%s12694_s17 + $0x70] sm:$0xff] }
 0x12c   : > { %v1836_v61 = vsel %vm1796_vm0, %v1762_v57, 0  ;;  %v1785_v62 = vunpack.c.l.b16 %v1762_v57  ;;  %v1872_v63 = vunpack.c.h.b16 %v1762_v57  ;;  %v2201_v57 = vld [vmem:[%s12699_s21 + $0x10] sm:$0xff] }
 0x12d   : > { %1845 = vmatpush.bf16.msra.mxu3 %v1836_v61  ;;  %v2200_v61 = vld [vmem:[%s12699_s21 + $0x8] sm:$0xff] }
 0x12e   : > { %v1669_v0 = vpop.f32.mrf.mxu2  ;;  %v1786_v1 = vpack.c.b16 %v1785_v62, %v1785_v62  ;;  %v1873_v2 = vpack.c.b16 %v1872_v63, %v1872_v63  ;;  %2210 = vperm.xlu2 %12393, %v2200_v61   ;;  %v11726_v62 = vld [vmem:[%s12694_s17 + $0x80] sm:$0xff]  ;;  %v11727_v63 = vld [vmem:[%s12694_s17 + $0x88] sm:$0xff] }
 0x12f   : > { %v1682_v4 = vpop.f32.mrf.mxu3 }
 0x130   : > { %1787 = vrot.lane.b32.xlu0 %v1786_v1, %s12666_s18  ;;  %v1881_v7 = vsel %vm1796_vm0, %v1873_v2, 0  ;;  %9084 = vmatmul.msk.bf16.vlgmr.msra.gmra.mxu3 %vm1789_vm1, %v11710_v24 }
 0x131   : > { %1890 = vmatpush.bf16.msrb.mxu0 %v1881_v7 }
 0x134   : > { %9098 = vmatmul.msk.bf16.vlgmr.msrb.gmra.mxu0 %vm1789_vm1, %v11714_v25 }
 0x138   : > { %1921 = vrot.lane.b32.xlu0 %v1873_v2, %s12666_s18 }
 0x140   : > { %9085 = vmatmul.msk.bf16.gmra.mxu3 %vm1789_vm1, %v11711_v26  ;;  %2215 = vperm.xlu0 %12394, %v2201_v57  }
 0x141   : > { %v1693_v9 = vpop.f32.mrf.mxu0 }
 0x142   : > { %v1706_v10 = vpop.f32.mrf.mxu1 }
 0x143   : > { %v1707_v11 = vadd.f32 %v1706_v10, %v1693_v9 }
 0x144   : > { %9099 = vmatmul.msk.bf16.gmra.mxu0 %vm1789_vm1, %v11715_v27 }
 0x146   : > { %v1719_v12 = vpop.f32.mrf.mxu2 }
 0x147   : > { %v1732_v13 = vpop.f32.mrf.mxu3 }
 0x148   : > { %v1733_v14 = vadd.f32 %v1732_v13, %v1719_v12 }
 0x149   : > { %v1695_v16 = vpop.f32.mrf.mxu0 }
 0x14a   : > { %v1763_v15 = vpack.c.bf16 %v1733_v14, %v1707_v11  ;;  %v1708_v19 = vpop.f32.mrf.mxu1 }
 0x14c   : > { %v2018_v17 = vunpack.c.l.b16 %v1763_v15  ;;  %v2069_v18 = vunpack.c.h.b16 %v1763_v15  ;;  %v1977_v31 = vsel %vm1796_vm0, %v1763_v15, 0 }
 0x14e   : > { %v2019_v20 = vpack.c.b16 %v2018_v17, %v2018_v17  ;;  %v2070_v21 = vpack.c.b16 %v2069_v18, %v2069_v18  ;;  %v1721_v22 = vpop.f32.mrf.mxu2 }
 0x14f   : > { %v1734_v23 = vpop.f32.mrf.mxu3 }
 0x150   : > { %2020 = vrot.lane.b32.xlu1 %v2019_v20, %s12666_s18  ;;  %v2078_v48 = vsel %vm1796_vm0, %v2070_v21, 0 }
 0x151   : > { %2087 = vmatpush.bf16.msra.mxu0 %v2078_v48 }
 0x154   : > { %9154 = vmatmul.msk.bf16.vlgmr.msra.gmra.mxu0 %vm1789_vm1, %v11722_v33 }
 0x158   : > { %2118 = vrot.lane.b32.xlu1 %v2070_v21, %s12666_s18 }
 0x160   : > { %2220 = vperm.xlu1 %12395, %v2202_v59  }
 0x161   : > { %v1745_v36 = vpop.f32.mrf.mxu0 }
 0x164   : > { %9155 = vmatmul.msk.bf16.gmra.mxu0 %vm1789_vm1, %v11723_v42 }
 0x169   : > { %v1747_v40 = vpop.f32.mrf.mxu0 }
 0x176   : > { %v1758_v38 = vpop.f32.mrf.mxu1 }
 0x177   : > { %v1759_v39 = vadd.f32 %v1758_v38, %v1745_v36  ;;  %v2206_v38 = vpop.permute.xlu2 %2205 }
 0x179   : > { %v1764_v41 = vpack.c.bf16 %v1759_v39, %v1759_v39 }
 0x17b   : > { %v2174_v43 = vsel %vm1796_vm0, %v1764_v41, 0 }
 0x17e   : > { %v1760_v45 = vpop.f32.mrf.mxu1 }
 0x188   : > { %v2211_v58 = vpop.permute.xlu2 %2210 }
 0x1a2   : > { %v1788_v28 = vpop.permute.xlu0 %1787 }
 0x1a3   : > { %v1798_v29 = vsel %vm1796_vm0, %v1788_v28, 0 }
 0x1a4   : > { %1807 = vmatpush.bf16.msra.mxu2 %v1798_v29 }
 0x1a7   : > { %9074 = vmatmul.msk.bf16.vlgmr.msra.gmra.mxu2 %vm1789_vm1, %v11712_v30 }
 0x1a8   : > { %1986 = vmatpush.bf16.msrb.mxu2 %v1977_v31 }
 0x1aa   : > { %v1922_v32 = vpop.permute.xlu0 %1921 }
 0x1ab   : > { %v1930_v34 = vsel %vm1796_vm0, %v1922_v32, 0 }
 0x1ac   : > { %1939 = vmatpush.bf16.msrb.mxu1 %v1930_v34  ;;  %2183 = vmatpush.bf16.msra.mxu2 %v2174_v43 }
 0x1af   : > { %9112 = vmatmul.msk.bf16.vlgmr.msrb.gmra.mxu1 %vm1789_vm1, %v11716_v35 }
 0x1b1   : > { %v1892_v3 = vpop.f32.mrf.mxu0 }
 0x1b3   : > { %v1847_v1 = vpop.f32.mrf.mxu3 }
 0x1b7   : > { %9075 = vmatmul.msk.bf16.gmra.mxu2 %vm1789_vm1, %v11713_v37 }
 0x1b9   : > { %v1894_v7 = vpop.f32.mrf.mxu0 }
 0x1bb   : > { %v1849_v6 = vpop.f32.mrf.mxu3 }
 0x1bf   : > { %9113 = vmatmul.msk.bf16.gmra.mxu1 %vm1789_vm1, %v11717_v44 }
 0x1c1   : > { %v1897_v11 = vpop.f32.mrf.mxu0 }
 0x1c2   : > { %v2021_v46 = vpop.permute.xlu1 %2020 }
 0x1c3   : > { %v2029_v47 = vsel %vm1796_vm0, %v2021_v46, 0  ;;  %v1852_v10 = vpop.f32.mrf.mxu3 }
 0x1c4   : > { %2038 = vmatpush.bf16.msrb.mxu3 %v2029_v47 }
 0x1c7   : > { %9140 = vmatmul.msk.bf16.vlgmr.msrb.gmra.mxu3 %vm1789_vm1, %v11720_v49  ;;  %9126 = vmatmul.msk.bf16.vlgmr.msrb.gmra.mxu2 %vm1789_vm1, %v11718_v50 }
 0x1c9   : > { %v1899_v17 = vpop.f32.mrf.mxu0 }
 0x1ca   : > { %v2119_v51 = vpop.permute.xlu1 %2118 }
 0x1cb   : > { %v2127_v52 = vsel %vm1796_vm0, %v2119_v51, 0  ;;  %v1854_v14 = vpop.f32.mrf.mxu3 }
 0x1cc   : > { %2136 = vmatpush.bf16.msra.mxu1 %v2127_v52 }
 0x1cf   : > { %9168 = vmatmul.msk.bf16.vlgmr.msra.gmra.mxu1 %vm1789_vm1, %v11724_v53 }
 0x1d1   : > { %v2089_v48 = vpop.f32.mrf.mxu0 }
 0x1d7   : > { %9141 = vmatmul.msk.bf16.gmra.mxu3 %vm1789_vm1, %v11721_v54  ;;  %9127 = vmatmul.msk.bf16.gmra.mxu2 %vm1789_vm1, %v11719_v55 }
 0x1d9   : > { %v2091_v34 = vpop.f32.mrf.mxu0 }
 0x1df   : > { %9169 = vmatmul.msk.bf16.gmra.mxu1 %vm1789_vm1, %v11725_v60 }
 0x1e1   : > { %v2094_v50 = vpop.f32.mrf.mxu0 }
 0x1e7   : > { %9182 = vmatmul.msk.bf16.vlgmr.msra.gmra.mxu2 %vm1789_vm1, %v11726_v62 }
 0x1f7   : > { %9183 = vmatmul.msk.bf16.gmra.mxu2 %vm1789_vm1, %v11727_v63 }
 0x22a   : > { %v1809_v0 = vpop.f32.mrf.mxu2 }
 0x22b   : > { %v1848_v16 = vadd.f32 %v1847_v1, %v1809_v0 }
 0x22c   : > { %v1941_v4 = vpop.f32.mrf.mxu1 }
 0x22d   : > { %v1902_v18 = vadd.f32 %v1892_v3, %v1848_v16 }
 0x22f   : > { %v1951_v22 = vadd.f32 %v1941_v4, %v1902_v18  ;;  %v2216_v4 = vpop.permute.xlu0 %2215 }
 0x232   : > { %v1811_v2 = vpop.f32.mrf.mxu2 }
 0x233   : > { %v1850_v23 = vadd.f32 %v1849_v6, %v1811_v2  ;;  %v2096_v2 = vpop.f32.mrf.mxu0 }
 0x234   : > { %v1943_v9 = vpop.f32.mrf.mxu1 }
 0x235   : > { %v1903_v25 = vadd.f32 %v1894_v7, %v1850_v23 }
 0x237   : > { %v1952_v30 = vadd.f32 %v1943_v9, %v1903_v25 }
 0x23a   : > { %v1814_v5 = vpop.f32.mrf.mxu2 }
 0x23b   : > { %v1853_v31 = vadd.f32 %v1852_v10, %v1814_v5 }
 0x23c   : > { %v1946_v13 = vpop.f32.mrf.mxu1 }
 0x23d   : > { %v1904_v35 = vadd.f32 %v1897_v11, %v1853_v31  ;;  %v11731_v31 = vld [vmem:[%s12704_s25 + $0x18] sm:$0xff] }
 0x23f   : > { %v1953_v41 = vadd.f32 %v1946_v13, %v1904_v35  ;;  %v11735_v35 = vld [vmem:[%s12704_s25 + $0x38] sm:$0xff] }
 0x242   : > { %v1816_v8 = vpop.f32.mrf.mxu2 }
 0x243   : > { %v1855_v42 = vadd.f32 %v1854_v14, %v1816_v8 }
 0x244   : > { %v1948_v19 = vpop.f32.mrf.mxu1 }
 0x245   : > { %v1905_v49 = vadd.f32 %v1899_v17, %v1855_v42  ;;  %v10802_v17 = vld [vmem:[%s14240_s6 + $0x10] sm:$0x3] }
 0x246   : > { %v6215_v18 = vunpack.c.l.bf16 %v10802_v17  ;;  %v11745_v17 = vld [vmem:[%s12709_s29 + $0x40] sm:$0xff] }
 0x247   : > { %v1954_v55 = vadd.f32 %v1948_v19, %v1905_v49 }
 0x24a   : > { %v1988_v12 = vpop.f32.mrf.mxu2  ;;  %v2040_v20 = vpop.f32.mrf.mxu3 }
 0x24b   : > { %v1998_v24 = vadd.f32 %v1988_v12, %v1951_v22  ;;  %v2221_v12 = vpop.permute.xlu1 %2220 }
 0x24c   : > { %v2138_v26 = vpop.f32.mrf.mxu1 }
 0x24d   : > { %v2050_v27 = vadd.f32 %v2040_v20, %v1998_v24 }
 0x24f   : > { %v2099_v32 = vadd.f32 %v2089_v48, %v2050_v27 }
 0x251   : > { %v2148_v36 = vadd.f32 %v2138_v26, %v2099_v32  ;;  %v11732_v32 = vld [vmem:[%s12704_s25 + $0x20] sm:$0xff] }
 0x252   : > { %v1990_v15 = vpop.f32.mrf.mxu2  ;;  %v2042_v28 = vpop.f32.mrf.mxu3 }
 0x253   : > { %v1999_v33 = vadd.f32 %v1990_v15, %v1952_v30  ;;  %v11730_v30 = vld [vmem:[%s12704_s25 + $0x10] sm:$0xff] }
 0x254   : > { %v2140_v39 = vpop.f32.mrf.mxu1 }
 0x255   : > { %v2051_v37 = vadd.f32 %v2042_v28, %v1999_v33  ;;  %v11734_v33 = vld [vmem:[%s12704_s25 + $0x30] sm:$0xff] }
 0x257   : > { %v2100_v45 = vadd.f32 %v2091_v34, %v2051_v37  ;;  %v11729_v34 = vld [vmem:[%s12704_s25 + $0x8] sm:$0xff]  ;;  %v11736_v37 = vld [vmem:[%s12704_s25 + $0x40] sm:$0xff] }
 0x259   : > { %v2149_v52 = vadd.f32 %v2140_v39, %v2100_v45  ;;  %v11744_v45 = vld [vmem:[%s12709_s29 + $0x38] sm:$0xff] }
 0x25a   : > { %v1993_v21 = vpop.f32.mrf.mxu2  ;;  %v2045_v43 = vpop.f32.mrf.mxu3 }
 0x25b   : > { %v2000_v46 = vadd.f32 %v1993_v21, %v1953_v41 }
 0x25c   : > { %v2143_v57 = vpop.f32.mrf.mxu1 }
 0x25d   : > { %v2052_v53 = vadd.f32 %v2045_v43, %v2000_v46  ;;  %v11752_v46 = vld [vmem:[%s12709_s29 + $0x78] sm:$0xff] }
 0x25f   : > { %v2101_v59 = vadd.f32 %v2094_v50, %v2052_v53 }
 0x261   : > { %v2150_v0 = vadd.f32 %v2143_v57, %v2101_v59 }
 0x262   : > { %v1995_v29 = vpop.f32.mrf.mxu2  ;;  %v2047_v62 = vpop.f32.mrf.mxu3 }
 0x263   : > { %v2001_v60 = vadd.f32 %v1995_v29, %v1954_v55  ;;  %v11728_v29 = vld [vmem:[%s12704_s25] sm:$0xff] }
 0x264   : > { %v2145_v8 = vpop.f32.mrf.mxu1 }
 0x265   : > { %v2053_v1 = vadd.f32 %v2047_v62, %v2001_v60 }
 0x267   : > { %v2102_v6 = vadd.f32 %v2096_v2, %v2053_v1 }
 0x269   : > { %v2151_v10 = vadd.f32 %v2145_v8, %v2102_v6  ;;  %v11738_v6 = vld [vmem:[%s12709_s29 + $0x8] sm:$0xff] }
 0x26a   : > { %v2185_v40 = vpop.f32.mrf.mxu2  ;;  %v11754_v8 = vld [vmem:[%s12709_s29 + $0x88] sm:$0xff] }
 0x26b   : > { %v2195_v44 = vadd.f32 %v2185_v40, %v2148_v36  ;;  %v11733_v36 = vld [vmem:[%s12704_s25 + $0x28] sm:$0xff] }
 0x26d   : > { %v2223_v47 = vadd.f32 %v2206_v38, %v2195_v44 }
 0x26f   : > { %v2227_v51 = vmax.f32 %v2223_v47, 0.0  ;;  %v11743_v47 = vld [vmem:[%s12709_s29 + $0x30] sm:$0xff] }
 0x271   : > { %2231 = vxpose.xlu2.b32.start [1/4] (short) (narrow) %v2227_v51, 64  ;;  %v11742_v51 = vld [vmem:[%s12709_s29 + $0x28] sm:$0xff] }
 0x272   : > { %v2187_v54 = vpop.f32.mrf.mxu2 }
 0x273   : > { %v2196_v56 = vadd.f32 %v2187_v54, %v2149_v52  ;;  %v11741_v54 = vld [vmem:[%s12709_s29 + $0x20] sm:$0xff] }
 0x275   : > { %v2224_v61 = vadd.f32 %v2211_v58, %v2196_v56 }
 0x277   : > { %v2228_v63 = vmax.f32 %v2224_v61, 0.0 }
 0x279   : > { %2232 = vxpose.xlu2.b32.cont [2/4] (short) (narrow) %v2228_v63, 64 }
 0x27a   : > { %v2190_v3 = vpop.f32.mrf.mxu2 }
 0x27b   : > { %v2197_v5 = vadd.f32 %v2190_v3, %v2150_v0  ;;  %v11740_v0 = vld [vmem:[%s12709_s29 + $0x18] sm:$0xff]  ;;  %v11739_v3 = vld [vmem:[%s12709_s29 + $0x10] sm:$0xff] }
 0x27d   : > { %v2225_v7 = vadd.f32 %v2216_v4, %v2197_v5  ;;  %v11751_v4 = vld [vmem:[%s12709_s29 + $0x70] sm:$0xff] }
 0x27f   : > { %v2229_v9 = vmax.f32 %v2225_v7, 0.0  ;;  %v11750_v7 = vld [vmem:[%s12709_s29 + $0x68] sm:$0xff] }
 0x281   : > { %2233 = vxpose.xlu2.b32.cont [3/4] (short) (narrow) %v2229_v9, 64  ;;  %v11737_v9 = vld [vmem:[%s12709_s29] sm:$0xff] }
 0x282   : > { %v2192_v11 = vpop.f32.mrf.mxu2 }
 0x283   : > { %v2198_v13 = vadd.f32 %v2192_v11, %v2151_v10  ;;  %v11749_v10 = vld [vmem:[%s12709_s29 + $0x60] sm:$0xff] }
 0x284   : > { %v11753_v11 = vld [vmem:[%s12709_s29 + $0x80] sm:$0xff] }
 0x285   : > { %v2226_v14 = vadd.f32 %v2221_v12, %v2198_v13 }
 0x287   : > { %v2230_v15 = vmax.f32 %v2226_v14, 0.0  ;;  %v11748_v14 = vld [vmem:[%s12709_s29 + $0x58] sm:$0xff] }
 0x289   : > { %2234 = vxpose.xlu2.b32.end [4/4] (short) (narrow) %v2230_v15, 64  ;;  %v11747_v15 = vld [vmem:[%s12709_s29 + $0x50] sm:$0xff] }
 0x30a   : > { %v2247_v16 = vpop.trf.xlu2 }
 0x312   : > { %6218 = vperm.xlu2 %12393, %v6215_v18   ;;  %v2248_v19 = vpop.trf.xlu2 }
 0x313   : > { %v2263_v28 = vpack.c.bf16 %v2248_v19, %v2247_v16  ;;  %v11746_v16 = vld [vmem:[%s12709_s29 + $0x48] sm:$0xff] }
 0x31a   : > { %v2249_v20 = vpop.trf.xlu2 }
 0x322   : > { %v2250_v21 = vpop.trf.xlu2 }
 0x323   : > { %v2264_v27 = vpack.c.bf16 %v2250_v21, %v2249_v20 }
 0x32a   : > { %v2251_v22 = vpop.trf.xlu2 }
 0x332   : > { %v2252_v23 = vpop.trf.xlu2 }
 0x333   : > { %v2265_v26 = vpack.c.bf16 %v2252_v23, %v2251_v22 }
 0x33a   : > { %v2253_v48 = vpop.trf.xlu2 }
 0x342   : > { %v2254_v24 = vpop.trf.xlu2 }
 0x343   : > { %v2266_v25 = vpack.c.bf16 %v2254_v24, %v2253_v48 }
 0x345   : > { %2282 = vmatpush.bf16.msra.mxu3 %v2266_v25  ;;  %2332 = vmatpush.bf16.msrb.mxu0 %v2266_v25 }
 0x346   : > { %2357 = vmatpush.bf16.msrb.mxu1 %v2266_v25  ;;  %2382 = vmatpush.bf16.msrb.mxu2 %v2266_v25 }
 0x349   : > { %2283 = vmatpush.bf16.msra.mxu3 %v2265_v26  ;;  %2333 = vmatpush.bf16.msrb.mxu0 %v2265_v26 }
 0x34a   : > { %2358 = vmatpush.bf16.msrb.mxu1 %v2265_v26  ;;  %2383 = vmatpush.bf16.msrb.mxu2 %v2265_v26 }
 0x34d   : > { %2284 = vmatpush.bf16.msra.mxu3 %v2264_v27  ;;  %2334 = vmatpush.bf16.msrb.mxu0 %v2264_v27 }
 0x34e   : > { %2359 = vmatpush.bf16.msrb.mxu1 %v2264_v27  ;;  %2384 = vmatpush.bf16.msrb.mxu2 %v2264_v27 }
 0x351   : > { %2285 = vmatpush.bf16.msra.mxu3 %v2263_v28  ;;  %2335 = vmatpush.bf16.msrb.mxu0 %v2263_v28 }
 0x352   : > { %2360 = vmatpush.bf16.msrb.mxu1 %v2263_v28  ;;  %2385 = vmatpush.bf16.msrb.mxu2 %v2263_v28 }
 0x354   : > { %9188 = vmatmul.msk.bf16.vlgmr.msra.gmra.mxu3 %vm2274_vm2, %v11728_v29  ;;  %9202 = vmatmul.msk.bf16.vlgmr.msrb.gmra.mxu0 %vm2274_vm2, %v11730_v30 }
 0x355   : > { %2307 = vmatpush.bf16.msrb.mxu3 %v2266_v25  ;;  %2432 = vmatpush.bf16.msra.mxu0 %v2266_v25 }
 0x356   : > { %2457 = vmatpush.bf16.msra.mxu1 %v2266_v25  ;;  %2482 = vmatpush.bf16.msra.mxu2 %v2266_v25 }
 0x357   : > { %9209 = vmatmul.msk.bf16.vlgmr.msrb.gmra.mxu1 %vm2274_vm2, %v11731_v31  ;;  %9216 = vmatmul.msk.bf16.vlgmr.msrb.gmra.mxu2 %vm2274_vm2, %v11732_v32 }
 0x359   : > { %2308 = vmatpush.bf16.msrb.mxu3 %v2265_v26  ;;  %2433 = vmatpush.bf16.msra.mxu0 %v2265_v26 }
 0x35a   : > { %2458 = vmatpush.bf16.msra.mxu1 %v2265_v26  ;;  %2483 = vmatpush.bf16.msra.mxu2 %v2265_v26 }
 0x35d   : > { %2309 = vmatpush.bf16.msrb.mxu3 %v2264_v27  ;;  %2434 = vmatpush.bf16.msra.mxu0 %v2264_v27 }
 0x35e   : > { %2459 = vmatpush.bf16.msra.mxu1 %v2264_v27  ;;  %2484 = vmatpush.bf16.msra.mxu2 %v2264_v27 }
 0x361   : > { %2310 = vmatpush.bf16.msrb.mxu3 %v2263_v28  ;;  %2435 = vmatpush.bf16.msra.mxu0 %v2263_v28 }
 0x362   : > { %2460 = vmatpush.bf16.msra.mxu1 %v2263_v28  ;;  %2485 = vmatpush.bf16.msra.mxu2 %v2263_v28 }
 0x364   : > { %9230 = vmatmul.msk.bf16.vlgmr.msra.gmra.mxu0 %vm2274_vm2, %v11734_v33  ;;  %9195 = vmatmul.msk.bf16.vlgmr.msrb.gmra.mxu3 %vm2274_vm2, %v11729_v34 }
 0x365   : > { %2407 = vmatpush.bf16.msra.mxu3 %v2266_v25  ;;  %2722 = vmatpush.bf16.msrb.mxu0 %v11752_v46 }
 0x366   : > { %2742 = vmatpush.bf16.msrb.mxu1 %v11754_v8  ;;  %v9321_v8 = vld [vmem:[%s14239_s8 + $0x4] sm:$0x3] }
 0x367   : > { %9237 = vmatmul.msk.bf16.vlgmr.msra.gmra.mxu1 %vm2274_vm2, %v11735_v35  ;;  %9244 = vmatmul.msk.bf16.vlgmr.msra.gmra.mxu2 %vm2274_vm2, %v11736_v37 }
 0x369   : > { %2408 = vmatpush.bf16.msra.mxu3 %v2265_v26  ;;  %2723 = vmatpush.bf16.msrb.mxu0 %v11751_v4  ;;  %v2753_v4 = vld [vmem:[%s14239_s8] sm:$0x3] }
 0x36a   : > { %2743 = vmatpush.bf16.msrb.mxu1 %v11753_v11 }
 0x36d   : > { %2409 = vmatpush.bf16.msra.mxu3 %v2264_v27  ;;  %2724 = vmatpush.bf16.msrb.mxu0 %v11750_v7  ;;  %v9331_v7 = vld [vmem:[%s14239_s8 + $0xe] sm:$0x3] }
 0x371   : > { %2410 = vmatpush.bf16.msra.mxu3 %v2263_v28  ;;  %2725 = vmatpush.bf16.msrb.mxu0 %v11749_v10  ;;  %v9333_v10 = vld [vmem:[%s14239_s8 + $0x10] sm:$0x3] }
 0x374   : > { %9223 = vmatmul.msk.bf16.vlgmr.msra.gmra.mxu3 %vm2274_vm2, %v11733_v36 }
 0x375   : > { %2708 = vmatpush.bf16.msrb.mxu3 %v11744_v45  ;;  %2726 = vmatpush.bf16.msrb.mxu0 %v11748_v14 }
 0x379   : > { %2709 = vmatpush.bf16.msrb.mxu3 %v11743_v47  ;;  %2727 = vmatpush.bf16.msrb.mxu0 %v11747_v15 }
 0x37d   : > { %2710 = vmatpush.bf16.msrb.mxu3 %v11742_v51  ;;  %2728 = vmatpush.bf16.msrb.mxu0 %v11746_v16  ;;  %v12451_v51 = vld [vmem:[%s14254_s3] ss:$0 sm:$0xff]  ;;  %v11761_v16 = vld [vmem:[%s12724_s14 + $0x30] sm:$0xff] }
 0x381   : > { %2711 = vmatpush.bf16.msrb.mxu3 %v11741_v54  ;;  %2729 = vmatpush.bf16.msrb.mxu0 %v11745_v17  ;;  %v11770_v17 = vld [vmem:[%s12724_s14 + $0x78] sm:$0xff] }
 0x385   : > { %2712 = vmatpush.bf16.msrb.mxu3 %v11740_v0 }
 0x389   : > { %2713 = vmatpush.bf16.msrb.mxu3 %v11739_v3  ;;  %v9323_v3 = vld [vmem:[%s14239_s8 + $0x6] sm:$0x3] }
 0x38d   : > { %2714 = vmatpush.bf16.msrb.mxu3 %v11738_v6  ;;  %v9327_v6 = vld [vmem:[%s14239_s8 + $0xa] sm:$0x3] }
 0x391   : > { %2715 = vmatpush.bf16.msrb.mxu3 %v11737_v9  ;;  %v9329_v9 = vld [vmem:[%s14239_s8 + $0xc] sm:$0x3] }
 0x3d1   : > { %v2337_v38 = vpop.f32.mrf.mxu0 }
 0x3d4   : > { %v2362_v43 = vpop.f32.mrf.mxu1 }
 0x3d7   : > { %v13200_v39 = vpop.f32.mrf.mxu3 }
 0x3d9   : > { %v2339_v40 = vpop.f32.mrf.mxu0 }
 0x3da   : > { %v12396_v41 = vpack.i.bf16 %v2339_v40, %v2337_v38  ;;  %v2387_v1 = vpop.f32.mrf.mxu2 }
 0x3dc   : > { %12397 = vrot.lane.b32.xlu0 %v12396_v41, %s12666_s18  ;;  %v2364_v52 = vpop.f32.mrf.mxu1 }
 0x3dd   : > { %v12406_v56 = vpack.i.bf16 %v2364_v52, %v2362_v43 }
 0x3df   : > { %v13203_v42 = vpop.f32.mrf.mxu3 }
 0x3e1   : > { %v2437_v53 = vpop.f32.mrf.mxu0 }
 0x3e2   : > { %v2389_v2 = vpop.f32.mrf.mxu2 }
 0x3e4   : > { %v2462_v57 = vpop.f32.mrf.mxu1 }
 0x3e7   : > { %v2312_v44 = vpop.f32.mrf.mxu3 }
 0x3e9   : > { %v2439_v58 = vpop.f32.mrf.mxu0 }
 0x3ea   : > { %v12411_v59 = vpack.i.bf16 %v2439_v58, %v2437_v53  ;;  %v2487_v5 = vpop.f32.mrf.mxu2 }
 0x3ec   : > { %v2464_v62 = vpop.f32.mrf.mxu1 }
 0x3ed   : > { %v12421_v63 = vpack.i.bf16 %v2464_v62, %v2462_v57 }
 0x3ef   : > { %v2314_v49 = vpop.f32.mrf.mxu3 }
 0x3f0   : > { %v12401_v50 = vpack.i.bf16 %v2314_v49, %v2312_v44 }
 0x3f2   : > { %12402 = vrot.lane.b32.xlu1 %v12401_v50, %s12668_s22  ;;  %v2489_v12 = vpop.f32.mrf.mxu2 }
 0x3f3   : > { %v2556_v13 = vpack.c.bf16 %v2489_v12, %v2487_v5  ;;  %v9325_v5 = vld [vmem:[%s14239_s8 + $0x8] sm:$0x3] }
 0x3f5   : > { %9317 = vmatmul.msk.bf16.vlgmr.msrb.gmra.mxu1 %vm2540_vm3, %v2556_v13  ;;  %v11762_v13 = vld [vmem:[%s12724_s14 + $0x38] sm:$0xff] }
 0x3f7   : > { %v2412_v55 = vpop.f32.mrf.mxu3 }
 0x3fa   : > { %12407 = vrot.lane.b32.xlu1 %v12406_v56, %s12669_s2 }
 0x3ff   : > { %v2414_v60 = vpop.f32.mrf.mxu3 }
 0x400   : > { %v12416_v61 = vpack.i.bf16 %v2414_v60, %v2412_v55 }
 0x402   : > { %12412 = vrot.lane.b32.xlu1 %v12411_v59, %s12666_s18  ;;  %12417 = vrot.lane.b32.xlu0 %v12416_v61, %s12668_s22 }
 0x40a   : > { %12422 = vrot.lane.b32.xlu0 %v12421_v63, %s12669_s2 }
 0x44e   : > { %v12398_v21 = vpop.permute.xlu0 %12397 }
 0x44f   : > { %v12400_v48 = vunpack.i.h.bf16 %v12398_v21  ;;  %v12399_v24 = vunpack.i.l.bf16 %v12398_v21  ;;  %v11777_v21 = vld [vmem:[%s12724_s14 + $0xb0] sm:$0xff] }
 0x464   : > { %v12403_v18 = vpop.permute.xlu1 %12402 }
 0x465   : > { %v12405_v19 = vunpack.i.h.bf16 %v12403_v18  ;;  %v12404_v20 = vunpack.i.l.bf16 %v12403_v18  ;;  %v11778_v18 = vld [vmem:[%s12724_s14 + $0xb8] sm:$0xff] }
 0x467   : > { %v2542_v22 = vsel %vm2540_vm3, %v13203_v42, %v12405_v19  ;;  %v2541_v23 = vsel %vm2540_vm3, %v13200_v39, %v12404_v20  ;;  %v11786_v19 = vld [vmem:[%s12724_s14 + $0xf8] sm:$0xff]  ;;  %v11769_v20 = vld [vmem:[%s12724_s14 + $0x70] sm:$0xff] }
 0x468   : > { %v2543_v28 = vsel %vm2274_vm2, %v2541_v23, %v12399_v24  ;;  %v2544_v29 = vsel %vm2274_vm2, %v2542_v22, %v12400_v48  ;;  %v11785_v22 = vld [vmem:[%s12724_s14 + $0xf0] sm:$0xff]  ;;  %v11760_v23 = vld [vmem:[%s12724_s14 + $0x28] sm:$0xff] }
 0x46c   : > { %v12408_v25 = vpop.permute.xlu1 %12407 }
 0x46d   : > { %v12410_v26 = vunpack.i.h.bf16 %v12408_v25  ;;  %v12409_v27 = vunpack.i.l.bf16 %v12408_v25 }
 0x46f   : > { %v2546_v30 = vsel %vm2545_vm4, %v2543_v28, %v12409_v27  ;;  %v2547_v31 = vsel %vm2545_vm4, %v2544_v29, %v12410_v26  ;;  %v6094_v26 = vld [vmem:[%s14240_s6] sm:$0x3]  ;;  %v10795_v27 = vld [vmem:[%s14240_s6 + $0x2] sm:$0x3] }
 0x470   : > { %v2554_v32 = vpack.c.bf16 %v2547_v31, %v2546_v30  ;;  %v11759_v29 = vld [vmem:[%s12724_s14 + $0x20] sm:$0xff]  ;;  %v6095_v30 = vunpack.c.l.bf16 %v6094_v26  ;;  %v6110_v31 = vunpack.c.l.bf16 %v10795_v27 }
 0x472   : > { %2716 = vmatmul.bf16.vlgmr.msrb.gmra.mxu3 %v2554_v32  ;;  %v2745_v52 = vpop.f32.mrf.mxu1  ;;  %v10796_v32 = vld [vmem:[%s14240_s6 + $0x4] sm:$0x3] }
 0x474   : > { %v12418_v33 = vpop.permute.xlu0 %12417  ;;  %v12413_v34 = vpop.permute.xlu1 %12412 }
 0x475   : > { %v12420_v35 = vunpack.i.h.bf16 %v12418_v33  ;;  %v12419_v36 = vunpack.i.l.bf16 %v12418_v33  ;;  %v12415_v37 = vunpack.i.h.bf16 %v12413_v34  ;;  %v12414_v38 = vunpack.i.l.bf16 %v12413_v34  ;;  %v10797_v33 = vld [vmem:[%s14240_s6 + $0x6] sm:$0x3]  ;;  %v11758_v34 = vld [vmem:[%s12724_s14 + $0x18] sm:$0xff] }
 0x477   : > { %v2549_v39 = vsel %vm2540_vm3, %v2389_v2, %v12420_v35  ;;  %v2548_v40 = vsel %vm2540_vm3, %v2387_v1, %v12419_v36  ;;  %v9319_v2 = vld [vmem:[%s14239_s8 + $0x2] sm:$0x3]  ;;  %v12431_v36 = vpack.i.bf16 %v6110_v31, %v6095_v30 }
 0x478   : > { %v2550_v43 = vsel %vm2274_vm2, %v2548_v40, %v12414_v38  ;;  %v2551_v45 = vsel %vm2274_vm2, %v2549_v39, %v12415_v37  ;;  %v6125_v37 = vunpack.c.l.bf16 %v10796_v32  ;;  %v6140_v38 = vunpack.c.l.bf16 %v10797_v33  ;;  %v10798_v40 = vld [vmem:[%s14240_s6 + $0x8] sm:$0x3] }
 0x47a   : > { %v2747_v61 = vpop.f32.mrf.mxu1 }
 0x47c   : > { %v12423_v41 = vpop.permute.xlu0 %12422 }
 0x47d   : > { %v12425_v42 = vunpack.i.h.bf16 %v12423_v41  ;;  %v12424_v44 = vunpack.i.l.bf16 %v12423_v41  ;;  %v10799_v41 = vld [vmem:[%s14240_s6 + $0xa] sm:$0x3] }
 0x47f   : > { %v2552_v46 = vsel %vm2545_vm4, %v2550_v43, %v12424_v44  ;;  %v2553_v47 = vsel %vm2545_vm4, %v2551_v45, %v12425_v42  ;;  %v11757_v42 = vld [vmem:[%s12724_s14 + $0x10] sm:$0xff]  ;;  %v12436_v44 = vpack.i.bf16 %v6140_v38, %v6125_v37  ;;  %v6155_v43 = vunpack.c.l.bf16 %v10798_v40  ;;  %v12452_v38 = vld [vmem:[%s12729_s19] ss:$0 sm:$0xff] }
 0x480   : > { %v2555_v49 = vpack.c.bf16 %v2553_v47, %v2552_v46  ;;  %v6170_v45 = vunpack.c.l.bf16 %v10799_v41  ;;  %v10800_v46 = vld [vmem:[%s14240_s6 + $0xc] sm:$0x3]  ;;  %v10801_v47 = vld [vmem:[%s14240_s6 + $0xe] sm:$0x3] }
 0x482   : > { %2730 = vmatmul.bf16.vlgmr.msrb.gmra.mxu0 %v2555_v49  ;;  %v11756_v49 = vld [vmem:[%s12724_s14 + $0x8] sm:$0xff] }
 0x4f5   : > { %v2717_v50 = vpop.f32.mrf.mxu3 }
 0x4f6   : > { %v2718_v54 = vadd.f32 %v12451_v51, %v2717_v50 }
 0x4fd   : > { %v2719_v55 = vpop.f32.mrf.mxu3 }
 0x4fe   : > { %v2720_v57 = vadd.f32 %v12451_v51, %v2719_v55  ;;  %v12441_v51 = vpack.i.bf16 %v6170_v45, %v6155_v43  ;;  %v11755_v55 = vld [vmem:[%s12724_s14] sm:$0xff] }
 0x4ff   : > { %v2731_v53 = vpop.f32.mrf.mxu0 }
 0x500   : > { %v2732_v56 = vadd.f32 %v2731_v53, %v2718_v54  ;;  %v6200_v53 = vunpack.c.l.bf16 %v10801_v47 }
 0x502   : > { %v2746_v59 = vadd.f32 %v2745_v52, %v2732_v56  ;;  %v6185_v52 = vunpack.c.l.bf16 %v10800_v46  ;;  %v11768_v56 = vld [vmem:[%s12724_s14 + $0x68] sm:$0xff] }
 0x504   : > { %v2750_v63 = vmax.f32 %v2746_v59, 0.0  ;;  %v12446_v54 = vpack.i.bf16 %v6200_v53, %v6185_v52  ;;  %v11767_v59 = vld [vmem:[%s12724_s14 + $0x60] sm:$0xff] }
 0x507   : > { %v2733_v58 = vpop.f32.mrf.mxu0 }
 0x508   : > { %v2734_v60 = vadd.f32 %v2733_v58, %v2720_v57  ;;  %v11776_v57 = vld [vmem:[%s12724_s14 + $0xa8] sm:$0xff] }
 0x509   : > { %v11784_v58 = vld [vmem:[%s12724_s14 + $0xe8] sm:$0xff] }
 0x50a   : > { %v2748_v62 = vadd.f32 %v2747_v61, %v2734_v60  ;;  %v11775_v60 = vld [vmem:[%s12724_s14 + $0xa0] sm:$0xff] }
 0x50c   : > { %v2751_v0 = vmax.f32 %v2748_v62, 0.0  ;;  %v11783_v62 = vld [vmem:[%s12724_s14 + $0xe0] sm:$0xff] }
 0x50e   : > { %v2752_v1 = vpack.c.bf16 %v2751_v0, %v2750_v63  ;;  %v11766_v0 = vld [vmem:[%s12724_s14 + $0x58] sm:$0xff] }
 0x510   : > { %2765 = vmatpush.bf16.msrb.mxu2 %v2752_v1  ;;  %2783 = vmatpush.bf16.msra.mxu1 %v2752_v1 }
 0x511   : > { %2819 = vmatpush.bf16.msra.mxu3 %v2752_v1  ;;  %2837 = vmatpush.bf16.msra.mxu0 %v2752_v1 }
 0x513   : > { %9320 = vmatmul.msk.bf16.vlgmr.msra.gmra.mxu1 %vm2754_vm5, %v9319_v2  ;;  %9318 = vmatmul.msk.bf16.vlgmr.msrb.gmra.mxu2 %vm2754_vm5, %v2753_v4  ;;  %v11774_v2 = vld [vmem:[%s12724_s14 + $0x98] sm:$0xff]  ;;  %v11789_v4 = vld [vmem:[%s12724_s14 + $0x110] sm:$0xff] }
 0x514   : > { %2801 = vmatpush.bf16.msra.mxu2 %v2752_v1  ;;  %2855 = vmatpush.bf16.msrb.mxu1 %v2752_v1 }
 0x515   : > { %2891 = vmatpush.bf16.msrb.mxu3 %v2752_v1  ;;  %2909 = vmatpush.bf16.msrb.mxu0 %v2752_v1 }
 0x516   : > { %9324 = vmatmul.msk.bf16.vlgmr.msra.gmra.mxu3 %vm2754_vm5, %v9323_v3  ;;  %9326 = vmatmul.msk.bf16.vlgmr.msra.gmra.mxu0 %vm2754_vm5, %v9325_v5  ;;  %v11782_v3 = vld [vmem:[%s12724_s14 + $0xd8] sm:$0xff]  ;;  %v11765_v5 = vld [vmem:[%s12724_s14 + $0x50] sm:$0xff] }
 0x518   : > { %2873 = vmatpush.bf16.msrb.mxu2 %v2752_v1  ;;  %3235 = vmatpush.bf16.msra.mxu1 %v11762_v13  ;;  %v11790_v1 = vld [vmem:[%s12724_s14 + $0x118] sm:$0xff]  ;;  %v11763_v13 = vld [vmem:[%s12724_s14 + $0x40] sm:$0xff] }
 0x519   : > { %3261 = vmatpush.bf16.msra.mxu3 %v11778_v18  ;;  %3274 = vmatpush.bf16.msra.mxu0 %v11786_v19  ;;  %v11787_v19 = vld [vmem:[%s12724_s14 + $0x100] sm:$0xff] }
 0x51c   : > { %3236 = vmatpush.bf16.msra.mxu1 %v11761_v16  ;;  %v11788_v16 = vld [vmem:[%s12724_s14 + $0x108] sm:$0xff] }
 0x51d   : > { %3262 = vmatpush.bf16.msra.mxu3 %v11777_v21  ;;  %3275 = vmatpush.bf16.msra.mxu0 %v11785_v22 }
 0x520   : > { %3237 = vmatpush.bf16.msra.mxu1 %v11760_v23 }
 0x521   : > { %3263 = vmatpush.bf16.msra.mxu3 %v11776_v57  ;;  %3276 = vmatpush.bf16.msra.mxu0 %v11784_v58  ;;  %v9483_v57 = vld [vmem:[%s12734_s24 + $0x2] sm:$0x1]  ;;  %v9485_v58 = vld [vmem:[%s12734_s24 + $0x3] sm:$0x1] }
 0x523   : > { %9328 = vmatmul.msk.bf16.vlgmr.msrb.gmra.mxu1 %vm2754_vm5, %v9327_v6  ;;  %9322 = vmatmul.msk.bf16.vlgmr.msra.gmra.mxu2 %vm2754_vm5, %v9321_v8  ;;  %v11773_v6 = vld [vmem:[%s12724_s14 + $0x90] sm:$0xff] }
 0x524   : > { %3248 = vmatpush.bf16.msra.mxu2 %v11770_v17  ;;  %3238 = vmatpush.bf16.msra.mxu1 %v11759_v29  ;;  %v11781_v8 = vld [vmem:[%s12724_s14 + $0xd0] sm:$0xff]  ;;  %v11779_v17 = vld [vmem:[%s12724_s14 + $0xc0] sm:$0xff] }
 0x525   : > { %3264 = vmatpush.bf16.msra.mxu3 %v11775_v60  ;;  %3277 = vmatpush.bf16.msra.mxu0 %v11783_v62  ;;  %v11838_v60 = vld [vmem:[%s14255_s7 + $0x174] sm:$0xf0]  ;;  %v9675_v62 = vld [vmem:[%s14255_s7 + $0x160] sm:$0xf] }
 0x526   : > { %9332 = vmatmul.msk.bf16.vlgmr.msrb.gmra.mxu3 %vm2754_vm5, %v9331_v7  ;;  %9334 = vmatmul.msk.bf16.vlgmr.msrb.gmra.mxu0 %vm2754_vm5, %v9333_v10  ;;  %v11764_v10 = vld [vmem:[%s12724_s14 + $0x48] sm:$0xff] }
 0x528   : > { %3249 = vmatpush.bf16.msra.mxu2 %v11769_v20  ;;  %3239 = vmatpush.bf16.msra.mxu1 %v11758_v34 }
 0x529   : > { %3265 = vmatpush.bf16.msra.mxu3 %v11774_v2  ;;  %3278 = vmatpush.bf16.msra.mxu0 %v11782_v3  ;;  %v11806_v2 = vld [vmem:[%s14255_s7 + $0x74] sm:$0xf0]  ;;  %v9619_v3 = vld [vmem:[%s14255_s7 + $0xf0] sm:$0xf] }
 0x52c   : > { %3240 = vmatpush.bf16.msra.mxu1 %v11757_v42  ;;  %3250 = vmatpush.bf16.msra.mxu2 %v11768_v56  ;;  %v9481_v56 = vld [vmem:[%s12734_s24 + $0x1] sm:$0x1] }
 0x52d   : > { %3266 = vmatpush.bf16.msra.mxu3 %v11773_v6  ;;  %3279 = vmatpush.bf16.msra.mxu0 %v11781_v8  ;;  %v11834_v8 = vld [vmem:[%s14255_s7 + $0x154] sm:$0xf0] }
 0x530   : > { %3241 = vmatpush.bf16.msra.mxu1 %v11756_v49  ;;  %3251 = vmatpush.bf16.msra.mxu2 %v11767_v59  ;;  %v9683_v59 = vld [vmem:[%s14255_s7 + $0x170] sm:$0xf] }
 0x533   : > { %9330 = vmatmul.msk.bf16.vlgmr.msrb.gmra.mxu2 %vm2754_vm5, %v9329_v9 }
 0x534   : > { %3242 = vmatpush.bf16.msra.mxu1 %v11755_v55  ;;  %3252 = vmatpush.bf16.msra.mxu2 %v11766_v0  ;;  %v3302_v55 = vld [vmem:[%s12734_s24] sm:$0x1]  ;;  %v9555_v0 = vld [vmem:[%s14255_s7 + $0x70] sm:$0xf] }
 0x538   : > { %3291 = vmatpush.bf16.msrb.mxu1 %v11790_v1  ;;  %3253 = vmatpush.bf16.msra.mxu2 %v11765_v5  ;;  %v9556_v5 = vor.u32 %v11806_v2, %v9555_v0 }
 0x53c   : > { %3292 = vmatpush.bf16.msrb.mxu1 %v11789_v4  ;;  %3254 = vmatpush.bf16.msra.mxu2 %v11764_v10  ;;  %v11822_v4 = vld [vmem:[%s14255_s7 + $0xf4] sm:$0xf0]  ;;  %v11804_v10 = vld [vmem:[%s14255_s7 + $0x64] sm:$0xf0] }
 0x53d   : > { %v9620_v6 = vor.u32 %v11822_v4, %v9619_v3  ;;  %v9627_v3 = vld [vmem:[%s14255_s7 + $0x100] sm:$0xf]  ;;  %v9507_v4 = vld [vmem:[%s14255_s7 + $0x10] sm:$0xf] }
 0x540   : > { %3255 = vmatpush.bf16.msra.mxu2 %v11763_v13  ;;  %3293 = vmatpush.bf16.msrb.mxu1 %v11788_v16  ;;  %v11820_v13 = vld [vmem:[%s14255_s7 + $0xe4] sm:$0xf0] }
 0x544   : > { %3294 = vmatpush.bf16.msrb.mxu1 %v11787_v19  ;;  %v9539_v19 = vld [vmem:[%s14255_s7 + $0x50] sm:$0xf] }
 0x590   : > { %v2785_v11 = vpop.f32.mrf.mxu1 }
 0x591   : > { %2916 = vrot.lane.b32.xlu1 %v2785_v11, %s12666_s18  ;;  %v11772_v11 = vld [vmem:[%s12724_s14 + $0x88] sm:$0xff] }
 0x592   : > { %3267 = vmatpush.bf16.msra.mxu3 %v11772_v11 }
 0x593   : > { %v2839_v63 = vpop.f32.mrf.mxu0 }
 0x596   : > { %v13264_v14 = vpop.f32.mrf.mxu2 }
 0x598   : > { %v2787_v15 = vpop.f32.mrf.mxu1 }
 0x599   : > { %v2821_v12 = vpop.f32.mrf.mxu3  ;;  %v11771_v15 = vld [vmem:[%s12724_s14 + $0x80] sm:$0xff] }
 0x59a   : > { %3268 = vmatpush.bf16.msra.mxu3 %v11771_v15 }
 0x59b   : > { %v2841_v9 = vpop.f32.mrf.mxu0 }
 0x59c   : > { %v9547_v9 = vld [vmem:[%s14255_s7 + $0x60] sm:$0xf] }
 0x59d   : > { %v9548_v11 = vor.u32 %v11804_v10, %v9547_v9  ;;  %v9939_v9 = vld [vmem:[%s14255_s7 + $0x370] sm:$0xf]  ;;  %v11902_v10 = vld [vmem:[%s14255_s7 + $0x374] sm:$0xf0] }
 0x59e   : > { %v2769_v24 = vpop.f32.mrf.mxu2 }
 0x5a0   : > { %v2857_v25 = vpop.f32.mrf.mxu1 }
 0x5a1   : > { %v2823_v48 = vpop.f32.mrf.mxu3  ;;  %v12426_v28 = vpack.i.bf16 %v2857_v25, %v2821_v12  ;;  %v11780_v12 = vld [vmem:[%s12724_s14 + $0xc8] sm:$0xff] }
 0x5a2   : > { %3280 = vmatpush.bf16.msra.mxu0 %v11780_v12  ;;  %v9611_v12 = vld [vmem:[%s14255_s7 + $0xe0] sm:$0xf] }
 0x5a3   : > { %12427 = vrot.lane.b32.xlu0 %v12426_v28, %s12666_s18  ;;  %v2911_v20 = vpop.f32.mrf.mxu0  ;;  %v9612_v16 = vor.u32 %v11820_v13, %v9611_v12  ;;  %v9715_v12 = vld [vmem:[%s14255_s7 + $0x1b0] sm:$0xf]  ;;  %v11846_v13 = vld [vmem:[%s14255_s7 + $0x1b4] sm:$0xf0] }
 0x5a4   : > { %v2939_v25 = vpack.c.bf16 %v2911_v20, %v2911_v20  ;;  %v11802_v20 = vld [vmem:[%s14255_s7 + $0x54] sm:$0xf0] }
 0x5a6   : > { %v2803_v61 = vpop.f32.mrf.mxu2  ;;  %3281 = vmatpush.bf16.msra.mxu0 %v11779_v17  ;;  %v9659_v17 = vld [vmem:[%s14255_s7 + $0x140] sm:$0xf] }
 0x5a8   : > { %v2859_v39 = vpop.f32.mrf.mxu1 }
 0x5a9   : > { %v2893_v35 = vpop.f32.mrf.mxu3 }
 0x5aa   : > { %2928 = vrot.lane.b32.xlu1 %v2893_v35, %s12666_s18 }
 0x5ab   : > { %12432 = vperm.xlu0 %12394, %v12431_v36   ;;  %v2913_v48 = vpop.f32.mrf.mxu0 }
 0x5ac   : > { %v11854_v48 = vld [vmem:[%s14255_s7 + $0x1f4] sm:$0xf0] }
 0x5ae   : > { %v2805_v7 = vpop.f32.mrf.mxu2 }
 0x5af   : > { %v9667_v7 = vld [vmem:[%s14255_s7 + $0x150] sm:$0xf] }
 0x5b0   : > { %v9668_v15 = vor.u32 %v11834_v8, %v9667_v7  ;;  %v9571_v7 = vld [vmem:[%s14255_s7 + $0x90] sm:$0xf]  ;;  %v11810_v8 = vld [vmem:[%s14255_s7 + $0x94] sm:$0xf0] }
 0x5b1   : > { %v2895_v50 = vpop.f32.mrf.mxu3 }
 0x5b2   : > { %12437 = vperm.xlu1 %12395, %v12436_v44  }
 0x5b3   : > { %12442 = vperm.xlu0 %12394, %v12441_v51  }
 0x5b6   : > { %v2875_v18 = vpop.f32.mrf.mxu2 }
 0x5ba   : > { %12447 = vperm.xlu1 %12395, %v12446_v54  }
 0x5be   : > { %v2877_v21 = vpop.f32.mrf.mxu2 }
 0x5bf   : > { %v9603_v21 = vld [vmem:[%s14255_s7 + $0xd0] sm:$0xf] }
 0x603   : > { %v2917_v22 = vpop.permute.xlu1 %2916 }
 0x604   : > { %v2931_v23 = vsel %vm2274_vm2, %v13264_v14, %v2917_v22  ;;  %v11818_v22 = vld [vmem:[%s14255_s7 + $0xd4] sm:$0xf0] }
 0x605   : > { %v2935_v24 = vpack.c.bf16 %v2931_v23, %v2931_v23  ;;  %v9747_v23 = vld [vmem:[%s14255_s7 + $0x1f0] sm:$0xf] }
 0x607   : > { %3243 = vmatmul.bf16.vlgmr.msra.gmra.mxu1 %v2935_v24  ;;  %v9540_v24 = vor.u32 %v11802_v20, %v9539_v19  ;;  %v9931_v19 = vld [vmem:[%s14255_s7 + $0x360] sm:$0xf] }
 0x608   : > { %v9499_v20 = vld [vmem:[%s14255_s7] sm:$0xf] }
 0x615   : > { %v12428_v26 = vpop.permute.xlu0 %12427 }
 0x616   : > { %v12430_v27 = vunpack.i.h.bf16 %v12428_v26  ;;  %v12429_v28 = vunpack.i.l.bf16 %v12428_v26 }
 0x617   : > { %9479 = vmatmul.msk.bf16.vlgmr.msrb.gmra.mxu1 %vm2274_vm2, %v2939_v25  ;;  %v9604_v25 = vor.u32 %v11818_v22, %v9603_v21  ;;  %v11792_v21 = vld [vmem:[%s14255_s7 + $0x4] sm:$0xf0]  ;;  %v9563_v22 = vld [vmem:[%s14255_s7 + $0x80] sm:$0xf] }
 0x618   : > { %v2933_v29 = vsel %vm2274_vm2, %v2839_v63, %v12430_v27  ;;  %v2932_v30 = vsel %vm2274_vm2, %v2803_v61, %v12429_v28  ;;  %v9684_v61 = vor.u32 %v11838_v60, %v9683_v59  ;;  %v11836_v63 = vld [vmem:[%s14255_s7 + $0x164] sm:$0xf0]  ;;  %v9651_v27 = vld [vmem:[%s14255_s7 + $0x130] sm:$0xf]  ;;  %v9531_v28 = vld [vmem:[%s14255_s7 + $0x40] sm:$0xf] }
 0x619   : > { %v2937_v31 = vpack.c.bf16 %v2933_v29, %v2933_v29  ;;  %v2936_v32 = vpack.c.bf16 %v2932_v30, %v2932_v30  ;;  %v9676_v1 = vor.u32 %v11836_v63, %v9675_v62  ;;  %v11800_v29 = vld [vmem:[%s14255_s7 + $0x44] sm:$0xf0]  ;;  %v11830_v30 = vld [vmem:[%s14255_s7 + $0x134] sm:$0xf0]  ;;  %v9579_v59 = vld [vmem:[%s14255_s7 + $0xa0] sm:$0xf] }
 0x61a   : > { %v11812_v60 = vld [vmem:[%s14255_s7 + $0xa4] sm:$0xf0]  ;;  %v9723_v62 = vld [vmem:[%s14255_s7 + $0x1c0] sm:$0xf] }
 0x61b   : > { %3256 = vmatmul.bf16.vlgmr.msra.gmra.mxu2 %v2936_v32  ;;  %3269 = vmatmul.bf16.vlgmr.msra.gmra.mxu3 %v2937_v31  ;;  %v9595_v31 = vld [vmem:[%s14255_s7 + $0xc0] sm:$0xf]  ;;  %v11816_v32 = vld [vmem:[%s14255_s7 + $0xc4] sm:$0xf0]  ;;  %v9580_v2 = vor.u32 %v11812_v60, %v9579_v59  ;;  %v11918_v59 = vld [vmem:[%s14255_s7 + $0x3f4] sm:$0xf0] }
 0x61c   : > { %v2929_v33 = vpop.permute.xlu1 %2928  ;;  %v11848_v63 = vld [vmem:[%s14255_s7 + $0x1c4] sm:$0xf0] }
 0x61d   : > { %v2934_v34 = vsel %vm2274_vm2, %v2875_v18, %v2929_v33  ;;  %v11832_v18 = vld [vmem:[%s14255_s7 + $0x144] sm:$0xf0]  ;;  %v9487_v33 = vld [vmem:[%s12734_s24 + $0x4] sm:$0x1] }
 0x61e   : > { %v2938_v14 = vpack.c.bf16 %v2934_v34, %v2934_v34  ;;  %v9660_v26 = vor.u32 %v11832_v18, %v9659_v17  ;;  %v9489_v34 = vld [vmem:[%s12734_s24 + $0x5] sm:$0x1]  ;;  %v9572_v18 = vor.u32 %v11810_v8, %v9571_v7  ;;  %v9995_v7 = vld [vmem:[%s14255_s7 + $0x3e0] sm:$0xf]  ;;  %v11916_v8 = vld [vmem:[%s14255_s7 + $0x3e4] sm:$0xf0] }
 0x620   : > { %3282 = vmatmul.bf16.vlgmr.msra.gmra.mxu0 %v2938_v14  ;;  %v9491_v14 = vld [vmem:[%s12734_s24 + $0x6] sm:$0x1] }
 0x684   : > { %v3244_v35 = vpop.f32.mrf.mxu1 }
 0x685   : > { %v3245_v41 = vadd.f32 %v12452_v38, %v3244_v35  ;;  %v9493_v35 = vld [vmem:[%s12734_s24 + $0x7] sm:$0x1]  ;;  %v11852_v38 = vld [vmem:[%s14255_s7 + $0x1e4] sm:$0xf0] }
 0x68c   : > { %v3246_v36 = vpop.f32.mrf.mxu1 }
 0x68d   : > { %v9748_v36 = vor.u32 %v11854_v48, %v9747_v23  ;;  %v9940_v23 = vor.u32 %v11902_v10, %v9939_v9  ;;  %v11808_v48 = vld [vmem:[%s14255_s7 + $0x84] sm:$0xf0] }
 0x694   : > { %v3296_v37 = vpop.f32.mrf.mxu1 }
 0x69c   : > { %v3298_v40 = vpop.f32.mrf.mxu1 }
 0x69d   : > { %v3283_v39 = vpop.f32.mrf.mxu0  ;;  %v9652_v40 = vor.u32 %v11830_v30, %v9651_v27  ;;  %v9875_v27 = vld [vmem:[%s14255_s7 + $0x2f0] sm:$0xf]  ;;  %v9500_v30 = vor.u32 %v11792_v21, %v9499_v20 }
 0x69e   : > { %v3257_v42 = vpop.f32.mrf.mxu2  ;;  %v3270_v44 = vpop.f32.mrf.mxu3  ;;  %v9987_v21 = vld [vmem:[%s14255_s7 + $0x3d0] sm:$0xf] }
 0x69f   : > { %v3258_v43 = vadd.f32 %v3257_v42, %v3245_v41  ;;  %v9596_v41 = vor.u32 %v11816_v32, %v9595_v31  ;;  %v9643_v42 = vld [vmem:[%s14255_s7 + $0x120] sm:$0xf]  ;;  %v11844_v32 = vld [vmem:[%s14255_s7 + $0x1a4] sm:$0xf0] }
 0x6a0   : > { %v9707_v31 = vld [vmem:[%s14255_s7 + $0x1a0] sm:$0xf] }
 0x6a1   : > { %v3271_v45 = vadd.f32 %v3270_v44, %v3258_v43  ;;  %v9523_v44 = vld [vmem:[%s14255_s7 + $0x30] sm:$0xf]  ;;  %v11798_v43 = vld [vmem:[%s14255_s7 + $0x34] sm:$0xf0] }
 0x6a3   : > { %v3284_v47 = vadd.f32 %v3283_v39, %v3271_v45  ;;  %v9532_v39 = vor.u32 %v11800_v29, %v9531_v28  ;;  %v11828_v45 = vld [vmem:[%s14255_s7 + $0x124] sm:$0xf0]  ;;  %v11886_v28 = vld [vmem:[%s14255_s7 + $0x2f4] sm:$0xf0]  ;;  %v9716_v29 = vor.u32 %v11846_v13, %v9715_v12  ;;  %v9899_v12 = vld [vmem:[%s14255_s7 + $0x320] sm:$0xf] }
 0x6a4   : > { %v9779_v13 = vld [vmem:[%s14255_s7 + $0x230] sm:$0xf] }
 0x6a5   : > { %v3285_v46 = vpop.f32.mrf.mxu0  ;;  %v3297_v49 = vadd.f32 %v3296_v37, %v3284_v47  ;;  %v9739_v37 = vld [vmem:[%s14255_s7 + $0x1e0] sm:$0xf]  ;;  %v11814_v47 = vld [vmem:[%s14255_s7 + $0xb4] sm:$0xf0] }
 0x6a6   : > { %v3259_v50 = vpop.f32.mrf.mxu2  ;;  %v3272_v51 = vpop.f32.mrf.mxu3  ;;  %v9587_v46 = vld [vmem:[%s14255_s7 + $0xb0] sm:$0xf] }
 0x6a7   : > { %v3300_v52 = vmax.f32 %v3297_v49, 0.0  ;;  %v9740_v49 = vor.u32 %v11852_v38, %v9739_v37  ;;  %v9731_v50 = vld [vmem:[%s14255_s7 + $0x1d0] sm:$0xf]  ;;  %v11850_v51 = vld [vmem:[%s14255_s7 + $0x1d4] sm:$0xf0] }
 0x6a8   : > { %v9803_v37 = vld [vmem:[%s14255_s7 + $0x260] sm:$0xf]  ;;  %v11868_v38 = vld [vmem:[%s14255_s7 + $0x264] sm:$0xf0] }
 0x6a9   : > { %v3301_v53 = vpack.c.bf16 %v3300_v52, %v3300_v52  ;;  %v9524_v52 = vor.u32 %v11798_v43, %v9523_v44  ;;  %v9699_v44 = vld [vmem:[%s14255_s7 + $0x190] sm:$0xf]  ;;  %v11842_v43 = vld [vmem:[%s14255_s7 + $0x194] sm:$0xf0] }
 0x6ab   : > { %v3307_v54 = vsel %vm1796_vm0, %v3301_v53, 0  ;;  %v9644_v53 = vor.u32 %v11828_v45, %v9643_v42  ;;  %v9708_v42 = vor.u32 %v11844_v32, %v9707_v31  ;;  %v9804_v45 = vor.u32 %v11868_v38, %v9803_v37  ;;  %v9971_v31 = vld [vmem:[%s14255_s7 + $0x3b0] sm:$0xf]  ;;  %v11910_v32 = vld [vmem:[%s14255_s7 + $0x3b4] sm:$0xf0] }
 0x6ac   : > { %3316 = vmatpush.bf16.msrb.mxu2 %v3307_v54  ;;  %3334 = vmatpush.bf16.msrb.mxu3 %v3307_v54  ;;  %v11906_v37 = vld [vmem:[%s14255_s7 + $0x394] sm:$0xf0] }
 0x6ad   : > { %3352 = vmatpush.bf16.msrb.mxu0 %v3307_v54  ;;  %3370 = vmatpush.bf16.msra.mxu1 %v3307_v54 }
 0x6af   : > { %9480 = vmatmul.msk.bf16.vlgmr.msrb.gmra.mxu2 %vm1789_vm1, %v3302_v55  ;;  %9482 = vmatmul.msk.bf16.vlgmr.msrb.gmra.mxu3 %vm1789_vm1, %v9481_v56  ;;  %v9635_v55 = vld [vmem:[%s14255_s7 + $0x110] sm:$0xf]  ;;  %v9515_v56 = vld [vmem:[%s14255_s7 + $0x20] sm:$0xf] }
 0x6b0   : > { %3388 = vmatpush.bf16.msra.mxu2 %v3307_v54  ;;  %3406 = vmatpush.bf16.msra.mxu3 %v3307_v54 }
 0x6b1   : > { %3424 = vmatpush.bf16.msra.mxu0 %v3307_v54  ;;  %3442 = vmatpush.bf16.msrb.mxu1 %v3307_v54 }
 0x6b2   : > { %9484 = vmatmul.msk.bf16.vlgmr.msrb.gmra.mxu0 %vm1789_vm1, %v9483_v57  ;;  %9486 = vmatmul.msk.bf16.vlgmr.msra.gmra.mxu1 %vm1789_vm1, %v9485_v58  ;;  %v11796_v57 = vld [vmem:[%s14255_s7 + $0x24] sm:$0xf0]  ;;  %v11826_v58 = vld [vmem:[%s14255_s7 + $0x114] sm:$0xf0] }
 0x6b3   : > { %v9516_v0 = vor.u32 %v11796_v57, %v9515_v56  ;;  %v9691_v56 = vld [vmem:[%s14255_s7 + $0x180] sm:$0xf]  ;;  %v11840_v57 = vld [vmem:[%s14255_s7 + $0x184] sm:$0xf0] }
 0x6b4   : > { %3460 = vmatpush.bf16.msrb.mxu2 %v3307_v54  ;;  %4345 = vmatpush.bf16.msrb.mxu3 %v9556_v5  ;;  %v9588_v54 = vor.u32 %v11814_v47, %v9587_v46  ;;  %v11794_v5 = vld [vmem:[%s14255_s7 + $0x14] sm:$0xf0] }
 0x6b5   : > { %4371 = vmatpush.bf16.msra.mxu1 %v9684_v61  ;;  %4358 = vmatpush.bf16.msrb.mxu0 %v9620_v6  ;;  %v9732_v61 = vor.u32 %v11850_v51, %v9731_v50  ;;  %v11824_v6 = vld [vmem:[%s14255_s7 + $0x104] sm:$0xf0]  ;;  %v9795_v50 = vld [vmem:[%s14255_s7 + $0x250] sm:$0xf]  ;;  %v11866_v51 = vld [vmem:[%s14255_s7 + $0x254] sm:$0xf0] }
 0x6b6   : > { %v9628_v17 = vor.u32 %v11824_v6, %v9627_v3  ;;  %v9796_v60 = vor.u32 %v11866_v51, %v9795_v50  ;;  %v9851_v3 = vld [vmem:[%s14255_s7 + $0x2c0] sm:$0xf]  ;;  %v11904_v50 = vld [vmem:[%s14255_s7 + $0x384] sm:$0xf0] }
 0x6b8   : > { %4346 = vmatpush.bf16.msrb.mxu3 %v9548_v11  ;;  %v9724_v11 = vor.u32 %v11848_v63, %v9723_v62  ;;  %v9907_v63 = vld [vmem:[%s14255_s7 + $0x330] sm:$0xf] }
 0x6b9   : > { %4372 = vmatpush.bf16.msra.mxu1 %v9676_v1  ;;  %4359 = vmatpush.bf16.msrb.mxu0 %v9612_v16  ;;  %v9636_v1 = vor.u32 %v11826_v58, %v9635_v55  ;;  %v9495_v16 = vld [vmem:[%s12734_s24 + $0x8] sm:$0x1]  ;;  %v9700_v55 = vor.u32 %v11842_v43, %v9699_v44  ;;  %v10003_v58 = vld [vmem:[%s14255_s7 + $0x3f0] sm:$0xf] }
 0x6ba   : > { %v10004_v6 = vor.u32 %v11918_v59, %v10003_v58  ;;  %v11876_v44 = vld [vmem:[%s14255_s7 + $0x2a4] sm:$0xf0]  ;;  %v9755_v58 = vld [vmem:[%s14255_s7 + $0x200] sm:$0xf] }
 0x6bb   : > { %v11856_v59 = vld [vmem:[%s14255_s7 + $0x204] sm:$0xf0] }
 0x6bc   : > { %4347 = vmatpush.bf16.msrb.mxu3 %v9540_v24  ;;  %v9811_v24 = vld [vmem:[%s14255_s7 + $0x270] sm:$0xf] }
 0x6bd   : > { %4373 = vmatpush.bf16.msra.mxu1 %v9668_v15  ;;  %4360 = vmatpush.bf16.msrb.mxu0 %v9604_v25  ;;  %v9508_v15 = vor.u32 %v11794_v5, %v9507_v4  ;;  %v11870_v25 = vld [vmem:[%s14255_s7 + $0x274] sm:$0xf0]  ;;  %v11880_v4 = vld [vmem:[%s14255_s7 + $0x2c4] sm:$0xf0]  ;;  %v9692_v5 = vor.u32 %v11840_v57, %v9691_v56 }
 0x6be   : > { %v11874_v56 = vld [vmem:[%s14255_s7 + $0x294] sm:$0xf0] }
 0x6bf   : > { %9488 = vmatmul.msk.bf16.vlgmr.msra.gmra.mxu2 %vm1789_vm1, %v9487_v33  ;;  %9490 = vmatmul.msk.bf16.vlgmr.msra.gmra.mxu3 %vm1789_vm1, %v9489_v34  ;;  %v9564_v33 = vor.u32 %v11808_v48, %v9563_v22  ;;  %v9812_v34 = vor.u32 %v11870_v25, %v9811_v24  ;;  %v11914_v22 = vld [vmem:[%s14255_s7 + $0x3d4] sm:$0xf0]  ;;  %v9891_v24 = vld [vmem:[%s14255_s7 + $0x310] sm:$0xf] }
 0x6c0   : > { %4384 = vmatpush.bf16.msra.mxu2 %v9748_v36  ;;  %4348 = vmatpush.bf16.msrb.mxu3 %v9532_v39  ;;  %v9923_v36 = vld [vmem:[%s14255_s7 + $0x350] sm:$0xf]  ;;  %v11898_v39 = vld [vmem:[%s14255_s7 + $0x354] sm:$0xf0] }
 0x6c1   : > { %4374 = vmatpush.bf16.msra.mxu1 %v9660_v26  ;;  %4361 = vmatpush.bf16.msrb.mxu0 %v9596_v41  ;;  %v11900_v26 = vld [vmem:[%s14255_s7 + $0x364] sm:$0xf0]  ;;  %v9924_v46 = vor.u32 %v11898_v39, %v9923_v36  ;;  %v11890_v25 = vld [vmem:[%s14255_s7 + $0x314] sm:$0xf0]  ;;  %v9955_v36 = vld [vmem:[%s14255_s7 + $0x390] sm:$0xf] }
 0x6c2   : > { %9492 = vmatmul.msk.bf16.vlgmr.msra.gmra.mxu0 %vm1789_vm1, %v9491_v14  ;;  %9494 = vmatmul.msk.bf16.vlgmr.msrb.gmra.mxu1 %vm1789_vm1, %v9493_v35  ;;  %v9932_v14 = vor.u32 %v11900_v26, %v9931_v19  ;;  %v9876_v35 = vor.u32 %v11886_v28, %v9875_v27  ;;  %v11884_v41 = vld [vmem:[%s14255_s7 + $0x2e4] sm:$0xf0]  ;;  %v9996_v19 = vor.u32 %v11916_v8, %v9995_v7  ;;  %v9979_v27 = vld [vmem:[%s14255_s7 + $0x3c0] sm:$0xf]  ;;  %v11819_v8 = vld [vmem:[%s14255_s7 + $0xe4] sm:$0xf] }
 0x6c3   : > { %v9988_v26 = vor.u32 %v11914_v22, %v9987_v21  ;;  %v11912_v28 = vld [vmem:[%s14255_s7 + $0x3c4] sm:$0xf0]  ;;  %v9956_v38 = vor.u32 %v11906_v37, %v9955_v36  ;;  %v9771_v39 = vld [vmem:[%s14255_s7 + $0x220] sm:$0xf]  ;;  %v11817_v21 = vld [vmem:[%s14255_s7 + $0xd4] sm:$0xf] }
 0x6c4   : > { %4385 = vmatpush.bf16.msra.mxu2 %v9740_v49  ;;  %4349 = vmatpush.bf16.msrb.mxu3 %v9524_v52  ;;  %v9915_v49 = vld [vmem:[%s14255_s7 + $0x340] sm:$0xf]  ;;  %v11896_v52 = vld [vmem:[%s14255_s7 + $0x344] sm:$0xf0]  ;;  %v11815_v37 = vld [vmem:[%s14255_s7 + $0xc4] sm:$0xf] }
 0x6c5   : > { %4375 = vmatpush.bf16.msra.mxu1 %v9652_v40  ;;  %4362 = vmatpush.bf16.msrb.mxu0 %v9588_v54  ;;  %v9867_v40 = vld [vmem:[%s14255_s7 + $0x2e0] sm:$0xf]  ;;  %v11882_v54 = vld [vmem:[%s14255_s7 + $0x2d4] sm:$0xf0] }
 0x6c6   : > { %v9868_v47 = vor.u32 %v11884_v41, %v9867_v40  ;;  %v11860_v40 = vld [vmem:[%s14255_s7 + $0x224] sm:$0xf0]  ;;  %v9835_v41 = vld [vmem:[%s14255_s7 + $0x2a0] sm:$0xf] }
 0x6c7   : > { %v9836_v43 = vor.u32 %v11876_v44, %v9835_v41  ;;  %v10051_v44 = vld [vmem:[%s14255_s7 + $0x450] sm:$0xf] }
 0x6c8   : > { %4386 = vmatpush.bf16.msra.mxu2 %v9732_v61  ;;  %4350 = vmatpush.bf16.msrb.mxu3 %v9516_v0  ;;  %v9916_v61 = vor.u32 %v11896_v52, %v9915_v49  ;;  %v9787_v0 = vld [vmem:[%s14255_s7 + $0x240] sm:$0xf]  ;;  %v9763_v52 = vld [vmem:[%s14255_s7 + $0x210] sm:$0xf] }
 0x6c9   : > { %4376 = vmatpush.bf16.msra.mxu1 %v9644_v53  ;;  %4363 = vmatpush.bf16.msrb.mxu0 %v9580_v2  ;;  %v9859_v53 = vld [vmem:[%s14255_s7 + $0x2d0] sm:$0xf]  ;;  %v11894_v2 = vld [vmem:[%s14255_s7 + $0x334] sm:$0xf0] }
 0x6ca   : > { %v9860_v62 = vor.u32 %v11882_v54, %v9859_v53  ;;  %v9908_v10 = vor.u32 %v11894_v2, %v9907_v63  ;;  %v11858_v53 = vld [vmem:[%s14255_s7 + $0x214] sm:$0xf0]  ;;  %v9827_v54 = vld [vmem:[%s14255_s7 + $0x290] sm:$0xf]  ;;  %v11837_v2 = vld [vmem:[%s14255_s7 + $0x174] sm:$0xf] }
 0x6cb   : > { %v9828_v57 = vor.u32 %v11874_v56, %v9827_v54  ;;  %v11829_v54 = vld [vmem:[%s14255_s7 + $0x134] sm:$0xf] }
 0x6cc   : > { %4387 = vmatpush.bf16.msra.mxu2 %v9724_v11  ;;  %4351 = vmatpush.bf16.msrb.mxu3 %v9508_v15  ;;  %v9852_v11 = vor.u32 %v11880_v4, %v9851_v3  ;;  %v11862_v15 = vld [vmem:[%s14255_s7 + $0x234] sm:$0xf0]  ;;  %v9685_v3 = vld [vmem:[%s14255_s7 + $0x178] sm:$0xf0] }
 0x6cd   : > { %4377 = vmatpush.bf16.msra.mxu1 %v9636_v1  ;;  %4364 = vmatpush.bf16.msrb.mxu0 %v9572_v18  ;;  %v11864_v1 = vld [vmem:[%s14255_s7 + $0x244] sm:$0xf0]  ;;  %v11878_v18 = vld [vmem:[%s14255_s7 + $0x2b4] sm:$0xf0]  ;;  %v9780_v20 = vor.u32 %v11862_v15, %v9779_v13  ;;  %v9688_v7 = vor.u32 %v11837_v2, %v9685_v3  ;;  %v9677_v13 = vld [vmem:[%s14255_s7 + $0x168] sm:$0xf0] }
 0x6ce   : > { %v9788_v9 = vor.u32 %v11864_v1, %v9787_v0  ;;  %v11821_v0 = vld [vmem:[%s14255_s7 + $0xf4] sm:$0xf]  ;;  %v9621_v1 = vld [vmem:[%s14255_s7 + $0xf8] sm:$0xf0]  ;;  %v10067_v15 = vld [vmem:[%s14255_s7 + $0x470] sm:$0xf] }
 0x6cf   : > { %9496 = vmatmul.msk.bf16.vlgmr.msrb.gmra.mxu2 %vm1789_vm1, %v9495_v16  ;;  %v11892_v16 = vld [vmem:[%s14255_s7 + $0x324] sm:$0xf0]  ;;  %v11811_v2 = vld [vmem:[%s14255_s7 + $0xa4] sm:$0xf] }
 0x6d0   : > { %4388 = vmatpush.bf16.msra.mxu2 %v9716_v29  ;;  %4352 = vmatpush.bf16.msrb.mxu3 %v9500_v30  ;;  %v9892_v29 = vor.u32 %v11890_v25, %v9891_v24  ;;  %v9980_v30 = vor.u32 %v11912_v28, %v9979_v27  ;;  %v11833_v24 = vld [vmem:[%s14255_s7 + $0x154] sm:$0xf]  ;;  %v9669_v25 = vld [vmem:[%s14255_s7 + $0x158] sm:$0xf0] }
 0x6d1   : > { %4378 = vmatpush.bf16.msra.mxu1 %v9628_v17  ;;  %4365 = vmatpush.bf16.msrb.mxu0 %v9564_v33  ;;  %v9843_v17 = vld [vmem:[%s14255_s7 + $0x2b0] sm:$0xf]  ;;  %v9972_v33 = vor.u32 %v11910_v32, %v9971_v31  ;;  %v11932_v31 = vld [vmem:[%s14255_s7 + $0x464] sm:$0xf0]  ;;  %v11803_v32 = vld [vmem:[%s14255_s7 + $0x64] sm:$0xf]  ;;  %v9672_v36 = vor.u32 %v11833_v24, %v9669_v25 }
 0x6d2   : > { %v9844_v48 = vor.u32 %v11878_v18, %v9843_v17  ;;  %v11805_v17 = vld [vmem:[%s14255_s7 + $0x74] sm:$0xf]  ;;  %v9557_v18 = vld [vmem:[%s14255_s7 + $0x78] sm:$0xf0] }
 0x6d3   : > { %v9637_v24 = vld [vmem:[%s14255_s7 + $0x118] sm:$0xf0] }
 0x6d4   : > { %4397 = vmatpush.bf16.msra.mxu3 %v9812_v34  ;;  %4389 = vmatpush.bf16.msra.mxu2 %v9708_v42  ;;  %v9963_v34 = vld [vmem:[%s14255_s7 + $0x3a0] sm:$0xf]  ;;  %v9772_v42 = vor.u32 %v11860_v40, %v9771_v39  ;;  %v11831_v39 = vld [vmem:[%s14255_s7 + $0x144] sm:$0xf]  ;;  %v9661_v40 = vld [vmem:[%s14255_s7 + $0x148] sm:$0xf0] }
 0x6d5   : > { %4423 = vmatpush.bf16.msrb.mxu1 %v9940_v23  ;;  %4410 = vmatpush.bf16.msra.mxu0 %v9876_v35  ;;  %v9900_v23 = vor.u32 %v11892_v16, %v9899_v12  ;;  %v11835_v12 = vld [vmem:[%s14255_s7 + $0x164] sm:$0xf]  ;;  %v11934_v16 = vld [vmem:[%s14255_s7 + $0x474] sm:$0xf0] }
 0x6d6   : > { %v10068_v28 = vor.u32 %v11934_v16, %v10067_v15  ;;  %v11797_v15 = vld [vmem:[%s14255_s7 + $0x34] sm:$0xf]  ;;  %v9525_v16 = vld [vmem:[%s14255_s7 + $0x38] sm:$0xf0] }
 0x6d8   : > { %4398 = vmatpush.bf16.msra.mxu3 %v9804_v45  ;;  %4390 = vmatpush.bf16.msra.mxu2 %v9700_v55  ;;  %v9883_v45 = vld [vmem:[%s14255_s7 + $0x300] sm:$0xf]  ;;  %v9764_v55 = vor.u32 %v11858_v53, %v9763_v52  ;;  %v9589_v53 = vld [vmem:[%s14255_s7 + $0xb8] sm:$0xf0] }
 0x6d9   : > { %4424 = vmatpush.bf16.msrb.mxu1 %v9932_v14  ;;  %4411 = vmatpush.bf16.msra.mxu0 %v9868_v47  ;;  %v11908_v14 = vld [vmem:[%s14255_s7 + $0x3a4] sm:$0xf0]  ;;  %v9947_v47 = vld [vmem:[%s14255_s7 + $0x380] sm:$0xf] }
 0x6da   : > { %v9964_v35 = vor.u32 %v11908_v14, %v9963_v34  ;;  %v9948_v51 = vor.u32 %v11904_v50, %v9947_v47  ;;  %v11813_v50 = vld [vmem:[%s14255_s7 + $0xb4] sm:$0xf] }
 0x6dc   : > { %4399 = vmatpush.bf16.msra.mxu3 %v9796_v60  ;;  %4391 = vmatpush.bf16.msra.mxu2 %v9692_v5  ;;  %v9756_v60 = vor.u32 %v11856_v59, %v9755_v58  ;;  %v10043_v58 = vld [vmem:[%s14255_s7 + $0x440] sm:$0xf]  ;;  %v11928_v59 = vld [vmem:[%s14255_s7 + $0x444] sm:$0xf0] }
 0x6dd   : > { %4425 = vmatpush.bf16.msrb.mxu1 %v9924_v46  ;;  %4412 = vmatpush.bf16.msra.mxu0 %v9860_v62  ;;  %v11888_v46 = vld [vmem:[%s14255_s7 + $0x304] sm:$0xf0] }
 0x6de   : > { %v9884_v49 = vor.u32 %v11888_v46, %v9883_v45  ;;  %v11872_v62 = vld [vmem:[%s14255_s7 + $0x284] sm:$0xf0]  ;;  %v11801_v45 = vld [vmem:[%s14255_s7 + $0x54] sm:$0xf]  ;;  %v9541_v46 = vld [vmem:[%s14255_s7 + $0x58] sm:$0xf0] }
 0x6e0   : > { %4436 = vmatpush.bf16.msrb.mxu2 %v10004_v6  ;;  %4400 = vmatpush.bf16.msra.mxu3 %v9788_v9  ;;  %v9624_v6 = vor.u32 %v11821_v0, %v9621_v1  ;;  %v9592_v0 = vor.u32 %v11813_v50, %v9589_v53  ;;  %v11793_v50 = vld [vmem:[%s14255_s7 + $0x14] sm:$0xf] }
 0x6e1   : > { %4426 = vmatpush.bf16.msrb.mxu1 %v9916_v61  ;;  %4413 = vmatpush.bf16.msra.mxu0 %v9852_v11  ;;  %v9819_v61 = vld [vmem:[%s14255_s7 + $0x280] sm:$0xf]  ;;  %v9613_v11 = vld [vmem:[%s14255_s7 + $0xe8] sm:$0xf0] }
 0x6e2   : > { %v9820_v63 = vor.u32 %v11872_v62, %v9819_v61  ;;  %v9533_v61 = vld [vmem:[%s14255_s7 + $0x48] sm:$0xf0] }
 0x6e4   : > { %4437 = vmatpush.bf16.msrb.mxu2 %v9996_v19  ;;  %4401 = vmatpush.bf16.msra.mxu3 %v9780_v20  ;;  %v9616_v19 = vor.u32 %v11819_v8, %v9613_v11  ;;  %v9680_v20 = vor.u32 %v11835_v12, %v9677_v13  ;;  %v10044_v8 = vor.u32 %v11928_v59, %v10043_v58  ;;  %v10035_v12 = vld [vmem:[%s14255_s7 + $0x430] sm:$0xf]  ;;  %v11926_v13 = vld [vmem:[%s14255_s7 + $0x434] sm:$0xf0]  ;;  %v9869_v58 = vld [vmem:[%s14255_s7 + $0x2e8] sm:$0xf0] }
 0x6e5   : > { %4427 = vmatpush.bf16.msrb.mxu1 %v9908_v10  ;;  %4414 = vmatpush.bf16.msra.mxu0 %v9844_v48  ;;  %v9605_v48 = vld [vmem:[%s14255_s7 + $0xd8] sm:$0xf0]  ;;  %v11899_v59 = vld [vmem:[%s14255_s7 + $0x364] sm:$0xf] }
 0x6e8   : > { %4438 = vmatpush.bf16.msrb.mxu2 %v9988_v26  ;;  %4402 = vmatpush.bf16.msra.mxu3 %v9772_v42 }
 0x6e9   : > { %4428 = vmatpush.bf16.msrb.mxu1 %v9900_v23  ;;  %4415 = vmatpush.bf16.msra.mxu0 %v9836_v43  ;;  %v11930_v43 = vld [vmem:[%s14255_s7 + $0x454] sm:$0xf0] }
 0x6ea   : > { %v10052_v56 = vor.u32 %v11930_v43, %v10051_v44 }
 0x6ec   : > { %4439 = vmatpush.bf16.msrb.mxu2 %v9980_v30  ;;  %4403 = vmatpush.bf16.msra.mxu3 %v9764_v55  ;;  %v10059_v30 = vld [vmem:[%s14255_s7 + $0x460] sm:$0xf]  ;;  %v9653_v55 = vld [vmem:[%s14255_s7 + $0x138] sm:$0xf0] }
 0x6ed   : > { %4429 = vmatpush.bf16.msrb.mxu1 %v9892_v29  ;;  %4416 = vmatpush.bf16.msra.mxu0 %v9828_v57  ;;  %v9560_v29 = vor.u32 %v11805_v17, %v9557_v18  ;;  %v10060_v41 = vor.u32 %v11932_v31, %v10059_v30  ;;  %v9544_v57 = vor.u32 %v11801_v45, %v9541_v46  ;;  %v10027_v30 = vld [vmem:[%s14255_s7 + $0x420] sm:$0xf]  ;;  %v11924_v31 = vld [vmem:[%s14255_s7 + $0x424] sm:$0xf0]  ;;  %v11901_v45 = vld [vmem:[%s14255_s7 + $0x374] sm:$0xf] }
 0x6ee   : > { %v9656_v1 = vor.u32 %v11829_v54, %v9653_v55  ;;  %v10028_v44 = vor.u32 %v11924_v31, %v10027_v30  ;;  %v9941_v46 = vld [vmem:[%s14255_s7 + $0x378] sm:$0xf0] }
 0x6f0   : > { %4440 = vmatpush.bf16.msrb.mxu2 %v9972_v33  ;;  %4404 = vmatpush.bf16.msra.mxu3 %v9756_v60  ;;  %v9549_v33 = vld [vmem:[%s14255_s7 + $0x68] sm:$0xf0]  ;;  %v11799_v60 = vld [vmem:[%s14255_s7 + $0x44] sm:$0xf] }
 0x6f1   : > { %4430 = vmatpush.bf16.msrb.mxu1 %v9884_v49  ;;  %4417 = vmatpush.bf16.msra.mxu0 %v9820_v63  ;;  %v9552_v42 = vor.u32 %v11803_v32, %v9549_v33  ;;  %v9664_v49 = vor.u32 %v11831_v39, %v9661_v40  ;;  %v9536_v11 = vor.u32 %v11799_v60, %v9533_v61  ;;  %v11795_v32 = vld [vmem:[%s14255_s7 + $0x24] sm:$0xf]  ;;  %v9517_v33 = vld [vmem:[%s14255_s7 + $0x28] sm:$0xf0] }
 0x6f2   : > { %v9629_v40 = vld [vmem:[%s14255_s7 + $0x108] sm:$0xf0]  ;;  %v9520_v43 = vor.u32 %v11795_v32, %v9517_v33  ;;  %v11879_v32 = vld [vmem:[%s14255_s7 + $0x2c4] sm:$0xf] }
 0x6f3   : > { %v9853_v33 = vld [vmem:[%s14255_s7 + $0x2c8] sm:$0xf0] }
 0x6f4   : > { %4441 = vmatpush.bf16.msrb.mxu2 %v9964_v35  ;;  %v9608_v35 = vor.u32 %v11817_v21, %v9605_v48  ;;  %v11825_v48 = vld [vmem:[%s14255_s7 + $0x114] sm:$0xf] }
 0x6f8   : > { %4442 = vmatpush.bf16.msrb.mxu2 %v9956_v38  ;;  %v9597_v38 = vld [vmem:[%s14255_s7 + $0xc8] sm:$0xf0] }
 0x6f9   : > { %v9600_v47 = vor.u32 %v11815_v37, %v9597_v38  ;;  %v11823_v37 = vld [vmem:[%s14255_s7 + $0x104] sm:$0xf] }
 0x6fa   : > { %v9632_v53 = vor.u32 %v11823_v37, %v9629_v40  ;;  %v11849_v37 = vld [vmem:[%s14255_s7 + $0x1d4] sm:$0xf]  ;;  %v9797_v40 = vld [vmem:[%s14255_s7 + $0x258] sm:$0xf0] }
 0x6fc   : > { %4443 = vmatpush.bf16.msrb.mxu2 %v9948_v51 }
 0x72f   : > { %v3354_v4 = vpop.f32.mrf.mxu0  ;;  %v3372_v5 = vpop.f32.mrf.mxu1 }
 0x730   : > { %v13470_v9 = vpack.c.bf16 %v3354_v4, %v3354_v4  ;;  %v13472_v10 = vpack.c.bf16 %v3372_v5, %v3372_v5  ;;  %v9581_v5 = vld [vmem:[%s14255_s7 + $0xa8] sm:$0xf0] }
 0x731   : > { %v9584_v17 = vor.u32 %v11811_v2, %v9581_v5  ;;  %v11791_v2 = vld [vmem:[%s14255_s7 + $0x4] sm:$0xf]  ;;  %v9501_v5 = vld [vmem:[%s14255_s7 + $0x8] sm:$0xf0] }
 0x732   : > { %4379 = vmatmul.bf16.vlgmr.msra.gmra.mxu1 %v13470_v9  ;;  %4392 = vmatmul.bf16.vlgmr.msra.gmra.mxu2 %v13472_v10  ;;  %v3318_v22 = vpop.f32.mrf.mxu2  ;;  %v3336_v23 = vpop.f32.mrf.mxu3 }
 0x733   : > { %4475 = vmatpush.bf16.msra.mxu1 %v9624_v6  ;;  %4488 = vmatpush.bf16.msra.mxu2 %v9688_v7  ;;  %v13487_v26 = vpack.c.bf16 %v3318_v22, %v3318_v22  ;;  %v13489_v27 = vpack.c.bf16 %v3336_v23, %v3336_v23  ;;  %v11827_v6 = vld [vmem:[%s14255_s7 + $0x124] sm:$0xf]  ;;  %v9645_v7 = vld [vmem:[%s14255_s7 + $0x128] sm:$0xf0]  ;;  %v10036_v22 = vor.u32 %v11926_v13, %v10035_v12  ;;  %v9573_v23 = vld [vmem:[%s14255_s7 + $0x98] sm:$0xf0] }
 0x734   : > { %v9648_v18 = vor.u32 %v11827_v6, %v9645_v7  ;;  %v11853_v6 = vld [vmem:[%s14255_s7 + $0x1f4] sm:$0xf]  ;;  %v9749_v7 = vld [vmem:[%s14255_s7 + $0x1f8] sm:$0xf0] }
 0x735   : > { %4353 = vmatmul.bf16.vlgmr.msrb.gmra.mxu3 %v13487_v26  ;;  %4366 = vmatmul.bf16.vlgmr.msrb.gmra.mxu0 %v13489_v27 }
 0x736   : > { %4449 = vmatpush.bf16.msrb.mxu3 %v10068_v28  ;;  %4462 = vmatpush.bf16.msrb.mxu0 %v9560_v29  ;;  %v9528_v29 = vor.u32 %v11797_v15, %v9525_v16  ;;  %v11881_v15 = vld [vmem:[%s14255_s7 + $0x2d4] sm:$0xf] }
 0x737   : > { %4476 = vmatpush.bf16.msra.mxu1 %v9616_v19  ;;  %4489 = vmatpush.bf16.msra.mxu2 %v9680_v20  ;;  %v3356_v34 = vpop.f32.mrf.mxu0  ;;  %v3374_v14 = vpop.f32.mrf.mxu1  ;;  %v11809_v19 = vld [vmem:[%s14255_s7 + $0x94] sm:$0xf] }
 0x738   : > { %v9576_v34 = vor.u32 %v11809_v19, %v9573_v23  ;;  %v9640_v14 = vor.u32 %v11825_v48, %v9637_v24  ;;  %v11897_v19 = vld [vmem:[%s14255_s7 + $0x354] sm:$0xf]  ;;  %v11851_v23 = vld [vmem:[%s14255_s7 + $0x1e4] sm:$0xf]  ;;  %v9741_v48 = vld [vmem:[%s14255_s7 + $0x1e8] sm:$0xf0] }
 0x739   : > { %v11867_v24 = vld [vmem:[%s14255_s7 + $0x264] sm:$0xf] }
 0x73a   : > { %v3320_v51 = vpop.f32.mrf.mxu2  ;;  %v3338_v52 = vpop.f32.mrf.mxu3  ;;  %4450 = vmatpush.bf16.msrb.mxu3 %v10060_v41  ;;  %4463 = vmatpush.bf16.msrb.mxu0 %v9552_v42  ;;  %v11885_v41 = vld [vmem:[%s14255_s7 + $0x2f4] sm:$0xf]  ;;  %v9877_v42 = vld [vmem:[%s14255_s7 + $0x2f8] sm:$0xf0] }
 0x73b   : > { %4477 = vmatpush.bf16.msra.mxu1 %v9608_v35  ;;  %4490 = vmatpush.bf16.msra.mxu2 %v9672_v36  ;;  %v11807_v35 = vld [vmem:[%s14255_s7 + $0x84] sm:$0xf]  ;;  %v9565_v36 = vld [vmem:[%s14255_s7 + $0x88] sm:$0xf0]  ;;  %v9509_v51 = vld [vmem:[%s14255_s7 + $0x18] sm:$0xf0]  ;;  %v9880_v55 = vor.u32 %v11885_v41, %v9877_v42  ;;  %v9856_v41 = vor.u32 %v11879_v32, %v9853_v33 }
 0x73c   : > { %v9568_v52 = vor.u32 %v11807_v35, %v9565_v36  ;;  %v9744_v35 = vor.u32 %v11851_v23, %v9741_v48  ;;  %v11887_v23 = vld [vmem:[%s14255_s7 + $0x304] sm:$0xf]  ;;  %v9885_v48 = vld [vmem:[%s14255_s7 + $0x308] sm:$0xf0]  ;;  %v9765_v32 = vld [vmem:[%s14255_s7 + $0x218] sm:$0xf0] }
 0x73e   : > { %4451 = vmatpush.bf16.msrb.mxu3 %v10052_v56  ;;  %4464 = vmatpush.bf16.msrb.mxu0 %v9544_v57  ;;  %v9944_v56 = vor.u32 %v11901_v45, %v9941_v46  ;;  %v11883_v57 = vld [vmem:[%s14255_s7 + $0x2e4] sm:$0xf]  ;;  %v11893_v45 = vld [vmem:[%s14255_s7 + $0x334] sm:$0xf]  ;;  %v9909_v46 = vld [vmem:[%s14255_s7 + $0x338] sm:$0xf0] }
 0x73f   : > { %4478 = vmatpush.bf16.msra.mxu1 %v9600_v47  ;;  %4491 = vmatpush.bf16.msra.mxu2 %v9664_v49  ;;  %v3426_v62 = vpop.f32.mrf.mxu0  ;;  %v3444_v63 = vpop.f32.mrf.mxu1  ;;  %v10019_v47 = vld [vmem:[%s14255_s7 + $0x410] sm:$0xf]  ;;  %v11922_v49 = vld [vmem:[%s14255_s7 + $0x414] sm:$0xf0]  ;;  %v9872_v12 = vor.u32 %v11883_v57, %v9869_v58  ;;  %v9837_v57 = vld [vmem:[%s14255_s7 + $0x2a8] sm:$0xf0] }
 0x740   : > { %v13514_v3 = vpack.c.bf16 %v3426_v62, %v3426_v62  ;;  %v13516_v4 = vpack.c.bf16 %v3444_v63, %v3444_v63  ;;  %v10020_v61 = vor.u32 %v11922_v49, %v10019_v47  ;;  %v9512_v62 = vor.u32 %v11793_v50, %v9509_v51  ;;  %v9933_v63 = vld [vmem:[%s14255_s7 + $0x368] sm:$0xf0]  ;;  %v11847_v50 = vld [vmem:[%s14255_s7 + $0x1c4] sm:$0xf] }
 0x741   : > { %v9936_v13 = vor.u32 %v11899_v59, %v9933_v63  ;;  %v9725_v51 = vld [vmem:[%s14255_s7 + $0x1c8] sm:$0xf0]  ;;  %v11891_v58 = vld [vmem:[%s14255_s7 + $0x324] sm:$0xf]  ;;  %v9717_v63 = vld [vmem:[%s14255_s7 + $0x1b8] sm:$0xf0] }
 0x742   : > { %4431 = vmatmul.bf16.vlgmr.msrb.gmra.mxu1 %v13514_v3  ;;  %4444 = vmatmul.bf16.vlgmr.msrb.gmra.mxu2 %v13516_v4  ;;  %v3390_v20 = vpop.f32.mrf.mxu2  ;;  %v3408_v21 = vpop.f32.mrf.mxu3  ;;  %v9901_v59 = vld [vmem:[%s14255_s7 + $0x328] sm:$0xf0] }
 0x743   : > { %4479 = vmatpush.bf16.msra.mxu1 %v9592_v0  ;;  %4492 = vmatpush.bf16.msra.mxu2 %v9656_v1  ;;  %v13531_v25 = vpack.c.bf16 %v3390_v20, %v3390_v20  ;;  %v13533_v28 = vpack.c.bf16 %v3408_v21, %v3408_v21  ;;  %v10011_v0 = vld [vmem:[%s14255_s7 + $0x400] sm:$0xf]  ;;  %v11920_v1 = vld [vmem:[%s14255_s7 + $0x404] sm:$0xf0]  ;;  %v9925_v20 = vld [vmem:[%s14255_s7 + $0x358] sm:$0xf0]  ;;  %v9752_v21 = vor.u32 %v11853_v6, %v9749_v7 }
 0x744   : > { %4452 = vmatpush.bf16.msrb.mxu3 %v10044_v8  ;;  %4465 = vmatpush.bf16.msrb.mxu0 %v9536_v11  ;;  %v11869_v8 = vld [vmem:[%s14255_s7 + $0x274] sm:$0xf]  ;;  %v9813_v11 = vld [vmem:[%s14255_s7 + $0x278] sm:$0xf0]  ;;  %v10012_v16 = vor.u32 %v11920_v1, %v10011_v0 }
 0x745   : > { %4405 = vmatmul.bf16.vlgmr.msra.gmra.mxu3 %v13531_v25  ;;  %4418 = vmatmul.bf16.vlgmr.msra.gmra.mxu0 %v13533_v28  ;;  %v11861_v0 = vld [vmem:[%s14255_s7 + $0x234] sm:$0xf]  ;;  %v9781_v1 = vld [vmem:[%s14255_s7 + $0x238] sm:$0xf0] }
 0x746   : > { %v11873_v6 = vld [vmem:[%s14255_s7 + $0x294] sm:$0xf]  ;;  %v9829_v7 = vld [vmem:[%s14255_s7 + $0x298] sm:$0xf0] }
 0x747   : > { %4480 = vmatpush.bf16.msra.mxu1 %v9584_v17  ;;  %4493 = vmatpush.bf16.msra.mxu2 %v9648_v18  ;;  %v3446_v38 = vpop.f32.mrf.mxu1  ;;  %v3428_v39 = vpop.f32.mrf.mxu0  ;;  %v9504_v17 = vor.u32 %v11791_v2, %v9501_v5  ;;  %v9861_v18 = vld [vmem:[%s14255_s7 + $0x2d8] sm:$0xf0]  ;;  %v9904_v5 = vor.u32 %v11891_v58, %v9901_v59  ;;  %v11911_v58 = vld [vmem:[%s14255_s7 + $0x3c4] sm:$0xf]  ;;  %v9981_v59 = vld [vmem:[%s14255_s7 + $0x3c8] sm:$0xf0] }
 0x748   : > { %4453 = vmatpush.bf16.msrb.mxu3 %v10036_v22  ;;  %4466 = vmatpush.bf16.msrb.mxu0 %v9528_v29  ;;  %v9816_v22 = vor.u32 %v11869_v8, %v9813_v11  ;;  %v9805_v29 = vld [vmem:[%s14255_s7 + $0x268] sm:$0xf0]  ;;  %v9864_v31 = vor.u32 %v11881_v15, %v9861_v18  ;;  %v9733_v38 = vld [vmem:[%s14255_s7 + $0x1d8] sm:$0xf0]  ;;  %v11865_v39 = vld [vmem:[%s14255_s7 + $0x254] sm:$0xf] }
 0x749   : > { %v9808_v36 = vor.u32 %v11867_v24, %v9805_v29  ;;  %v9736_v47 = vor.u32 %v11849_v37, %v9733_v38  ;;  %v9800_v49 = vor.u32 %v11865_v39, %v9797_v40  ;;  %v11889_v8 = vld [vmem:[%s14255_s7 + $0x314] sm:$0xf]  ;;  %v9893_v11 = vld [vmem:[%s14255_s7 + $0x318] sm:$0xf0]  ;;  %v11843_v15 = vld [vmem:[%s14255_s7 + $0x1a4] sm:$0xf] }
 0x74a   : > { %v3392_v54 = vpop.f32.mrf.mxu2  ;;  %v3410_v60 = vpop.f32.mrf.mxu3  ;;  %v9773_v18 = vld [vmem:[%s14255_s7 + $0x228] sm:$0xf0]  ;;  %v11855_v38 = vld [vmem:[%s14255_s7 + $0x204] sm:$0xf]  ;;  %v11917_v40 = vld [vmem:[%s14255_s7 + $0x3f4] sm:$0xf] }
 0x74b   : > { %4481 = vmatpush.bf16.msra.mxu1 %v9576_v34  ;;  %4494 = vmatpush.bf16.msra.mxu2 %v9640_v14  ;;  %v11895_v34 = vld [vmem:[%s14255_s7 + $0x344] sm:$0xf]  ;;  %v9917_v14 = vld [vmem:[%s14255_s7 + $0x348] sm:$0xf0]  ;;  %v9912_v54 = vor.u32 %v11893_v45, %v9909_v46  ;;  %v9728_v60 = vor.u32 %v11847_v50, %v9725_v51 }
 0x74c   : > { %4454 = vmatpush.bf16.msrb.mxu3 %v10028_v44  ;;  %4467 = vmatpush.bf16.msrb.mxu0 %v9520_v43  ;;  %v9920_v42 = vor.u32 %v11895_v34, %v9917_v14  ;;  %v11877_v44 = vld [vmem:[%s14255_s7 + $0x2b4] sm:$0xf]  ;;  %v9845_v43 = vld [vmem:[%s14255_s7 + $0x2b8] sm:$0xf0]  ;;  %v9888_v34 = vor.u32 %v11887_v23, %v9885_v48  ;;  %v9693_v37 = vld [vmem:[%s14255_s7 + $0x188] sm:$0xf0] }
 0x74d   : > { %v9757_v39 = vld [vmem:[%s14255_s7 + $0x208] sm:$0xf0]  ;;  %v11931_v51 = vld [vmem:[%s14255_s7 + $0x464] sm:$0xf] }
 0x74e   : > { %v9760_v45 = vor.u32 %v11855_v38, %v9757_v39  ;;  %v9997_v50 = vld [vmem:[%s14255_s7 + $0x3e8] sm:$0xf0]  ;;  %v11919_v23 = vld [vmem:[%s14255_s7 + $0x404] sm:$0xf]  ;;  %v11937_v39 = vld [vmem:[%s14256_s11 + $0x10] sm:$0xff] }
 0x74f   : > { %4482 = vmatpush.bf16.msra.mxu1 %v9568_v52  ;;  %4495 = vmatpush.bf16.msra.mxu2 %v9632_v53  ;;  %v11863_v52 = vld [vmem:[%s14255_s7 + $0x244] sm:$0xf]  ;;  %v9789_v53 = vld [vmem:[%s14255_s7 + $0x248] sm:$0xf0] }
 0x750   : > { %4455 = vmatpush.bf16.msrb.mxu3 %v10020_v61  ;;  %4468 = vmatpush.bf16.msrb.mxu0 %v9512_v62  ;;  %v9792_v61 = vor.u32 %v11863_v52, %v9789_v53  ;;  %v11845_v62 = vld [vmem:[%s14255_s7 + $0x1b4] sm:$0xf]  ;;  %v10061_v52 = vld [vmem:[%s14255_s7 + $0x468] sm:$0xf0] }
 0x751   : > { %v10013_v48 = vld [vmem:[%s14255_s7 + $0x408] sm:$0xf0] }
 0x752   : > { %4483 = vmatmul.bf16.vlgmr.msra.gmra.mxu1 %v13489_v27  ;;  %4496 = vmatmul.bf16.vlgmr.msra.gmra.mxu2 %v13470_v9  ;;  %v3462_v30 = vpop.f32.mrf.mxu2  ;;  %v9928_v27 = vor.u32 %v11897_v19, %v9925_v20  ;;  %v9832_v19 = vor.u32 %v11873_v6, %v9829_v7  ;;  %v9896_v20 = vor.u32 %v11889_v8, %v9893_v11  ;;  %v11907_v6 = vld [vmem:[%s14255_s7 + $0x3a4] sm:$0xf]  ;;  %v9965_v7 = vld [vmem:[%s14255_s7 + $0x3a8] sm:$0xf0] }
 0x753   : > { %4527 = vmatpush.bf16.msrb.mxu1 %v9880_v55  ;;  %4540 = vmatpush.bf16.msrb.mxu2 %v9944_v56  ;;  %v13576_v9 = vpack.c.bf16 %v3462_v30, %v3462_v30  ;;  %v11875_v55 = vld [vmem:[%s14255_s7 + $0x2a4] sm:$0xf]  ;;  %v11841_v30 = vld [vmem:[%s14255_s7 + $0x194] sm:$0xf]  ;;  %v10029_v11 = vld [vmem:[%s14255_s7 + $0x428] sm:$0xf0] }
 0x754   : > { %4456 = vmatpush.bf16.msrb.mxu3 %v10012_v16  ;;  %4469 = vmatpush.bf16.msrb.mxu0 %v9504_v17  ;;  %v9840_v2 = vor.u32 %v11875_v55, %v9837_v57  ;;  %v9709_v16 = vld [vmem:[%s14255_s7 + $0x1a8] sm:$0xf0]  ;;  %v11859_v17 = vld [vmem:[%s14255_s7 + $0x224] sm:$0xf]  ;;  %v10053_v55 = vld [vmem:[%s14255_s7 + $0x458] sm:$0xf0] }
 0x755   : > { %v9712_v24 = vor.u32 %v11843_v15, %v9709_v16  ;;  %v9776_v29 = vor.u32 %v11859_v17, %v9773_v18  ;;  %v11923_v8 = vld [vmem:[%s14255_s7 + $0x424] sm:$0xf]  ;;  %v11905_v15 = vld [vmem:[%s14255_s7 + $0x394] sm:$0xf]  ;;  %v9957_v16 = vld [vmem:[%s14255_s7 + $0x398] sm:$0xf0] }
 0x756   : > { %v11921_v17 = vld [vmem:[%s14255_s7 + $0x414] sm:$0xf]  ;;  %v10021_v18 = vld [vmem:[%s14255_s7 + $0x418] sm:$0xf0] }
 0x757   : > { %4528 = vmatpush.bf16.msrb.mxu1 %v9872_v12  ;;  %4541 = vmatpush.bf16.msrb.mxu2 %v9936_v13  ;;  %v9720_v12 = vor.u32 %v11845_v62, %v9717_v63  ;;  %v9784_v13 = vor.u32 %v11861_v0, %v9781_v1  ;;  %v9984_v62 = vor.u32 %v11911_v58, %v9981_v59  ;;  %v11909_v63 = vld [vmem:[%s14255_s7 + $0x3b4] sm:$0xf]  ;;  %v10037_v1 = vld [vmem:[%s14255_s7 + $0x438] sm:$0xf0] }
 0x758   : > { %4501 = vmatpush.bf16.msra.mxu3 %v9752_v21  ;;  %4514 = vmatpush.bf16.msra.mxu0 %v9816_v22  ;;  %v11871_v21 = vld [vmem:[%s14255_s7 + $0x284] sm:$0xf]  ;;  %v9821_v22 = vld [vmem:[%s14255_s7 + $0x288] sm:$0xf0]  ;;  %v11925_v0 = vld [vmem:[%s14255_s7 + $0x434] sm:$0xf] }
 0x759   : > { %4457 = vmatmul.bf16.vlgmr.msrb.gmra.mxu3 %v13576_v9  ;;  %4470 = vmatmul.bf16.vlgmr.msrb.gmra.mxu0 %v13487_v26  ;;  %v9848_v26 = vor.u32 %v11877_v44, %v9845_v43  ;;  %v9824_v33 = vor.u32 %v11871_v21, %v9821_v22  ;;  %v10069_v44 = vld [vmem:[%s14255_s7 + $0x478] sm:$0xf0]  ;;  %v11903_v21 = vld [vmem:[%s14255_s7 + $0x384] sm:$0xf]  ;;  %v9949_v22 = vld [vmem:[%s14255_s7 + $0x388] sm:$0xf0] }
 0x75a   : > { %v3464_v56 = vpop.f32.mrf.mxu2 }
 0x75b   : > { %4529 = vmatpush.bf16.msrb.mxu1 %v9864_v31  ;;  %4542 = vmatpush.bf16.msrb.mxu2 %v9928_v27  ;;  %v9701_v31 = vld [vmem:[%s14255_s7 + $0x198] sm:$0xf0]  ;;  %v11857_v27 = vld [vmem:[%s14255_s7 + $0x214] sm:$0xf] }
 0x75c   : > { %4502 = vmatpush.bf16.msra.mxu3 %v9744_v35  ;;  %4515 = vmatpush.bf16.msra.mxu0 %v9808_v36  ;;  %v9704_v14 = vor.u32 %v11841_v30, %v9701_v31  ;;  %v9768_v35 = vor.u32 %v11857_v27, %v9765_v32  ;;  %v11839_v36 = vld [vmem:[%s14255_s7 + $0x184] sm:$0xf]  ;;  %v11942_v30 = vld [vmem:[%s14256_s11 + $0x38] sm:$0xff]  ;;  %v11941_v27 = vld [vmem:[%s14256_s11 + $0x30] sm:$0xff] }
 0x75d   : > { %v9696_v43 = vor.u32 %v11839_v36, %v9693_v37  ;;  %v11958_v31 = vld [vmem:[%s14257_s1 + $0x38] sm:$0xff]  ;;  %v11957_v32 = vld [vmem:[%s14257_s1 + $0x30] sm:$0xff] }
 0x75e   : > { %v11954_v36 = vld [vmem:[%s14257_s1 + $0x18] sm:$0xff] }
 0x75f   : > { %4530 = vmatpush.bf16.msrb.mxu1 %v9856_v41  ;;  %4543 = vmatpush.bf16.msrb.mxu2 %v9920_v42  ;;  %v10005_v41 = vld [vmem:[%s14255_s7 + $0x3f8] sm:$0xf0]  ;;  %v11933_v42 = vld [vmem:[%s14255_s7 + $0x474] sm:$0xf] }
 0x760   : > { %4503 = vmatpush.bf16.msra.mxu3 %v9736_v47  ;;  %4516 = vmatpush.bf16.msra.mxu0 %v9800_v49  ;;  %v10008_v46 = vor.u32 %v11917_v40, %v10005_v41  ;;  %v10072_v47 = vor.u32 %v11933_v42, %v10069_v44  ;;  %v11915_v49 = vld [vmem:[%s14255_s7 + $0x3e4] sm:$0xf]  ;;  %v11953_v40 = vld [vmem:[%s14257_s1 + $0x10] sm:$0xff]  ;;  %v13674_v42 = vld [vmem:[%s14258_s28] sm:$0x3]  ;;  %s13725_s28 = sand.u32 1, %s12616_s16  }
 0x761   : > { %v10000_v53 = vor.u32 %v11915_v49, %v9997_v50  ;;  %v11936_v44 = vld [vmem:[%s14256_s11 + $0x8] sm:$0xff]  ;;  %v11935_v50 = vld [vmem:[%s14256_s11] sm:$0xff]  ;;  %s14203_s10 = scalar_lea.vmem [#allocation8], %s13725_s28  ;;  %s8525_s5 = scalar_lea.sflag [#allocation4], %s13725_s28 }
 0x763   : > { %4531 = vmatpush.bf16.msrb.mxu1 %v9848_v26  ;;  %4544 = vmatpush.bf16.msrb.mxu2 %v9912_v54  ;;  %v11913_v26 = vld [vmem:[%s14255_s7 + $0x3d4] sm:$0xf]  ;;  %v9989_v54 = vld [vmem:[%s14255_s7 + $0x3d8] sm:$0xf0] }
 0x764   : > { %4504 = vmatpush.bf16.msra.mxu3 %v9728_v60  ;;  %4517 = vmatpush.bf16.msra.mxu0 %v9792_v61  ;;  %v9992_v56 = vor.u32 %v11913_v26, %v9989_v54  ;;  %v11927_v60 = vld [vmem:[%s14255_s7 + $0x444] sm:$0xf]  ;;  %v10045_v61 = vld [vmem:[%s14255_s7 + $0x448] sm:$0xf0] }
 0x767   : > { %4532 = vmatpush.bf16.msrb.mxu1 %v9840_v2  ;;  %4545 = vmatpush.bf16.msrb.mxu2 %v9904_v5  ;;  %v10040_v5 = vor.u32 %v11925_v0, %v10037_v1 }
 0x768   : > { %4505 = vmatpush.bf16.msra.mxu3 %v9720_v12  ;;  %4518 = vmatpush.bf16.msra.mxu0 %v9784_v13  ;;  %v9968_v12 = vor.u32 %v11907_v6, %v9965_v7  ;;  %v10032_v13 = vor.u32 %v11923_v8, %v10029_v11  ;;  %v11950_v6 = vld [vmem:[%s14256_s11 + $0x78] sm:$0xff] }
 0x769   : > { %v11966_v7 = vld [vmem:[%s14257_s1 + $0x78] sm:$0xff] }
 0x76b   : > { %4533 = vmatpush.bf16.msrb.mxu1 %v9832_v19  ;;  %4546 = vmatpush.bf16.msrb.mxu2 %v9896_v20  ;;  %v9960_v19 = vor.u32 %v11905_v15, %v9957_v16  ;;  %v10024_v20 = vor.u32 %v11921_v17, %v10021_v18  ;;  %v11949_v16 = vld [vmem:[%s14256_s11 + $0x70] sm:$0xff] }
 0x76c   : > { %4506 = vmatpush.bf16.msra.mxu3 %v9712_v24  ;;  %4519 = vmatpush.bf16.msra.mxu0 %v9776_v29  ;;  %v9952_v24 = vor.u32 %v11903_v21, %v9949_v22  ;;  %v10016_v29 = vor.u32 %v11919_v23, %v10013_v48  ;;  %v11965_v17 = vld [vmem:[%s14257_s1 + $0x70] sm:$0xff]  ;;  %v11947_v22 = vld [vmem:[%s14256_s11 + $0x60] sm:$0xff] }
 0x76d   : > { %v11963_v23 = vld [vmem:[%s14257_s1 + $0x60] sm:$0xff] }
 0x76f   : > { %4534 = vmatpush.bf16.msrb.mxu1 %v9824_v33  ;;  %4547 = vmatpush.bf16.msrb.mxu2 %v9888_v34  ;;  %v11940_v33 = vld [vmem:[%s14256_s11 + $0x28] sm:$0xff] }
 0x770   : > { %4507 = vmatpush.bf16.msra.mxu3 %v9704_v14  ;;  %4520 = vmatpush.bf16.msra.mxu0 %v9768_v35  ;;  %v11956_v34 = vld [vmem:[%s14257_s1 + $0x28] sm:$0xff]  ;;  %v11939_v14 = vld [vmem:[%s14256_s11 + $0x20] sm:$0xff]  ;;  %v11938_v35 = vld [vmem:[%s14256_s11 + $0x18] sm:$0xff] }
 0x772   : > { %4535 = vmatmul.bf16.vlgmr.msrb.gmra.mxu1 %v13533_v28  ;;  %4548 = vmatmul.bf16.vlgmr.msrb.gmra.mxu2 %v13514_v3  ;;  %v10064_v28 = vor.u32 %v11931_v51, %v10061_v52  ;;  %v11929_v3 = vld [vmem:[%s14255_s7 + $0x454] sm:$0xf]  ;;  %v11951_v51 = vld [vmem:[%s14257_s1] sm:$0xff] }
 0x773   : > { %v10056_v57 = vor.u32 %v11929_v3, %v10053_v55  ;;  %4712 = vmatpush.bf16.msra.mxu1 %v11942_v30  ;;  %4725 = vmatpush.bf16.msra.mxu2 %v11950_v6  ;;  %v11945_v30 = vld [vmem:[%s14256_s11 + $0x50] sm:$0xff]  ;;  %v12038_v6 = vld [vmem:[#allocation2 + $0x218] sm:$0xf0] }
 0x774   : > { %4508 = vmatpush.bf16.msra.mxu3 %v9696_v43  ;;  %4521 = vmatpush.bf16.msra.mxu0 %v9760_v45  ;;  %v11952_v43 = vld [vmem:[%s14257_s1 + $0x8] sm:$0xff] }
 0x777   : > { %4509 = vmatmul.bf16.vlgmr.msra.gmra.mxu3 %v13472_v10  ;;  %4522 = vmatmul.bf16.vlgmr.msra.gmra.mxu0 %v13531_v25  ;;  %v10048_v10 = vor.u32 %v11927_v60, %v10045_v61  ;;  %v9973_v25 = vld [vmem:[%s14255_s7 + $0x3b8] sm:$0xf0] }
 0x778   : > { %4553 = vmatpush.bf16.msrb.mxu3 %v10008_v46  ;;  %4566 = vmatpush.bf16.msrb.mxu0 %v10072_v47  ;;  %v9976_v2 = vor.u32 %v11909_v63, %v9973_v25  ;;  %v4341_v46 = vperm.slane %v13674_v42, 0 }
 0x779   : > { %4713 = vmatpush.bf16.msra.mxu1 %v11941_v27  ;;  %4726 = vmatpush.bf16.msra.mxu2 %v11949_v16  ;;  %v12025_v16 = vld [vmem:[#allocation2 + $0x1b4] sm:$0xf] }
 0x77c   : > { %4554 = vmatpush.bf16.msrb.mxu3 %v10000_v53  ;;  %4567 = vmatpush.bf16.msrb.mxu0 %v10064_v28 }
 0x77d   : > { %4714 = vmatpush.bf16.msra.mxu1 %v11940_v33 }
 0x780   : > { %4555 = vmatpush.bf16.msrb.mxu3 %v9992_v56  ;;  %4568 = vmatpush.bf16.msrb.mxu0 %v10056_v57 }
 0x781   : > { %4715 = vmatpush.bf16.msra.mxu1 %v11939_v14  ;;  %v11960_v14 = vld [vmem:[%s14257_s1 + $0x48] sm:$0xff] }
 0x784   : > { %4556 = vmatpush.bf16.msrb.mxu3 %v9984_v62  ;;  %4569 = vmatpush.bf16.msrb.mxu0 %v10048_v10 }
 0x785   : > { %4716 = vmatpush.bf16.msra.mxu1 %v11938_v35  ;;  %v11959_v35 = vld [vmem:[%s14257_s1 + $0x40] sm:$0xff] }
 0x788   : > { %4557 = vmatpush.bf16.msrb.mxu3 %v9976_v2  ;;  %4570 = vmatpush.bf16.msrb.mxu0 %v10040_v5 }
 0x789   : > { %4717 = vmatpush.bf16.msra.mxu1 %v11937_v39 }
 0x78c   : > { %4558 = vmatpush.bf16.msrb.mxu3 %v9968_v12  ;;  %4571 = vmatpush.bf16.msrb.mxu0 %v10032_v13 }
 0x78d   : > { %4718 = vmatpush.bf16.msra.mxu1 %v11936_v44 }
 0x790   : > { %4559 = vmatpush.bf16.msrb.mxu3 %v9960_v19  ;;  %4572 = vmatpush.bf16.msrb.mxu0 %v10024_v20  ;;  %v11948_v19 = vld [vmem:[%s14256_s11 + $0x68] sm:$0xff] }
 0x791   : > { %4719 = vmatpush.bf16.msra.mxu1 %v11935_v50  ;;  %v11964_v20 = vld [vmem:[%s14257_s1 + $0x68] sm:$0xff]  ;;  %4727 = vmatpush.bf16.msra.mxu2 %v11948_v19 }
 0x794   : > { %4560 = vmatpush.bf16.msrb.mxu3 %v9952_v24  ;;  %4573 = vmatpush.bf16.msrb.mxu0 %v10016_v29  ;;  %v11946_v24 = vld [vmem:[%s14256_s11 + $0x58] sm:$0xff] }
 0x795   : > { %4728 = vmatpush.bf16.msra.mxu2 %v11947_v22  ;;  %v11962_v29 = vld [vmem:[%s14257_s1 + $0x58] sm:$0xff]  ;;  %v10763_v22 = vld [vmem:[#allocation2 + $0x45c] sm:$0xf0] }
 0x797   : > { %4561 = vmatmul.bf16.vlgmr.msrb.gmra.mxu3 %v13516_v4  ;;  %4574 = vmatmul.bf16.vlgmr.msrb.gmra.mxu0 %v13576_v9  ;;  %v11955_v4 = vld [vmem:[%s14257_s1 + $0x20] sm:$0xff] }
 0x798   : > { %4867 = vmatpush.bf16.msra.mxu3 %v11958_v31  ;;  %4880 = vmatpush.bf16.msra.mxu0 %v11966_v7  ;;  %v11961_v31 = vld [vmem:[%s14257_s1 + $0x50] sm:$0xff]  ;;  %v12034_v7 = vld [vmem:[#allocation2 + $0x1fc] sm:$0xf] }
 0x799   : > { %4729 = vmatpush.bf16.msra.mxu2 %v11946_v24 }
 0x79c   : > { %4868 = vmatpush.bf16.msra.mxu3 %v11957_v32  ;;  %4881 = vmatpush.bf16.msra.mxu0 %v11965_v17  ;;  %v10439_v17 = vld [vmem:[#allocation2 + $0x1d4] sm:$0xf0] }
 0x79d   : > { %4730 = vmatpush.bf16.msra.mxu2 %v11945_v30  ;;  %v12020_v30 = vld [vmem:[#allocation2 + $0x188] sm:$0xf0] }
 0x7a0   : > { %4869 = vmatpush.bf16.msra.mxu3 %v11956_v34  ;;  %4882 = vmatpush.bf16.msra.mxu0 %v11964_v20  ;;  %v11944_v34 = vld [vmem:[%s14256_s11 + $0x48] sm:$0xff]  ;;  %v12110_v20 = vld [vmem:[#allocation2 + $0x458] sm:$0xf0] }
 0x7a1   : > { %4731 = vmatpush.bf16.msra.mxu2 %v11944_v34 }
 0x7a4   : > { %4870 = vmatpush.bf16.msra.mxu3 %v11955_v4  ;;  %4883 = vmatpush.bf16.msra.mxu0 %v11963_v23  ;;  %v10442_v23 = vor.u32 %v12025_v16, %v10439_v17  ;;  %v10581_v16 = vld [vmem:[#allocation2 + $0x2d0] sm:$0xf] }
 0x7a8   : > { %4871 = vmatpush.bf16.msra.mxu3 %v11954_v36  ;;  %4884 = vmatpush.bf16.msra.mxu0 %v11962_v29  ;;  %v4342_v36 = vperm.slane %v13674_v42, 1  ;;  %v10401_v29 = vld [vmem:[#allocation2 + $0x168] sm:$0xf] }
 0x7ac   : > { %4872 = vmatpush.bf16.msra.mxu3 %v11953_v40  ;;  %4885 = vmatpush.bf16.msra.mxu0 %v11961_v31  ;;  %v12016_v31 = vld [vmem:[#allocation2 + $0x16c] sm:$0xf] }
 0x7af   : > { %v4380_v9 = vpop.f32.mrf.mxu1 }
 0x7b0   : > { %4873 = vmatpush.bf16.msra.mxu3 %v11952_v43  ;;  %4886 = vmatpush.bf16.msra.mxu0 %v11960_v14  ;;  %v12097_v14 = vld [vmem:[#allocation2 + $0x3f4] sm:$0xf] }
 0x7b2   : > { %v4367_v37 = vpop.f32.mrf.mxu0 }
 0x7b4   : > { %4874 = vmatpush.bf16.msra.mxu3 %v11951_v51  ;;  %4887 = vmatpush.bf16.msra.mxu0 %v11959_v35  ;;  %v10402_v35 = vor.u32 %v12020_v30, %v10401_v29  ;;  %v11980_v29 = vld [vmem:[#allocation2 + $0x4c] sm:$0xf]  ;;  %v10259_v30 = vld [vmem:[#allocation2 + $0x6c] sm:$0xf0] }
 0x7b5   : > { %v4393_v38 = vpop.f32.mrf.mxu2 }
 0x7b7   : > { %v4382_v41 = vpop.f32.mrf.mxu1 }
 0x7b8   : > { %v4354_v45 = vpop.f32.mrf.mxu3 }
 0x7b9   : > { %v4355_v53 = vadd.f32 %v4354_v45, %v4341_v46 }
 0x7ba   : > { %v4369_v47 = vpop.f32.mrf.mxu0 }
 0x7bb   : > { %v4368_v26 = vadd.f32 %v4367_v37, %v4355_v53 }
 0x7bd   : > { %v4395_v49 = vpop.f32.mrf.mxu2  ;;  %v4381_v56 = vadd.f32 %v4380_v9, %v4368_v26  ;;  %v11943_v9 = vld [vmem:[%s14256_s11 + $0x40] sm:$0xff] }
 0x7be   : > { %4732 = vmatpush.bf16.msra.mxu2 %v11943_v9  ;;  %v4770_v9 = vld [vmem:[%s14260_s26] sm:$0x1]  ;;  %s14204_s26 = scalar_lea.vmem [#allocation7], %s13725_s28 }
 0x7bf   : > { %v4432_v52 = vpop.f32.mrf.mxu1  ;;  %v4394_v58 = vadd.f32 %v4393_v38, %v4381_v56 }
 0x7c0   : > { %v4356_v28 = vpop.f32.mrf.mxu3 }
 0x7c2   : > { %v4419_v54 = vpop.f32.mrf.mxu0 }
 0x7c5   : > { %v4445_v3 = vpop.f32.mrf.mxu2 }
 0x7c7   : > { %v4434_v55 = vpop.f32.mrf.mxu1 }
 0x7c8   : > { %v4406_v57 = vpop.f32.mrf.mxu3 }
 0x7c9   : > { %v4407_v61 = vadd.f32 %v4406_v57, %v4394_v58  ;;  %v10211_v57 = vld [vmem:[%s14259_s23 + $0x10] sm:$0xf]  ;;  %v11970_v58 = vld [vmem:[%s14259_s23 + $0x14] sm:$0xf0] }
 0x7ca   : > { %v4421_v59 = vpop.f32.mrf.mxu0 }
 0x7cb   : > { %v4420_v10 = vadd.f32 %v4419_v54, %v4407_v61  ;;  %v11969_v59 = vld [vmem:[%s14259_s23 + $0x14] sm:$0xf]  ;;  %v10213_v61 = vld [vmem:[%s14259_s23 + $0x18] sm:$0xf0] }
 0x7cd   : > { %v4447_v60 = vpop.f32.mrf.mxu2  ;;  %v4433_v2 = vadd.f32 %v4432_v52, %v4420_v10  ;;  %v10203_v10 = vld [vmem:[%s14259_s23] sm:$0xf] }
 0x7ce   : > { %v10212_v60 = vor.u32 %v11970_v58, %v10211_v57  ;;  %v12002_v57 = vld [vmem:[#allocation2 + $0xf8] sm:$0xf0] }
 0x7cf   : > { %v4484_v62 = vpop.f32.mrf.mxu1  ;;  %v4446_v5 = vadd.f32 %v4445_v3, %v4433_v2 }
 0x7d0   : > { %v4408_v63 = vpop.f32.mrf.mxu3  ;;  %4942 = vmatpush.bf16.msrb.mxu1 %v10212_v60  ;;  %v10331_v60 = vld [vmem:[#allocation2 + $0xfc] sm:$0xf0] }
 0x7d1   : > { %v11968_v63 = vld [vmem:[%s14259_s23 + $0x4] sm:$0xf0] }
 0x7d5   : > { %v4497_v25 = vpop.f32.mrf.mxu2 }
 0x7d6   : > { %v4471_v0 = vpop.f32.mrf.mxu0 }
 0x7d7   : > { %v4486_v1 = vpop.f32.mrf.mxu1  ;;  %v4472_v39 = vadd.f32 %v4471_v0, %v4342_v36  ;;  %v10204_v0 = vor.u32 %v11968_v63, %v10203_v10  ;;  %v10617_v10 = vld [vmem:[#allocation2 + $0x318] sm:$0xf] }
 0x7d8   : > { %v10205_v1 = vld [vmem:[%s14259_s23 + $0x8] sm:$0xf0] }
 0x7d9   : > { %v4485_v41 = vadd.f32 %v4484_v62, %v4472_v39  ;;  %v10216_v62 = vor.u32 %v11969_v59, %v10213_v61  ;;  %4943 = vmatpush.bf16.msrb.mxu1 %v10204_v0  ;;  %v11998_v59 = vld [vmem:[#allocation2 + $0xdc] sm:$0xf] }
 0x7da   : > { %v12070_v0 = vld [vmem:[#allocation2 + $0x31c] sm:$0xf] }
 0x7db   : > { %v4498_v44 = vadd.f32 %v4497_v25, %v4485_v41  ;;  %4955 = vmatpush.bf16.msrb.mxu2 %v10216_v62  ;;  %v11967_v25 = vld [vmem:[%s14259_s23 + $0x4] sm:$0xf]  ;;  %v12092_v41 = vld [vmem:[#allocation2 + $0x3c8] sm:$0xf0] }
 0x7dc   : > { %v4458_v8 = vpop.f32.mrf.mxu3  ;;  %v10208_v2 = vor.u32 %v11967_v25, %v10205_v1  ;;  %v10619_v1 = vld [vmem:[#allocation2 + $0x33c] sm:$0xf0] }
 0x7dd   : > { %v4459_v11 = vadd.f32 %v4458_v8, %v4446_v5  ;;  %v4499_v12 = vpop.f32.mrf.mxu2  ;;  %v10473_v5 = vld [vmem:[#allocation2 + $0x1f8] sm:$0xf] }
 0x7de   : > { %v4473_v13 = vpop.f32.mrf.mxu0  ;;  %v10474_v8 = vor.u32 %v12038_v6, %v10473_v5  ;;  %v10437_v12 = vld [vmem:[#allocation2 + $0x1b0] sm:$0xf]  ;;  %v11993_v6 = vld [vmem:[#allocation2 + $0xb0] sm:$0xf0] }
 0x7df   : > { %v4579_v15 = vmax.f32 %v4459_v11, 0.0  ;;  %4956 = vmatpush.bf16.msrb.mxu2 %v10208_v2  ;;  %v10475_v11 = vld [vmem:[#allocation2 + $0x21c] sm:$0xf0]  ;;  %v12029_v13 = vld [vmem:[#allocation2 + $0x1d0] sm:$0xf0]  ;;  %v10334_v2 = vor.u32 %v11998_v59, %v10331_v60 }
 0x7e0   : > { %v10438_v19 = vor.u32 %v12029_v13, %v10437_v12  ;;  %v10293_v5 = vld [vmem:[#allocation2 + $0x90] sm:$0xf] }
 0x7e1   : > { %v4581_v18 = vpack.c.bf16 %v4579_v15, %v4579_v15  ;;  %v10478_v15 = vor.u32 %v12034_v7, %v10475_v11  ;;  %v10295_v11 = vld [vmem:[#allocation2 + $0xb4] sm:$0xf0]  ;;  %v10294_v17 = vor.u32 %v11993_v6, %v10293_v5 }
 0x7e3   : > { %4720 = vmatmul.bf16.vlgmr.msra.gmra.mxu1 %v4581_v18  ;;  %4875 = vmatmul.bf16.vlgmr.msra.gmra.mxu3 %v4581_v18  ;;  %v10761_v18 = vld [vmem:[#allocation2 + $0x438] sm:$0xf] }
 0x7e4   : > { %v4460_v21 = vpop.f32.mrf.mxu3  ;;  %5860 = vmatpush.bf16.msra.mxu1 %v10474_v8  ;;  %5886 = vmatpush.bf16.msrb.mxu3 %v10478_v15  ;;  %v11989_v8 = vld [vmem:[#allocation2 + $0x94] sm:$0xf]  ;;  %v10622_v15 = vor.u32 %v12070_v0, %v10619_v1  ;;  %v12026_v1 = vld [vmem:[#allocation2 + $0x1bc] sm:$0xf] }
 0x7e5   : > { %v12106_v21 = vld [vmem:[#allocation2 + $0x43c] sm:$0xf] }
 0x7e6   : > { %v10766_v24 = vor.u32 %v12106_v21, %v10763_v22  ;;  %v4615_v21 = vld [vmem:[%s14262_s15] sm:$0x1]  ;;  %s14263_s15 = sld [smem:[#allocation25_spill]] }
 0x7e8   : > { %5899 = vmatpush.bf16.msrb.mxu0 %v10766_v24  ;;  %5861 = vmatpush.bf16.msra.mxu1 %v10438_v19  ;;  %v12061_v19 = vld [vmem:[#allocation2 + $0x2d4] sm:$0xf]  ;;  %v11984_v24 = vld [vmem:[#allocation2 + $0x68] sm:$0xf0] }
 0x7e9   : > { %5887 = vmatpush.bf16.msrb.mxu3 %v10442_v23  ;;  %v10298_v23 = vor.u32 %v11989_v8, %v10295_v11  ;;  %v10733_v8 = vld [vmem:[#allocation2 + $0x3f8] sm:$0xf]  ;;  %v12102_v11 = vld [vmem:[#allocation2 + $0x418] sm:$0xf0] }
 0x7ec   : > { %5862 = vmatpush.bf16.msra.mxu1 %v10402_v35  ;;  %v10547_v35 = vld [vmem:[#allocation2 + $0x2ac] sm:$0xf0] }
 0x7ef   : > { %v4536_v48 = vpop.f32.mrf.mxu1 }
 0x7f4   : > { %v4523_v27 = vpop.f32.mrf.mxu0 }
 0x7f5   : > { %v4549_v32 = vpop.f32.mrf.mxu2 }
 0x7f7   : > { %v4538_v33 = vpop.f32.mrf.mxu1 }
 0x7f8   : > { %v12101_v33 = vld [vmem:[#allocation2 + $0x410] sm:$0xf0] }
 0x7fa   : > { %v4510_v4 = vpop.f32.mrf.mxu3 }
 0x7fb   : > { %v4511_v43 = vadd.f32 %v4510_v4, %v4498_v44  ;;  %v10727_v4 = vld [vmem:[#allocation2 + $0x414] sm:$0xf0]  ;;  %v12088_v44 = vld [vmem:[#allocation2 + $0x3ac] sm:$0xf] }
 0x7fc   : > { %v4525_v37 = vpop.f32.mrf.mxu0  ;;  %v10730_v36 = vor.u32 %v12097_v14, %v10727_v4  ;;  %v12056_v4 = vld [vmem:[#allocation2 + $0x2a8] sm:$0xf0] }
 0x7fd   : > { %v4551_v38 = vpop.f32.mrf.mxu2  ;;  %v4524_v45 = vadd.f32 %v4523_v27, %v4511_v43  ;;  %v10403_v27 = vld [vmem:[#allocation2 + $0x18c] sm:$0xf0]  ;;  %v10365_v37 = vld [vmem:[#allocation2 + $0x120] sm:$0xf]  ;;  %v12007_v43 = vld [vmem:[#allocation2 + $0x124] sm:$0xf] }
 0x7fe   : > { %v12011_v38 = vld [vmem:[#allocation2 + $0x140] sm:$0xf0]  ;;  %v10406_v39 = vor.u32 %v12016_v31, %v10403_v27  ;;  %5900 = vmatpush.bf16.msrb.mxu0 %v10730_v36  ;;  %v4896_v31 = vld [vmem:[%s1104_s27] sm:$0x1]  ;;  %v10262_v36 = vor.u32 %v11980_v29, %v10259_v30  ;;  %v12089_v29 = vld [vmem:[#allocation2 + $0x3b4] sm:$0xf] }
 0x7ff   : > { %v4537_v47 = vadd.f32 %v4536_v48, %v4524_v45  ;;  %v10762_v48 = vor.u32 %v12110_v20, %v10761_v18  ;;  %v10367_v45 = vld [vmem:[#allocation2 + $0x144] sm:$0xf0]  ;;  %v12065_v18 = vld [vmem:[#allocation2 + $0x2f0] sm:$0xf0]  ;;  %v10583_v20 = vld [vmem:[#allocation2 + $0x2f4] sm:$0xf0] }
 0x800   : > { %5888 = vmatpush.bf16.msrb.mxu3 %v10406_v39  ;;  %v10582_v27 = vor.u32 %v12065_v18, %v10581_v16  ;;  %v12021_v18 = vld [vmem:[#allocation2 + $0x190] sm:$0xf0]  ;;  %v10699_v30 = vld [vmem:[#allocation2 + $0x3d4] sm:$0xf0]  ;;  %s14264_s27 = sld [smem:[#allocation30_spill]] }
 0x801   : > { %v4550_v49 = vadd.f32 %v4549_v32, %v4537_v47  ;;  %v10725_v32 = vld [vmem:[#allocation2 + $0x3f0] sm:$0xf] }
 0x802   : > { %v4512_v40 = vpop.f32.mrf.mxu3  ;;  %v10726_v34 = vor.u32 %v12101_v33, %v10725_v32  ;;  %v10586_v32 = vor.u32 %v12061_v19, %v10583_v20  ;;  %v10545_v33 = vld [vmem:[#allocation2 + $0x288] sm:$0xf]  ;;  %v12017_v19 = vld [vmem:[#allocation2 + $0x174] sm:$0xf]  ;;  %v10411_v20 = vld [vmem:[#allocation2 + $0x194] sm:$0xf0] }
 0x803   : > { %v10689_v40 = vld [vmem:[#allocation2 + $0x3a8] sm:$0xf] }
 0x804   : > { %v10690_v47 = vor.u32 %v12092_v41, %v10689_v40  ;;  %v11971_v41 = vld [vmem:[#allocation2 + $0x4] sm:$0xf] }
 0x814   : > { %v4575_v46 = vpop.f32.mrf.mxu0 }
 0x81a   : > { %v4562_v50 = vpop.f32.mrf.mxu3 }
 0x81b   : > { %v4563_v51 = vadd.f32 %v4562_v50, %v4550_v49  ;;  %v10653_v50 = vld [vmem:[#allocation2 + $0x360] sm:$0xf] }
 0x81c   : > { %v4577_v42 = vpop.f32.mrf.mxu0 }
 0x81d   : > { %v4576_v52 = vadd.f32 %v4575_v46, %v4563_v51  ;;  %v10691_v46 = vld [vmem:[#allocation2 + $0x3cc] sm:$0xf0]  ;;  %v10366_v42 = vor.u32 %v12011_v38, %v10365_v37  ;;  %v10221_v37 = vld [vmem:[#allocation2] sm:$0xf]  ;;  %v11975_v38 = vld [vmem:[#allocation2 + $0x20] sm:$0xf0] }
 0x81e   : > { %v10694_v49 = vor.u32 %v12088_v44, %v10691_v46  ;;  %v10223_v44 = vld [vmem:[#allocation2 + $0x24] sm:$0xf0] }
 0x81f   : > { %v4580_v53 = vmax.f32 %v4576_v52, 0.0  ;;  %v12083_v52 = vld [vmem:[#allocation2 + $0x380] sm:$0xf0]  ;;  %5863 = vmatpush.bf16.msra.mxu1 %v10366_v42  ;;  %v10222_v42 = vor.u32 %v11975_v38, %v10221_v37  ;;  %v10226_v59 = vor.u32 %v11971_v41, %v10223_v44  ;;  %v12080_v37 = vld [vmem:[#allocation2 + $0x36c] sm:$0xf] }
 0x820   : > { %5901 = vmatpush.bf16.msrb.mxu0 %v10694_v49  ;;  %v10654_v61 = vor.u32 %v12083_v52, %v10653_v50  ;;  %v10483_v49 = vld [vmem:[#allocation2 + $0x224] sm:$0xf0]  ;;  %v10546_v50 = vor.u32 %v12056_v4, %v10545_v33  ;;  %v10509_v52 = vld [vmem:[#allocation2 + $0x240] sm:$0xf]  ;;  %v12008_v33 = vld [vmem:[#allocation2 + $0x12c] sm:$0xf]  ;;  %v10702_v4 = vor.u32 %v12089_v29, %v10699_v30 }
 0x821   : > { %v4582_v28 = vpack.c.bf16 %v4580_v53, %v4580_v53  ;;  %v12079_v53 = vld [vmem:[#allocation2 + $0x364] sm:$0xf]  ;;  %v10663_v38 = vld [vmem:[#allocation2 + $0x38c] sm:$0xf0]  ;;  %v4907_v30 = vld [vmem:[%s14263_s15] sm:$0x3] }
 0x822   : > { %v4564_v26 = vpop.f32.mrf.mxu3  ;;  %v12003_v41 = vld [vmem:[#allocation2 + $0x100] sm:$0xf0]  ;;  %s14265_s15 = sld [smem:[#allocation28_spill]] }
 0x823   : > { %4733 = vmatmul.bf16.vlgmr.msra.gmra.mxu2 %v4582_v28  ;;  %4888 = vmatmul.bf16.vlgmr.msra.gmra.mxu0 %v4582_v28  ;;  %v10655_v28 = vld [vmem:[#allocation2 + $0x384] sm:$0xf0]  ;;  %v11999_v44 = vld [vmem:[#allocation2 + $0xe4] sm:$0xf] }
 0x824   : > { %5873 = vmatpush.bf16.msra.mxu2 %v10762_v48  ;;  %v10658_v62 = vor.u32 %v12079_v53, %v10655_v28  ;;  %v10257_v48 = vld [vmem:[#allocation2 + $0x48] sm:$0xf]  ;;  %v12047_v53 = vld [vmem:[#allocation2 + $0x260] sm:$0xf0] }
 0x825   : > { %v10258_v14 = vor.u32 %v11984_v24, %v10257_v48  ;;  %v12043_v28 = vld [vmem:[#allocation2 + $0x244] sm:$0xf]  ;;  %v10510_v0 = vor.u32 %v12047_v53, %v10509_v52  ;;  %v12093_v48 = vld [vmem:[#allocation2 + $0x3d0] sm:$0xf0]  ;;  %v11994_v52 = vld [vmem:[#allocation2 + $0xb8] sm:$0xf0] }
 0x826   : > { %5902 = vmatpush.bf16.msrb.mxu0 %v10658_v62  ;;  %v10771_v62 = vld [vmem:[#allocation2 + $0x464] sm:$0xf0]  ;;  %v11990_v53 = vld [vmem:[#allocation2 + $0x9c] sm:$0xf] }
 0x828   : > { %5874 = vmatpush.bf16.msra.mxu2 %v10726_v34 }
 0x82a   : > { %5903 = vmatpush.bf16.msrb.mxu0 %v10622_v15  ;;  %v10735_v15 = vld [vmem:[#allocation2 + $0x41c] sm:$0xf0] }
 0x82c   : > { %5875 = vmatpush.bf16.msra.mxu2 %v10690_v47  ;;  %v12035_v47 = vld [vmem:[#allocation2 + $0x204] sm:$0xf] }
 0x82e   : > { %5904 = vmatpush.bf16.msrb.mxu0 %v10586_v32  ;;  %v12012_v32 = vld [vmem:[#allocation2 + $0x148] sm:$0xf0] }
 0x830   : > { %5876 = vmatpush.bf16.msra.mxu2 %v10654_v61  ;;  %v12107_v61 = vld [vmem:[#allocation2 + $0x444] sm:$0xf] }
 0x860   : > { %v13698_v54 = vpop.f32.mrf.mxu1 }
 0x861   : > { %v4722_v34 = vadd.f32 %v13698_v54, %v4615_v21  ;;  %v12039_v54 = vld [vmem:[#allocation2 + $0x220] sm:$0xf0]  ;;  %v10734_v21 = vor.u32 %v12102_v11, %v10733_v8  ;;  %v11972_v8 = vld [vmem:[#allocation2 + $0xc] sm:$0xf] }
 0x866   : > { %v13700_v3 = vpop.f32.mrf.mxu3 }
 0x867   : > { %v4877_v51 = vadd.f32 %v13700_v3, %v4770_v9  ;;  %v12074_v3 = vld [vmem:[#allocation2 + $0x338] sm:$0xf0]  ;;  %v12052_v9 = vld [vmem:[#allocation2 + $0x28c] sm:$0xf] }
 0x868   : > { %v4723_v55 = vpop.f32.mrf.mxu1  ;;  %v10618_v13 = vor.u32 %v12074_v3, %v10617_v10  ;;  %v10486_v3 = vor.u32 %v12035_v47, %v10483_v49  ;;  %v12071_v49 = vld [vmem:[#allocation2 + $0x324] sm:$0xf] }
 0x869   : > { %v10370_v55 = vor.u32 %v12007_v43, %v10367_v45  ;;  %v10481_v43 = vld [vmem:[#allocation2 + $0x200] sm:$0xf] }
 0x86a   : > { %5877 = vmatpush.bf16.msra.mxu2 %v10618_v13  ;;  %v10482_v60 = vor.u32 %v12039_v54, %v10481_v43  ;;  %v12098_v13 = vld [vmem:[#allocation2 + $0x3fc] sm:$0xf]  ;;  %v10339_v43 = vld [vmem:[#allocation2 + $0x104] sm:$0xf0]  ;;  %v12075_v54 = vld [vmem:[#allocation2 + $0x340] sm:$0xf0] }
 0x86b   : > { %5889 = vmatpush.bf16.msrb.mxu3 %v10370_v55  ;;  %v10511_v55 = vld [vmem:[#allocation2 + $0x264] sm:$0xf0] }
 0x86c   : > { %v10514_v5 = vor.u32 %v12043_v28, %v10511_v55  ;;  %v10303_v28 = vld [vmem:[#allocation2 + $0xbc] sm:$0xf0] }
 0x86e   : > { %v4878_v56 = vpop.f32.mrf.mxu3  ;;  %5878 = vmatpush.bf16.msra.mxu2 %v10582_v27  ;;  %v10373_v27 = vld [vmem:[#allocation2 + $0x128] sm:$0xf] }
 0x86f   : > { %v10329_v56 = vld [vmem:[#allocation2 + $0xd8] sm:$0xf]  ;;  %5890 = vmatpush.bf16.msrb.mxu3 %v10334_v2  ;;  %v10447_v2 = vld [vmem:[#allocation2 + $0x1dc] sm:$0xf0] }
 0x870   : > { %v10330_v25 = vor.u32 %v12002_v57, %v10329_v56  ;;  %v10769_v56 = vld [vmem:[#allocation2 + $0x440] sm:$0xf]  ;;  %v12111_v57 = vld [vmem:[#allocation2 + $0x460] sm:$0xf0]  ;;  %v10450_v16 = vor.u32 %v12026_v1, %v10447_v2 }
 0x871   : > { %v10770_v6 = vor.u32 %v12111_v57, %v10769_v56  ;;  %v10306_v57 = vor.u32 %v11990_v53, %v10303_v28  ;;  %v10591_v2 = vld [vmem:[#allocation2 + $0x2fc] sm:$0xf0] }
 0x872   : > { %5864 = vmatpush.bf16.msra.mxu1 %v10330_v25  ;;  %5879 = vmatpush.bf16.msra.mxu2 %v10546_v50  ;;  %v12030_v25 = vld [vmem:[#allocation2 + $0x1d8] sm:$0xf0]  ;;  %v10627_v50 = vld [vmem:[#allocation2 + $0x344] sm:$0xf0] }
 0x873   : > { %5891 = vmatpush.bf16.msrb.mxu3 %v10298_v23  ;;  %v10697_v23 = vld [vmem:[#allocation2 + $0x3b0] sm:$0xf]  ;;  %v10630_v55 = vor.u32 %v12071_v49, %v10627_v50  ;;  %v10417_v49 = vld [vmem:[#allocation2 + $0x178] sm:$0xf] }
 0x876   : > { %5865 = vmatpush.bf16.msra.mxu1 %v10294_v17  ;;  %5880 = vmatpush.bf16.msra.mxu2 %v10510_v0  ;;  %v10409_v17 = vld [vmem:[#allocation2 + $0x170] sm:$0xf]  ;;  %v12062_v0 = vld [vmem:[#allocation2 + $0x2dc] sm:$0xf] }
 0x877   : > { %5892 = vmatpush.bf16.msrb.mxu3 %v10262_v36  ;;  %v10410_v24 = vor.u32 %v12021_v18, %v10409_v17  ;;  %v10374_v36 = vor.u32 %v12012_v32, %v10373_v27  ;;  %v12053_v17 = vld [vmem:[#allocation2 + $0x294] sm:$0xf]  ;;  %v10489_v27 = vld [vmem:[#allocation2 + $0x208] sm:$0xf]  ;;  %v12040_v32 = vld [vmem:[#allocation2 + $0x228] sm:$0xf0] }
 0x87a   : > { %5866 = vmatpush.bf16.msra.mxu1 %v10258_v14  ;;  %v10698_v14 = vor.u32 %v12093_v48, %v10697_v23  ;;  %v12044_v48 = vld [vmem:[#allocation2 + $0x24c] sm:$0xf] }
 0x87b   : > { %5893 = vmatpush.bf16.msrb.mxu3 %v10226_v59  ;;  %v10265_v59 = vld [vmem:[#allocation2 + $0x50] sm:$0xf] }
 0x87e   : > { %5867 = vmatpush.bf16.msra.mxu1 %v10222_v42  ;;  %v10301_v42 = vld [vmem:[#allocation2 + $0x98] sm:$0xf] }
 0x87f   : > { %5938 = vmatpush.bf16.msra.mxu3 %v10486_v3  ;;  %v10302_v56 = vor.u32 %v11994_v52, %v10301_v42  ;;  %v12018_v42 = vld [vmem:[#allocation2 + $0x17c] sm:$0xf]  ;;  %v10419_v52 = vld [vmem:[#allocation2 + $0x19c] sm:$0xf0] }
 0x883   : > { %5939 = vmatpush.bf16.msra.mxu3 %v10450_v16  ;;  %v12057_v16 = vld [vmem:[#allocation2 + $0x2b0] sm:$0xf0] }
 0x8a0   : > { %v4889_v26 = vpop.f32.mrf.mxu0 }
 0x8a1   : > { %v13712_v58 = vadd.f32 %v4889_v26, %v4877_v51  ;;  %v10550_v51 = vor.u32 %v12052_v9, %v10547_v35  ;;  %v10661_v9 = vld [vmem:[#allocation2 + $0x368] sm:$0xf]  ;;  %v12084_v35 = vld [vmem:[#allocation2 + $0x388] sm:$0xf0] }
 0x8a3   : > { %v4897_v63 = vmul.f32 0.5, %v13712_v58  ;;  %5905 = vmatpush.bf16.msrb.mxu0 %v10550_v51  ;;  %4895 = vst.msk [vmem:[%s14203_s10] sm:$0x1] %vm4893_vm6, %v13712_v58  ;;  %v10662_v58 = vor.u32 %v12084_v35, %v10661_v9  ;;  %v10342_v51 = vor.u32 %v11999_v44, %v10339_v43  ;;  %v10490_v9 = vor.u32 %v12040_v32, %v10489_v27  ;;  %v10777_v44 = vld [vmem:[#allocation2 + $0x448] sm:$0xf] }
 0x8a4   : > { %v12112_v43 = vld [vmem:[#allocation2 + $0x468] sm:$0xf0]  ;;  %v10311_v27 = vld [vmem:[#allocation2 + $0xc4] sm:$0xf0] }
 0x8a5   : > { %v4898_v7 = vmul.f32 1.442695, %v4897_v63  ;;  %v10445_v63 = vld [vmem:[#allocation2 + $0x1b8] sm:$0xf]  ;;  %v10778_v28 = vor.u32 %v12112_v43, %v10777_v44 }
 0x8a6   : > { %v4734_v12 = vpop.f32.mrf.mxu2 }
 0x8a7   : > { %12456 = vpow2.f32 %v4898_v7  ;;  %v13719_v40 = vadd.f32 %v4734_v12, %v4722_v34  ;;  %v10774_v7 = vor.u32 %v12107_v61, %v10771_v62  ;;  %v10446_v12 = vor.u32 %v12030_v25, %v10445_v63  ;;  %5906 = vmatpush.bf16.msrb.mxu0 %v10514_v5  ;;  %v10375_v34 = vld [vmem:[#allocation2 + $0x14c] sm:$0xf0]  ;;  %v11981_v61 = vld [vmem:[#allocation2 + $0x54] sm:$0xf]  ;;  %v10589_v63 = vld [vmem:[#allocation2 + $0x2d8] sm:$0xf] }
 0x8a8   : > { %v4891_v22 = vpop.f32.mrf.mxu0  ;;  %v12066_v25 = vld [vmem:[#allocation2 + $0x2f8] sm:$0xf0]  ;;  %v10594_v5 = vor.u32 %v12062_v0, %v10591_v2  ;;  %v10705_v2 = vld [vmem:[#allocation2 + $0x3b8] sm:$0xf] }
 0x8a9   : > { %v10738_v22 = vor.u32 %v12098_v13, %v10735_v15  ;;  %4894 = vst.msk [vmem:[%s14204_s26] sm:$0x1] %vm4893_vm6, %v13719_v40  ;;  %v10590_v1 = vor.u32 %v12066_v25, %v10589_v63  ;;  %v10553_v15 = vld [vmem:[#allocation2 + $0x290] sm:$0xf]  ;;  %v12009_v63 = vld [vmem:[#allocation2 + $0x134] sm:$0xf] }
 0x8aa   : > { %v10554_v18 = vor.u32 %v12057_v16, %v10553_v15  ;;  %v10383_v25 = vld [vmem:[#allocation2 + $0x154] sm:$0xf0]  ;;  %v12004_v15 = vld [vmem:[#allocation2 + $0x108] sm:$0xf0] }
 0x8ab   : > { %5951 = vmatpush.bf16.msra.mxu0 %v10774_v7  ;;  %v11976_v7 = vld [vmem:[#allocation2 + $0x28] sm:$0xf0] }
 0x8ac   : > { %v12000_v16 = vld [vmem:[#allocation2 + $0xec] sm:$0xf] }
 0x8ad   : > { %v12457_v39 = vpop.eup %12456 }
 0x8ae   : > { %v4900_v45 = vmul.f32 %v12457_v39, %v4896_v31  ;;  %v4736_v46 = vpop.f32.mrf.mxu2  ;;  %v10414_v31 = vor.u32 %v12017_v19, %v10411_v20  ;;  %v10378_v39 = vor.u32 %v12008_v33, %v10375_v34  ;;  %v10555_v19 = vld [vmem:[#allocation2 + $0x2b4] sm:$0xf0]  ;;  %v12036_v33 = vld [vmem:[#allocation2 + $0x20c] sm:$0xf]  ;;  %v10491_v34 = vld [vmem:[#allocation2 + $0x22c] sm:$0xf0] }
 0x8af   : > { %5952 = vmatpush.bf16.msra.mxu0 %v10738_v22  ;;  %v10625_v46 = vld [vmem:[#allocation2 + $0x320] sm:$0xf]  ;;  %v10558_v20 = vor.u32 %v12053_v17, %v10555_v19  ;;  %v12048_v22 = vld [vmem:[#allocation2 + $0x268] sm:$0xf0]  ;;  %v10494_v35 = vor.u32 %v12036_v33, %v10491_v34  ;;  %v10347_v17 = vld [vmem:[#allocation2 + $0x10c] sm:$0xf0] }
 0x8b0   : > { %v4901_v26 = vadd.f32 %v4900_v45, %v13719_v40  ;;  %5940 = vmatpush.bf16.msra.mxu3 %v10414_v31  ;;  %v10337_v40 = vld [vmem:[#allocation2 + $0xe0] sm:$0xf]  ;;  %v10666_v45 = vor.u32 %v12080_v37, %v10663_v38  ;;  %v4929_v31 = vperm.slane %v4907_v30, 0  ;;  %v10633_v34 = vld [vmem:[#allocation2 + $0x328] sm:$0xf] }
 0x8b1   : > { %v10338_v47 = vor.u32 %v12003_v41, %v10337_v40  ;;  %v10453_v37 = vld [vmem:[#allocation2 + $0x1c0] sm:$0xf]  ;;  %v12027_v40 = vld [vmem:[#allocation2 + $0x1c4] sm:$0xf]  ;;  %v10455_v41 = vld [vmem:[#allocation2 + $0x1e4] sm:$0xf0] }
 0x8b2   : > { %v4902_v10 = vpack.c.bf16 %v4901_v26, %v4901_v26  ;;  %v10626_v26 = vor.u32 %v12075_v54, %v10625_v46 }
 0x8b3   : > { %5953 = vmatpush.bf16.msra.mxu0 %v10702_v4 }
 0x8b4   : > { %10217 = vmatmul.msk.bf16.vlgmr.msrb.gmra.mxu1 %vm2540_vm3, %v4902_v10  ;;  %10218 = vmatmul.msk.bf16.vlgmr.msrb.gmra.mxu2 %vm2540_vm3, %v4902_v10  ;;  %v10267_v10 = vld [vmem:[#allocation2 + $0x74] sm:$0xf0] }
 0x8b5   : > { %5912 = vmatpush.bf16.msrb.mxu1 %v10482_v60  ;;  %5925 = vmatpush.bf16.msrb.mxu2 %v10770_v6  ;;  %v11985_v60 = vld [vmem:[#allocation2 + $0x70] sm:$0xf0]  ;;  %v10270_v3 = vor.u32 %v11981_v61, %v10267_v10  ;;  %v10229_v6 = vld [vmem:[#allocation2 + $0x8] sm:$0xf]  ;;  %v10381_v10 = vld [vmem:[#allocation2 + $0x130] sm:$0xf] }
 0x8b6   : > { %5941 = vmatpush.bf16.msra.mxu3 %v10378_v39  ;;  %v10266_v62 = vor.u32 %v11985_v60, %v10265_v59  ;;  %v10230_v11 = vor.u32 %v11976_v7, %v10229_v6  ;;  %v12031_v39 = vld [vmem:[#allocation2 + $0x1e0] sm:$0xf0]  ;;  %v10743_v60 = vld [vmem:[#allocation2 + $0x424] sm:$0xf0]  ;;  %v12090_v6 = vld [vmem:[#allocation2 + $0x3bc] sm:$0xf] }
 0x8b7   : > { %5954 = vmatpush.bf16.msra.mxu0 %v10666_v45  ;;  %v10779_v45 = vld [vmem:[#allocation2 + $0x46c] sm:$0xf0]  ;;  %v10454_v54 = vor.u32 %v12031_v39, %v10453_v37  ;;  %v12099_v59 = vld [vmem:[#allocation2 + $0x404] sm:$0xf]  ;;  %v10707_v7 = vld [vmem:[#allocation2 + $0x3dc] sm:$0xf0] }
 0x8b8   : > { %v10710_v19 = vor.u32 %v12090_v6, %v10707_v7  ;;  %v10273_v37 = vld [vmem:[#allocation2 + $0x58] sm:$0xf]  ;;  %v11986_v39 = vld [vmem:[#allocation2 + $0x78] sm:$0xf0] }
 0x8b9   : > { %5913 = vmatpush.bf16.msrb.mxu1 %v10446_v12  ;;  %5926 = vmatpush.bf16.msrb.mxu2 %v10734_v21  ;;  %v10231_v12 = vld [vmem:[#allocation2 + $0x2c] sm:$0xf0]  ;;  %v10517_v21 = vld [vmem:[#allocation2 + $0x248] sm:$0xf] }
 0x8ba   : > { %5942 = vmatpush.bf16.msra.mxu3 %v10342_v51  ;;  %v10234_v13 = vor.u32 %v11972_v8, %v10231_v12  ;;  %v10518_v23 = vor.u32 %v12048_v22, %v10517_v21  ;;  %v12022_v51 = vld [vmem:[#allocation2 + $0x198] sm:$0xf0]  ;;  %v10386_v12 = vor.u32 %v12009_v63, %v10383_v25  ;;  %v12085_v21 = vld [vmem:[#allocation2 + $0x390] sm:$0xf0] }
 0x8bb   : > { %5955 = vmatpush.bf16.msra.mxu0 %v10630_v55  ;;  %v10741_v55 = vld [vmem:[#allocation2 + $0x400] sm:$0xf]  ;;  %v10418_v61 = vor.u32 %v12022_v51, %v10417_v49  ;;  %v12081_v22 = vld [vmem:[#allocation2 + $0x374] sm:$0xf] }
 0x8bc   : > { %v11977_v51 = vld [vmem:[#allocation2 + $0x30] sm:$0xf0] }
 0x8bd   : > { %5914 = vmatpush.bf16.msrb.mxu1 %v10410_v24  ;;  %5927 = vmatpush.bf16.msrb.mxu2 %v10698_v14  ;;  %v10519_v24 = vld [vmem:[#allocation2 + $0x26c] sm:$0xf0] }
 0x8be   : > { %5943 = vmatpush.bf16.msra.mxu3 %v10306_v57  ;;  %v10522_v29 = vor.u32 %v12044_v48, %v10519_v24  ;;  %v12103_v57 = vld [vmem:[#allocation2 + $0x420] sm:$0xf0]  ;;  %v10350_v24 = vor.u32 %v12000_v16, %v10347_v17  ;;  %v10785_v16 = vld [vmem:[#allocation2 + $0x450] sm:$0xf]  ;;  %v12113_v17 = vld [vmem:[#allocation2 + $0x470] sm:$0xf0] }
 0x8bf   : > { %5956 = vmatpush.bf16.msra.mxu0 %v10594_v5  ;;  %v10742_v0 = vor.u32 %v12103_v57, %v10741_v55  ;;  %v12094_v5 = vld [vmem:[#allocation2 + $0x3d8] sm:$0xf0]  ;;  %v12037_v57 = vld [vmem:[#allocation2 + $0x214] sm:$0xf] }
 0x8c1   : > { %5915 = vmatpush.bf16.msrb.mxu1 %v10374_v36  ;;  %5928 = vmatpush.bf16.msrb.mxu2 %v10662_v58  ;;  %v4930_v36 = vperm.slane %v4907_v30, 1  ;;  %v12108_v58 = vld [vmem:[#allocation2 + $0x44c] sm:$0xf]  ;;  %v11995_v30 = vld [vmem:[#allocation2 + $0xc0] sm:$0xf0] }
 0x8c2   : > { %5944 = vmatpush.bf16.msra.mxu3 %v10270_v3  ;;  %v12013_v3 = vld [vmem:[#allocation2 + $0x150] sm:$0xf0] }
 0x8c3   : > { %5957 = vmatpush.bf16.msra.mxu0 %v10558_v20  ;;  %v10669_v20 = vld [vmem:[#allocation2 + $0x370] sm:$0xf] }
 0x8c4   : > { %v10670_v32 = vor.u32 %v12085_v21, %v10669_v20 }
 0x8c5   : > { %5916 = vmatpush.bf16.msrb.mxu1 %v10338_v47  ;;  %5929 = vmatpush.bf16.msrb.mxu2 %v10626_v26  ;;  %v10458_v47 = vor.u32 %v12027_v40, %v10455_v41  ;;  %v10782_v26 = vor.u32 %v12108_v58, %v10779_v45  ;;  %v11982_v40 = vld [vmem:[#allocation2 + $0x5c] sm:$0xf]  ;;  %v10275_v41 = vld [vmem:[#allocation2 + $0x7c] sm:$0xf0]  ;;  %v12067_v45 = vld [vmem:[#allocation2 + $0x300] sm:$0xf0] }
 0x8c6   : > { %5945 = vmatpush.bf16.msra.mxu3 %v10234_v13  ;;  %v10345_v13 = vld [vmem:[#allocation2 + $0xe8] sm:$0xf]  ;;  %v10597_v58 = vld [vmem:[#allocation2 + $0x2e0] sm:$0xf]  ;;  %v10278_v49 = vor.u32 %v11982_v40, %v10275_v41 }
 0x8c7   : > { %5958 = vmatpush.bf16.msra.mxu0 %v10522_v29  ;;  %v10346_v48 = vor.u32 %v12004_v15, %v10345_v13  ;;  %v10309_v29 = vld [vmem:[#allocation2 + $0xa0] sm:$0xf]  ;;  %v12045_v13 = vld [vmem:[#allocation2 + $0x254] sm:$0xf]  ;;  %v10527_v15 = vld [vmem:[#allocation2 + $0x274] sm:$0xf0] }
 0x8c9   : > { %5917 = vmatpush.bf16.msrb.mxu1 %v10302_v56  ;;  %5930 = vmatpush.bf16.msrb.mxu2 %v10590_v1  ;;  %v10746_v1 = vor.u32 %v12099_v59, %v10743_v60  ;;  %v10499_v59 = vld [vmem:[#allocation2 + $0x234] sm:$0xf0] }
 0x8ca   : > { %v10561_v60 = vld [vmem:[#allocation2 + $0x298] sm:$0xf] }
 0x8cd   : > { %5918 = vmatpush.bf16.msrb.mxu1 %v10266_v62  ;;  %5931 = vmatpush.bf16.msrb.mxu2 %v10554_v18  ;;  %v10422_v62 = vor.u32 %v12018_v42, %v10419_v52  ;;  %v10706_v18 = vor.u32 %v12094_v5, %v10705_v2  ;;  %v11973_v42 = vld [vmem:[#allocation2 + $0x14] sm:$0xf]  ;;  %v10239_v52 = vld [vmem:[#allocation2 + $0x34] sm:$0xf0]  ;;  %v12032_v2 = vld [vmem:[#allocation2 + $0x1e8] sm:$0xf0] }
 0x8ce   : > { %v10242_v63 = vor.u32 %v11973_v42, %v10239_v52  ;;  %v12028_v5 = vld [vmem:[#allocation2 + $0x1cc] sm:$0xf] }
 0x8d1   : > { %5919 = vmatpush.bf16.msrb.mxu1 %v10230_v11  ;;  %5932 = vmatpush.bf16.msrb.mxu2 %v10518_v23  ;;  %v10382_v11 = vor.u32 %v12013_v3, %v10381_v10  ;;  %v10671_v23 = vld [vmem:[#allocation2 + $0x394] sm:$0xf0]  ;;  %v10563_v10 = vld [vmem:[#allocation2 + $0x2bc] sm:$0xf0] }
 0x8d2   : > { %v10674_v33 = vor.u32 %v12081_v22, %v10671_v23  ;;  %v10425_v22 = vld [vmem:[#allocation2 + $0x180] sm:$0xf] }
 0x931   : > { %v4945_v14 = vpop.f32.mrf.mxu1 }
 0x932   : > { %v4946_v4 = vadd.f32 %v4945_v14, %v4929_v31  ;;  %v11991_v31 = vld [vmem:[#allocation2 + $0xa4] sm:$0xf]  ;;  %v12076_v14 = vld [vmem:[#allocation2 + $0x348] sm:$0xf0] }
 0x933   : > { %v10634_v44 = vor.u32 %v12076_v14, %v10633_v34  ;;  %v12100_v34 = vld [vmem:[#allocation2 + $0x40c] sm:$0xf]  ;;  %v10751_v14 = vld [vmem:[#allocation2 + $0x42c] sm:$0xf0] }
 0x934   : > { %v13738_v38 = vpack.c.bf16 %v4946_v4, %v4946_v4  ;;  %v12072_v4 = vld [vmem:[#allocation2 + $0x32c] sm:$0xf]  ;;  %v10754_v41 = vor.u32 %v12100_v34, %v10751_v14  ;;  %v12055_v34 = vld [vmem:[#allocation2 + $0x2a4] sm:$0xf]  ;;  %v10571_v14 = vld [vmem:[#allocation2 + $0x2c4] sm:$0xf0] }
 0x936   : > { %5868 = vmatmul.bf16.vlgmr.msra.gmra.mxu1 %v13738_v38  ;;  %5894 = vmatmul.bf16.vlgmr.msrb.gmra.mxu3 %v13738_v38 }
 0x937   : > { %5964 = vmatpush.bf16.msra.mxu1 %v10490_v9  ;;  %5990 = vmatpush.bf16.msrb.mxu3 %v10494_v35  ;;  %v4958_v46 = vpop.f32.mrf.mxu2  ;;  %v10635_v9 = vld [vmem:[#allocation2 + $0x34c] sm:$0xf0]  ;;  %v10310_v35 = vor.u32 %v11995_v30, %v10309_v29  ;;  %v12019_v29 = vld [vmem:[#allocation2 + $0x184] sm:$0xf]  ;;  %v10427_v30 = vld [vmem:[#allocation2 + $0x1a4] sm:$0xf0] }
 0x938   : > { %v4959_v50 = vadd.f32 %v4958_v46, %v4930_v36  ;;  %v10314_v36 = vor.u32 %v11991_v31, %v10311_v27  ;;  %v10638_v43 = vor.u32 %v12072_v4, %v10635_v9  ;;  %v12063_v46 = vld [vmem:[#allocation2 + $0x2e4] sm:$0xf]  ;;  %v10786_v31 = vor.u32 %v12113_v17, %v10785_v16  ;;  %v10605_v16 = vld [vmem:[#allocation2 + $0x2e8] sm:$0xf]  ;;  %v12068_v17 = vld [vmem:[#allocation2 + $0x308] sm:$0xf0] }
 0x939   : > { %v4947_v53 = vpop.f32.mrf.mxu1  ;;  %v10430_v9 = vor.u32 %v12019_v29, %v10427_v30  ;;  %v10606_v29 = vor.u32 %v12068_v17, %v10605_v16  ;;  %v12069_v16 = vld [vmem:[#allocation2 + $0x310] sm:$0xf0] }
 0x93a   : > { %v13742_v56 = vpack.c.bf16 %v4959_v50, %v4959_v50  ;;  %v10237_v50 = vld [vmem:[#allocation2 + $0x10] sm:$0xf] }
 0x93b   : > { %5965 = vmatpush.bf16.msra.mxu1 %v10454_v54  ;;  %5991 = vmatpush.bf16.msrb.mxu3 %v10458_v47  ;;  %v10599_v54 = vld [vmem:[#allocation2 + $0x304] sm:$0xf0]  ;;  %v10274_v47 = vor.u32 %v11986_v39, %v10273_v37  ;;  %v10497_v53 = vld [vmem:[#allocation2 + $0x210] sm:$0xf]  ;;  %v10238_v3 = vor.u32 %v11977_v51, %v10237_v50  ;;  %v12010_v37 = vld [vmem:[#allocation2 + $0x13c] sm:$0xf] }
 0x93c   : > { %5881 = vmatmul.bf16.vlgmr.msra.gmra.mxu2 %v13742_v56  ;;  %5907 = vmatmul.bf16.vlgmr.msrb.gmra.mxu0 %v13742_v56  ;;  %v10602_v55 = vor.u32 %v12063_v46, %v10599_v54  ;;  %v10391_v39 = vld [vmem:[#allocation2 + $0x15c] sm:$0xf0]  ;;  %v12001_v50 = vld [vmem:[#allocation2 + $0xf4] sm:$0xf]  ;;  %v10355_v51 = vld [vmem:[#allocation2 + $0x114] sm:$0xf0] }
 0x93d   : > { %5977 = vmatpush.bf16.msra.mxu2 %v10778_v28  ;;  %6003 = vmatpush.bf16.msrb.mxu0 %v10782_v26  ;;  %v12041_v28 = vld [vmem:[#allocation2 + $0x230] sm:$0xf0]  ;;  %v10598_v26 = vor.u32 %v12067_v45, %v10597_v58  ;;  %v12091_v58 = vld [vmem:[#allocation2 + $0x3c4] sm:$0xf]  ;;  %v10715_v45 = vld [vmem:[#allocation2 + $0x3e4] sm:$0xf0]  ;;  %v10394_v54 = vor.u32 %v12010_v37, %v10391_v39  ;;  %v10574_v37 = vor.u32 %v12055_v34, %v10571_v14  ;;  %v12433_v34 = vpop.permute.xlu0 %12432 }
 0x93e   : > { %v10498_v25 = vor.u32 %v12041_v28, %v10497_v53  ;;  %v10718_v52 = vor.u32 %v12091_v58, %v10715_v45  ;;  %v10677_v53 = vld [vmem:[#allocation2 + $0x378] sm:$0xf]  ;;  %v12086_v28 = vld [vmem:[#allocation2 + $0x398] sm:$0xf0]  ;;  %v10469_v39 = vld [vmem:[#allocation2 + $0x1d0] sm:$0xf] }
 0x93f   : > { %5966 = vmatpush.bf16.msra.mxu1 %v10418_v61  ;;  %5992 = vmatpush.bf16.msrb.mxu3 %v10422_v62  ;;  %v4960_v8 = vpop.f32.mrf.mxu2  ;;  %v12058_v61 = vld [vmem:[#allocation2 + $0x2b8] sm:$0xf0]  ;;  %v10535_v58 = vld [vmem:[#allocation2 + $0x27c] sm:$0xf0]  ;;  %v10793_v45 = vld [vmem:[#allocation2 + $0x458] sm:$0xf] }
 0x940   : > { %v12054_v62 = vld [vmem:[#allocation2 + $0x29c] sm:$0xf]  ;;  %v10562_v6 = vor.u32 %v12058_v61, %v10561_v60  ;;  %v10463_v8 = vld [vmem:[#allocation2 + $0x1ec] sm:$0xf0]  ;;  %v10317_v60 = vld [vmem:[#allocation2 + $0xa8] sm:$0xf] }
 0x941   : > { %5978 = vmatpush.bf16.msra.mxu2 %v10742_v0  ;;  %6004 = vmatpush.bf16.msrb.mxu0 %v10746_v1  ;;  %v10502_v0 = vor.u32 %v12037_v57, %v10499_v59  ;;  %v10461_v1 = vld [vmem:[#allocation2 + $0x1c8] sm:$0xf]  ;;  %v10566_v7 = vor.u32 %v12054_v62, %v10563_v10  ;;  %v10466_v21 = vor.u32 %v12028_v5, %v10463_v8  ;;  %v11996_v61 = vld [vmem:[#allocation2 + $0xc8] sm:$0xf0]  ;;  %v10319_v10 = vld [vmem:[#allocation2 + $0xcc] sm:$0xf0] }
 0x942   : > { %v10462_v20 = vor.u32 %v12032_v2, %v10461_v1  ;;  %v10358_v59 = vor.u32 %v12001_v50, %v10355_v51  ;;  %v11992_v62 = vld [vmem:[#allocation2 + $0xac] sm:$0xf]  ;;  %v12073_v1 = vld [vmem:[#allocation2 + $0x334] sm:$0xf]  ;;  %v10643_v2 = vld [vmem:[#allocation2 + $0x354] sm:$0xf0]  ;;  %v10318_v5 = vor.u32 %v11996_v61, %v10317_v60 }
 0x943   : > { %5967 = vmatpush.bf16.msra.mxu1 %v10382_v11  ;;  %5993 = vmatpush.bf16.msrb.mxu3 %v10386_v12  ;;  %v10525_v11 = vld [vmem:[#allocation2 + $0x250] sm:$0xf]  ;;  %v12049_v12 = vld [vmem:[#allocation2 + $0x270] sm:$0xf0]  ;;  %v11987_v8 = vld [vmem:[#allocation2 + $0x80] sm:$0xf0] }
 0x944   : > { %v10526_v23 = vor.u32 %v12049_v12, %v10525_v11  ;;  %v11983_v11 = vld [vmem:[#allocation2 + $0x64] sm:$0xf]  ;;  %v10283_v12 = vld [vmem:[#allocation2 + $0x84] sm:$0xf0]  ;;  %v12096_v60 = vld [vmem:[#allocation2 + $0x3e8] sm:$0xf0] }
 0x945   : > { %5979 = vmatpush.bf16.msra.mxu2 %v10706_v18  ;;  %6005 = vmatpush.bf16.msrb.mxu0 %v10710_v19  ;;  %v12109_v18 = vld [vmem:[#allocation2 + $0x454] sm:$0xf]  ;;  %v10787_v19 = vld [vmem:[#allocation2 + $0x474] sm:$0xf0]  ;;  %v10433_v51 = vld [vmem:[#allocation2 + $0x188] sm:$0xf] }
 0x946   : > { %5920 = vmatmul.bf16.vlgmr.msrb.gmra.mxu1 %v13738_v38  ;;  %5946 = vmatmul.bf16.vlgmr.msra.gmra.mxu3 %v13738_v38  ;;  %v10790_v27 = vor.u32 %v12109_v18, %v10787_v19  ;;  %v12064_v18 = vld [vmem:[#allocation2 + $0x2ec] sm:$0xf]  ;;  %v10607_v19 = vld [vmem:[#allocation2 + $0x30c] sm:$0xf0] }
 0x947   : > { %5968 = vmatpush.bf16.msra.mxu1 %v10346_v48  ;;  %5994 = vmatpush.bf16.msrb.mxu3 %v10350_v24  ;;  %v10530_v48 = vor.u32 %v12045_v13, %v10527_v15  ;;  %v12023_v24 = vld [vmem:[#allocation2 + $0x1a0] sm:$0xf0]  ;;  %v10646_v15 = vor.u32 %v12073_v1, %v10643_v2  ;;  %v10610_v30 = vor.u32 %v12064_v18, %v10607_v19  ;;  %v10325_v2 = vld [vmem:[#allocation2 + $0xb0] sm:$0xf]  ;;  %v10253_v19 = vld [vmem:[#allocation2 + $0x20] sm:$0xf] }
 0x948   : > { %v10426_v4 = vor.u32 %v12023_v24, %v10425_v22  ;;  %v10245_v22 = vld [vmem:[#allocation2 + $0x18] sm:$0xf]  ;;  %v10247_v24 = vld [vmem:[#allocation2 + $0x3c] sm:$0xf0] }
 0x949   : > { %5980 = vmatpush.bf16.msra.mxu2 %v10670_v32  ;;  %6006 = vmatpush.bf16.msrb.mxu0 %v10674_v33  ;;  %v10749_v32 = vld [vmem:[#allocation2 + $0x408] sm:$0xf]  ;;  %v12104_v33 = vld [vmem:[#allocation2 + $0x428] sm:$0xf0] }
 0x94a   : > { %v10750_v40 = vor.u32 %v12104_v33, %v10749_v32  ;;  %v10569_v32 = vld [vmem:[#allocation2 + $0x2a0] sm:$0xf]  ;;  %v12059_v33 = vld [vmem:[#allocation2 + $0x2c0] sm:$0xf0] }
 0x94b   : > { %5969 = vmatpush.bf16.msra.mxu1 %v10310_v35  ;;  %5995 = vmatpush.bf16.msrb.mxu3 %v10314_v36  ;;  %v10389_v35 = vld [vmem:[#allocation2 + $0x138] sm:$0xf]  ;;  %v12014_v36 = vld [vmem:[#allocation2 + $0x158] sm:$0xf0] }
 0x94c   : > { %5933 = vmatmul.bf16.vlgmr.msrb.gmra.mxu2 %v13742_v56  ;;  %5959 = vmatmul.bf16.vlgmr.msra.gmra.mxu0 %v13742_v56  ;;  %v10390_v46 = vor.u32 %v12014_v36, %v10389_v35  ;;  %v10570_v36 = vor.u32 %v12059_v33, %v10569_v32 }
 0x94d   : > { %5981 = vmatpush.bf16.msra.mxu2 %v10634_v44  ;;  %6007 = vmatpush.bf16.msrb.mxu0 %v10638_v43  ;;  %v10713_v44 = vld [vmem:[#allocation2 + $0x3c0] sm:$0xf]  ;;  %v12095_v43 = vld [vmem:[#allocation2 + $0x3e0] sm:$0xf0] }
 0x94e   : > { %v10714_v42 = vor.u32 %v12095_v43, %v10713_v44  ;;  %v12050_v44 = vld [vmem:[#allocation2 + $0x278] sm:$0xf0] }
 0x94f   : > { %5970 = vmatpush.bf16.msra.mxu1 %v10274_v47  ;;  %5996 = vmatpush.bf16.msrb.mxu3 %v10278_v49  ;;  %v10353_v47 = vld [vmem:[#allocation2 + $0xf0] sm:$0xf]  ;;  %v12005_v49 = vld [vmem:[#allocation2 + $0x110] sm:$0xf0]  ;;  %v12046_v43 = vld [vmem:[#allocation2 + $0x25c] sm:$0xf] }
 0x950   : > { %v10354_v57 = vor.u32 %v12005_v49, %v10353_v47  ;;  %v10538_v49 = vor.u32 %v12046_v43, %v10535_v58 }
 0x951   : > { %5982 = vmatpush.bf16.msra.mxu2 %v10598_v26  ;;  %6008 = vmatpush.bf16.msrb.mxu0 %v10602_v55  ;;  %v12082_v26 = vld [vmem:[#allocation2 + $0x37c] sm:$0xf]  ;;  %v10679_v55 = vld [vmem:[#allocation2 + $0x39c] sm:$0xf0] }
 0x953   : > { %5971 = vmatpush.bf16.msra.mxu1 %v10238_v3  ;;  %5997 = vmatpush.bf16.msrb.mxu3 %v10242_v63  ;;  %v10678_v3 = vor.u32 %v12086_v28, %v10677_v53  ;;  %v10682_v63 = vor.u32 %v12082_v26, %v10679_v55  ;;  %v12105_v53 = vld [vmem:[#allocation2 + $0x430] sm:$0xf0]  ;;  %v10397_v55 = vld [vmem:[#allocation2 + $0x140] sm:$0xf] }
 0x955   : > { %5983 = vmatpush.bf16.msra.mxu2 %v10562_v6  ;;  %6009 = vmatpush.bf16.msrb.mxu0 %v10566_v7  ;;  %v10322_v6 = vor.u32 %v11992_v62, %v10319_v10  ;;  %v10281_v7 = vld [vmem:[#allocation2 + $0x60] sm:$0xf]  ;;  %v10361_v10 = vld [vmem:[#allocation2 + $0xf8] sm:$0xf] }
 0x956   : > { %5972 = vmatmul.bf16.vlgmr.msra.gmra.mxu1 %v13738_v38  ;;  %5998 = vmatmul.bf16.vlgmr.msrb.gmra.mxu3 %v13738_v38 }
 0x957   : > { %6016 = vmatpush.bf16.msrb.mxu1 %v10498_v25  ;;  %6042 = vmatpush.bf16.msra.mxu3 %v10502_v0  ;;  %v10641_v25 = vld [vmem:[#allocation2 + $0x330] sm:$0xf]  ;;  %v12077_v0 = vld [vmem:[#allocation2 + $0x350] sm:$0xf0] }
 0x958   : > { %v10642_v13 = vor.u32 %v12077_v0, %v10641_v25  ;;  %v12087_v25 = vld [vmem:[#allocation2 + $0x3a0] sm:$0xf0] }
 0x959   : > { %5984 = vmatpush.bf16.msra.mxu2 %v10526_v23  ;;  %6010 = vmatpush.bf16.msrb.mxu0 %v10530_v48  ;;  %v11978_v23 = vld [vmem:[#allocation2 + $0x38] sm:$0xf0] }
 0x95a   : > { %v11974_v48 = vld [vmem:[#allocation2 + $0x1c] sm:$0xf] }
 0x95b   : > { %6017 = vmatpush.bf16.msrb.mxu1 %v10462_v20  ;;  %6043 = vmatpush.bf16.msra.mxu3 %v10466_v21  ;;  %v10282_v20 = vor.u32 %v11987_v8, %v10281_v7  ;;  %v10286_v21 = vor.u32 %v11983_v11, %v10283_v12  ;;  %v12078_v7 = vld [vmem:[#allocation2 + $0x358] sm:$0xf0]  ;;  %v10289_v12 = vld [vmem:[#allocation2 + $0x68] sm:$0xf] }
 0x95c   : > { %5985 = vmatmul.bf16.vlgmr.msra.gmra.mxu2 %v13742_v56  ;;  %6011 = vmatmul.bf16.vlgmr.msrb.gmra.mxu0 %v13742_v56 }
 0x95d   : > { %6029 = vmatpush.bf16.msrb.mxu2 %v10786_v31  ;;  %6055 = vmatpush.bf16.msra.mxu0 %v10790_v27  ;;  %v10505_v31 = vld [vmem:[#allocation2 + $0x218] sm:$0xf]  ;;  %v12042_v27 = vld [vmem:[#allocation2 + $0x238] sm:$0xf0] }
 0x95e   : > { %v10506_v35 = vor.u32 %v12042_v27, %v10505_v31 }
 0x95f   : > { %6018 = vmatpush.bf16.msrb.mxu1 %v10426_v4  ;;  %6044 = vmatpush.bf16.msra.mxu3 %v10430_v9  ;;  %v10246_v4 = vor.u32 %v11978_v23, %v10245_v22  ;;  %v10250_v9 = vor.u32 %v11974_v48, %v10247_v24  ;;  %v12060_v22 = vld [vmem:[#allocation2 + $0x2c8] sm:$0xf0]  ;;  %v10541_v24 = vld [vmem:[#allocation2 + $0x260] sm:$0xf] }
 0x961   : > { %6030 = vmatpush.bf16.msrb.mxu2 %v10750_v40  ;;  %6056 = vmatpush.bf16.msra.mxu0 %v10754_v41  ;;  %v12033_v40 = vld [vmem:[#allocation2 + $0x1f0] sm:$0xf0]  ;;  %v10533_v41 = vld [vmem:[#allocation2 + $0x258] sm:$0xf] }
 0x962   : > { %v10534_v47 = vor.u32 %v12050_v44, %v10533_v41 }
 0x963   : > { %6019 = vmatpush.bf16.msrb.mxu1 %v10390_v46  ;;  %6045 = vmatpush.bf16.msra.mxu3 %v10394_v54  ;;  %v12114_v46 = vld [vmem:[#allocation2 + $0x478] sm:$0xf0]  ;;  %v10470_v54 = vor.u32 %v12033_v40, %v10469_v39 }
 0x964   : > { %v10794_v50 = vor.u32 %v12114_v46, %v10793_v45 }
 0x965   : > { %6031 = vmatpush.bf16.msrb.mxu2 %v10714_v42  ;;  %6057 = vmatpush.bf16.msra.mxu0 %v10718_v52  ;;  %v12024_v42 = vld [vmem:[#allocation2 + $0x1a8] sm:$0xf0]  ;;  %v10757_v52 = vld [vmem:[#allocation2 + $0x410] sm:$0xf] }
 0x966   : > { %v10434_v28 = vor.u32 %v12024_v42, %v10433_v51  ;;  %v10758_v26 = vor.u32 %v12105_v53, %v10757_v52  ;;  %v12438_v52 = vpop.permute.xlu1 %12437 }
 0x967   : > { %6020 = vmatpush.bf16.msrb.mxu1 %v10354_v57  ;;  %6046 = vmatpush.bf16.msra.mxu3 %v10358_v59  ;;  %v12015_v57 = vld [vmem:[#allocation2 + $0x160] sm:$0xf0]  ;;  %v10721_v59 = vld [vmem:[#allocation2 + $0x3c8] sm:$0xf] }
 0x968   : > { %v10398_v61 = vor.u32 %v12015_v57, %v10397_v55  ;;  %v10722_v62 = vor.u32 %v12096_v60, %v10721_v59  ;;  %v12440_v55 = vunpack.i.h.bf16 %v12438_v52 }
 0x969   : > { %6032 = vmatpush.bf16.msrb.mxu2 %v10678_v3  ;;  %6058 = vmatpush.bf16.msra.mxu0 %v10682_v63  ;;  %v12006_v3 = vld [vmem:[#allocation2 + $0x118] sm:$0xf0]  ;;  %v10685_v63 = vld [vmem:[#allocation2 + $0x380] sm:$0xf] }
 0x96a   : > { %v10362_v0 = vor.u32 %v12006_v3, %v10361_v10  ;;  %v10686_v1 = vor.u32 %v12087_v25, %v10685_v63 }
 0x96b   : > { %6021 = vmatpush.bf16.msrb.mxu1 %v10318_v5  ;;  %6047 = vmatpush.bf16.msra.mxu3 %v10322_v6  ;;  %v11997_v5 = vld [vmem:[#allocation2 + $0xd0] sm:$0xf0]  ;;  %v10649_v6 = vld [vmem:[#allocation2 + $0x338] sm:$0xf] }
 0x96c   : > { %v10326_v8 = vor.u32 %v11997_v5, %v10325_v2  ;;  %v10650_v11 = vor.u32 %v12078_v7, %v10649_v6 }
 0x96d   : > { %6033 = vmatpush.bf16.msrb.mxu2 %v10642_v13  ;;  %6059 = vmatpush.bf16.msra.mxu0 %v10646_v15  ;;  %v11988_v13 = vld [vmem:[#allocation2 + $0x88] sm:$0xf0]  ;;  %v10613_v15 = vld [vmem:[#allocation2 + $0x2f0] sm:$0xf] }
 0x96e   : > { %v10290_v17 = vor.u32 %v11988_v13, %v10289_v12  ;;  %v10614_v18 = vor.u32 %v12069_v16, %v10613_v15  ;;  %v10925_v15 = vld [vmem:[%s14264_s27 + $0xf0] sm:$0xf]  ;;  %v12147_v16 = vld [vmem:[%s14264_s27 + $0x100] sm:$0xf0] }
 0x96f   : > { %6022 = vmatpush.bf16.msrb.mxu1 %v10282_v20  ;;  %6048 = vmatpush.bf16.msra.mxu3 %v10286_v21  ;;  %v11979_v20 = vld [vmem:[#allocation2 + $0x40] sm:$0xf0]  ;;  %v10577_v21 = vld [vmem:[#allocation2 + $0x2a8] sm:$0xf] }
 0x970   : > { %v10254_v23 = vor.u32 %v11979_v20, %v10253_v19  ;;  %v10578_v48 = vor.u32 %v12060_v22, %v10577_v21  ;;  %v10905_v21 = vld [vmem:[%s14264_s27 + $0xc8] sm:$0xf]  ;;  %v12142_v22 = vld [vmem:[%s14264_s27 + $0xd8] sm:$0xf0] }
 0x971   : > { %6034 = vmatpush.bf16.msrb.mxu2 %v10606_v29  ;;  %6060 = vmatpush.bf16.msra.mxu0 %v10610_v30  ;;  %v12051_v29 = vld [vmem:[#allocation2 + $0x280] sm:$0xf0] }
 0x972   : > { %v10542_v30 = vor.u32 %v12051_v29, %v10541_v24  ;;  %v12137_v24 = vld [vmem:[%s14264_s27 + $0xb0] sm:$0xf0]  ;;  %v12150_v29 = vld [vmem:[%s14264_s27 + $0x11c] sm:$0xf] }
 0x973   : > { %6023 = vmatpush.bf16.msrb.mxu1 %v10246_v4  ;;  %6049 = vmatpush.bf16.msra.mxu3 %v10250_v9  ;;  %v12670_v4 = vmov 839922192  }
 0x974   : > { %v6102_v9 = vunpack.c.l.s4 %v12670_v4  ;;  %v10955_v4 = vld [vmem:[%s14264_s27 + $0x134] sm:$0xf0] }
 0x975   : > { %6035 = vmatpush.bf16.msrb.mxu2 %v10570_v36  ;;  %6061 = vmatpush.bf16.msra.mxu0 %v10574_v37  ;;  %v12434_v36 = vunpack.i.l.bf16 %v12433_v34 }
 0x976   : > { %6024 = vmatmul.bf16.vlgmr.msrb.gmra.mxu1 %v13738_v38  ;;  %6050 = vmatmul.bf16.vlgmr.msra.gmra.mxu3 %v13738_v38  ;;  %v13760_v39 = vunpack.c.0.s8 %v6102_v9  ;;  %v10865_v9 = vld [vmem:[%s14264_s27 + $0x78] sm:$0xf] }
 0x977   : > { %6068 = vmatpush.bf16.msra.mxu1 %v10506_v35  ;;  %v12435_v35 = vunpack.i.h.bf16 %v12433_v34 }
 0x978   : > { %v6149_v63 = vperm.slane %v12440_v55, %v13760_v39 }
 0x979   : > { %6036 = vmatpush.bf16.msrb.mxu2 %v10534_v47  ;;  %6062 = vmatpush.bf16.msra.mxu0 %v10538_v49  ;;  %v6119_v43 = vperm.slane %v12435_v35, %v13760_v39 }
 0x97b   : > { %6069 = vmatpush.bf16.msra.mxu1 %v10470_v54 }
 0x97c   : > { %6037 = vmatmul.bf16.vlgmr.msrb.gmra.mxu2 %v13742_v56  ;;  %6063 = vmatmul.bf16.vlgmr.msra.gmra.mxu0 %v13742_v56 }
 0x97d   : > { %6081 = vmatpush.bf16.msra.mxu2 %v10794_v50 }
 0x97f   : > { %6070 = vmatpush.bf16.msra.mxu1 %v10434_v28  ;;  %v12439_v28 = vunpack.i.l.bf16 %v12438_v52  ;;  %v10913_v52 = vld [vmem:[%s14264_s27 + $0xd0] sm:$0xf] }
 0x981   : > { %6082 = vmatpush.bf16.msra.mxu2 %v10758_v26 }
 0x983   : > { %6071 = vmatpush.bf16.msra.mxu1 %v10398_v61  ;;  %v6134_v61 = vperm.slane %v12439_v28, %v13760_v39 }
 0x985   : > { %6083 = vmatpush.bf16.msra.mxu2 %v10722_v62 }
 0x987   : > { %6072 = vmatpush.bf16.msra.mxu1 %v10362_v0 }
 0x989   : > { %6084 = vmatpush.bf16.msra.mxu2 %v10686_v1 }
 0x98b   : > { %6073 = vmatpush.bf16.msra.mxu1 %v10326_v8  ;;  %v10945_v8 = vld [vmem:[%s14264_s27 + $0x118] sm:$0xf] }
 0x98d   : > { %6085 = vmatpush.bf16.msra.mxu2 %v10650_v11  ;;  %v12152_v11 = vld [vmem:[%s14264_s27 + $0x128] sm:$0xf0] }
 0x98e   : > { %v10946_v13 = vor.u32 %v12152_v11, %v10945_v8  ;;  %v12136_v8 = vld [vmem:[%s14264_s27 + $0xac] sm:$0xf]  ;;  %v10895_v11 = vld [vmem:[%s14264_s27 + $0xbc] sm:$0xf0] }
 0x98f   : > { %6074 = vmatpush.bf16.msra.mxu1 %v10290_v17  ;;  %v10926_v17 = vor.u32 %v12147_v16, %v10925_v15 }
 0x990   : > { %6491 = vmatpush.bf16.msrb.mxu3 %v10946_v13  ;;  %v10898_v13 = vor.u32 %v12136_v8, %v10895_v11 }
 0x991   : > { %6086 = vmatpush.bf16.msra.mxu2 %v10614_v18 }
 0x993   : > { %6075 = vmatpush.bf16.msra.mxu1 %v10254_v23  ;;  %v10906_v23 = vor.u32 %v12142_v22, %v10905_v21  ;;  %v12130_v21 = vld [vmem:[%s14264_s27 + $0x7c] sm:$0xf]  ;;  %v10867_v22 = vld [vmem:[%s14264_s27 + $0x8c] sm:$0xf0] }
 0x994   : > { %6492 = vmatpush.bf16.msrb.mxu3 %v10926_v17  ;;  %v10805_v17 = vld [vmem:[%s14264_s27] sm:$0xf] }
 0x995   : > { %6087 = vmatpush.bf16.msra.mxu2 %v10578_v48  ;;  %v10885_v48 = vld [vmem:[%s14264_s27 + $0xa0] sm:$0xf] }
 0x996   : > { %6076 = vmatmul.bf16.vlgmr.msra.gmra.mxu1 %v13738_v38 }
 0x998   : > { %6493 = vmatpush.bf16.msrb.mxu3 %v10906_v23  ;;  %v10873_v23 = vld [vmem:[%s14264_s27 + $0x80] sm:$0xf] }
 0x999   : > { %6088 = vmatpush.bf16.msra.mxu2 %v10542_v30  ;;  %v10886_v30 = vor.u32 %v12137_v24, %v10885_v48  ;;  %v10870_v24 = vor.u32 %v12130_v21, %v10867_v22  ;;  %v12134_v21 = vld [vmem:[%s14264_s27 + $0x98] sm:$0xf0] }
 0x99c   : > { %6089 = vmatmul.bf16.vlgmr.msra.gmra.mxu2 %v13742_v56  ;;  %v6104_v56 = vperm.slane %v12434_v36, %v13760_v39  ;;  %v12132_v36 = vld [vmem:[%s14264_s27 + $0x88] sm:$0xf0]  ;;  %6494 = vmatpush.bf16.msrb.mxu3 %v10886_v30  ;;  %v12131_v30 = vld [vmem:[%s14264_s27 + $0x84] sm:$0xf] }
 0x9b3   : > { %v5869_v31 = vpop.f32.mrf.mxu1 }
 0x9b9   : > { %v5895_v27 = vpop.f32.mrf.mxu3  ;;  %v5908_v32 = vpop.f32.mrf.mxu0 }
 0x9ba   : > { %v5909_v33 = vadd.f32 %v5908_v32, %v5895_v27  ;;  %v10953_v27 = vld [vmem:[%s14264_s27 + $0x120] sm:$0xf]  ;;  %v12153_v32 = vld [vmem:[%s14264_s27 + $0x130] sm:$0xf0] }
 0x9bb   : > { %v5871_v14 = vpop.f32.mrf.mxu1  ;;  %v10954_v34 = vor.u32 %v12153_v32, %v10953_v27 }
 0x9bc   : > { %v6120_v40 = vperm.slane %v5909_v33, 0  ;;  %v12151_v14 = vld [vmem:[%s14264_s27 + $0x124] sm:$0xf] }
 0x9bd   : > { %v10958_v35 = vor.u32 %v12151_v14, %v10955_v4  ;;  %6517 = vmatpush.bf16.msrb.mxu1 %v10954_v34  ;;  %v12154_v34 = vld [vmem:[%s14264_s27 + $0x138] sm:$0xf0]  ;;  %v12125_v4 = vld [vmem:[%s14264_s27 + $0x54] sm:$0xf] }
 0x9be   : > { %v6121_v46 = vmul.f32 %v6120_v40, %v6119_v43  ;;  %v10866_v40 = vor.u32 %v12132_v36, %v10865_v9  ;;  %v10847_v9 = vld [vmem:[%s14264_s27 + $0x64] sm:$0xf0] }
 0x9bf   : > { %v5882_v37 = vpop.f32.mrf.mxu2  ;;  %6530 = vmatpush.bf16.msrb.mxu2 %v10958_v35  ;;  %v10853_v35 = vld [vmem:[%s14264_s27 + $0x58] sm:$0xf] }
 0x9c0   : > { %v5883_v41 = vadd.f32 %v5882_v37, %v5869_v31  ;;  %v10947_v31 = vld [vmem:[%s14264_s27 + $0x12c] sm:$0xf0]  ;;  %6495 = vmatpush.bf16.msrb.mxu3 %v10866_v40  ;;  %v12128_v40 = vld [vmem:[%s14264_s27 + $0x68] sm:$0xf0] }
 0x9c1   : > { %v5897_v44 = vpop.f32.mrf.mxu3  ;;  %v5910_v38 = vpop.f32.mrf.mxu0  ;;  %v10950_v33 = vor.u32 %v12150_v29, %v10947_v31  ;;  %v12133_v29 = vld [vmem:[%s14264_s27 + $0x90] sm:$0xf0]  ;;  %v10875_v31 = vld [vmem:[%s14264_s27 + $0x94] sm:$0xf0] }
 0x9c2   : > { %v6105_v58 = vperm.slane %v5883_v41, 0  ;;  %v12145_v41 = vld [vmem:[%s14264_s27 + $0xf4] sm:$0xf]  ;;  %v10927_v44 = vld [vmem:[%s14264_s27 + $0x104] sm:$0xf0]  ;;  %v10874_v27 = vor.u32 %v12133_v29, %v10873_v23  ;;  %v10878_v32 = vor.u32 %v12131_v30, %v10875_v31  ;;  %v12448_v31 = vpop.permute.xlu1 %12447 }
 0x9c3   : > { %v5921_v45 = vpop.f32.mrf.mxu1  ;;  %6504 = vmatpush.bf16.msrb.mxu0 %v10950_v33  ;;  %v10933_v38 = vld [vmem:[%s14264_s27 + $0xf8] sm:$0xf]  ;;  %v10930_v43 = vor.u32 %v12145_v41, %v10927_v44  ;;  %v10961_v33 = vld [vmem:[%s14264_s27 + $0x128] sm:$0xf]  ;;  %v12126_v41 = vld [vmem:[%s14264_s27 + $0x5c] sm:$0xf] }
 0x9c4   : > { %v6106_v54 = vmul.f32 %v6105_v58, %v6104_v56  ;;  %v12148_v56 = vld [vmem:[%s14264_s27 + $0x108] sm:$0xf0]  ;;  %v12146_v58 = vld [vmem:[%s14264_s27 + $0xfc] sm:$0xf]  ;;  %v10962_v14 = vor.u32 %v12154_v34, %v10961_v33  ;;  %v10855_v44 = vld [vmem:[%s14264_s27 + $0x6c] sm:$0xf0] }
 0x9c5   : > { %v12129_v29 = vld [vmem:[%s14264_s27 + $0x70] sm:$0xf0]  ;;  %v10841_v34 = vld [vmem:[%s14264_s27 + $0x38] sm:$0xf] }
 0x9c6   : > { %v6122_v47 = vadd.f32 %v6121_v46, %v6106_v54  ;;  %v10934_v46 = vor.u32 %v12148_v56, %v10933_v38  ;;  %v10854_v38 = vor.u32 %v12128_v40, %v10853_v35  ;;  %v10941_v56 = vld [vmem:[%s14264_s27 + $0x100] sm:$0xf] }
 0x9c7   : > { %v5884_v49 = vpop.f32.mrf.mxu2  ;;  %6505 = vmatpush.bf16.msrb.mxu0 %v10930_v43  ;;  %v10858_v43 = vor.u32 %v12126_v41, %v10855_v44  ;;  %v10821_v44 = vld [vmem:[%s14264_s27 + $0x10] sm:$0xf] }
 0x9c8   : > { %v12127_v49 = vld [vmem:[%s14264_s27 + $0x60] sm:$0xf0]  ;;  %6518 = vmatpush.bf16.msrb.mxu1 %v10934_v46 }
 0x9c9   : > { %v5947_v50 = vpop.f32.mrf.mxu3  ;;  %v5960_v51 = vpop.f32.mrf.mxu0 }
 0x9ca   : > { %v5961_v42 = vadd.f32 %v5960_v51, %v5947_v50  ;;  %v12140_v50 = vld [vmem:[%s14264_s27 + $0xcc] sm:$0xf] }
 0x9cb   : > { %v5923_v53 = vpop.f32.mrf.mxu1 }
 0x9cc   : > { %v6150_v62 = vperm.slane %v5961_v42, 0  ;;  %v10907_v42 = vld [vmem:[%s14264_s27 + $0xdc] sm:$0xf0]  ;;  %v12143_v53 = vld [vmem:[%s14264_s27 + $0xe0] sm:$0xf0] }
 0x9cd   : > { %v10914_v55 = vor.u32 %v12143_v53, %v10913_v52  ;;  %v12121_v53 = vld [vmem:[%s14264_s27 + $0x34] sm:$0xf] }
 0x9ce   : > { %v6151_v0 = vmul.f32 %v6150_v62, %v6149_v63  ;;  %v12122_v62 = vld [vmem:[%s14264_s27 + $0x38] sm:$0xf0]  ;;  %v12135_v63 = vld [vmem:[%s14264_s27 + $0xa4] sm:$0xf] }
 0x9cf   : > { %v5934_v26 = vpop.f32.mrf.mxu2  ;;  %6519 = vmatpush.bf16.msrb.mxu1 %v10914_v55  ;;  %v10921_v55 = vld [vmem:[%s14264_s27 + $0xd8] sm:$0xf] }
 0x9d0   : > { %v5935_v57 = vadd.f32 %v5934_v26, %v5921_v45  ;;  %v10935_v45 = vld [vmem:[%s14264_s27 + $0x10c] sm:$0xf0]  ;;  %v10910_v26 = vor.u32 %v12140_v50, %v10907_v42  ;;  %v12123_v42 = vld [vmem:[%s14264_s27 + $0x40] sm:$0xf0] }
 0x9d1   : > { %v5949_v59 = vpop.f32.mrf.mxu3  ;;  %v5962_v60 = vpop.f32.mrf.mxu0  ;;  %v10938_v54 = vor.u32 %v12146_v58, %v10935_v45  ;;  %v12149_v58 = vld [vmem:[%s14264_s27 + $0x110] sm:$0xf0] }
 0x9d2   : > { %v6135_v10 = vperm.slane %v5935_v57, 0  ;;  %v12141_v57 = vld [vmem:[%s14264_s27 + $0xd4] sm:$0xf]  ;;  %v10915_v59 = vld [vmem:[%s14264_s27 + $0xe4] sm:$0xf0]  ;;  %6506 = vmatpush.bf16.msrb.mxu0 %v10910_v26 }
 0x9d3   : > { %v13765_v3 = vpop.f32.mrf.mxu1  ;;  %6531 = vmatpush.bf16.msrb.mxu2 %v10938_v54  ;;  %v10825_v60 = vld [vmem:[%s14264_s27 + $0x28] sm:$0xf]  ;;  %v10942_v54 = vor.u32 %v12149_v58, %v10941_v56 }
 0x9d4   : > { %v6136_v25 = vmul.f32 %v6135_v10, %v6134_v61  ;;  %v10918_v61 = vor.u32 %v12141_v57, %v10915_v59  ;;  %v10826_v10 = vor.u32 %v12122_v62, %v10825_v60  ;;  %v10835_v26 = vld [vmem:[%s14264_s27 + $0x44] sm:$0xf0]  ;;  %v12144_v59 = vld [vmem:[%s14264_s27 + $0xe8] sm:$0xf0]  ;;  %v10807_v62 = vld [vmem:[%s14264_s27 + $0x14] sm:$0xf0] }
 0x9d5   : > { %v10838_v57 = vor.u32 %v12121_v53, %v10835_v26  ;;  %v10922_v60 = vor.u32 %v12144_v59, %v10921_v55  ;;  %v12453_v55 = vld [vmem:[%s14265_s15] ss:$0 sm:$0xff]  ;;  %s14266_s15 = sld [smem:[#allocation29_spill]] }
 0x9d6   : > { %v6137_v1 = vadd.f32 %v6136_v25, %v6122_v47  ;;  %v10845_v47 = vld [vmem:[%s14264_s27 + $0x50] sm:$0xf]  ;;  %v10887_v25 = vld [vmem:[%s14264_s27 + $0xb4] sm:$0xf0] }
 0x9d7   : > { %v5936_v2 = vpop.f32.mrf.mxu2  ;;  %v10846_v51 = vor.u32 %v12127_v49, %v10845_v47  ;;  %6532 = vmatpush.bf16.msrb.mxu2 %v10918_v61  ;;  %v12120_v47 = vld [vmem:[%s14264_s27 + $0x2c] sm:$0xf]  ;;  %v10827_v49 = vld [vmem:[%s14264_s27 + $0x3c] sm:$0xf0]  ;;  %v12115_v61 = vld [vmem:[%s14264_s27 + $0x4] sm:$0xf] }
 0x9d8   : > { %v13768_v5 = vadd.f32 %v6151_v0, %v6137_v1  ;;  %v10893_v0 = vld [vmem:[%s14264_s27 + $0xa8] sm:$0xf]  ;;  %v10890_v1 = vor.u32 %v12135_v63, %v10887_v25  ;;  %v12138_v2 = vld [vmem:[%s14264_s27 + $0xb8] sm:$0xf0]  ;;  %v10830_v50 = vor.u32 %v12120_v47, %v10827_v49  ;;  %v10810_v25 = vor.u32 %v12115_v61, %v10807_v62  ;;  %v6219_v49 = vpop.permute.xlu2 %6218 }
 0x9d9   : > { %v13770_v6 = vpop.f32.mrf.mxu3  ;;  %v13772_v7 = vpop.f32.mrf.mxu0  ;;  %6496 = vmatpush.bf16.msrb.mxu3 %v10846_v51  ;;  %v10833_v51 = vld [vmem:[%s14264_s27 + $0x30] sm:$0xf] }
 0x9da   : > { %6507 = vmatpush.bf16.msrb.mxu0 %v10890_v1  ;;  %v10834_v52 = vor.u32 %v12123_v42, %v10833_v51  ;;  %v12116_v1 = vld [vmem:[%s14264_s27 + $0xc] sm:$0xf]  ;;  %v6013_v33 = vadd.f32 %v13772_v7, %v13770_v6 }
 0x9db   : > { %v5975_v12 = vpop.f32.mrf.mxu1  ;;  %6533 = vmatpush.bf16.msrb.mxu2 %v10898_v13  ;;  %v12139_v13 = vld [vmem:[%s14264_s27 + $0xc0] sm:$0xf0]  ;;  %s14267_s30 = smov %s14266_s15 }
 0x9dc   : > { %v10894_v12 = vor.u32 %v12138_v2, %v10893_v0  ;;  %v12118_v0 = vld [vmem:[%s14264_s27 + $0x18] sm:$0xf0]  ;;  %v10815_v2 = vld [vmem:[%s14264_s27 + $0x1c] sm:$0xf0]  ;;  %v6180_v40 = vperm.slane %v6013_v33, 0 }
 0x9dd   : > { %6497 = vmatpush.bf16.msrb.mxu3 %v10826_v10  ;;  %v10813_v10 = vld [vmem:[%s14264_s27 + $0x8] sm:$0xf]  ;;  %v10818_v11 = vor.u32 %v12116_v1, %v10815_v2 }
 0x9de   : > { %6520 = vmatpush.bf16.msrb.mxu1 %v10894_v12  ;;  %6508 = vmatpush.bf16.msrb.mxu0 %v10870_v24  ;;  %v10814_v8 = vor.u32 %v12118_v0, %v10813_v10  ;;  %v10901_v12 = vld [vmem:[%s14264_s27 + $0xb0] sm:$0xf]  ;;  %v10861_v24 = vld [vmem:[%s14264_s27 + $0x60] sm:$0xf] }
 0x9df   : > { %v13778_v18 = vpop.f32.mrf.mxu2  ;;  %6534 = vmatpush.bf16.msrb.mxu2 %v10878_v32 }
 0x9e0   : > { %v5987_v22 = vadd.f32 %v13778_v18, %v13765_v3 }
 0x9e1   : > { %v6001_v19 = vpop.f32.mrf.mxu3  ;;  %v6014_v20 = vpop.f32.mrf.mxu0 }
 0x9e2   : > { %v12117_v19 = vld [vmem:[%s14264_s27 + $0x10] sm:$0xf0]  ;;  %6521 = vmatpush.bf16.msrb.mxu1 %v10874_v27  ;;  %v6165_v30 = vperm.slane %v5987_v22, 0  ;;  %v10862_v27 = vor.u32 %v12129_v29, %v10861_v24 }
 0x9e3   : > { %v10806_v20 = vor.u32 %v12117_v19, %v10805_v17  ;;  %6535 = vmatpush.bf16.msrb.mxu2 %v10858_v43  ;;  %v10902_v17 = vor.u32 %v12139_v13, %v10901_v12  ;;  %v12443_v19 = vpop.permute.xlu0 %12442 }
 0x9e5   : > { %6498 = vmatpush.bf16.msrb.mxu3 %v10806_v20  ;;  %v10881_v20 = vld [vmem:[%s14264_s27 + $0x88] sm:$0xf] }
 0x9e6   : > { %6522 = vmatpush.bf16.msrb.mxu1 %v10854_v38  ;;  %v10882_v23 = vor.u32 %v12134_v21, %v10881_v20  ;;  %v12119_v38 = vld [vmem:[%s14264_s27 + $0x20] sm:$0xf0] }
 0x9e7   : > { %v5988_v37 = vpop.f32.mrf.mxu2  ;;  %6536 = vmatpush.bf16.msrb.mxu2 %v10838_v57 }
 0x9e8   : > { %v10850_v37 = vor.u32 %v12125_v4, %v10847_v9  ;;  %v12445_v4 = vunpack.i.h.bf16 %v12443_v19  ;;  %v12449_v9 = vunpack.i.l.bf16 %v12448_v31 }
 0x9e9   : > { %6543 = vmatpush.bf16.msra.mxu3 %v10962_v14  ;;  %v12124_v14 = vld [vmem:[%s14264_s27 + $0x48] sm:$0xf0] }
 0x9ea   : > { %6509 = vmatpush.bf16.msrb.mxu0 %v10850_v37  ;;  %6523 = vmatpush.bf16.msrb.mxu1 %v10834_v52  ;;  %v10842_v37 = vor.u32 %v12124_v14, %v10841_v34  ;;  %v6179_v43 = vperm.slane %v12445_v4, %v13760_v39  ;;  %v6194_v56 = vperm.slane %v12449_v9, %v13760_v39  ;;  %v12163_v34 = vld [vmem:[%s14267_s30 + $0x40] sm:$0xff]  ;;  %v12161_v14 = vld [vmem:[%s14267_s30 + $0x30] sm:$0xff] }
 0x9eb   : > { %6537 = vmatpush.bf16.msrb.mxu2 %v10818_v11 }
 0x9ec   : > { %v6181_v58 = vmul.f32 %v6180_v40, %v6179_v43  ;;  %v12156_v40 = vld [vmem:[%s14267_s30 + $0x8] sm:$0xff] }
 0x9ed   : > { %6544 = vmatpush.bf16.msra.mxu3 %v10942_v54 }
 0x9ee   : > { %6510 = vmatpush.bf16.msrb.mxu0 %v10830_v50  ;;  %6524 = vmatpush.bf16.msrb.mxu1 %v10814_v8 }
 0x9f1   : > { %6545 = vmatpush.bf16.msra.mxu3 %v10922_v60 }
 0x9f2   : > { %6511 = vmatpush.bf16.msrb.mxu0 %v10810_v25 }
 0x9f3   : > { %v13804_v28 = vpop.f32.mrf.mxu1 }
 0x9f5   : > { %6546 = vmatpush.bf16.msra.mxu3 %v10902_v17 }
 0x9f9   : > { %v13816_v15 = vpop.f32.mrf.mxu3  ;;  %v13818_v16 = vpop.f32.mrf.mxu0  ;;  %6547 = vmatpush.bf16.msra.mxu3 %v10882_v23 }
 0x9fa   : > { %v6065_v7 = vadd.f32 %v13818_v16, %v13816_v15 }
 0x9fb   : > { %v6027_v48 = vpop.f32.mrf.mxu1 }
 0x9fc   : > { %v12444_v48 = vunpack.i.l.bf16 %v12443_v19  ;;  %v6210_v54 = vperm.slane %v6065_v7, 0  ;;  %v12155_v7 = vld [vmem:[%s14267_s30] sm:$0xff] }
 0x9fd   : > { %6548 = vmatpush.bf16.msra.mxu3 %v10862_v27 }
 0x9fe   : > { %v6164_v32 = vperm.slane %v12444_v48, %v13760_v39 }
 0x9ff   : > { %v13833_v36 = vpop.f32.mrf.mxu2 }
 0xa00   : > { %v6039_v3 = vadd.f32 %v13833_v36, %v13804_v28  ;;  %v6166_v35 = vmul.f32 %v6165_v30, %v6164_v32  ;;  %v10822_v28 = vor.u32 %v12119_v38, %v10821_v44  ;;  %v12450_v36 = vunpack.i.h.bf16 %v12448_v31 }
 0xa01   : > { %v6053_v45 = vpop.f32.mrf.mxu3  ;;  %v6066_v46 = vpop.f32.mrf.mxu0  ;;  %6549 = vmatpush.bf16.msra.mxu3 %v10842_v37 }
 0xa02   : > { %v6195_v41 = vperm.slane %v6039_v3, 0  ;;  %v6167_v6 = vadd.f32 %v6166_v35, %v13768_v5  ;;  %v6209_v51 = vperm.slane %v12450_v36, %v13760_v39  ;;  %v6224_v5 = vperm.slane %v6219_v49, %v13760_v39  ;;  %v12159_v3 = vld [vmem:[%s14266_s15 + $0x20] sm:$0xff]  ;;  %s14268_s15 = sld [smem:[#allocation33_spill]]  ;;  %v12160_v36 = vld [vmem:[%s14267_s30 + $0x28] sm:$0xff] }
 0xa04   : > { %v6196_v45 = vmul.f32 %v6195_v41, %v6194_v56  ;;  %v6182_v47 = vadd.f32 %v6181_v58, %v6167_v6  ;;  %v6211_v53 = vmul.f32 %v6210_v54, %v6209_v51  ;;  %v12158_v41 = vld [vmem:[%s14267_s30 + $0x18] sm:$0xff] }
 0xa05   : > { %6550 = vmatpush.bf16.msra.mxu3 %v10822_v28  ;;  %v12162_v28 = vld [vmem:[%s14267_s30 + $0x38] sm:$0xff] }
 0xa06   : > { %v6197_v42 = vadd.f32 %v6196_v45, %v6182_v47 }
 0xa07   : > { %v6040_v63 = vpop.f32.mrf.mxu2 }
 0xa08   : > { %v6212_v16 = vadd.f32 %v6211_v53, %v6197_v42  ;;  %s14269_s10 = smov %s14268_s15  ;;  %v11062_v45 = vld [vmem:[%s14268_s15 + $0x48] sm:$0xf]  ;;  %s14270_s15 = sld [smem:[#allocation31_spill]] }
 0xa09   : > { %v12173_v54 = vld [vmem:[%s14269_s10 + $0x4c] sm:$0xf]  ;;  %v11064_v49 = vld [vmem:[%s14269_s10 + $0x54] sm:$0xf0]  ;;  %v11050_v53 = vld [vmem:[%s14269_s10 + $0x30] sm:$0xf] }
 0xa0a   : > { %v11067_v42 = vor.u32 %v12173_v54, %v11064_v49 }
 0xa13   : > { %v6077_v18 = vpop.f32.mrf.mxu1 }
 0xa1b   : > { %v6079_v46 = vpop.f32.mrf.mxu1 }
 0xa1c   : > { %v12174_v46 = vld [vmem:[%s14269_s10 + $0x50] sm:$0xf0] }
 0xa1d   : > { %v11063_v47 = vor.u32 %v12174_v46, %v11062_v45  ;;  %v12454_v45 = vld [vmem:[%s14270_s15] ss:$0 sm:$0xff]  ;;  %s14271_s15 = sld [smem:[#allocation32_spill]] }
 0xa1f   : > { %v6090_v50 = vpop.f32.mrf.mxu2 }
 0xa20   : > { %v6091_v52 = vadd.f32 %v6090_v50, %v6077_v18  ;;  %v12157_v18 = vld [vmem:[%s14267_s30 + $0x10] sm:$0xff] }
 0xa21   : > { %v11070_v50 = vld [vmem:[%s14269_s10 + $0x50] sm:$0xf] }
 0xa22   : > { %v6225_v15 = vperm.slane %v6091_v52, 0  ;;  %v12175_v52 = vld [vmem:[%s14269_s10 + $0x58] sm:$0xf0] }
 0xa23   : > { %s14272_s26 = smov %s14271_s15 }
 0xa24   : > { %v6226_v26 = vmul.f32 %v6225_v15, %v6224_v5  ;;  %v11071_v5 = vor.u32 %v12175_v52, %v11070_v50  ;;  %v12171_v15 = vld [vmem:[%s14269_s10 + $0x38] sm:$0xf0] }
 0xa26   : > { %v6227_v57 = vadd.f32 %v6226_v26, %v6212_v16  ;;  %v12170_v16 = vld [vmem:[%s14269_s10 + $0x34] sm:$0xf]  ;;  %v11051_v26 = vor.u32 %v12171_v15, %v11050_v53 }
 0xa27   : > { %v6092_v59 = vpop.f32.mrf.mxu2 }
 0xa28   : > { %v6232_v60 = vadd.f32 %v12453_v55, %v6227_v57  ;;  %v11052_v55 = vld [vmem:[%s14269_s10 + $0x3c] sm:$0xf0]  ;;  %v11058_v57 = vld [vmem:[%s14269_s10 + $0x38] sm:$0xf]  ;;  %v12172_v59 = vld [vmem:[%s14269_s10 + $0x40] sm:$0xf0] }
 0xa2a   : > { %v6233_v61 = vmax.f32 %v6232_v60, 0.0 }
 0xa2c   : > { %v6234_v62 = vpack.c.bf16 %v6233_v61, %v6233_v61  ;;  %v11055_v61 = vor.u32 %v12170_v16, %v11052_v55 }
 0xa2e   : > { %6499 = vmatmul.bf16.vlgmr.msrb.gmra.mxu3 %v6234_v62  ;;  %6512 = vmatmul.bf16.vlgmr.msrb.gmra.mxu0 %v6234_v62 }
 0xa2f   : > { %6525 = vmatmul.bf16.vlgmr.msrb.gmra.mxu1 %v6234_v62  ;;  %6538 = vmatmul.bf16.vlgmr.msrb.gmra.mxu2 %v6234_v62 }
 0xa3e   : > { %6551 = vmatmul.bf16.vlgmr.msra.gmra.mxu3 %v6234_v62  ;;  %v11059_v62 = vor.u32 %v12172_v59, %v11058_v57 }
 0xaab   : > { %v6513_v10 = vpop.f32.mrf.mxu0 }
 0xaac   : > { %v6526_v63 = vpop.f32.mrf.mxu1 }
 0xab1   : > { %v6500_v25 = vpop.f32.mrf.mxu3 }
 0xab2   : > { %v6556_v0 = vpack.c.bf16 %v6513_v10, %v6500_v25  ;;  %v6539_v39 = vpop.f32.mrf.mxu2  ;;  %v12168_v25 = vld [vmem:[%s14269_s10 + $0x20] sm:$0xf0] }
 0xab3   : > { %v6557_v1 = vpack.c.bf16 %v6539_v39, %v6526_v63  ;;  %v6515_v2 = vpop.f32.mrf.mxu0  ;;  %v11038_v63 = vld [vmem:[%s14269_s10 + $0x18] sm:$0xf] }
 0xab4   : > { %v6528_v8 = vpop.f32.mrf.mxu1  ;;  %v6627_v11 = vunpack.c.h.b16 %v6556_v0  ;;  %v6570_v12 = vunpack.c.l.b16 %v6556_v0  ;;  %v6603_v44 = vsel %vm1796_vm0, %v6556_v0, 0  ;;  %v12167_v0 = vld [vmem:[%s14269_s10 + $0x1c] sm:$0xf]  ;;  %v11039_v39 = vor.u32 %v12168_v25, %v11038_v63  ;;  %v11046_v2 = vld [vmem:[%s14269_s10 + $0x20] sm:$0xf] }
 0xab5   : > { %v6756_v13 = vunpack.c.h.b16 %v6557_v1  ;;  %v6695_v17 = vsel %vm1796_vm0, %v6557_v1, 0  ;;  %v6722_v29 = vunpack.c.l.b16 %v6557_v1  ;;  %v11040_v1 = vld [vmem:[%s14269_s10 + $0x24] sm:$0xf0]  ;;  %v12169_v8 = vld [vmem:[%s14269_s10 + $0x28] sm:$0xf0] }
 0xab6   : > { %6704 = vmatpush.bf16.msrb.mxu3 %v6695_v17  ;;  %v6628_v19 = vpack.c.b16 %v6627_v11, %v6627_v11  ;;  %v6571_v20 = vpack.c.b16 %v6570_v12, %v6570_v12  ;;  %v11047_v17 = vor.u32 %v12169_v8, %v11046_v2 }
 0xab7   : > { %v6757_v21 = vpack.c.b16 %v6756_v13, %v6756_v13  ;;  %v6723_v30 = vpack.c.b16 %v6722_v29, %v6722_v29  ;;  %v11043_v13 = vor.u32 %v12167_v0, %v11040_v1  ;;  %v12166_v29 = vld [vmem:[%s14269_s10 + $0x10] sm:$0xf0]  ;;  %v12176_v0 = vld [vmem:[%s14271_s15] sm:$0xff]  ;;  %v12177_v1 = vld [vmem:[%s14272_s26 + $0x8] sm:$0xff] }
 0xab8   : > { %6659 = vrot.lane.b32.xlu1 %v6628_v19, %s12666_s18  ;;  %6572 = vrot.lane.b32.xlu0 %v6571_v20, %s12666_s18  ;;  %v6633_v22 = vsel %vm1796_vm0, %v6628_v19, 0  ;;  %v11026_v19 = vld [vmem:[%s14269_s10] sm:$0xf]  ;;  %v12165_v20 = vld [vmem:[%s14269_s10 + $0x8] sm:$0xf0] }
 0xab9   : > { %v6502_v23 = vpop.f32.mrf.mxu3  ;;  %6642 = vmatpush.bf16.msra.mxu1 %v6633_v22  ;;  %v6762_v48 = vsel %vm1796_vm0, %v6757_v21, 0  ;;  %10995 = vmatmul.msk.bf16.vlgmr.msrb.gmra.mxu3 %vm1789_vm1, %v12159_v3 }
 0xaba   : > { %v6541_v24 = vpop.f32.mrf.mxu2  ;;  %v11027_v23 = vor.u32 %v12165_v20, %v11026_v19  ;;  %v12180_v19 = vld [vmem:[%s14272_s26 + $0x20] sm:$0xff] }
 0xabb   : > { %v11034_v24 = vld [vmem:[%s14269_s10 + $0x8] sm:$0xf]  ;;  %v12188_v20 = vld [vmem:[%s14272_s26 + $0x60] sm:$0xff] }
 0xabc   : > { %10981 = vmatmul.msk.bf16.vlgmr.msra.gmra.mxu1 %vm1789_vm1, %v12157_v18 }
 0xabd   : > { %6771 = vmatpush.bf16.msrb.mxu1 %v6762_v48  ;;  %v11028_v48 = vld [vmem:[%s14269_s10 + $0xc] sm:$0xf0] }
 0xac0   : > { %6724 = vrot.lane.b32.xlu1 %v6723_v30, %s12666_s18  ;;  %6788 = vrot.lane.b32.xlu0 %v6757_v21, %s12666_s18  ;;  %v12164_v21 = vld [vmem:[%s14269_s10 + $0x4] sm:$0xf] }
 0xac1   : > { %v6552_v31 = vpop.f32.mrf.mxu3  ;;  %6952 = vmatpush.bf16.msra.mxu1 %v11067_v42  ;;  %v11031_v30 = vor.u32 %v12164_v21, %v11028_v48 }
 0xac2   : > { %v6558_v27 = vpack.c.bf16 %v6552_v31, %v6552_v31  ;;  %v11035_v31 = vor.u32 %v12166_v29, %v11034_v24  ;;  %v12184_v29 = vld [vmem:[%s14272_s26 + $0x40] sm:$0xff] }
 0xac4   : > { %v6824_v32 = vsel %vm1796_vm0, %v6558_v27, 0 }
 0xac5   : > { %6833 = vmatpush.bf16.msra.mxu3 %v6824_v32  ;;  %6953 = vmatpush.bf16.msra.mxu1 %v11055_v61 }
 0xac9   : > { %v6554_v33 = vpop.f32.mrf.mxu3  ;;  %11023 = vmatmul.msk.bf16.vlgmr.msra.gmra.mxu3 %vm1789_vm1, %v12163_v34  ;;  %6954 = vmatpush.bf16.msra.mxu1 %v11043_v13 }
 0xacc   : > { %11009 = vmatmul.msk.bf16.vlgmr.msrb.gmra.mxu1 %vm1789_vm1, %v12161_v14 }
 0xacd   : > { %6955 = vmatpush.bf16.msra.mxu1 %v11031_v30 }
 0xb2a   : > { %v6660_v4 = vpop.permute.xlu1 %6659  ;;  %v6573_v9 = vpop.permute.xlu0 %6572 }
 0xb2b   : > { %v6665_v35 = vsel %vm1796_vm0, %v6660_v4, 0  ;;  %v6578_v37 = vsel %vm1796_vm0, %v6573_v9, 0 }
 0xb2c   : > { %6587 = vmatpush.bf16.msra.mxu0 %v6578_v37  ;;  %6674 = vmatpush.bf16.msra.mxu2 %v6665_v35 }
 0xb2f   : > { %10969 = vmatmul.msk.bf16.vlgmr.msra.gmra.mxu0 %vm1789_vm1, %v12156_v40  ;;  %10988 = vmatmul.msk.bf16.vlgmr.msra.gmra.mxu2 %vm1789_vm1, %v12158_v41 }
 0xb30   : > { %6612 = vmatpush.bf16.msrb.mxu0 %v6603_v44 }
 0xb32   : > { %v6725_v38 = vpop.permute.xlu1 %6724  ;;  %v6789_v43 = vpop.permute.xlu0 %6788 }
 0xb33   : > { %v6730_v56 = vsel %vm1796_vm0, %v6725_v38, 0  ;;  %v6794_v6 = vsel %vm1796_vm0, %v6789_v43, 0 }
 0xb34   : > { %6739 = vmatpush.bf16.msra.mxu0 %v6730_v56  ;;  %6803 = vmatpush.bf16.msrb.mxu2 %v6794_v6 }
 0xb38   : > { %6966 = vmatpush.bf16.msra.mxu2 %v11071_v5 }
 0xb39   : > { %v6644_v60 = vpop.f32.mrf.mxu1 }
 0xb3c   : > { %6967 = vmatpush.bf16.msra.mxu2 %v11059_v62  ;;  %v6706_v11 = vpop.f32.mrf.mxu3 }
 0xb3f   : > { %10974 = vmatmul.msk.bf16.vlgmr.msrb.gmra.mxu0 %vm1789_vm1, %v12155_v7  ;;  %11016 = vmatmul.msk.bf16.vlgmr.msrb.gmra.mxu2 %vm1789_vm1, %v12162_v28 }
 0xb40   : > { %6938 = vmatpush.bf16.msrb.mxu0 %v11063_v47  ;;  %6968 = vmatpush.bf16.msra.mxu2 %v11047_v17 }
 0xb41   : > { %v6646_v27 = vpop.f32.mrf.mxu1 }
 0xb44   : > { %6939 = vmatpush.bf16.msrb.mxu0 %v11051_v26  ;;  %6969 = vmatpush.bf16.msra.mxu2 %v11035_v31  ;;  %v6708_v18 = vpop.f32.mrf.mxu3 }
 0xb48   : > { %6940 = vmatpush.bf16.msrb.mxu0 %v11039_v39 }
 0xb49   : > { %v6773_v35 = vpop.f32.mrf.mxu1 }
 0xb4c   : > { %6941 = vmatpush.bf16.msrb.mxu0 %v11027_v23  ;;  %v6835_v43 = vpop.f32.mrf.mxu3  ;;  %v12178_v23 = vld [vmem:[%s14272_s26 + $0x10] sm:$0xff] }
 0xb4f   : > { %11002 = vmatmul.msk.bf16.vlgmr.msra.gmra.mxu0 %vm1789_vm1, %v12160_v36 }
 0xb51   : > { %v6775_v36 = vpop.f32.mrf.mxu1 }
 0xb54   : > { %v6837_v49 = vpop.f32.mrf.mxu3 }
 0xbac   : > { %v6589_v58 = vpop.f32.mrf.mxu0 }
 0xbb2   : > { %v6676_v10 = vpop.f32.mrf.mxu2 }
 0xbb4   : > { %v6591_v51 = vpop.f32.mrf.mxu0 }
 0xbba   : > { %v6678_v33 = vpop.f32.mrf.mxu2 }
 0xbbc   : > { %v6614_v12 = vpop.f32.mrf.mxu0 }
 0xbbd   : > { %v6615_v22 = vadd.f32 %v6614_v12, %v6589_v58 }
 0xbbf   : > { %v6649_v32 = vadd.f32 %v6644_v60, %v6615_v22 }
 0xbc1   : > { %v6681_v14 = vadd.f32 %v6676_v10, %v6649_v32  ;;  %v12189_v32 = vld [vmem:[%s14272_s26 + $0x68] sm:$0xff] }
 0xbc2   : > { %v6805_v41 = vpop.f32.mrf.mxu2 }
 0xbc3   : > { %v6711_v9 = vadd.f32 %v6706_v11, %v6681_v14  ;;  %v12196_v14 = vld [vmem:[%s14272_s26 + $0xa0] sm:$0xff] }
 0xbc4   : > { %v6616_v3 = vpop.f32.mrf.mxu0 }
 0xbc5   : > { %v6617_v34 = vadd.f32 %v6616_v3, %v6591_v51  ;;  %v12185_v3 = vld [vmem:[%s14272_s26 + $0x48] sm:$0xff] }
 0xbc7   : > { %v6650_v4 = vadd.f32 %v6646_v27, %v6617_v34  ;;  %v12181_v27 = vld [vmem:[%s14272_s26 + $0x28] sm:$0xff]  ;;  %v12190_v34 = vld [vmem:[%s14272_s26 + $0x70] sm:$0xff] }
 0xbc9   : > { %v6682_v38 = vadd.f32 %v6678_v33, %v6650_v4  ;;  %v12179_v33 = vld [vmem:[%s14272_s26 + $0x18] sm:$0xff]  ;;  %v12186_v4 = vld [vmem:[%s14272_s26 + $0x50] sm:$0xff] }
 0xbca   : > { %v6807_v54 = vpop.f32.mrf.mxu2 }
 0xbcb   : > { %v6712_v6 = vadd.f32 %v6708_v18, %v6682_v38  ;;  %v12182_v18 = vld [vmem:[%s14272_s26 + $0x30] sm:$0xff] }
 0xbcc   : > { %v6741_v37 = vpop.f32.mrf.mxu0  ;;  %v12198_v38 = vld [vmem:[%s14272_s26 + $0xb0] sm:$0xff] }
 0xbcd   : > { %v6746_v40 = vadd.f32 %v6741_v37, %v6711_v9  ;;  %v12183_v9 = vld [vmem:[%s14272_s26 + $0x38] sm:$0xff]  ;;  %v12197_v37 = vld [vmem:[%s14272_s26 + $0xa8] sm:$0xff] }
 0xbcf   : > { %v6778_v44 = vadd.f32 %v6773_v35, %v6746_v40  ;;  %v12191_v35 = vld [vmem:[%s14272_s26 + $0x78] sm:$0xff] }
 0xbd0   : > { %v12187_v40 = vld [vmem:[%s14272_s26 + $0x58] sm:$0xff] }
 0xbd1   : > { %v6810_v56 = vadd.f32 %v6805_v41, %v6778_v44  ;;  %v12192_v41 = vld [vmem:[%s14272_s26 + $0x80] sm:$0xff] }
 0xbd2   : > { %v12204_v44 = vld [vmem:[%s14272_s26 + $0xe0] sm:$0xff] }
 0xbd3   : > { %v6840_v58 = vadd.f32 %v6835_v43, %v6810_v56  ;;  %v12200_v43 = vld [vmem:[%s14272_s26 + $0xc0] sm:$0xff]  ;;  %v12193_v56 = vld [vmem:[%s14272_s26 + $0x88] sm:$0xff] }
 0xbd4   : > { %v6743_v7 = vpop.f32.mrf.mxu0 }
 0xbd5   : > { %v6747_v28 = vadd.f32 %v6743_v7, %v6712_v6  ;;  %v6846_v50 = vadd.f32 %v12454_v45, %v6840_v58  ;;  %v12205_v6 = vld [vmem:[%s14272_s26 + $0xe8] sm:$0xff]  ;;  %v12199_v7 = vld [vmem:[%s14272_s26 + $0xb8] sm:$0xff]  ;;  %v12206_v58 = vld [vmem:[%s14272_s26 + $0xf0] sm:$0xff] }
 0xbd7   : > { %v6779_v46 = vadd.f32 %v6775_v36, %v6747_v28  ;;  %v6848_v52 = vmax.f32 %v6846_v50, 0.0  ;;  %v12201_v28 = vld [vmem:[%s14272_s26 + $0xc8] sm:$0xff]  ;;  %v12194_v36 = vld [vmem:[%s14272_s26 + $0x90] sm:$0xff] }
 0xbd9   : > { %v6811_v47 = vadd.f32 %v6807_v54, %v6779_v46  ;;  %v12195_v46 = vld [vmem:[%s14272_s26 + $0x98] sm:$0xff] }
 0xbda   : > { %v12207_v54 = vld [vmem:[%s14272_s26 + $0xf8] sm:$0xff] }
 0xbdb   : > { %v6841_v51 = vadd.f32 %v6837_v49, %v6811_v47  ;;  %v12203_v47 = vld [vmem:[%s14272_s26 + $0xd8] sm:$0xff]  ;;  %v12208_v49 = vld [vmem:[%s14272_s26 + $0x100] sm:$0xff] }
 0xbdd   : > { %v6847_v42 = vadd.f32 %v12454_v45, %v6841_v51  ;;  %v12202_v45 = vld [vmem:[%s14272_s26 + $0xd0] sm:$0xff] }
 0xbdf   : > { %v6849_v5 = vmax.f32 %v6847_v42, 0.0  ;;  %v12209_v42 = vld [vmem:[%s14272_s26 + $0x108] sm:$0xff] }
 0xbe1   : > { %v6850_v53 = vpack.c.bf16 %v6849_v5, %v6848_v52 }
 0xbe3   : > { %11072 = vmatmul.msk.bf16.vlgmr.msrb.gmra.mxu0 %vm2274_vm2, %v6850_v53  ;;  %11073 = vmatmul.msk.bf16.vlgmr.msra.gmra.mxu1 %vm2274_vm2, %v6850_v53 }
 0xbe4   : > { %11074 = vmatmul.msk.bf16.vlgmr.msra.gmra.mxu2 %vm2274_vm2, %v6850_v53 }
 0xc60   : > { %v6943_v15 = vpop.f32.mrf.mxu0  ;;  %v6957_v16 = vpop.f32.mrf.mxu1 }
 0xc61   : > { %v6976_v26 = vpack.c.bf16 %v6957_v16, %v6943_v15  ;;  %v12210_v15 = vld [vmem:[%s14272_s26 + $0x110] sm:$0xff] }
 0xc63   : > { %v7019_v60 = vunpack.c.l.b16 %v6976_v26  ;;  %v7319_v63 = vunpack.c.h.b16 %v6976_v26 }
 0xc67   : > { %v6971_v39 = vpop.f32.mrf.mxu2 }
 0xc68   : > { %v6945_v55 = vpop.f32.mrf.mxu0  ;;  %v6959_v57 = vpop.f32.mrf.mxu1  ;;  %v6977_v11 = vpack.c.bf16 %v6971_v39, %v6971_v39 }
 0xc69   : > { %v6978_v59 = vpack.c.bf16 %v6959_v57, %v6945_v55 }
 0xc6a   : > { %v7646_v21 = vunpack.c.l.b16 %v6977_v11 }
 0xc6b   : > { %v7020_v61 = vunpack.c.l.b16 %v6978_v59  ;;  %v7320_v10 = vunpack.c.h.b16 %v6978_v59 }
 0xc6d   : > { %v7021_v62 = vpack.c.b16 %v7020_v61, %v7019_v60  ;;  %v7321_v25 = vpack.c.b16 %v7320_v10, %v7319_v63  ;;  %v12211_v61 = vld [vmem:[%s14272_s26 + $0x118] sm:$0xff] }
 0xc6f   : > { %7238 = vrot.lane.b32.xlu1 %v7021_v62, %s12668_s22  ;;  %7022 = vrot.lane.b32.xlu0 %v7021_v62, %s12669_s2  ;;  %v6973_v2 = vpop.f32.mrf.mxu2 }
 0xc70   : > { %7106 = vmatpush.bf16.msra.mxu0 %v7021_v62  ;;  %v6979_v8 = vpack.c.bf16 %v6973_v2, %v6973_v2 }
 0xc72   : > { %v7647_v12 = vunpack.c.l.b16 %v6979_v8 }
 0xc73   : > { %11119 = vmatmul.msk.bf16.vlgmr.msra.gmra.mxu0 %vm2754_vm5, %v12176_v0 }
 0xc74   : > { %v7648_v22 = vpack.c.b16 %v7647_v12, %v7646_v21 }
 0xc77   : > { %7563 = vrot.lane.b32.xlu1 %v7321_v25, %s12668_s22  ;;  %7157 = vrot.lane.b32.xlu0 %v7021_v62, %s12666_s18  ;;  %s14273_s22 = sld [smem:[#allocation34_spill]] }
 0xc7f   : > { %7482 = vrot.lane.b32.xlu1 %v7321_v25, %s12666_s18  ;;  %7401 = vrot.lane.b32.xlu0 %v7321_v25, %s12669_s2  ;;  %s14274_s2 = sld [smem:[#allocation35_spill]] }
 0xc83   : > { %11120 = vmatmul.msk.bf16.gmra.mxu0 %vm2754_vm5, %v12177_v1 }
 0xc93   : > { %11121 = vmatmul.msk.bf16.gmra.mxu0 %vm2754_vm5, %v12178_v23 }
 0xca3   : > { %11122 = vmatmul.msk.bf16.gmra.mxu0 %vm2754_vm5, %v12179_v33 }
 0xce1   : > { %v7239_v13 = vpop.permute.xlu1 %7238  ;;  %v7023_v17 = vpop.permute.xlu0 %7022 }
 0xce2   : > { %7044 = vmatpush.bf16.msrb.mxu3 %v7023_v17  ;;  %7260 = vmatpush.bf16.msrb.mxu2 %v7239_v13 }
 0xce5   : > { %11099 = vmatmul.msk.bf16.vlgmr.msrb.gmra.mxu3 %vm2754_vm5, %v12180_v19  ;;  %11175 = vmatmul.msk.bf16.vlgmr.msrb.gmra.mxu2 %vm2754_vm5, %v12188_v20 }
 0xce6   : > { %7342 = vmatpush.bf16.msra.mxu3 %v7321_v25 }
 0xce9   : > { %v7564_v48 = vpop.permute.xlu1 %7563  ;;  %v7158_v24 = vpop.permute.xlu0 %7157 }
 0xcea   : > { %7669 = vmatpush.bf16.msrb.mxu3 %v7648_v22  ;;  %7179 = vmatpush.bf16.msrb.mxu1 %v7158_v24 }
 0xceb   : > { %7585 = vmatpush.bf16.msra.mxu2 %v7564_v48 }
 0xced   : > { %11147 = vmatmul.msk.bf16.vlgmr.msrb.gmra.mxu1 %vm2754_vm5, %v12184_v29 }
 0xcf0   : > { %v7108_v5 = vpop.f32.mrf.mxu0 }
 0xcf1   : > { %v7483_v30 = vpop.permute.xlu1 %7482  ;;  %v7402_v31 = vpop.permute.xlu0 %7401 }
 0xcf2   : > { %7423 = vmatpush.bf16.msrb.mxu0 %v7402_v31  ;;  %7504 = vmatpush.bf16.msra.mxu1 %v7483_v30 }
 0xcf5   : > { %11100 = vmatmul.msk.bf16.gmra.mxu3 %vm2754_vm5, %v12181_v27  ;;  %11176 = vmatmul.msk.bf16.gmra.mxu2 %vm2754_vm5, %v12189_v32 }
 0xcf6   : > { %11231 = vmatmul.msk.bf16.vlgmr.msrb.gmra.mxu0 %vm2754_vm5, %v12196_v14 }
 0xcf8   : > { %v7110_v57 = vpop.f32.mrf.mxu0 }
 0xcfd   : > { %11148 = vmatmul.msk.bf16.gmra.mxu1 %vm2754_vm5, %v12185_v3 }
 0xd00   : > { %v7113_v10 = vpop.f32.mrf.mxu0 }
 0xd05   : > { %11101 = vmatmul.msk.bf16.gmra.mxu3 %vm2754_vm5, %v12182_v18  ;;  %11177 = vmatmul.msk.bf16.gmra.mxu2 %vm2754_vm5, %v12190_v34 }
 0xd06   : > { %11232 = vmatmul.msk.bf16.gmra.mxu0 %vm2754_vm5, %v12197_v37 }
 0xd08   : > { %v7115_v39 = vpop.f32.mrf.mxu0 }
 0xd0d   : > { %11149 = vmatmul.msk.bf16.gmra.mxu1 %vm2754_vm5, %v12186_v4 }
 0xd10   : > { %v7118_v11 = vpop.f32.mrf.mxu0 }
 0xd15   : > { %11102 = vmatmul.msk.bf16.gmra.mxu3 %vm2754_vm5, %v12183_v9  ;;  %11178 = vmatmul.msk.bf16.gmra.mxu2 %vm2754_vm5, %v12191_v35 }
 0xd16   : > { %11233 = vmatmul.msk.bf16.gmra.mxu0 %vm2754_vm5, %v12198_v38 }
 0xd18   : > { %v14030_v20 = vpop.f32.mrf.mxu0 }
 0xd1d   : > { %11150 = vmatmul.msk.bf16.gmra.mxu1 %vm2754_vm5, %v12187_v40 }
 0xd20   : > { %v14036_v48 = vpop.f32.mrf.mxu0 }
 0xd25   : > { %11203 = vmatmul.msk.bf16.vlgmr.msra.gmra.mxu3 %vm2754_vm5, %v12192_v41  ;;  %11287 = vmatmul.msk.bf16.vlgmr.msra.gmra.mxu2 %vm2754_vm5, %v12204_v44 }
 0xd26   : > { %11234 = vmatmul.msk.bf16.gmra.mxu0 %vm2754_vm5, %v12199_v7 }
 0xd28   : > { %v14042_v31 = vpop.f32.mrf.mxu0 }
 0xd2d   : > { %11259 = vmatmul.msk.bf16.vlgmr.msra.gmra.mxu1 %vm2754_vm5, %v12200_v43 }
 0xd35   : > { %11204 = vmatmul.msk.bf16.gmra.mxu3 %vm2754_vm5, %v12193_v56  ;;  %11288 = vmatmul.msk.bf16.gmra.mxu2 %vm2754_vm5, %v12205_v6 }
 0xd3d   : > { %11260 = vmatmul.msk.bf16.gmra.mxu1 %vm2754_vm5, %v12201_v28 }
 0xd45   : > { %11205 = vmatmul.msk.bf16.gmra.mxu3 %vm2754_vm5, %v12194_v36  ;;  %11289 = vmatmul.msk.bf16.gmra.mxu2 %vm2754_vm5, %v12206_v58 }
 0xd4d   : > { %11261 = vmatmul.msk.bf16.gmra.mxu1 %vm2754_vm5, %v12202_v45 }
 0xd55   : > { %11206 = vmatmul.msk.bf16.gmra.mxu3 %vm2754_vm5, %v12195_v46  ;;  %11290 = vmatmul.msk.bf16.gmra.mxu2 %vm2754_vm5, %v12207_v54 }
 0xd5d   : > { %11262 = vmatmul.msk.bf16.gmra.mxu1 %vm2754_vm5, %v12203_v47 }
 0xd65   : > { %11315 = vmatmul.msk.bf16.vlgmr.msrb.gmra.mxu3 %vm2754_vm5, %v12208_v49 }
 0xd68   : > { %v7046_v50 = vpop.f32.mrf.mxu3  ;;  %v7262_v26 = vpop.f32.mrf.mxu2 }
 0xd69   : > { %v7109_v34 = vadd.f32 %v7108_v5, %v7046_v50 }
 0xd6a   : > { %v7181_v16 = vpop.f32.mrf.mxu1 }
 0xd6b   : > { %v7201_v4 = vadd.f32 %v7181_v16, %v7109_v34 }
 0xd6d   : > { %v7282_v40 = vadd.f32 %v7262_v26, %v7201_v4 }
 0xd70   : > { %v7048_v51 = vpop.f32.mrf.mxu3  ;;  %v7264_v62 = vpop.f32.mrf.mxu2 }
 0xd71   : > { %v7111_v41 = vadd.f32 %v7110_v57, %v7048_v51 }
 0xd72   : > { %v7183_v59 = vpop.f32.mrf.mxu1 }
 0xd73   : > { %v7425_v3 = vpop.f32.mrf.mxu0  ;;  %v7202_v43 = vadd.f32 %v7183_v59, %v7111_v41 }
 0xd75   : > { %11316 = vmatmul.msk.bf16.gmra.mxu3 %vm2754_vm5, %v12209_v42  ;;  %v7283_v28 = vadd.f32 %v7264_v62, %v7202_v43  ;;  %v14057_v42 = vld [vmem:[%s14273_s22] ss:$0 sm:$0xff] }
 0xd78   : > { %v7051_v52 = vpop.f32.mrf.mxu3  ;;  %v7267_v0 = vpop.f32.mrf.mxu2 }
 0xd79   : > { %v7114_v36 = vadd.f32 %v7113_v10, %v7051_v52 }
 0xd7a   : > { %v7186_v63 = vpop.f32.mrf.mxu1 }
 0xd7b   : > { %v7427_v35 = vpop.f32.mrf.mxu0  ;;  %v7203_v54 = vadd.f32 %v7186_v63, %v7114_v36 }
 0xd7d   : > { %v7284_v5 = vadd.f32 %v7267_v0, %v7203_v54 }
 0xd80   : > { %v14012_v53 = vpop.f32.mrf.mxu3  ;;  %v7269_v8 = vpop.f32.mrf.mxu2 }
 0xd82   : > { %v7188_v2 = vpop.f32.mrf.mxu1 }
 0xd83   : > { %v7430_v58 = vpop.f32.mrf.mxu0 }
 0xd85   : > { %11317 = vmatmul.msk.bf16.gmra.mxu3 %vm2754_vm5, %v12210_v15  ;;  %v7116_v15 = vadd.f32 %v7115_v39, %v14012_v53 }
 0xd87   : > { %v7204_v62 = vadd.f32 %v7188_v2, %v7116_v15 }
 0xd88   : > { %v14016_v55 = vpop.f32.mrf.mxu3  ;;  %v14028_v17 = vpop.f32.mrf.mxu2 }
 0xd89   : > { %v7285_v34 = vadd.f32 %v7269_v8, %v7204_v62 }
 0xd8a   : > { %v14026_v13 = vpop.f32.mrf.mxu1 }
 0xd8b   : > { %v7432_v52 = vpop.f32.mrf.mxu0 }
 0xd90   : > { %v14018_v60 = vpop.f32.mrf.mxu3  ;;  %v14034_v23 = vpop.f32.mrf.mxu2 }
 0xd91   : > { %v7121_v8 = vadd.f32 %v14030_v20, %v14018_v60 }
 0xd92   : > { %v14032_v21 = vpop.f32.mrf.mxu1 }
 0xd95   : > { %11318 = vmatmul.msk.bf16.gmra.mxu3 %vm2754_vm5, %v12211_v61 }
 0xd98   : > { %v14022_v25 = vpop.f32.mrf.mxu3  ;;  %v14040_v30 = vpop.f32.mrf.mxu2 }
 0xd99   : > { %v7124_v60 = vadd.f32 %v14036_v48, %v14022_v25 }
 0xd9a   : > { %v14038_v24 = vpop.f32.mrf.mxu1 }
 0xda0   : > { %v14024_v1 = vpop.f32.mrf.mxu3  ;;  %v14048_v33 = vpop.f32.mrf.mxu2 }
 0xda1   : > { %v7126_v25 = vadd.f32 %v14042_v31, %v14024_v1 }
 0xda2   : > { %v14046_v32 = vpop.f32.mrf.mxu1 }
 0xda8   : > { %v7344_v12 = vpop.f32.mrf.mxu3  ;;  %v7587_v9 = vpop.f32.mrf.mxu2 }
 0xda9   : > { %v7364_v44 = vadd.f32 %v7344_v12, %v7282_v40  ;;  %v7435_v40 = vpop.f32.mrf.mxu0 }
 0xdaa   : > { %v7506_v14 = vpop.f32.mrf.mxu1 }
 0xdab   : > { %v7445_v56 = vadd.f32 %v7425_v3, %v7364_v44 }
 0xdad   : > { %v7526_v45 = vadd.f32 %v7506_v14, %v7445_v56  ;;  %v7119_v14 = vadd.f32 %v7118_v11, %v14016_v55 }
 0xdaf   : > { %v7607_v49 = vadd.f32 %v7587_v9, %v7526_v45 }
 0xdb0   : > { %v7346_v19 = vpop.f32.mrf.mxu3  ;;  %v7589_v6 = vpop.f32.mrf.mxu2 }
 0xdb1   : > { %v7365_v46 = vadd.f32 %v7346_v19, %v7283_v28  ;;  %v7437_v45 = vpop.f32.mrf.mxu0 }
 0xdb2   : > { %v7508_v38 = vpop.f32.mrf.mxu1 }
 0xdb3   : > { %v7446_v50 = vadd.f32 %v7427_v35, %v7365_v46 }
 0xdb5   : > { %v7527_v57 = vadd.f32 %v7508_v38, %v7446_v50 }
 0xdb7   : > { %v7608_v12 = vadd.f32 %v7589_v6, %v7527_v57 }
 0xdb8   : > { %v7349_v22 = vpop.f32.mrf.mxu3  ;;  %v7592_v26 = vpop.f32.mrf.mxu2 }
 0xdb9   : > { %v7366_v59 = vadd.f32 %v7349_v22, %v7284_v5  ;;  %v7205_v22 = vadd.f32 %v14026_v13, %v7119_v14  ;;  %v7206_v13 = vadd.f32 %v14032_v21, %v7121_v8  ;;  %v7207_v21 = vadd.f32 %v14038_v24, %v7124_v60 }
 0xdba   : > { %v7511_v47 = vpop.f32.mrf.mxu1  ;;  %v7208_v24 = vadd.f32 %v14046_v32, %v7126_v25 }
 0xdbb   : > { %v7447_v63 = vadd.f32 %v7430_v58, %v7366_v59  ;;  %v7286_v38 = vadd.f32 %v14028_v17, %v7205_v22  ;;  %v7287_v17 = vadd.f32 %v14034_v23, %v7206_v13  ;;  %v7288_v23 = vadd.f32 %v14040_v30, %v7207_v21  ;;  %v11324_v13 = vld [vmem:[%s14274_s2 + $0x6] sm:$0x3]  ;;  %v11394_v21 = vld [vmem:[#allocation5 + $0x70] sm:$0xf] }
 0xdbc   : > { %v7289_v30 = vadd.f32 %v14048_v33, %v7208_v24  ;;  %v12223_v24 = vld [vmem:[#allocation5 + $0x54] sm:$0xf0] }
 0xdbd   : > { %v7528_v4 = vadd.f32 %v7511_v47, %v7447_v63 }
 0xdbf   : > { %v7609_v2 = vadd.f32 %v7592_v26, %v7528_v4  ;;  %v7440_v26 = vpop.f32.mrf.mxu0 }
 0xdc0   : > { %v7351_v29 = vpop.f32.mrf.mxu3  ;;  %v7594_v9 = vpop.f32.mrf.mxu2 }
 0xdc1   : > { %v7367_v53 = vadd.f32 %v7351_v29, %v7285_v34 }
 0xdc2   : > { %v7513_v19 = vpop.f32.mrf.mxu1 }
 0xdc3   : > { %v7448_v41 = vadd.f32 %v7432_v52, %v7367_v53 }
 0xdc5   : > { %v7529_v43 = vadd.f32 %v7513_v19, %v7448_v41 }
 0xdc7   : > { %v7610_v36 = vadd.f32 %v7594_v9, %v7529_v43 }
 0xdc8   : > { %v14044_v27 = vpop.f32.mrf.mxu3  ;;  %v7597_v28 = vpop.f32.mrf.mxu2 }
 0xdc9   : > { %v7368_v29 = vadd.f32 %v14044_v27, %v7286_v38 }
 0xdca   : > { %v7516_v11 = vpop.f32.mrf.mxu1 }
 0xdcb   : > { %v7449_v58 = vadd.f32 %v7435_v40, %v7368_v29  ;;  %v7753_v29 = vld [vmem:[%s14274_s2] sm:$0x3] }
 0xdcd   : > { %v7530_v54 = vadd.f32 %v7516_v11, %v7449_v58  ;;  %v11334_v58 = vld [vmem:[%s14274_s2 + $0x10] sm:$0x3] }
 0xdd0   : > { %v14050_v18 = vpop.f32.mrf.mxu3  ;;  %v7599_v15 = vpop.f32.mrf.mxu2 }
 0xdd1   : > { %v7369_v27 = vadd.f32 %v14050_v18, %v7287_v17 }
 0xdd3   : > { %v7450_v5 = vadd.f32 %v7437_v45, %v7369_v27  ;;  %v11330_v45 = vld [vmem:[%s14274_s2 + $0xc] sm:$0x3] }
 0xdd8   : > { %v14052_v37 = vpop.f32.mrf.mxu3  ;;  %v7602_v19 = vpop.f32.mrf.mxu2 }
 0xdd9   : > { %v7370_v18 = vadd.f32 %v14052_v37, %v7288_v23  ;;  %v7442_v37 = vpop.f32.mrf.mxu0  ;;  %v12225_v23 = vld [vmem:[#allocation5 + $0x64] sm:$0xf0] }
 0xde0   : > { %v14054_v7 = vpop.f32.mrf.mxu3  ;;  %v7604_v22 = vpop.f32.mrf.mxu2 }
 0xde1   : > { %v7371_v31 = vadd.f32 %v14054_v7, %v7289_v30 }
 0xde8   : > { %v7671_v51 = vpop.f32.mrf.mxu3 }
 0xde9   : > { %v7691_v16 = vadd.f32 %v7671_v51, %v7607_v49  ;;  %v7518_v49 = vpop.f32.mrf.mxu1  ;;  %v7611_v51 = vadd.f32 %v7597_v28, %v7530_v54  ;;  %v11328_v28 = vld [vmem:[%s14274_s2 + $0xa] sm:$0x3] }
 0xdea   : > { %v7531_v57 = vadd.f32 %v7518_v49, %v7450_v5 }
 0xdeb   : > { %v7703_v61 = vadd.f32 %v14057_v42, %v7691_v16 }
 0xdec   : > { %v7612_v62 = vadd.f32 %v7599_v15, %v7531_v57  ;;  %v12243_v15 = vld [vmem:[#allocation5 + $0xf4] sm:$0xf0] }
 0xded   : > { %v7711_v10 = vmax.f32 %v7703_v61, 0.0 }
 0xdef   : > { %7719 = vxpose.xlu0.b32.start [1/8] (short) (narrow) %v7711_v10, 32  ;;  %v7451_v10 = vadd.f32 %v7440_v26, %v7370_v18  ;;  %v12241_v26 = vld [vmem:[#allocation5 + $0xe4] sm:$0xf0] }
 0xdf0   : > { %v7673_v3 = vpop.f32.mrf.mxu3 }
 0xdf1   : > { %v7692_v0 = vadd.f32 %v7673_v3, %v7608_v12  ;;  %v7521_v52 = vpop.f32.mrf.mxu1 }
 0xdf2   : > { %v7532_v1 = vadd.f32 %v7521_v52, %v7451_v10  ;;  %v12239_v52 = vld [vmem:[#allocation5 + $0xd4] sm:$0xf0]  ;;  %v11586_v10 = vld [vmem:[#allocation5 + $0x1f0] sm:$0xf] }
 0xdf3   : > { %v7704_v39 = vadd.f32 %v14057_v42, %v7692_v0  ;;  %v7452_v0 = vadd.f32 %v7442_v37, %v7371_v31  ;;  %v11370_v31 = vld [vmem:[#allocation5 + $0x40] sm:$0xf] }
 0xdf4   : > { %v7613_v14 = vadd.f32 %v7602_v19, %v7532_v1  ;;  %v12275_v19 = vld [vmem:[#allocation5 + $0x1f4] sm:$0xf0] }
 0xdf5   : > { %v7712_v35 = vmax.f32 %v7704_v39, 0.0  ;;  %v11587_v37 = vor.u32 %v12275_v19, %v11586_v10  ;;  %v11562_v10 = vld [vmem:[#allocation5 + $0x1c0] sm:$0xf]  ;;  %v12226_v19 = vld [vmem:[#allocation5 + $0x74] sm:$0xf] }
 0xdf7   : > { %7720 = vxpose.xlu0.b32.cont [2/8] (short) (narrow) %v7712_v35, 32 }
 0xdf8   : > { %v7676_v44 = vpop.f32.mrf.mxu3 }
 0xdf9   : > { %v7693_v55 = vadd.f32 %v7676_v44, %v7609_v2  ;;  %v7523_v32 = vpop.f32.mrf.mxu1 }
 0xdfa   : > { %v7533_v39 = vadd.f32 %v7523_v32, %v7452_v0  ;;  %v12237_v0 = vld [vmem:[#allocation5 + $0xc4] sm:$0xf0] }
 0xdfb   : > { %v7705_v56 = vadd.f32 %v14057_v42, %v7693_v55  ;;  %v12273_v32 = vld [vmem:[#allocation5 + $0x1e4] sm:$0xf0] }
 0xdfc   : > { %v7614_v35 = vadd.f32 %v7604_v22, %v7533_v39  ;;  %v12259_v39 = vld [vmem:[#allocation5 + $0x174] sm:$0xf0] }
 0xdfd   : > { %v7713_v6 = vmax.f32 %v7705_v56, 0.0  ;;  %v11320_v56 = vld [vmem:[%s14274_s2 + $0x2] sm:$0x3] }
 0xdff   : > { %7721 = vxpose.xlu0.b32.cont [3/8] (short) (narrow) %v7713_v6, 32  ;;  %v11326_v6 = vld [vmem:[%s14274_s2 + $0x8] sm:$0x3] }
 0xe00   : > { %v7678_v46 = vpop.f32.mrf.mxu3 }
 0xe01   : > { %v7694_v20 = vadd.f32 %v7678_v46, %v7610_v36  ;;  %v11332_v36 = vld [vmem:[%s14274_s2 + $0xe] sm:$0x3] }
 0xe03   : > { %v7706_v47 = vadd.f32 %v14057_v42, %v7694_v20 }
 0xe05   : > { %v7714_v50 = vmax.f32 %v7706_v47, 0.0 }
 0xe07   : > { %7722 = vxpose.xlu0.b32.cont [4/8] (short) (narrow) %v7714_v50, 32  ;;  %v12227_v50 = vld [vmem:[#allocation5 + $0x74] sm:$0xf0] }
 0xe08   : > { %v7681_v16 = vpop.f32.mrf.mxu3  ;;  %v11395_v5 = vor.u32 %v12227_v50, %v11394_v21  ;;  %v11618_v21 = vld [vmem:[#allocation5 + $0x230] sm:$0xf]  ;;  %v12283_v50 = vld [vmem:[#allocation5 + $0x234] sm:$0xf0] }
 0xe09   : > { %v7695_v48 = vadd.f32 %v7681_v16, %v7611_v51  ;;  %v11458_v51 = vld [vmem:[#allocation5 + $0xf0] sm:$0xf]  ;;  %v11386_v16 = vld [vmem:[#allocation5 + $0x60] sm:$0xf] }
 0xe0a   : > { %v11459_v25 = vor.u32 %v12243_v15, %v11458_v51  ;;  %8380 = vmatpush.bf16.msra.mxu3 %v11395_v5  ;;  %v11387_v57 = vor.u32 %v12225_v23, %v11386_v16  ;;  %v11619_v51 = vor.u32 %v12283_v50, %v11618_v21  ;;  %v11610_v5 = vld [vmem:[#allocation5 + $0x220] sm:$0xf]  ;;  %v12281_v15 = vld [vmem:[#allocation5 + $0x224] sm:$0xf0]  ;;  %v11410_v23 = vld [vmem:[#allocation5 + $0x90] sm:$0xf] }
 0xe0b   : > { %v7707_v59 = vadd.f32 %v14057_v42, %v7695_v48  ;;  %v11450_v48 = vld [vmem:[#allocation5 + $0xe0] sm:$0xf]  ;;  %v11611_v16 = vor.u32 %v12281_v15, %v11610_v5  ;;  %v11364_v21 = vld [vmem:[#allocation5 + $0x38] sm:$0xf0]  ;;  %v12258_v5 = vld [vmem:[#allocation5 + $0x174] sm:$0xf] }
 0xe0c   : > { %v11451_v18 = vor.u32 %v12241_v26, %v11450_v48  ;;  %v11602_v48 = vld [vmem:[#allocation5 + $0x210] sm:$0xf]  ;;  %v11524_v15 = vld [vmem:[#allocation5 + $0x178] sm:$0xf0] }
 0xe0d   : > { %v7715_v61 = vmax.f32 %v7707_v59, 0.0  ;;  %v11378_v59 = vld [vmem:[#allocation5 + $0x50] sm:$0xf] }
 0xe0e   : > { %8381 = vmatpush.bf16.msra.mxu3 %v11387_v57  ;;  %v12279_v57 = vld [vmem:[#allocation5 + $0x214] sm:$0xf0] }
 0xe0f   : > { %7723 = vxpose.xlu0.b32.cont [5/8] (short) (narrow) %v7715_v61, 32  ;;  %v11442_v61 = vld [vmem:[#allocation5 + $0xd0] sm:$0xf] }
 0xe10   : > { %v7683_v12 = vpop.f32.mrf.mxu3  ;;  %v11443_v1 = vor.u32 %v12239_v52, %v11442_v61  ;;  %v11514_v61 = vld [vmem:[#allocation5 + $0x160] sm:$0xf] }
 0xe11   : > { %v7696_v63 = vadd.f32 %v7683_v12, %v7612_v62 }
 0xe13   : > { %v7708_v3 = vadd.f32 %v14057_v42, %v7696_v63  ;;  %v11379_v63 = vor.u32 %v12223_v24, %v11378_v59  ;;  %v11402_v59 = vld [vmem:[#allocation5 + $0x80] sm:$0xf]  ;;  %v12229_v24 = vld [vmem:[#allocation5 + $0x84] sm:$0xf0] }
 0xe14   : > { %v11403_v52 = vor.u32 %v12229_v24, %v11402_v59  ;;  %v11516_v59 = vld [vmem:[#allocation5 + $0x168] sm:$0xf0] }
 0xe15   : > { %v7716_v34 = vmax.f32 %v7708_v3, 0.0  ;;  %v12221_v3 = vld [vmem:[#allocation5 + $0x44] sm:$0xf0]  ;;  %8382 = vmatpush.bf16.msra.mxu3 %v11379_v63 }
 0xe17   : > { %7724 = vxpose.xlu0.b32.cont [6/8] (short) (narrow) %v7716_v34, 32  ;;  %v11578_v34 = vld [vmem:[#allocation5 + $0x1e0] sm:$0xf] }
 0xe18   : > { %v7686_v4 = vpop.f32.mrf.mxu3 }
 0xe19   : > { %v7697_v53 = vadd.f32 %v7686_v4, %v7613_v14  ;;  %v11434_v14 = vld [vmem:[#allocation5 + $0xc0] sm:$0xf]  ;;  %v11579_v4 = vor.u32 %v12273_v32, %v11578_v34  ;;  %v11554_v34 = vld [vmem:[#allocation5 + $0x1b0] sm:$0xf] }
 0xe1b   : > { %v7709_v9 = vadd.f32 %v14057_v42, %v7697_v53  ;;  %v11522_v53 = vld [vmem:[#allocation5 + $0x170] sm:$0xf] }
 0xe1c   : > { %v11523_v22 = vor.u32 %v12259_v39, %v11522_v53  ;;  %v11388_v53 = vld [vmem:[#allocation5 + $0x68] sm:$0xf0]  ;;  %v11498_v39 = vld [vmem:[#allocation5 + $0x140] sm:$0xf] }
 0xe1d   : > { %v7717_v33 = vmax.f32 %v7709_v9, 0.0  ;;  %v11371_v9 = vor.u32 %v12221_v3, %v11370_v31  ;;  %v11506_v31 = vld [vmem:[#allocation5 + $0x150] sm:$0xf] }
 0xe1f   : > { %7725 = vxpose.xlu0.b32.cont [7/8] (short) (narrow) %v7717_v33, 32  ;;  %v11570_v33 = vld [vmem:[#allocation5 + $0x1d0] sm:$0xf]  ;;  %8383 = vmatpush.bf16.msra.mxu3 %v11371_v9 }
 0xe20   : > { %v7688_v40 = vpop.f32.mrf.mxu3 }
 0xe21   : > { %v7698_v7 = vadd.f32 %v7688_v40, %v7614_v35  ;;  %v12271_v35 = vld [vmem:[#allocation5 + $0x1d4] sm:$0xf0]  ;;  %v11435_v40 = vor.u32 %v12237_v0, %v11434_v14 }
 0xe22   : > { %v12267_v14 = vld [vmem:[#allocation5 + $0x1b4] sm:$0xf0] }
 0xe23   : > { %v7710_v2 = vadd.f32 %v14057_v42, %v7698_v7  ;;  %v11322_v42 = vld [vmem:[%s14274_s2 + $0x4] sm:$0x3]  ;;  %v11362_v7 = vld [vmem:[#allocation5 + $0x30] sm:$0xf]  ;;  %v11555_v32 = vor.u32 %v12267_v14, %v11554_v34  ;;  %s14278_s2 = scalar_lea.vmem [#allocation7], %s13725_s28 }
 0xe24   : > { %s8542_s3 = sshll.u32 %s14278_s2, 4  ;;  %s8543_s3 = int_to_ptr.vmem [resolvable:$true] %s8542_s3 }
 0xe25   : > { %v7718_v41 = vmax.f32 %v7710_v2, 0.0  ;;  %v12219_v2 = vld [vmem:[#allocation5 + $0x34] sm:$0xf0] }
 0xe27   : > { %7726 = vxpose.xlu0.b32.end [8/8] (short) (narrow) %v7718_v41, 32  ;;  %v11426_v41 = vld [vmem:[#allocation5 + $0xb0] sm:$0xf] }
 0xe93   : > { %v7735_v44 = vpop.trf.xlu0 }
 0xe9b   : > { %v7736_v38 = vpop.trf.xlu0 }
 0xe9c   : > { %v7751_v43 = vpack.c.bf16 %v7736_v38, %v7735_v44  ;;  %v12235_v44 = vld [vmem:[#allocation5 + $0xb4] sm:$0xf0] }
 0xea3   : > { %v7737_v8 = vpop.trf.xlu0 }
 0xeab   : > { %v7738_v55 = vpop.trf.xlu0 }
 0xeac   : > { %v7752_v11 = vpack.c.bf16 %v7738_v55, %v7737_v8  ;;  %v11571_v8 = vor.u32 %v12271_v35, %v11570_v33  ;;  %v11546_v33 = vld [vmem:[#allocation5 + $0x1a0] sm:$0xf]  ;;  %v12265_v35 = vld [vmem:[#allocation5 + $0x1a4] sm:$0xf0] }
 0xeae   : > { %7763 = vmatpush.bf16.msra.mxu0 %v7752_v11  ;;  %7781 = vmatpush.bf16.msrb.mxu1 %v7752_v11 }
 0xeaf   : > { %7799 = vmatpush.bf16.msrb.mxu2 %v7752_v11 }
 0xeb2   : > { %7764 = vmatpush.bf16.msra.mxu0 %v7751_v43  ;;  %7782 = vmatpush.bf16.msrb.mxu1 %v7751_v43 }
 0xeb3   : > { %7800 = vmatpush.bf16.msrb.mxu2 %v7751_v43 }
 0xeb5   : > { %11319 = vmatmul.msk.bf16.vlgmr.msra.gmra.mxu0 %vm2540_vm3, %v7753_v29  ;;  %11321 = vmatmul.msk.bf16.vlgmr.msrb.gmra.mxu1 %vm2540_vm3, %v11320_v56  ;;  %v11354_v29 = vld [vmem:[#allocation5 + $0x20] sm:$0xf]  ;;  %v12217_v56 = vld [vmem:[#allocation5 + $0x24] sm:$0xf0] }
 0xeb6   : > { %7817 = vmatpush.bf16.msrb.mxu0 %v7752_v11  ;;  %7835 = vmatpush.bf16.msra.mxu1 %v7752_v11 }
 0xeb7   : > { %7853 = vmatpush.bf16.msra.mxu2 %v7752_v11 }
 0xeb8   : > { %11323 = vmatmul.msk.bf16.vlgmr.msrb.gmra.mxu2 %vm2540_vm3, %v11322_v42  ;;  %v11418_v42 = vld [vmem:[#allocation5 + $0xa0] sm:$0xf] }
 0xeba   : > { %7818 = vmatpush.bf16.msrb.mxu0 %v7751_v43  ;;  %7836 = vmatpush.bf16.msra.mxu1 %v7751_v43 }
 0xebb   : > { %7854 = vmatpush.bf16.msra.mxu2 %v7751_v43 }
 0xebe   : > { %7871 = vmatpush.bf16.msra.mxu0 %v7752_v11  ;;  %7889 = vmatpush.bf16.msrb.mxu1 %v7752_v11 }
 0xebf   : > { %7907 = vmatpush.bf16.msrb.mxu2 %v7752_v11  ;;  %v11363_v11 = vor.u32 %v12219_v2, %v11362_v7  ;;  %v11380_v7 = vld [vmem:[#allocation5 + $0x58] sm:$0xf0] }
 0xec1   : > { %8384 = vmatpush.bf16.msra.mxu3 %v11363_v11  ;;  %v12251_v11 = vld [vmem:[#allocation5 + $0x134] sm:$0xf0] }
 0xec2   : > { %7872 = vmatpush.bf16.msra.mxu0 %v7751_v43  ;;  %7890 = vmatpush.bf16.msrb.mxu1 %v7751_v43 }
 0xec3   : > { %7908 = vmatpush.bf16.msrb.mxu2 %v7751_v43  ;;  %v11427_v43 = vor.u32 %v12235_v44, %v11426_v41  ;;  %v11547_v41 = vor.u32 %v12265_v35, %v11546_v33  ;;  %v11490_v44 = vld [vmem:[#allocation5 + $0x130] sm:$0xf] }
 0xec5   : > { %11325 = vmatmul.msk.bf16.vlgmr.msrb.gmra.mxu0 %vm2540_vm3, %v11324_v13  ;;  %11327 = vmatmul.msk.bf16.vlgmr.msra.gmra.mxu1 %vm2540_vm3, %v11326_v6  ;;  %v12233_v13 = vld [vmem:[#allocation5 + $0xa4] sm:$0xf0]  ;;  %v11355_v6 = vor.u32 %v12217_v56, %v11354_v29  ;;  %v12263_v29 = vld [vmem:[#allocation5 + $0x194] sm:$0xf0] }
 0xec6   : > { %8393 = vmatpush.bf16.msrb.mxu0 %v11459_v25  ;;  %8406 = vmatpush.bf16.msra.mxu1 %v11523_v22  ;;  %v12231_v25 = vld [vmem:[#allocation5 + $0x94] sm:$0xf0]  ;;  %v12253_v22 = vld [vmem:[#allocation5 + $0x144] sm:$0xf0] }
 0xec7   : > { %8385 = vmatpush.bf16.msra.mxu3 %v11355_v6  ;;  %v11411_v26 = vor.u32 %v12231_v25, %v11410_v23  ;;  %v11499_v2 = vor.u32 %v12253_v22, %v11498_v39  ;;  %v12220_v6 = vld [vmem:[#allocation5 + $0x44] sm:$0xf]  ;;  %v11527_v23 = vor.u32 %v12258_v5, %v11524_v15  ;;  %v12247_v25 = vld [vmem:[#allocation5 + $0x114] sm:$0xf0]  ;;  %v12234_v15 = vld [vmem:[#allocation5 + $0xb4] sm:$0xf] }
 0xec8   : > { %11329 = vmatmul.msk.bf16.vlgmr.msra.gmra.mxu2 %vm2540_vm3, %v11328_v28  ;;  %v11419_v28 = vor.u32 %v12233_v13, %v11418_v42  ;;  %v11491_v42 = vor.u32 %v12251_v11, %v11490_v44  ;;  %v12212_v39 = vld [vmem:[#allocation5 + $0x4] sm:$0xf] }
 0xec9   : > { %8419 = vmatpush.bf16.msra.mxu2 %v11587_v37  ;;  %v12255_v37 = vld [vmem:[#allocation5 + $0x154] sm:$0xf0]  ;;  %v12240_v22 = vld [vmem:[#allocation5 + $0xe4] sm:$0xf] }
 0xeca   : > { %8394 = vmatpush.bf16.msrb.mxu0 %v11451_v18  ;;  %v11603_v18 = vor.u32 %v12279_v57, %v11602_v48  ;;  %v11507_v0 = vor.u32 %v12255_v37, %v11506_v31  ;;  %v12216_v48 = vld [vmem:[#allocation5 + $0x24] sm:$0xf] }
 0xecd   : > { %8420 = vmatpush.bf16.msra.mxu2 %v11579_v4  ;;  %v12224_v4 = vld [vmem:[#allocation5 + $0x64] sm:$0xf] }
 0xece   : > { %8395 = vmatpush.bf16.msrb.mxu0 %v11443_v1  ;;  %v11396_v1 = vld [vmem:[#allocation5 + $0x78] sm:$0xf0]  ;;  %v11391_v9 = vor.u32 %v12224_v4, %v11388_v53 }
 0xecf   : > { %v11399_v3 = vor.u32 %v12226_v19, %v11396_v1  ;;  %v12254_v19 = vld [vmem:[#allocation5 + $0x154] sm:$0xf]  ;;  %v11508_v1 = vld [vmem:[#allocation5 + $0x158] sm:$0xf0] }
 0xed0   : > { %v11511_v14 = vor.u32 %v12254_v19, %v11508_v1 }
 0xed1   : > { %8421 = vmatpush.bf16.msra.mxu2 %v11571_v8  ;;  %v12277_v8 = vld [vmem:[#allocation5 + $0x204] sm:$0xf0] }
 0xed2   : > { %8396 = vmatpush.bf16.msrb.mxu0 %v11435_v40  ;;  %v12222_v40 = vld [vmem:[#allocation5 + $0x54] sm:$0xf] }
 0xed5   : > { %11333 = vmatmul.msk.bf16.vlgmr.msrb.gmra.mxu1 %vm2540_vm3, %v11332_v36  ;;  %11331 = vmatmul.msk.bf16.vlgmr.msra.gmra.mxu0 %vm2540_vm3, %v11330_v45  ;;  %v11346_v36 = vld [vmem:[#allocation5 + $0x10] sm:$0xf] }
 0xed6   : > { %8397 = vmatpush.bf16.msrb.mxu0 %v11427_v43  ;;  %v11538_v43 = vld [vmem:[#allocation5 + $0x190] sm:$0xf] }
 0xed7   : > { %v11539_v13 = vor.u32 %v12263_v29, %v11538_v43  ;;  %v12238_v43 = vld [vmem:[#allocation5 + $0xd4] sm:$0xf]  ;;  %v11444_v29 = vld [vmem:[#allocation5 + $0xd8] sm:$0xf0] }
 0xed8   : > { %11335 = vmatmul.msk.bf16.vlgmr.msrb.gmra.mxu2 %vm2540_vm3, %v11334_v58  ;;  %v12215_v58 = vld [vmem:[#allocation5 + $0x14] sm:$0xf0] }
 0xeda   : > { %8398 = vmatpush.bf16.msrb.mxu0 %v11419_v28  ;;  %v11372_v28 = vld [vmem:[#allocation5 + $0x48] sm:$0xf0] }
 0xede   : > { %8399 = vmatpush.bf16.msrb.mxu0 %v11411_v26  ;;  %v11356_v26 = vld [vmem:[#allocation5 + $0x28] sm:$0xf0] }
 0xedf   : > { %v11359_v24 = vor.u32 %v12216_v48, %v11356_v26  ;;  %v11476_v26 = vld [vmem:[#allocation5 + $0x118] sm:$0xf0] }
 0xee2   : > { %8400 = vmatpush.bf16.msrb.mxu0 %v11403_v52  ;;  %v11466_v52 = vld [vmem:[#allocation5 + $0x100] sm:$0xf] }
 0xee6   : > { %8445 = vmatpush.bf16.msra.mxu0 %v11399_v3 }
 0xeea   : > { %8446 = vmatpush.bf16.msra.mxu0 %v11391_v9  ;;  %v11340_v9 = vld [vmem:[#allocation5 + $0x8] sm:$0xf0] }
 0xf32   : > { %v14105_v46 = vpop.f32.mrf.mxu0  ;;  %v7784_v17 = vpop.f32.mrf.mxu1 }
 0xf33   : > { %7915 = vrot.lane.b32.xlu1 %v7784_v17, %s12666_s18  ;;  %v11347_v17 = vor.u32 %v12215_v58, %v11346_v36  ;;  %v11375_v36 = vor.u32 %v12220_v6, %v11372_v28  ;;  %v11482_v58 = vld [vmem:[#allocation5 + $0x120] sm:$0xf]  ;;  %v12270_v6 = vld [vmem:[#allocation5 + $0x1d4] sm:$0xf]  ;;  %v11572_v28 = vld [vmem:[#allocation5 + $0x1d8] sm:$0xf0] }
 0xf35   : > { %8386 = vmatpush.bf16.msra.mxu3 %v11347_v17  ;;  %v11530_v17 = vld [vmem:[#allocation5 + $0x180] sm:$0xf] }
 0xf3a   : > { %v7768_v20 = vpop.f32.mrf.mxu0  ;;  %v7786_v54 = vpop.f32.mrf.mxu1 }
 0xf3b   : > { %v14108_v60 = vpop.f32.mrf.mxu2  ;;  %v8011_v20 = vld [vmem:[%s12834_s20] sm:$0xf]  ;;  %v11338_v54 = vld [vmem:[#allocation5] sm:$0xf] }
 0xf42   : > { %v7820_v47 = vpop.f32.mrf.mxu0  ;;  %v14110_v49 = vpop.f32.mrf.mxu1 }
 0xf43   : > { %v7804_v27 = vpop.f32.mrf.mxu2  ;;  %7919 = vrot.lane.b32.xlu1 %v7820_v47, %s12666_s18 }
 0xf44   : > { %v12213_v27 = vld [vmem:[#allocation5 + $0x4] sm:$0xf0] }
 0xf45   : > { %v11339_v47 = vor.u32 %v12213_v27, %v11338_v54  ;;  %v12261_v27 = vld [vmem:[#allocation5 + $0x184] sm:$0xf0] }
 0xf46   : > { %v11531_v50 = vor.u32 %v12261_v27, %v11530_v17  ;;  %v11436_v17 = vld [vmem:[#allocation5 + $0xc8] sm:$0xf0]  ;;  %v11575_v27 = vor.u32 %v12270_v6, %v11572_v28 }
 0xf47   : > { %8387 = vmatpush.bf16.msra.mxu3 %v11339_v47  ;;  %v12218_v47 = vld [vmem:[#allocation5 + $0x34] sm:$0xf] }
 0xf4a   : > { %v7840_v12 = vpop.f32.mrf.mxu1  ;;  %v7822_v30 = vpop.f32.mrf.mxu0 }
 0xf4b   : > { %v7856_v62 = vpop.f32.mrf.mxu2  ;;  %8436 = vmatpush.bf16.msrb.mxu3 %v11619_v51  ;;  %v12269_v12 = vld [vmem:[#allocation5 + $0x1c4] sm:$0xf0]  ;;  %v11367_v51 = vor.u32 %v12218_v47, %v11364_v21  ;;  %v11484_v21 = vld [vmem:[#allocation5 + $0x128] sm:$0xf0] }
 0xf4c   : > { %v11563_v63 = vor.u32 %v12269_v12, %v11562_v10  ;;  %v12214_v10 = vld [vmem:[#allocation5 + $0x14] sm:$0xf]  ;;  %v11348_v12 = vld [vmem:[#allocation5 + $0x18] sm:$0xf0] }
 0xf4d   : > { %v11351_v37 = vor.u32 %v12214_v10, %v11348_v12  ;;  %v12232_v10 = vld [vmem:[#allocation5 + $0xa4] sm:$0xf]  ;;  %v11420_v12 = vld [vmem:[#allocation5 + $0xa8] sm:$0xf0] }
 0xf4e   : > { %8422 = vmatpush.bf16.msra.mxu2 %v11563_v63  ;;  %v11460_v63 = vld [vmem:[#allocation5 + $0xf8] sm:$0xf0]  ;;  %v11423_v1 = vor.u32 %v12232_v10, %v11420_v12 }
 0xf4f   : > { %8437 = vmatpush.bf16.msrb.mxu3 %v11611_v16  ;;  %v11474_v16 = vld [vmem:[#allocation5 + $0x110] sm:$0xf] }
 0xf50   : > { %v11475_v57 = vor.u32 %v12247_v25, %v11474_v16  ;;  %v11428_v16 = vld [vmem:[#allocation5 + $0xb8] sm:$0xf0] }
 0xf51   : > { %v11431_v48 = vor.u32 %v12234_v15, %v11428_v16 }
 0xf52   : > { %v7892_v55 = vpop.f32.mrf.mxu1  ;;  %8423 = vmatpush.bf16.msra.mxu2 %v11555_v32  ;;  %v11588_v32 = vld [vmem:[#allocation5 + $0x1f8] sm:$0xf0]  ;;  %v14118_v4 = vpop.f32.mrf.mxu0 }
 0xf53   : > { %v7858_v38 = vpop.f32.mrf.mxu2  ;;  %7927 = vrot.lane.b32.xlu1 %v7892_v55, %s12666_s18  ;;  %8438 = vmatpush.bf16.msrb.mxu3 %v11603_v18  ;;  %v11383_v55 = vor.u32 %v12222_v40, %v11380_v7  ;;  %v12256_v18 = vld [vmem:[#allocation5 + $0x164] sm:$0xf]  ;;  %v11343_v40 = vor.u32 %v12212_v39, %v11340_v9  ;;  %v11452_v7 = vld [vmem:[#allocation5 + $0xe8] sm:$0xf0]  ;;  %v11412_v39 = vld [vmem:[#allocation5 + $0x98] sm:$0xf0] }
 0xf54   : > { %v11594_v38 = vld [vmem:[#allocation5 + $0x200] sm:$0xf]  ;;  %v12262_v9 = vld [vmem:[#allocation5 + $0x194] sm:$0xf] }
 0xf55   : > { %v11595_v56 = vor.u32 %v12277_v8, %v11594_v38  ;;  %8447 = vmatpush.bf16.msra.mxu0 %v11383_v55  ;;  %v12272_v38 = vld [vmem:[#allocation5 + $0x1e4] sm:$0xf]  ;;  %v11580_v8 = vld [vmem:[#allocation5 + $0x1e8] sm:$0xf0]  ;;  %v11455_v55 = vor.u32 %v12240_v22, %v11452_v7 }
 0xf56   : > { %8424 = vmatpush.bf16.msra.mxu2 %v11547_v41  ;;  %v11500_v41 = vld [vmem:[#allocation5 + $0x148] sm:$0xf0] }
 0xf57   : > { %8439 = vmatpush.bf16.msrb.mxu3 %v11595_v56  ;;  %v12250_v56 = vld [vmem:[#allocation5 + $0x134] sm:$0xf]  ;;  %v11404_v7 = vld [vmem:[#allocation5 + $0x88] sm:$0xf0] }
 0xf59   : > { %8448 = vmatpush.bf16.msra.mxu0 %v11375_v36 }
 0xf5a   : > { %v7894_v45 = vpop.f32.mrf.mxu1  ;;  %8425 = vmatpush.bf16.msra.mxu2 %v11539_v13  ;;  %v11492_v13 = vld [vmem:[#allocation5 + $0x138] sm:$0xf0] }
 0xf5b   : > { %7923 = vrot.lane.b32.xlu1 %v7856_v62, %s12666_s18  ;;  %v12257_v62 = vld [vmem:[#allocation5 + $0x164] sm:$0xf0]  ;;  %v11495_v36 = vor.u32 %v12250_v56, %v11492_v13  ;;  %v11596_v56 = vld [vmem:[#allocation5 + $0x208] sm:$0xf0]  ;;  %s14275_s18 = sld [smem:[#allocation37_spill]] }
 0xf5c   : > { %v11515_v30 = vor.u32 %v12257_v62, %v11514_v61  ;;  %v12249_v45 = vld [vmem:[#allocation5 + $0x124] sm:$0xf0]  ;;  %v11519_v61 = vor.u32 %v12256_v18, %v11516_v59  ;;  %v11556_v18 = vld [vmem:[#allocation5 + $0x1b8] sm:$0xf0] }
 0xf5d   : > { %v11483_v54 = vor.u32 %v12249_v45, %v11482_v58  ;;  %8449 = vmatpush.bf16.msra.mxu0 %v11367_v51  ;;  %v12245_v62 = vld [vmem:[#allocation5 + $0x104] sm:$0xf0]  ;;  %v7876_v58 = vpop.f32.mrf.mxu0  ;;  %v12236_v45 = vld [vmem:[#allocation5 + $0xc4] sm:$0xf]  ;;  %v11564_v51 = vld [vmem:[#allocation5 + $0x1c8] sm:$0xf0] }
 0xf5e   : > { %8407 = vmatpush.bf16.msra.mxu1 %v11515_v30  ;;  %8426 = vmatpush.bf16.msra.mxu2 %v11531_v50  ;;  %v12242_v30 = vld [vmem:[#allocation5 + $0xf4] sm:$0xf]  ;;  %v11467_v31 = vor.u32 %v12245_v62, %v11466_v52  ;;  %v11439_v47 = vor.u32 %v12236_v45, %v11436_v17  ;;  %v12268_v50 = vld [vmem:[#allocation5 + $0x1c4] sm:$0xf] }
 0xf5f   : > { %v11463_v34 = vor.u32 %v12242_v30, %v11460_v63  ;;  %v11567_v25 = vor.u32 %v12268_v50, %v11564_v51  ;;  %v12244_v30 = vld [vmem:[#allocation5 + $0x104] sm:$0xf] }
 0xf61   : > { %8450 = vmatpush.bf16.msra.mxu0 %v11359_v24  ;;  %v12282_v24 = vld [vmem:[#allocation5 + $0x234] sm:$0xf]  ;;  %s14276_s1 = smov %s14275_s18  ;;  %s8540_s22 = scalar_lea.hbm %s14275_s18, %s12872_s0 }
 0xf62   : > { %8408 = vmatpush.bf16.msra.mxu1 %v11507_v0  ;;  %8471 = vmatpush.bf16.msrb.mxu2 %v11527_v23  ;;  %v12274_v0 = vld [vmem:[#allocation5 + $0x1f4] sm:$0xf]  ;;  %s8544_s4 = sshll.u32 %s8540_s22, 4  ;;  %s12542_s8 = scalar_lea.hbm %s14276_s1, 2  ;;  %s8545_s4 = int_to_ptr.hbm [resolvable:$true] %s8544_s4 }
 0xf63   : > { %8014 = vperm.xlu1 %12395, %v8011_v20   ;;  %v14116_v20 = vpop.f32.mrf.mxu2  ;;  %v11591_v35 = vor.u32 %v12274_v0, %v11588_v32  ;;  %v12246_v23 = vld [vmem:[#allocation5 + $0x114] sm:$0xf]  ;;  %v12280_v32 = vld [vmem:[#allocation5 + $0x224] sm:$0xf]  ;;  %s12536_s6 = sshra.s32 %s8545_s4, 4  ;;  %s12537_s6 = int_to_ptr.hbm [resolvable:$true] %s12536_s6 }
 0xf64   : > { %v11479_v59 = vor.u32 %v12246_v23, %v11476_v26  ;;  %v14127_v62 = vpack.c.bf16 %v14116_v20, %v14116_v20  ;;  %v11612_v20 = vld [vmem:[#allocation5 + $0x228] sm:$0xf0]  ;;  %s12538_s7 = scalar_lea.hbm %s12537_s6, 1  ;;  %p12543_p8 = scmp.lt.s32.totalorder %s12537_s6, %s14276_s1 }
 0xf65   : > { %8451 = vmatpush.bf16.msra.mxu0 %v11351_v37  ;;  %v12264_v37 = vld [vmem:[#allocation5 + $0x1a4] sm:$0xf]  ;;  %p12539_p9 = scmp.ne.s32.totalorder %s12537_s6, %s12538_s7  ;;  %p12544_p11 = scmp.lt.s32.totalorder %s12542_s8, %s12538_s7 }
 0xf66   : > { %8409 = vmatpush.bf16.msra.mxu1 %v11499_v2  ;;  %8472 = vmatpush.bf16.msrb.mxu2 %v11519_v61  ;;  %v12252_v2 = vld [vmem:[#allocation5 + $0x144] sm:$0xf]  ;;  %v11620_v61 = vld [vmem:[#allocation5 + $0x238] sm:$0xf0] }
 0xf67   : > { %v11503_v11 = vor.u32 %v12252_v2, %v11500_v41  ;;  %v11623_v0 = vor.u32 %v12282_v24, %v11620_v61  ;;  %v12278_v2 = vld [vmem:[#allocation5 + $0x214] sm:$0xf]  ;;  %v11604_v41 = vld [vmem:[#allocation5 + $0x218] sm:$0xf0]  ;;  %p12540_p12 = pnand %p12539_p9, %p12889_p5  ;;  %p12545_p13 = por %p12544_p11, %p12543_p8 }
 0xf69   : > { %8452 = vmatpush.bf16.msra.mxu0 %v11343_v40  ;;  %v12228_v40 = vld [vmem:[#allocation5 + $0x84] sm:$0xf]  ;;  %p12541_p0 = pneg %p12540_p12 }
 0xf6a   : > { %8410 = vmatpush.bf16.msra.mxu1 %v11491_v42  ;;  %8473 = vmatpush.bf16.msrb.mxu2 %v11511_v14  ;;  %v11447_v42 = vor.u32 %v12238_v43, %v11444_v29  ;;  %v11607_v43 = vor.u32 %v12278_v2, %v11604_v41  ;;  %v12276_v29 = vld [vmem:[#allocation5 + $0x204] sm:$0xf] }
 0xf6b   : > { %v7912_v3 = vpop.f32.mrf.mxu2  ;;  %p12546_p1 = pnand %p12545_p13, %p12541_p0 }
 0xf6e   : > { %8411 = vmatpush.bf16.msra.mxu1 %v11483_v54  ;;  %8474 = vmatpush.bf16.msrb.mxu2 %v11503_v11  ;;  %v12248_v54 = vld [vmem:[#allocation5 + $0x124] sm:$0xf]  ;;  %v11532_v11 = vld [vmem:[#allocation5 + $0x188] sm:$0xf0] }
 0xf6f   : > { %v11487_v5 = vor.u32 %v12248_v54, %v11484_v21 }
 0xf72   : > { %8412 = vmatpush.bf16.msra.mxu1 %v11475_v57  ;;  %8475 = vmatpush.bf16.msrb.mxu2 %v11495_v36  ;;  %v12266_v57 = vld [vmem:[#allocation5 + $0x1b4] sm:$0xf] }
 0xf73   : > { %v11559_v19 = vor.u32 %v12266_v57, %v11556_v18 }
 0xf76   : > { %8413 = vmatpush.bf16.msra.mxu1 %v11467_v31  ;;  %8476 = vmatpush.bf16.msrb.mxu2 %v11487_v5  ;;  %v11468_v31 = vld [vmem:[#allocation5 + $0x108] sm:$0xf0] }
 0xf77   : > { %v11471_v14 = vor.u32 %v12244_v30, %v11468_v31 }
 0xf7a   : > { %8458 = vmatpush.bf16.msrb.mxu1 %v11463_v34  ;;  %8477 = vmatpush.bf16.msrb.mxu2 %v11479_v59  ;;  %v11548_v34 = vld [vmem:[#allocation5 + $0x1a8] sm:$0xf0] }
 0xf7e   : > { %8459 = vmatpush.bf16.msrb.mxu1 %v11455_v55  ;;  %8478 = vmatpush.bf16.msrb.mxu2 %v11471_v14  ;;  %v12260_v55 = vld [vmem:[#allocation5 + $0x184] sm:$0xf] }
 0xf82   : > { %8460 = vmatpush.bf16.msrb.mxu1 %v11447_v42  ;;  %v11599_v42 = vor.u32 %v12276_v29, %v11596_v56 }
 0xf86   : > { %8461 = vmatpush.bf16.msrb.mxu1 %v11439_v47 }
 0xf8a   : > { %8462 = vmatpush.bf16.msrb.mxu1 %v11431_v48 }
 0xf8e   : > { %8463 = vmatpush.bf16.msrb.mxu1 %v11423_v1 }
 0xfa5   : > { %v7916_v53 = vpop.permute.xlu1 %7915 }
 0xfa6   : > { %v7930_v33 = vsel %vm2274_vm2, %v14105_v46, %v7916_v53  ;;  %v11583_v46 = vor.u32 %v12272_v38, %v11580_v8  ;;  %v12230_v53 = vld [vmem:[#allocation5 + $0x94] sm:$0xf]  ;;  %v11407_v8 = vor.u32 %v12228_v40, %v11404_v7 }
 0xfa7   : > { %v14122_v44 = vpack.c.bf16 %v7930_v33, %v7930_v33  ;;  %v11415_v22 = vor.u32 %v12230_v53, %v11412_v39  ;;  %v11540_v33 = vld [vmem:[#allocation5 + $0x198] sm:$0xf0] }
 0xfa8   : > { %v11543_v38 = vor.u32 %v12262_v9, %v11540_v33 }
 0xfa9   : > { %8388 = vmatmul.bf16.vlgmr.msra.gmra.mxu3 %v14122_v44  ;;  %8464 = vmatpush.bf16.msrb.mxu1 %v11415_v22 }
 0xfaa   : > { %8484 = vmatpush.bf16.msra.mxu3 %v11591_v35  ;;  %v11615_v35 = vor.u32 %v12280_v32, %v11612_v20 }
 0xfad   : > { %8465 = vmatpush.bf16.msrb.mxu1 %v11407_v8 }
 0xfae   : > { %8485 = vmatpush.bf16.msra.mxu3 %v11583_v46  ;;  %v11535_v46 = vor.u32 %v12260_v55, %v11532_v11 }
 0xfb2   : > { %8486 = vmatpush.bf16.msra.mxu3 %v11575_v27 }
 0xfb5   : > { %v7920_v52 = vpop.permute.xlu1 %7919 }
 0xfb6   : > { %v7931_v63 = vsel %vm2274_vm2, %v14108_v60, %v7920_v52  ;;  %8487 = vmatpush.bf16.msra.mxu3 %v11567_v25  ;;  %v11551_v60 = vor.u32 %v12264_v37, %v11548_v34 }
 0xfb7   : > { %v7935_v3 = vpack.c.bf16 %v7931_v63, %v7931_v63 }
 0xfb9   : > { %8401 = vmatmul.bf16.vlgmr.msrb.gmra.mxu0 %v7935_v3  ;;  %11624 = vmatmul.msk.bf16.vlgmr.msrb.gmra.mxu3 %vm2274_vm2, %v14127_v62 }
 0xfba   : > { %8488 = vmatpush.bf16.msra.mxu3 %v11559_v19  ;;  %8501 = vmatpush.bf16.msrb.mxu0 %v11623_v0 }
 0xfbe   : > { %8489 = vmatpush.bf16.msra.mxu3 %v11551_v60  ;;  %8502 = vmatpush.bf16.msrb.mxu0 %v11615_v35 }
 0xfc2   : > { %8490 = vmatpush.bf16.msra.mxu3 %v11543_v38  ;;  %8503 = vmatpush.bf16.msrb.mxu0 %v11607_v43 }
 0xfc5   : > { %v7928_v13 = vpop.permute.xlu1 %7927 }
 0xfc6   : > { %v7933_v6 = vsel %vm2274_vm2, %v14118_v4, %v7928_v13  ;;  %8491 = vmatpush.bf16.msra.mxu3 %v11535_v46  ;;  %8504 = vmatpush.bf16.msrb.mxu0 %v11599_v42 }
 0xfc7   : > { %v7937_v28 = vpack.c.bf16 %v7933_v6, %v7933_v6 }
 0xfc9   : > { %8427 = vmatmul.bf16.vlgmr.msra.gmra.mxu2 %v7937_v28  ;;  %8453 = vmatmul.bf16.vlgmr.msra.gmra.mxu0 %v14122_v44 }
 0xfca   : > { %8492 = vmatmul.bf16.vlgmr.msra.gmra.mxu3 %v7937_v28 }
 0xfcd   : > { %v7924_v36 = vpop.permute.xlu1 %7923 }
 0xfce   : > { %v7932_v58 = vsel %vm2274_vm2, %v14110_v49, %v7924_v36 }
 0xfcf   : > { %v7936_v45 = vpack.c.bf16 %v7932_v58, %v7932_v58 }
 0xfd1   : > { %8414 = vmatmul.bf16.vlgmr.msra.gmra.mxu1 %v7936_v45 }
 0xfd9   : > { %8479 = vmatmul.bf16.vlgmr.msrb.gmra.mxu2 %v7936_v45  ;;  %11625 = vmatmul.msk.bf16.vlgmr.msrb.gmra.mxu0 %vm2274_vm2, %v14127_v62 }
 0xfe1   : > { %8466 = vmatmul.bf16.vlgmr.msrb.gmra.mxu1 %v7935_v3 }
 0xfe2   : > { %12549 = shalt.err (!%p12546_p1)
}
 0xfe3   : > { %s14279_s2 = sld [smem:[#allocation38_spill]]  ;;  %s14280_s22 = scalar_lea.vmem [#allocation8], %s13725_s28 }
 0xfe4   : > { %12292 = dma.vmem_to_hbm [thread:$0]  (%p12889_p5), %s8543_s3, 16, %s8545_s4, %s8525_s5  }
 0xfe5   : > { %s8555_s10 = sshll.u32 %s14280_s22, 4  ;;  %s8529_s8 = scalar_lea.sflag [#allocation9], %s13725_s28  ;;  %s8556_s10 = int_to_ptr.vmem [resolvable:$true] %s8555_s10 }
 0xfe9   : > { %s8553_s18 = scalar_lea.hbm %s14279_s2, %s12872_s0  ;;  %s12570_s1 = scalar_lea.hbm %s14279_s2, 2 }
 0xfea   : > { %s8557_s11 = sshll.u32 %s8553_s18, 4  ;;  %s8558_s11 = int_to_ptr.hbm [resolvable:$true] %s8557_s11 }
 0xfeb   : > { %s12564_s6 = sshra.s32 %s8558_s11, 4  ;;  %s12565_s6 = int_to_ptr.hbm [resolvable:$true] %s12564_s6 }
 0xfec   : > { %s12566_s7 = scalar_lea.hbm %s12565_s6, 1  ;;  %p12571_p7 = scmp.lt.s32.totalorder %s12565_s6, %s14279_s2 }
 0xfed   : > { %p12567_p2 = scmp.ne.s32.totalorder %s12565_s6, %s12566_s7  ;;  %p12572_p10 = scmp.lt.s32.totalorder %s12570_s1, %s12566_s7 }
 0xfef   : > { %p12568_p3 = pnand %p12567_p2, %p12889_p5  ;;  %p12573_p9 = por %p12572_p10, %p12571_p7 }
 0xff1   : > { %p12569_p4 = pneg %p12568_p3 }
 0xff3   : > { %p12574_p12 = pnand %p12573_p9, %p12569_p4 }
 0xff5   : > { %12577 = shalt.err (!%p12574_p12)
}
 0xff6   : > { %12293 = dma.vmem_to_hbm [thread:$0]  (%p12889_p5), %s8556_s10, 16, %s8558_s11, %s8529_s8   ;;  %v8015_v48 = vpop.permute.xlu1 %8014  ;;  %vm8515_vm7 = vcmask 1043456  }
 0xff7   : > { %s14281_s5 = sld [smem:[#allocation36_spill]]  ;;  %s14282_s3 = sshll.u32 %s12980_s9, 3 }
 0xffd   : > { %s1109_s4 = scalar_lea.vmem %s14281_s5, %s14282_s3 }
0x102c   : > { %v8389_v49 = vpop.f32.mrf.mxu3 }
0x102d   : > { %v8390_v26 = vadd.f32 %v8389_v49, %v8015_v48 }
0x1034   : > { %v8391_v4 = vpop.f32.mrf.mxu3 }
0x1036   : > { %v8402_v44 = vpop.f32.mrf.mxu0 }
0x1037   : > { %v8403_v57 = vadd.f32 %v8402_v44, %v8390_v26 }
0x103c   : > { %v8441_v17 = vpop.f32.mrf.mxu3 }
0x103e   : > { %v8404_v54 = vpop.f32.mrf.mxu0 }
0x1044   : > { %v8443_v27 = vpop.f32.mrf.mxu3 }
0x1046   : > { %v8454_v47 = vpop.f32.mrf.mxu0 }
0x1047   : > { %v8455_v59 = vadd.f32 %v8454_v47, %v8015_v48 }
0x104c   : > { %v8428_v21 = vpop.f32.mrf.mxu2 }
0x104d   : > { %v8493_v50 = vpop.f32.mrf.mxu3 }
0x104e   : > { %v8415_v51 = vpop.f32.mrf.mxu1  ;;  %v8456_v5 = vpop.f32.mrf.mxu0 }
0x104f   : > { %v8416_v24 = vadd.f32 %v8415_v51, %v8403_v57 }
0x1051   : > { %v8429_v10 = vadd.f32 %v8428_v21, %v8416_v24 }
0x1053   : > { %v8442_v19 = vadd.f32 %v8441_v17, %v8429_v10 }
0x1054   : > { %v8430_v15 = vpop.f32.mrf.mxu2 }
0x1055   : > { %v8495_v16 = vpop.f32.mrf.mxu3 }
0x1056   : > { %v8417_v23 = vpop.f32.mrf.mxu1  ;;  %v8506_v25 = vpop.f32.mrf.mxu0 }
0x105c   : > { %v8480_v18 = vpop.f32.mrf.mxu2 }
0x105e   : > { %v8467_v61 = vpop.f32.mrf.mxu1  ;;  %v8508_v52 = vpop.f32.mrf.mxu0 }
0x105f   : > { %v8468_v62 = vadd.f32 %v8467_v61, %v8455_v59 }
0x1061   : > { %v8481_v12 = vadd.f32 %v8480_v18, %v8468_v62 }
0x1063   : > { %v8494_v30 = vadd.f32 %v8493_v50, %v8481_v12 }
0x1064   : > { %v8482_v63 = vpop.f32.mrf.mxu2 }
0x1065   : > { %v8507_v1 = vadd.f32 %v8506_v25, %v8494_v30 }
0x1066   : > { %v8469_v31 = vpop.f32.mrf.mxu1 }
0x1067   : > { %12458 = vtanh.f32 %v8507_v1 }
0x1068   : > { %12460 = vtanh.f32 %v8442_v19 }
0x106d   : > { %v12459_v3 = vpop.eup %12458 }
0x106e   : > { %v8514_v37 = vrot.slane %v12459_v3, 4  ;;  %v12461_v34 = vpop.eup %12460 }
0x1070   : > { %v8516_v14 = vsel %vm8515_vm7, %v12461_v34, %v8514_v37 }
0x1071   : > { %8518 = vst [vmem:[%s1109_s4] sm:$0xff] %v8516_v14 }
0x1072 PF: > { %s14283_s0 = sld [smem:[#allocation41_spill]] }
0x1073   : > { %s14284_s11 = sld [smem:[#allocation39_spill]] }
0x1078   : > { %p12314_p5 = scmp.ge.s32.totalorder %s14283_s0, 2 }
0x1079   : > { %s8577_s28 = sand.u32 1, %s14284_s11  }
0x107a   : > { %p12304_p0 = pnand %p12314_p5, %p12893_p6  ;;  %s8578_s10 = scalar_lea.sflag [#allocation4], %s8577_s28 }
0x107c   : > { %p12305_p8 = pneg %p12304_p0 }
0x107e   : > { %12603 = dma.done.wait (%p12305_p8), %s8578_s10, 16  }
0x107f   : > { %12605 = vsyncadd (%p12305_p8), %s8578_s10, 4294967280  ;;  %s8587_s15 = scalar_lea.sflag [#allocation9], %s8577_s28 }
0x1080   : > { %12607 = dma.done.wait (%p12305_p8), %s8587_s15, 16  }
0x1081   : > { %12609 = vsyncadd (%p12305_p8), %s8587_s15, 4294967280  ;;  %s14286_s22 = sld [smem:[#allocation42_spill]]  ;;  %s14289_s15 = smov %s12616_s16 }
0x1082   : > { %s14287_s9 = sld [smem:[#allocation40_spill]] }
0x1083   : > { %s14288_s18 = sld [smem:[#allocation43_spill]] }
0x1087   : > { %p85_p11 = scmp.ge.s32.totalorder %s14286_s22, 4  }
0x1088   : > { %s14290_s16 = smov %s14287_s9 }
0x1089   :  { %87 = sbr.rel (!%p85_p11) target bundleno = 74 (0x4a), region = 322 }
0x108e   :  { %8592 = vsyncpa [#allocation3], 1 }
0x108f   :  { %8594 = vsyncpa [#allocation3 + $0x1], 1 }
0x1090   :  { %8595 = vsyncpa [#allocation6], 1 }
0x1091   :  { %8596 = vsyncpa [#allocation4], 1 }
0x1092   :  { %8598 = vsyncpa [#allocation4 + $0x1], 1 }
0x1093   :  { %8599 = vsyncpa [#allocation9], 1 }
0x1094   :  { %8601 = vsyncpa [#allocation9 + $0x1], 1 }

</bundles_post_ra>
